<compile_context>
chip_gen: v5e
topology: v5e:2x2
jax: 0.10.0
libtpu: 0.0.40
codegen_flags: <defaults>
</compile_context>

<pallas_src>
import functools

import jax
import jax.numpy as jnp
import numpy as np
from jax.experimental import pallas as pl
from jax.experimental.pallas import tpu as pltpu


def decoder_rnn_kernel(len_ref, is_last_ref, x_ref,
                       wih0_ref, whh0_ref, b0_ref,
                       wc1_ref, b1_ref, wc2_ref, b2_ref,
                       w1f_ref, b1f_ref, w2f_ref, b2f_ref,
                       out_ref, gx_ref, *, hidden, batch, seq, unroll):
    """Single invocation: whole recurrence + FC head run inside one kernel call.

    gx_ref: VMEM scratch (T*B, 4H) f32 holding the hoisted layer-0 input projection.
    Gate columns are pre-permuted to (i, f, o, g) by the wrapper.
    """
    H, B, T = hidden, batch, seq

    # ---- prologue: hoisted layer-0 input projection for ALL timesteps (one big matmul) ----
    gx_ref[...] = (jnp.dot(x_ref[...], wih0_ref[...],
                           preferred_element_type=jnp.float32) + b0_ref[...])

    lengths = len_ref[...]                      # (B, 1) int32, loaded once

    # loop-invariant bias broadcasts hoisted out of the recurrence
    b1b = jnp.broadcast_to(b1_ref[...], (B, 4 * H))
    b2b = jnp.broadcast_to(b2_ref[...], (B, 4 * H))

    def cell(g, h_prev, c_prev, m):
        # gate order (i, f, o, g): one sigmoid over 3H columns, one tanh over H columns.
        sg = jax.nn.sigmoid(g[:, 0:3 * H])
        i = sg[:, 0:H]
        f = sg[:, H:2 * H]
        o = sg[:, 2 * H:3 * H]
        gg = jnp.tanh(g[:, 3 * H:4 * H])
        c_new = f * c_prev + i * gg
        h_new = o * jnp.tanh(c_new)
        # packed-sequence behaviour: freeze state past end of each sequence.
        # m is 0/1 f32 already broadcast to (B, H); arithmetic blend is exact.
        h_new = h_prev + m * (h_new - h_prev)
        c_new = c_prev + m * (c_new - c_prev)
        return h_new, c_new

    def step(t, carry):
        h0, c0, h1, c1, h2, c2 = carry
        # single mask broadcast per step, reused by all six state blends
        m = jnp.broadcast_to((t < lengths).astype(jnp.float32), (B, H))
        start = t * B
        if (not isinstance(t, int)) and B % 8 == 0:
            start = pl.multiple_of(start, 8)    # sublane-aligned dynamic slice (fori path)
        # layer 0: input contribution precomputed; only the recurrent matmul is on the path
        g0 = gx_ref[pl.ds(start, B), :] + jnp.dot(
            h0.astype(jnp.bfloat16), whh0_ref[...], preferred_element_type=jnp.float32)
        h0, c0 = cell(g0, h0, c0, m)
        # layers 1/2: fused [x_in, h_prev] @ [W_ih; W_hh] — one MXU op each.
        # H % 128 == 0 keeps the lane-dim concat tile-aligned (no relayout).
        g1 = jnp.dot(jnp.concatenate([h0, h1], axis=1).astype(jnp.bfloat16),
                     wc1_ref[...], preferred_element_type=jnp.float32) + b1b
        h1, c1 = cell(g1, h1, c1, m)
        g2 = jnp.dot(jnp.concatenate([h1, h2], axis=1).astype(jnp.bfloat16),
                     wc2_ref[...], preferred_element_type=jnp.float32) + b2b
        h2, c2 = cell(g2, h2, c2, m)
        return (h0, c0, h1, c1, h2, c2)

    zero = jnp.zeros((B, H), jnp.float32)
    carry = (zero, zero, zero, zero, zero, zero)
    if unroll:
        # small/medium static T: full unroll with all-static slices; lets the scheduler
        # overlap layer-0 of step t+1 with layers 1/2 of step t.
        for t in range(T):
            carry = step(t, carry)
    else:
        # large T fallback: in-kernel loop (not a grid), partially unrolled for ILP.
        carry = jax.lax.fori_loop(0, T, step, carry, unroll=8)
    h2 = carry[4]

    # ---- epilogue: fc1 -> ReLU -> (dropout = identity, eval) -> fc2 ----
    # RNN_out[:, -1, :] is zero for sequences shorter than the batch max length;
    # is_last (0/1 per row) is precomputed in the wrapper from the GLOBAL max length.
    last = h2 * is_last_ref[...]
    y = jnp.dot(last, w1f_ref[...], preferred_element_type=jnp.float32) + b1f_ref[...]
    y = jnp.maximum(y, 0.0)
    out_ref[...] = jnp.dot(y, w2f_ref[...], preferred_element_type=jnp.float32) + b2f_ref[...]


def _reorder_gates(w):
    """Permute the last-dim gate columns (i, f, g, o) -> (i, f, o, g)."""
    H = w.shape[-1] // 4
    return jnp.concatenate([w[:, 0:2 * H], w[:, 3 * H:4 * H], w[:, 2 * H:3 * H]], axis=-1)


def decoder_rnn_varlen(x, lengths, params):
    """x: (B, T, D) float32 batch-first; lengths: (B,) int. Returns (B, num_classes)."""
    B, T, D = x.shape
    H = params["whh0"].shape[0]
    FC = params["w1"].shape[1]
    C = params["w2"].shape[1]

    lengths = jnp.minimum(lengths.astype(jnp.int32), T).reshape(B, 1)
    # precomputed epilogue selection mask (global max length, computed in the wrapper)
    is_last = (lengths == jnp.max(lengths)).astype(jnp.float32)
    # Flatten time-major for the hoisted layer-0 projection (tiny transpose; no zeroing pass).
    x_flat = jnp.transpose(x, (1, 0, 2)).reshape(T * B, D).astype(jnp.bfloat16)

    # bf16 MXU operands; fused [W_ih; W_hh] weights for layers 1/2; gates permuted to (i,f,o,g).
    wih0 = _reorder_gates(params["wih0"]).astype(jnp.bfloat16)
    whh0 = _reorder_gates(params["whh0"]).astype(jnp.bfloat16)
    b0 = _reorder_gates(params["b0"])
    wc1 = _reorder_gates(
        jnp.concatenate([params["wih1"], params["whh1"]], axis=0)).astype(jnp.bfloat16)
    b1 = _reorder_gates(params["b1"])
    wc2 = _reorder_gates(
        jnp.concatenate([params["wih2"], params["whh2"]], axis=0)).astype(jnp.bfloat16)
    b2 = _reorder_gates(params["b2"])

    def const(shape):
        return pl.BlockSpec(shape, lambda i, _n=len(shape): (0,) * _n)

    kernel = functools.partial(decoder_rnn_kernel, hidden=H, batch=B, seq=T,
                               unroll=(T <= 64))

    # VMEM guard: the gx scratch scales as T*B*4H*4 bytes; raise the scoped limit if it grows.
    # TODO(synk): for very long T, chunk the prologue projection over time windows instead.
    gx_bytes = T * B * 4 * H * 4
    vmem_limit = None
    if gx_bytes > 8 * 1024 * 1024:
        vmem_limit = min(2 * gx_bytes + (8 << 20), 100 * 1024 * 1024)

    return pl.pallas_call(
        kernel,
        out_shape=jax.ShapeDtypeStruct((B, C), jnp.float32),
        grid_spec=pltpu.PrefetchScalarGridSpec(
            num_scalar_prefetch=0,
            grid=(1,),
            in_specs=[
                const((B, 1)),               # lengths
                const((B, 1)),               # is_last epilogue mask
                const((T * B, D)),           # x, time-major flattened
                const((D, 4 * H)), const((H, 4 * H)), const((1, 4 * H)),    # layer 0
                const((2 * H, 4 * H)), const((1, 4 * H)),                   # layer 1 (fused)
                const((2 * H, 4 * H)), const((1, 4 * H)),                   # layer 2 (fused)
                const((H, FC)), const((1, FC)),                             # fc1
                const((FC, C)), const((1, C)),                              # fc2
            ],
            out_specs=const((B, C)),
            scratch_shapes=[pltpu.VMEM((T * B, 4 * H), jnp.float32)],       # hoisted x@W_ih0+b0
        ),
        compiler_params=pltpu.CompilerParams(
            dimension_semantics=("arbitrary",),
            vmem_limit_bytes=vmem_limit),
    )(lengths, is_last, x_flat,
      wih0, whh0, b0,
      wc1, b1,
      wc2, b2,
      params["w1"], params["b1f"], params["w2"], params["b2f"])


def reference_forward(x, lengths, params):
    """Pure-JAX f32 reference with identical packed-LSTM semantics (PyTorch gate order)."""
    B, T, D = x.shape
    H = params["whh0"].shape[0]
    lengths = jnp.minimum(lengths.astype(jnp.int32), T)
    Ws = [(params["wih0"], params["whh0"], params["b0"]),
          (params["wih1"], params["whh1"], params["b1"]),
          (params["wih2"], params["whh2"], params["b2"])]
    h = jnp.zeros((3, B, H), jnp.float32)
    c = jnp.zeros((3, B, H), jnp.float32)

    def body(carry, inp):
        h, c = carry
        t, xt = inp
        mask = (t < lengths)[:, None]
        layer_in = xt
        hs, cs = [], []
        for l, (wih, whh, b) in enumerate(Ws):
            g = layer_in @ wih + h[l] @ whh + b
            i = jax.nn.sigmoid(g[:, :H])
            f = jax.nn.sigmoid(g[:, H:2 * H])
            gg = jnp.tanh(g[:, 2 * H:3 * H])
            o = jax.nn.sigmoid(g[:, 3 * H:])
            cn = f * c[l] + i * gg
            hn = o * jnp.tanh(cn)
            hn = jnp.where(mask, hn, h[l])
            cn = jnp.where(mask, cn, c[l])
            hs.append(hn); cs.append(cn)
            layer_in = hn
        return (jnp.stack(hs), jnp.stack(cs)), None

    (h, c), _ = jax.lax.scan(body, (h, c),
                             (jnp.arange(T), jnp.transpose(x, (1, 0, 2)).astype(jnp.float32)))
    t_max = jnp.max(lengths)
    last = jnp.where((lengths == t_max)[:, None], h[2], 0.0)
    y = jnp.maximum(last @ params["w1"] + params["b1f"], 0.0)
    return y @ params["w2"] + params["b2f"]


def init_params(key, D, H, FC, C):
    """Deterministic PyTorch-style init (uniform +/- 1/sqrt(H)); weights pre-transposed."""
    s = 1.0 / np.sqrt(H)
    keys = jax.random.split(key, 16)
    u = lambda k, shape: jax.random.uniform(k, shape, jnp.float32, -s, s)
    p = {}
    in_dims = [D, H, H]
    ki = 0
    for l in range(3):
        p[f"wih{l}"] = u(keys[ki], (in_dims[l], 4 * H)); ki += 1
        p[f"whh{l}"] = u(keys[ki], (H, 4 * H)); ki += 1
        # b = b_ih + b_hh combined
        p[f"b{l}"] = (u(keys[ki], (1, 4 * H)) + u(keys[ki + 1], (1, 4 * H))); ki += 2
    p["w1"] = u(keys[ki], (H, FC)); ki += 1
    p["b1f"] = u(keys[ki], (1, FC)); ki += 1
    p["w2"] = u(keys[ki], (FC, C)); ki += 1
    p["b2f"] = u(keys[ki], (1, C)); ki += 1
    return p


if __name__ == "__main__":
    B, T, D = 8, 8, 32            # batch, seq, CNN_embed_dim
    H, FC, C = 128, 128, 16       # h_RNN (lane-aligned), h_FC_dim, num_classes; h_RNN_layers = 3

    key = jax.random.PRNGKey(0)
    kx, kp = jax.random.split(key)
    x = jax.random.normal(kx, (B, T, D), jnp.float32)
    lengths = jnp.array([8, 5, 10, 3, 8, 1, 7, 8], jnp.int32)  # 10 exercises clip-to-T
    params = init_params(kp, D, H, FC, C)

    out = decoder_rnn_varlen(x, lengths, params)
    out = jax.block_until_ready(out)

    ref = jax.block_until_ready(reference_forward(x, lengths, params))
    # bf16 MXU operands with f32 accumulation: loosened tolerance vs. pure-f32 reference.
    np.testing.assert_allclose(np.asarray(out), np.asarray(ref), rtol=2e-2, atol=2e-2)

    print("KERNEL_OK")
</pallas_src>

<mosaic_0001>
module attributes {stable_mosaic.version = 11 : i64} {
  func.func @decoder_rnn_kernel(%arg0: i32, %arg1: memref<8x1xi32, #tpu.memory_space<vmem>>, %arg2: memref<8x1xf32, #tpu.memory_space<vmem>>, %arg3: memref<64x32xbf16, #tpu.memory_space<vmem>>, %arg4: memref<32x512xbf16, #tpu.memory_space<vmem>>, %arg5: memref<128x512xbf16, #tpu.memory_space<vmem>>, %arg6: memref<1x512xf32, #tpu.memory_space<vmem>>, %arg7: memref<256x512xbf16, #tpu.memory_space<vmem>>, %arg8: memref<1x512xf32, #tpu.memory_space<vmem>>, %arg9: memref<256x512xbf16, #tpu.memory_space<vmem>>, %arg10: memref<1x512xf32, #tpu.memory_space<vmem>>, %arg11: memref<128x128xf32, #tpu.memory_space<vmem>>, %arg12: memref<1x128xf32, #tpu.memory_space<vmem>>, %arg13: memref<128x16xf32, #tpu.memory_space<vmem>>, %arg14: memref<1x16xf32, #tpu.memory_space<vmem>>, %arg15: memref<8x16xf32, #tpu.memory_space<vmem>>, %arg16: memref<64x512xf32, #tpu.memory_space<vmem>>) attributes {dimension_semantics = [#tpu.dimension_semantics<arbitrary>], iteration_bounds = array<i64: 1>, scalar_prefetch = 0 : i64, scratch_operands = 1 : i64, tpu.core_type = #tpu.core_type<tc>, window_params = [{pipeline_mode = #tpu.pipeline_mode<synchronous>, transform_indices = @transform_0, window_bounds = array<i64: 8, 1>}, {pipeline_mode = #tpu.pipeline_mode<synchronous>, transform_indices = @transform_1, window_bounds = array<i64: 8, 1>}, {pipeline_mode = #tpu.pipeline_mode<synchronous>, transform_indices = @transform_2, window_bounds = array<i64: 64, 32>}, {pipeline_mode = #tpu.pipeline_mode<synchronous>, transform_indices = @transform_3, window_bounds = array<i64: 32, 512>}, {pipeline_mode = #tpu.pipeline_mode<synchronous>, transform_indices = @transform_4, window_bounds = array<i64: 128, 512>}, {pipeline_mode = #tpu.pipeline_mode<synchronous>, transform_indices = @transform_5, window_bounds = array<i64: 1, 512>}, {pipeline_mode = #tpu.pipeline_mode<synchronous>, transform_indices = @transform_6, window_bounds = array<i64: 256, 512>}, {pipeline_mode = #tpu.pipeline_mode<synchronous>, transform_indices = @transform_7, window_bounds = array<i64: 1, 512>}, {pipeline_mode = #tpu.pipeline_mode<synchronous>, transform_indices = @transform_8, window_bounds = array<i64: 256, 512>}, {pipeline_mode = #tpu.pipeline_mode<synchronous>, transform_indices = @transform_9, window_bounds = array<i64: 1, 512>}, {pipeline_mode = #tpu.pipeline_mode<synchronous>, transform_indices = @transform_10, window_bounds = array<i64: 128, 128>}, {pipeline_mode = #tpu.pipeline_mode<synchronous>, transform_indices = @transform_11, window_bounds = array<i64: 1, 128>}, {pipeline_mode = #tpu.pipeline_mode<synchronous>, transform_indices = @transform_12, window_bounds = array<i64: 128, 16>}, {pipeline_mode = #tpu.pipeline_mode<synchronous>, transform_indices = @transform_13, window_bounds = array<i64: 1, 16>}, {pipeline_mode = #tpu.pipeline_mode<synchronous>, transform_indices = @transform_14, window_bounds = array<i64: 8, 16>}]} {
    %c0 = arith.constant 0 : index
    %c0_0 = arith.constant 0 : index
    %0 = vector.load %arg3[%c0, %c0_0] : memref<64x32xbf16, #tpu.memory_space<vmem>>, vector<64x32xbf16>
    %c0_1 = arith.constant 0 : index
    %c0_2 = arith.constant 0 : index
    %1 = vector.load %arg4[%c0_1, %c0_2] : memref<32x512xbf16, #tpu.memory_space<vmem>>, vector<32x512xbf16>
    %cst = arith.constant dense<0.000000e+00> : vector<64x512xf32>
    %2 = tpu.matmul %0, %1, %cst {dimension_numbers = #tpu.dot_dimension_numbers<[1], [0], [0], [1], [0, 0, 1, 1], [], []>} : vector<64x32xbf16>, vector<32x512xbf16>, vector<64x512xf32> -> vector<64x512xf32>
    %c0_3 = arith.constant 0 : index
    %c0_4 = arith.constant 0 : index
    %3 = vector.load %arg6[%c0_3, %c0_4] : memref<1x512xf32, #tpu.memory_space<vmem>>, vector<1x512xf32>
    %4 = vector.broadcast %3 : vector<1x512xf32> to vector<64x512xf32>
    %5 = arith.addf %2, %4 : vector<64x512xf32>
    %c0_5 = arith.constant 0 : index
    %c0_6 = arith.constant 0 : index
    %6 = vector.load %arg16[%c0_5, %c0_6] : memref<64x512xf32, #tpu.memory_space<vmem>>, vector<64x512xf32>
    tpu.vector_store %arg16[%c0_5, %c0_6], %5 {strides = array<i32>} : memref<64x512xf32, #tpu.memory_space<vmem>>, vector<64x512xf32>,
    %c0_7 = arith.constant 0 : index
    %c0_8 = arith.constant 0 : index
    %7 = vector.load %arg1[%c0_7, %c0_8] : memref<8x1xi32, #tpu.memory_space<vmem>>, vector<8x1xi32>
    %c0_9 = arith.constant 0 : index
    %c0_10 = arith.constant 0 : index
    %8 = vector.load %arg8[%c0_9, %c0_10] : memref<1x512xf32, #tpu.memory_space<vmem>>, vector<1x512xf32>
    %9 = vector.shape_cast %8 : vector<1x512xf32> to vector<1x512xf32>
    %10 = vector.broadcast %9 : vector<1x512xf32> to vector<8x512xf32>
    %c0_11 = arith.constant 0 : index
    %c0_12 = arith.constant 0 : index
    %11 = vector.load %arg10[%c0_11, %c0_12] : memref<1x512xf32, #tpu.memory_space<vmem>>, vector<1x512xf32>
    %12 = vector.shape_cast %11 : vector<1x512xf32> to vector<1x512xf32>
    %13 = vector.broadcast %12 : vector<1x512xf32> to vector<8x512xf32>
    %cst_13 = arith.constant 0.000000e+00 : f32
    %14 = vector.broadcast %cst_13 : f32 to vector<8x128xf32>
    %c0_i32 = arith.constant 0 : i32
    %15 = vector.broadcast %c0_i32 : i32 to vector<8x1xi32>
    %16 = arith.cmpi sgt, %7, %15 : vector<8x1xi32>
    %17 = arith.extui %16 : vector<8x1xi1> to vector<8x1xi32>
    %18 = arith.sitofp %17 : vector<8x1xi32> to vector<8x1xf32>
    %19 = vector.shape_cast %18 : vector<8x1xf32> to vector<8x1xf32>
    %20 = vector.broadcast %19 : vector<8x1xf32> to vector<8x128xf32>
    %c0_14 = arith.constant 0 : index
    %c0_15 = arith.constant 0 : index
    %21 = vector.load %arg16[%c0_14, %c0_15] : memref<64x512xf32, #tpu.memory_space<vmem>>, vector<8x512xf32>
    %22 = arith.truncf %14 : vector<8x128xf32> to vector<8x128xbf16>
    %c0_16 = arith.constant 0 : index
    %c0_17 = arith.constant 0 : index
    %23 = vector.load %arg5[%c0_16, %c0_17] : memref<128x512xbf16, #tpu.memory_space<vmem>>, vector<128x512xbf16>
    %cst_18 = arith.constant dense<0.000000e+00> : vector<8x512xf32>
    %24 = tpu.matmul %22, %23, %cst_18 {dimension_numbers = #tpu.dot_dimension_numbers<[1], [0], [0], [1], [0, 0, 1, 1], [], []>} : vector<8x128xbf16>, vector<128x512xbf16>, vector<8x512xf32> -> vector<8x512xf32>
    %25 = arith.addf %21, %24 : vector<8x512xf32>
    %26 = vector.extract_strided_slice %25 {offsets = [0, 0], sizes = [8, 384], strides = [1, 1]} : vector<8x512xf32> to vector<8x384xf32>
    %27 = arith.negf %26 : vector<8x384xf32>
    %28 = math.exp %27 : vector<8x384xf32>
    %cst_19 = arith.constant 1.000000e+00 : f32
    %29 = vector.broadcast %cst_19 : f32 to vector<8x384xf32>
    %30 = arith.addf %29, %28 : vector<8x384xf32>
    %31 = arith.divf %29, %30 : vector<8x384xf32>
    %32 = vector.extract_strided_slice %31 {offsets = [0, 0], sizes = [8, 128], strides = [1, 1]} : vector<8x384xf32> to vector<8x128xf32>
    %33 = vector.extract_strided_slice %31 {offsets = [0, 128], sizes = [8, 128], strides = [1, 1]} : vector<8x384xf32> to vector<8x128xf32>
    %34 = vector.extract_strided_slice %31 {offsets = [0, 256], sizes = [8, 128], strides = [1, 1]} : vector<8x384xf32> to vector<8x128xf32>
    %35 = vector.extract_strided_slice %25 {offsets = [0, 384], sizes = [8, 128], strides = [1, 1]} : vector<8x512xf32> to vector<8x128xf32>
    %36 = math.tanh %35 : vector<8x128xf32>
    %37 = arith.mulf %33, %14 : vector<8x128xf32>
    %38 = arith.mulf %32, %36 : vector<8x128xf32>
    %39 = arith.addf %37, %38 : vector<8x128xf32>
    %40 = math.tanh %39 : vector<8x128xf32>
    %41 = arith.mulf %34, %40 : vector<8x128xf32>
    %42 = arith.subf %41, %14 : vector<8x128xf32>
    %43 = arith.mulf %20, %42 : vector<8x128xf32>
    %44 = arith.addf %14, %43 : vector<8x128xf32>
    %45 = arith.subf %39, %14 : vector<8x128xf32>
    %46 = arith.mulf %20, %45 : vector<8x128xf32>
    %47 = arith.addf %14, %46 : vector<8x128xf32>
    %48 = tpu.concatenate %44, %14 in 1 : vector<8x128xf32>, vector<8x128xf32> -> vector<8x256xf32>
    %49 = arith.truncf %48 : vector<8x256xf32> to vector<8x256xbf16>
    %c0_20 = arith.constant 0 : index
    %c0_21 = arith.constant 0 : index
    %50 = vector.load %arg7[%c0_20, %c0_21] : memref<256x512xbf16, #tpu.memory_space<vmem>>, vector<256x512xbf16>
    %cst_22 = arith.constant dense<0.000000e+00> : vector<8x512xf32>
    %51 = tpu.matmul %49, %50, %cst_22 {dimension_numbers = #tpu.dot_dimension_numbers<[1], [0], [0], [1], [0, 0, 1, 1], [], []>} : vector<8x256xbf16>, vector<256x512xbf16>, vector<8x512xf32> -> vector<8x512xf32>
    %52 = arith.addf %51, %10 : vector<8x512xf32>
    %53 = vector.extract_strided_slice %52 {offsets = [0, 0], sizes = [8, 384], strides = [1, 1]} : vector<8x512xf32> to vector<8x384xf32>
    %54 = arith.negf %53 : vector<8x384xf32>
    %55 = math.exp %54 : vector<8x384xf32>
    %cst_23 = arith.constant 1.000000e+00 : f32
    %56 = vector.broadcast %cst_23 : f32 to vector<8x384xf32>
    %57 = arith.addf %56, %55 : vector<8x384xf32>
    %58 = arith.divf %56, %57 : vector<8x384xf32>
    %59 = vector.extract_strided_slice %58 {offsets = [0, 0], sizes = [8, 128], strides = [1, 1]} : vector<8x384xf32> to vector<8x128xf32>
    %60 = vector.extract_strided_slice %58 {offsets = [0, 128], sizes = [8, 128], strides = [1, 1]} : vector<8x384xf32> to vector<8x128xf32>
    %61 = vector.extract_strided_slice %58 {offsets = [0, 256], sizes = [8, 128], strides = [1, 1]} : vector<8x384xf32> to vector<8x128xf32>
    %62 = vector.extract_strided_slice %52 {offsets = [0, 384], sizes = [8, 128], strides = [1, 1]} : vector<8x512xf32> to vector<8x128xf32>
    %63 = math.tanh %62 : vector<8x128xf32>
    %64 = arith.mulf %60, %14 : vector<8x128xf32>
    %65 = arith.mulf %59, %63 : vector<8x128xf32>
    %66 = arith.addf %64, %65 : vector<8x128xf32>
    %67 = math.tanh %66 : vector<8x128xf32>
    %68 = arith.mulf %61, %67 : vector<8x128xf32>
    %69 = arith.subf %68, %14 : vector<8x128xf32>
    %70 = arith.mulf %20, %69 : vector<8x128xf32>
    %71 = arith.addf %14, %70 : vector<8x128xf32>
    %72 = arith.subf %66, %14 : vector<8x128xf32>
    %73 = arith.mulf %20, %72 : vector<8x128xf32>
    %74 = arith.addf %14, %73 : vector<8x128xf32>
    %75 = tpu.concatenate %71, %14 in 1 : vector<8x128xf32>, vector<8x128xf32> -> vector<8x256xf32>
    %76 = arith.truncf %75 : vector<8x256xf32> to vector<8x256xbf16>
    %c0_24 = arith.constant 0 : index
    %c0_25 = arith.constant 0 : index
    %77 = vector.load %arg9[%c0_24, %c0_25] : memref<256x512xbf16, #tpu.memory_space<vmem>>, vector<256x512xbf16>
    %cst_26 = arith.constant dense<0.000000e+00> : vector<8x512xf32>
    %78 = tpu.matmul %76, %77, %cst_26 {dimension_numbers = #tpu.dot_dimension_numbers<[1], [0], [0], [1], [0, 0, 1, 1], [], []>} : vector<8x256xbf16>, vector<256x512xbf16>, vector<8x512xf32> -> vector<8x512xf32>
    %79 = arith.addf %78, %13 : vector<8x512xf32>
    %80 = vector.extract_strided_slice %79 {offsets = [0, 0], sizes = [8, 384], strides = [1, 1]} : vector<8x512xf32> to vector<8x384xf32>
    %81 = arith.negf %80 : vector<8x384xf32>
    %82 = math.exp %81 : vector<8x384xf32>
    %cst_27 = arith.constant 1.000000e+00 : f32
    %83 = vector.broadcast %cst_27 : f32 to vector<8x384xf32>
    %84 = arith.addf %83, %82 : vector<8x384xf32>
    %85 = arith.divf %83, %84 : vector<8x384xf32>
    %86 = vector.extract_strided_slice %85 {offsets = [0, 0], sizes = [8, 128], strides = [1, 1]} : vector<8x384xf32> to vector<8x128xf32>
    %87 = vector.extract_strided_slice %85 {offsets = [0, 128], sizes = [8, 128], strides = [1, 1]} : vector<8x384xf32> to vector<8x128xf32>
    %88 = vector.extract_strided_slice %85 {offsets = [0, 256], sizes = [8, 128], strides = [1, 1]} : vector<8x384xf32> to vector<8x128xf32>
    %89 = vector.extract_strided_slice %79 {offsets = [0, 384], sizes = [8, 128], strides = [1, 1]} : vector<8x512xf32> to vector<8x128xf32>
    %90 = math.tanh %89 : vector<8x128xf32>
    %91 = arith.mulf %87, %14 : vector<8x128xf32>
    %92 = arith.mulf %86, %90 : vector<8x128xf32>
    %93 = arith.addf %91, %92 : vector<8x128xf32>
    %94 = math.tanh %93 : vector<8x128xf32>
    %95 = arith.mulf %88, %94 : vector<8x128xf32>
    %96 = arith.subf %95, %14 : vector<8x128xf32>
    %97 = arith.mulf %20, %96 : vector<8x128xf32>
    %98 = arith.addf %14, %97 : vector<8x128xf32>
    %99 = arith.subf %93, %14 : vector<8x128xf32>
    %100 = arith.mulf %20, %99 : vector<8x128xf32>
    %101 = arith.addf %14, %100 : vector<8x128xf32>
    %c1_i32 = arith.constant 1 : i32
    %102 = vector.broadcast %c1_i32 : i32 to vector<8x1xi32>
    %103 = arith.cmpi sgt, %7, %102 : vector<8x1xi32>
    %104 = arith.extui %103 : vector<8x1xi1> to vector<8x1xi32>
    %105 = arith.sitofp %104 : vector<8x1xi32> to vector<8x1xf32>
    %106 = vector.shape_cast %105 : vector<8x1xf32> to vector<8x1xf32>
    %107 = vector.broadcast %106 : vector<8x1xf32> to vector<8x128xf32>
    %c8 = arith.constant 8 : index
    %c0_28 = arith.constant 0 : index
    %108 = vector.load %arg16[%c8, %c0_28] : memref<64x512xf32, #tpu.memory_space<vmem>>, vector<8x512xf32>
    %109 = arith.truncf %44 : vector<8x128xf32> to vector<8x128xbf16>
    %c0_29 = arith.constant 0 : index
    %c0_30 = arith.constant 0 : index
    %110 = vector.load %arg5[%c0_29, %c0_30] : memref<128x512xbf16, #tpu.memory_space<vmem>>, vector<128x512xbf16>
    %cst_31 = arith.constant dense<0.000000e+00> : vector<8x512xf32>
    %111 = tpu.matmul %109, %110, %cst_31 {dimension_numbers = #tpu.dot_dimension_numbers<[1], [0], [0], [1], [0, 0, 1, 1], [], []>} : vector<8x128xbf16>, vector<128x512xbf16>, vector<8x512xf32> -> vector<8x512xf32>
    %112 = arith.addf %108, %111 : vector<8x512xf32>
    %113 = vector.extract_strided_slice %112 {offsets = [0, 0], sizes = [8, 384], strides = [1, 1]} : vector<8x512xf32> to vector<8x384xf32>
    %114 = arith.negf %113 : vector<8x384xf32>
    %115 = math.exp %114 : vector<8x384xf32>
    %cst_32 = arith.constant 1.000000e+00 : f32
    %116 = vector.broadcast %cst_32 : f32 to vector<8x384xf32>
    %117 = arith.addf %116, %115 : vector<8x384xf32>
    %118 = arith.divf %116, %117 : vector<8x384xf32>
    %119 = vector.extract_strided_slice %118 {offsets = [0, 0], sizes = [8, 128], strides = [1, 1]} : vector<8x384xf32> to vector<8x128xf32>
    %120 = vector.extract_strided_slice %118 {offsets = [0, 128], sizes = [8, 128], strides = [1, 1]} : vector<8x384xf32> to vector<8x128xf32>
    %121 = vector.extract_strided_slice %118 {offsets = [0, 256], sizes = [8, 128], strides = [1, 1]} : vector<8x384xf32> to vector<8x128xf32>
    %122 = vector.extract_strided_slice %112 {offsets = [0, 384], sizes = [8, 128], strides = [1, 1]} : vector<8x512xf32> to vector<8x128xf32>
    %123 = math.tanh %122 : vector<8x128xf32>
    %124 = arith.mulf %120, %47 : vector<8x128xf32>
    %125 = arith.mulf %119, %123 : vector<8x128xf32>
    %126 = arith.addf %124, %125 : vector<8x128xf32>
    %127 = math.tanh %126 : vector<8x128xf32>
    %128 = arith.mulf %121, %127 : vector<8x128xf32>
    %129 = arith.subf %128, %44 : vector<8x128xf32>
    %130 = arith.mulf %107, %129 : vector<8x128xf32>
    %131 = arith.addf %44, %130 : vector<8x128xf32>
    %132 = arith.subf %126, %47 : vector<8x128xf32>
    %133 = arith.mulf %107, %132 : vector<8x128xf32>
    %134 = arith.addf %47, %133 : vector<8x128xf32>
    %135 = tpu.concatenate %131, %71 in 1 : vector<8x128xf32>, vector<8x128xf32> -> vector<8x256xf32>
    %136 = arith.truncf %135 : vector<8x256xf32> to vector<8x256xbf16>
    %c0_33 = arith.constant 0 : index
    %c0_34 = arith.constant 0 : index
    %137 = vector.load %arg7[%c0_33, %c0_34] : memref<256x512xbf16, #tpu.memory_space<vmem>>, vector<256x512xbf16>
    %cst_35 = arith.constant dense<0.000000e+00> : vector<8x512xf32>
    %138 = tpu.matmul %136, %137, %cst_35 {dimension_numbers = #tpu.dot_dimension_numbers<[1], [0], [0], [1], [0, 0, 1, 1], [], []>} : vector<8x256xbf16>, vector<256x512xbf16>, vector<8x512xf32> -> vector<8x512xf32>
    %139 = arith.addf %138, %10 : vector<8x512xf32>
    %140 = vector.extract_strided_slice %139 {offsets = [0, 0], sizes = [8, 384], strides = [1, 1]} : vector<8x512xf32> to vector<8x384xf32>
    %141 = arith.negf %140 : vector<8x384xf32>
    %142 = math.exp %141 : vector<8x384xf32>
    %cst_36 = arith.constant 1.000000e+00 : f32
    %143 = vector.broadcast %cst_36 : f32 to vector<8x384xf32>
    %144 = arith.addf %143, %142 : vector<8x384xf32>
    %145 = arith.divf %143, %144 : vector<8x384xf32>
    %146 = vector.extract_strided_slice %145 {offsets = [0, 0], sizes = [8, 128], strides = [1, 1]} : vector<8x384xf32> to vector<8x128xf32>
    %147 = vector.extract_strided_slice %145 {offsets = [0, 128], sizes = [8, 128], strides = [1, 1]} : vector<8x384xf32> to vector<8x128xf32>
    %148 = vector.extract_strided_slice %145 {offsets = [0, 256], sizes = [8, 128], strides = [1, 1]} : vector<8x384xf32> to vector<8x128xf32>
    %149 = vector.extract_strided_slice %139 {offsets = [0, 384], sizes = [8, 128], strides = [1, 1]} : vector<8x512xf32> to vector<8x128xf32>
    %150 = math.tanh %149 : vector<8x128xf32>
    %151 = arith.mulf %147, %74 : vector<8x128xf32>
    %152 = arith.mulf %146, %150 : vector<8x128xf32>
    %153 = arith.addf %151, %152 : vector<8x128xf32>
    %154 = math.tanh %153 : vector<8x128xf32>
    %155 = arith.mulf %148, %154 : vector<8x128xf32>
    %156 = arith.subf %155, %71 : vector<8x128xf32>
    %157 = arith.mulf %107, %156 : vector<8x128xf32>
    %158 = arith.addf %71, %157 : vector<8x128xf32>
    %159 = arith.subf %153, %74 : vector<8x128xf32>
    %160 = arith.mulf %107, %159 : vector<8x128xf32>
    %161 = arith.addf %74, %160 : vector<8x128xf32>
    %162 = tpu.concatenate %158, %98 in 1 : vector<8x128xf32>, vector<8x128xf32> -> vector<8x256xf32>
    %163 = arith.truncf %162 : vector<8x256xf32> to vector<8x256xbf16>
    %c0_37 = arith.constant 0 : index
    %c0_38 = arith.constant 0 : index
    %164 = vector.load %arg9[%c0_37, %c0_38] : memref<256x512xbf16, #tpu.memory_space<vmem>>, vector<256x512xbf16>
    %cst_39 = arith.constant dense<0.000000e+00> : vector<8x512xf32>
    %165 = tpu.matmul %163, %164, %cst_39 {dimension_numbers = #tpu.dot_dimension_numbers<[1], [0], [0], [1], [0, 0, 1, 1], [], []>} : vector<8x256xbf16>, vector<256x512xbf16>, vector<8x512xf32> -> vector<8x512xf32>
    %166 = arith.addf %165, %13 : vector<8x512xf32>
    %167 = vector.extract_strided_slice %166 {offsets = [0, 0], sizes = [8, 384], strides = [1, 1]} : vector<8x512xf32> to vector<8x384xf32>
    %168 = arith.negf %167 : vector<8x384xf32>
    %169 = math.exp %168 : vector<8x384xf32>
    %cst_40 = arith.constant 1.000000e+00 : f32
    %170 = vector.broadcast %cst_40 : f32 to vector<8x384xf32>
    %171 = arith.addf %170, %169 : vector<8x384xf32>
    %172 = arith.divf %170, %171 : vector<8x384xf32>
    %173 = vector.extract_strided_slice %172 {offsets = [0, 0], sizes = [8, 128], strides = [1, 1]} : vector<8x384xf32> to vector<8x128xf32>
    %174 = vector.extract_strided_slice %172 {offsets = [0, 128], sizes = [8, 128], strides = [1, 1]} : vector<8x384xf32> to vector<8x128xf32>
    %175 = vector.extract_strided_slice %172 {offsets = [0, 256], sizes = [8, 128], strides = [1, 1]} : vector<8x384xf32> to vector<8x128xf32>
    %176 = vector.extract_strided_slice %166 {offsets = [0, 384], sizes = [8, 128], strides = [1, 1]} : vector<8x512xf32> to vector<8x128xf32>
    %177 = math.tanh %176 : vector<8x128xf32>
    %178 = arith.mulf %174, %101 : vector<8x128xf32>
    %179 = arith.mulf %173, %177 : vector<8x128xf32>
    %180 = arith.addf %178, %179 : vector<8x128xf32>
    %181 = math.tanh %180 : vector<8x128xf32>
    %182 = arith.mulf %175, %181 : vector<8x128xf32>
    %183 = arith.subf %182, %98 : vector<8x128xf32>
    %184 = arith.mulf %107, %183 : vector<8x128xf32>
    %185 = arith.addf %98, %184 : vector<8x128xf32>
    %186 = arith.subf %180, %101 : vector<8x128xf32>
    %187 = arith.mulf %107, %186 : vector<8x128xf32>
    %188 = arith.addf %101, %187 : vector<8x128xf32>
    %c2_i32 = arith.constant 2 : i32
    %189 = vector.broadcast %c2_i32 : i32 to vector<8x1xi32>
    %190 = arith.cmpi sgt, %7, %189 : vector<8x1xi32>
    %191 = arith.extui %190 : vector<8x1xi1> to vector<8x1xi32>
    %192 = arith.sitofp %191 : vector<8x1xi32> to vector<8x1xf32>
    %193 = vector.shape_cast %192 : vector<8x1xf32> to vector<8x1xf32>
    %194 = vector.broadcast %193 : vector<8x1xf32> to vector<8x128xf32>
    %c16 = arith.constant 16 : index
    %c0_41 = arith.constant 0 : index
    %195 = vector.load %arg16[%c16, %c0_41] : memref<64x512xf32, #tpu.memory_space<vmem>>, vector<8x512xf32>
    %196 = arith.truncf %131 : vector<8x128xf32> to vector<8x128xbf16>
    %c0_42 = arith.constant 0 : index
    %c0_43 = arith.constant 0 : index
    %197 = vector.load %arg5[%c0_42, %c0_43] : memref<128x512xbf16, #tpu.memory_space<vmem>>, vector<128x512xbf16>
    %cst_44 = arith.constant dense<0.000000e+00> : vector<8x512xf32>
    %198 = tpu.matmul %196, %197, %cst_44 {dimension_numbers = #tpu.dot_dimension_numbers<[1], [0], [0], [1], [0, 0, 1, 1], [], []>} : vector<8x128xbf16>, vector<128x512xbf16>, vector<8x512xf32> -> vector<8x512xf32>
    %199 = arith.addf %195, %198 : vector<8x512xf32>
    %200 = vector.extract_strided_slice %199 {offsets = [0, 0], sizes = [8, 384], strides = [1, 1]} : vector<8x512xf32> to vector<8x384xf32>
    %201 = arith.negf %200 : vector<8x384xf32>
    %202 = math.exp %201 : vector<8x384xf32>
    %cst_45 = arith.constant 1.000000e+00 : f32
    %203 = vector.broadcast %cst_45 : f32 to vector<8x384xf32>
    %204 = arith.addf %203, %202 : vector<8x384xf32>
    %205 = arith.divf %203, %204 : vector<8x384xf32>
    %206 = vector.extract_strided_slice %205 {offsets = [0, 0], sizes = [8, 128], strides = [1, 1]} : vector<8x384xf32> to vector<8x128xf32>
    %207 = vector.extract_strided_slice %205 {offsets = [0, 128], sizes = [8, 128], strides = [1, 1]} : vector<8x384xf32> to vector<8x128xf32>
    %208 = vector.extract_strided_slice %205 {offsets = [0, 256], sizes = [8, 128], strides = [1, 1]} : vector<8x384xf32> to vector<8x128xf32>
    %209 = vector.extract_strided_slice %199 {offsets = [0, 384], sizes = [8, 128], strides = [1, 1]} : vector<8x512xf32> to vector<8x128xf32>
    %210 = math.tanh %209 : vector<8x128xf32>
    %211 = arith.mulf %207, %134 : vector<8x128xf32>
    %212 = arith.mulf %206, %210 : vector<8x128xf32>
    %213 = arith.addf %211, %212 : vector<8x128xf32>
    %214 = math.tanh %213 : vector<8x128xf32>
    %215 = arith.mulf %208, %214 : vector<8x128xf32>
    %216 = arith.subf %215, %131 : vector<8x128xf32>
    %217 = arith.mulf %194, %216 : vector<8x128xf32>
    %218 = arith.addf %131, %217 : vector<8x128xf32>
    %219 = arith.subf %213, %134 : vector<8x128xf32>
    %220 = arith.mulf %194, %219 : vector<8x128xf32>
    %221 = arith.addf %134, %220 : vector<8x128xf32>
    %222 = tpu.concatenate %218, %158 in 1 : vector<8x128xf32>, vector<8x128xf32> -> vector<8x256xf32>
    %223 = arith.truncf %222 : vector<8x256xf32> to vector<8x256xbf16>
    %c0_46 = arith.constant 0 : index
    %c0_47 = arith.constant 0 : index
    %224 = vector.load %arg7[%c0_46, %c0_47] : memref<256x512xbf16, #tpu.memory_space<vmem>>, vector<256x512xbf16>
    %cst_48 = arith.constant dense<0.000000e+00> : vector<8x512xf32>
    %225 = tpu.matmul %223, %224, %cst_48 {dimension_numbers = #tpu.dot_dimension_numbers<[1], [0], [0], [1], [0, 0, 1, 1], [], []>} : vector<8x256xbf16>, vector<256x512xbf16>, vector<8x512xf32> -> vector<8x512xf32>
    %226 = arith.addf %225, %10 : vector<8x512xf32>
    %227 = vector.extract_strided_slice %226 {offsets = [0, 0], sizes = [8, 384], strides = [1, 1]} : vector<8x512xf32> to vector<8x384xf32>
    %228 = arith.negf %227 : vector<8x384xf32>
    %229 = math.exp %228 : vector<8x384xf32>
    %cst_49 = arith.constant 1.000000e+00 : f32
    %230 = vector.broadcast %cst_49 : f32 to vector<8x384xf32>
    %231 = arith.addf %230, %229 : vector<8x384xf32>
    %232 = arith.divf %230, %231 : vector<8x384xf32>
    %233 = vector.extract_strided_slice %232 {offsets = [0, 0], sizes = [8, 128], strides = [1, 1]} : vector<8x384xf32> to vector<8x128xf32>
    %234 = vector.extract_strided_slice %232 {offsets = [0, 128], sizes = [8, 128], strides = [1, 1]} : vector<8x384xf32> to vector<8x128xf32>
    %235 = vector.extract_strided_slice %232 {offsets = [0, 256], sizes = [8, 128], strides = [1, 1]} : vector<8x384xf32> to vector<8x128xf32>
    %236 = vector.extract_strided_slice %226 {offsets = [0, 384], sizes = [8, 128], strides = [1, 1]} : vector<8x512xf32> to vector<8x128xf32>
    %237 = math.tanh %236 : vector<8x128xf32>
    %238 = arith.mulf %234, %161 : vector<8x128xf32>
    %239 = arith.mulf %233, %237 : vector<8x128xf32>
    %240 = arith.addf %238, %239 : vector<8x128xf32>
    %241 = math.tanh %240 : vector<8x128xf32>
    %242 = arith.mulf %235, %241 : vector<8x128xf32>
    %243 = arith.subf %242, %158 : vector<8x128xf32>
    %244 = arith.mulf %194, %243 : vector<8x128xf32>
    %245 = arith.addf %158, %244 : vector<8x128xf32>
    %246 = arith.subf %240, %161 : vector<8x128xf32>
    %247 = arith.mulf %194, %246 : vector<8x128xf32>
    %248 = arith.addf %161, %247 : vector<8x128xf32>
    %249 = tpu.concatenate %245, %185 in 1 : vector<8x128xf32>, vector<8x128xf32> -> vector<8x256xf32>
    %250 = arith.truncf %249 : vector<8x256xf32> to vector<8x256xbf16>
    %c0_50 = arith.constant 0 : index
    %c0_51 = arith.constant 0 : index
    %251 = vector.load %arg9[%c0_50, %c0_51] : memref<256x512xbf16, #tpu.memory_space<vmem>>, vector<256x512xbf16>
    %cst_52 = arith.constant dense<0.000000e+00> : vector<8x512xf32>
    %252 = tpu.matmul %250, %251, %cst_52 {dimension_numbers = #tpu.dot_dimension_numbers<[1], [0], [0], [1], [0, 0, 1, 1], [], []>} : vector<8x256xbf16>, vector<256x512xbf16>, vector<8x512xf32> -> vector<8x512xf32>
    %253 = arith.addf %252, %13 : vector<8x512xf32>
    %254 = vector.extract_strided_slice %253 {offsets = [0, 0], sizes = [8, 384], strides = [1, 1]} : vector<8x512xf32> to vector<8x384xf32>
    %255 = arith.negf %254 : vector<8x384xf32>
    %256 = math.exp %255 : vector<8x384xf32>
    %cst_53 = arith.constant 1.000000e+00 : f32
    %257 = vector.broadcast %cst_53 : f32 to vector<8x384xf32>
    %258 = arith.addf %257, %256 : vector<8x384xf32>
    %259 = arith.divf %257, %258 : vector<8x384xf32>
    %260 = vector.extract_strided_slice %259 {offsets = [0, 0], sizes = [8, 128], strides = [1, 1]} : vector<8x384xf32> to vector<8x128xf32>
    %261 = vector.extract_strided_slice %259 {offsets = [0, 128], sizes = [8, 128], strides = [1, 1]} : vector<8x384xf32> to vector<8x128xf32>
    %262 = vector.extract_strided_slice %259 {offsets = [0, 256], sizes = [8, 128], strides = [1, 1]} : vector<8x384xf32> to vector<8x128xf32>
    %263 = vector.extract_strided_slice %253 {offsets = [0, 384], sizes = [8, 128], strides = [1, 1]} : vector<8x512xf32> to vector<8x128xf32>
    %264 = math.tanh %263 : vector<8x128xf32>
    %265 = arith.mulf %261, %188 : vector<8x128xf32>
    %266 = arith.mulf %260, %264 : vector<8x128xf32>
    %267 = arith.addf %265, %266 : vector<8x128xf32>
    %268 = math.tanh %267 : vector<8x128xf32>
    %269 = arith.mulf %262, %268 : vector<8x128xf32>
    %270 = arith.subf %269, %185 : vector<8x128xf32>
    %271 = arith.mulf %194, %270 : vector<8x128xf32>
    %272 = arith.addf %185, %271 : vector<8x128xf32>
    %273 = arith.subf %267, %188 : vector<8x128xf32>
    %274 = arith.mulf %194, %273 : vector<8x128xf32>
    %275 = arith.addf %188, %274 : vector<8x128xf32>
    %c3_i32 = arith.constant 3 : i32
    %276 = vector.broadcast %c3_i32 : i32 to vector<8x1xi32>
    %277 = arith.cmpi sgt, %7, %276 : vector<8x1xi32>
    %278 = arith.extui %277 : vector<8x1xi1> to vector<8x1xi32>
    %279 = arith.sitofp %278 : vector<8x1xi32> to vector<8x1xf32>
    %280 = vector.shape_cast %279 : vector<8x1xf32> to vector<8x1xf32>
    %281 = vector.broadcast %280 : vector<8x1xf32> to vector<8x128xf32>
    %c24 = arith.constant 24 : index
    %c0_54 = arith.constant 0 : index
    %282 = vector.load %arg16[%c24, %c0_54] : memref<64x512xf32, #tpu.memory_space<vmem>>, vector<8x512xf32>
    %283 = arith.truncf %218 : vector<8x128xf32> to vector<8x128xbf16>
    %c0_55 = arith.constant 0 : index
    %c0_56 = arith.constant 0 : index
    %284 = vector.load %arg5[%c0_55, %c0_56] : memref<128x512xbf16, #tpu.memory_space<vmem>>, vector<128x512xbf16>
    %cst_57 = arith.constant dense<0.000000e+00> : vector<8x512xf32>
    %285 = tpu.matmul %283, %284, %cst_57 {dimension_numbers = #tpu.dot_dimension_numbers<[1], [0], [0], [1], [0, 0, 1, 1], [], []>} : vector<8x128xbf16>, vector<128x512xbf16>, vector<8x512xf32> -> vector<8x512xf32>
    %286 = arith.addf %282, %285 : vector<8x512xf32>
    %287 = vector.extract_strided_slice %286 {offsets = [0, 0], sizes = [8, 384], strides = [1, 1]} : vector<8x512xf32> to vector<8x384xf32>
    %288 = arith.negf %287 : vector<8x384xf32>
    %289 = math.exp %288 : vector<8x384xf32>
    %cst_58 = arith.constant 1.000000e+00 : f32
    %290 = vector.broadcast %cst_58 : f32 to vector<8x384xf32>
    %291 = arith.addf %290, %289 : vector<8x384xf32>
    %292 = arith.divf %290, %291 : vector<8x384xf32>
    %293 = vector.extract_strided_slice %292 {offsets = [0, 0], sizes = [8, 128], strides = [1, 1]} : vector<8x384xf32> to vector<8x128xf32>
    %294 = vector.extract_strided_slice %292 {offsets = [0, 128], sizes = [8, 128], strides = [1, 1]} : vector<8x384xf32> to vector<8x128xf32>
    %295 = vector.extract_strided_slice %292 {offsets = [0, 256], sizes = [8, 128], strides = [1, 1]} : vector<8x384xf32> to vector<8x128xf32>
    %296 = vector.extract_strided_slice %286 {offsets = [0, 384], sizes = [8, 128], strides = [1, 1]} : vector<8x512xf32> to vector<8x128xf32>
    %297 = math.tanh %296 : vector<8x128xf32>
    %298 = arith.mulf %294, %221 : vector<8x128xf32>
    %299 = arith.mulf %293, %297 : vector<8x128xf32>
    %300 = arith.addf %298, %299 : vector<8x128xf32>
    %301 = math.tanh %300 : vector<8x128xf32>
    %302 = arith.mulf %295, %301 : vector<8x128xf32>
    %303 = arith.subf %302, %218 : vector<8x128xf32>
    %304 = arith.mulf %281, %303 : vector<8x128xf32>
    %305 = arith.addf %218, %304 : vector<8x128xf32>
    %306 = arith.subf %300, %221 : vector<8x128xf32>
    %307 = arith.mulf %281, %306 : vector<8x128xf32>
    %308 = arith.addf %221, %307 : vector<8x128xf32>
    %309 = tpu.concatenate %305, %245 in 1 : vector<8x128xf32>, vector<8x128xf32> -> vector<8x256xf32>
    %310 = arith.truncf %309 : vector<8x256xf32> to vector<8x256xbf16>
    %c0_59 = arith.constant 0 : index
    %c0_60 = arith.constant 0 : index
    %311 = vector.load %arg7[%c0_59, %c0_60] : memref<256x512xbf16, #tpu.memory_space<vmem>>, vector<256x512xbf16>
    %cst_61 = arith.constant dense<0.000000e+00> : vector<8x512xf32>
    %312 = tpu.matmul %310, %311, %cst_61 {dimension_numbers = #tpu.dot_dimension_numbers<[1], [0], [0], [1], [0, 0, 1, 1], [], []>} : vector<8x256xbf16>, vector<256x512xbf16>, vector<8x512xf32> -> vector<8x512xf32>
    %313 = arith.addf %312, %10 : vector<8x512xf32>
    %314 = vector.extract_strided_slice %313 {offsets = [0, 0], sizes = [8, 384], strides = [1, 1]} : vector<8x512xf32> to vector<8x384xf32>
    %315 = arith.negf %314 : vector<8x384xf32>
    %316 = math.exp %315 : vector<8x384xf32>
    %cst_62 = arith.constant 1.000000e+00 : f32
    %317 = vector.broadcast %cst_62 : f32 to vector<8x384xf32>
    %318 = arith.addf %317, %316 : vector<8x384xf32>
    %319 = arith.divf %317, %318 : vector<8x384xf32>
    %320 = vector.extract_strided_slice %319 {offsets = [0, 0], sizes = [8, 128], strides = [1, 1]} : vector<8x384xf32> to vector<8x128xf32>
    %321 = vector.extract_strided_slice %319 {offsets = [0, 128], sizes = [8, 128], strides = [1, 1]} : vector<8x384xf32> to vector<8x128xf32>
    %322 = vector.extract_strided_slice %319 {offsets = [0, 256], sizes = [8, 128], strides = [1, 1]} : vector<8x384xf32> to vector<8x128xf32>
    %323 = vector.extract_strided_slice %313 {offsets = [0, 384], sizes = [8, 128], strides = [1, 1]} : vector<8x512xf32> to vector<8x128xf32>
    %324 = math.tanh %323 : vector<8x128xf32>
    %325 = arith.mulf %321, %248 : vector<8x128xf32>
    %326 = arith.mulf %320, %324 : vector<8x128xf32>
    %327 = arith.addf %325, %326 : vector<8x128xf32>
    %328 = math.tanh %327 : vector<8x128xf32>
    %329 = arith.mulf %322, %328 : vector<8x128xf32>
    %330 = arith.subf %329, %245 : vector<8x128xf32>
    %331 = arith.mulf %281, %330 : vector<8x128xf32>
    %332 = arith.addf %245, %331 : vector<8x128xf32>
    %333 = arith.subf %327, %248 : vector<8x128xf32>
    %334 = arith.mulf %281, %333 : vector<8x128xf32>
    %335 = arith.addf %248, %334 : vector<8x128xf32>
    %336 = tpu.concatenate %332, %272 in 1 : vector<8x128xf32>, vector<8x128xf32> -> vector<8x256xf32>
    %337 = arith.truncf %336 : vector<8x256xf32> to vector<8x256xbf16>
    %c0_63 = arith.constant 0 : index
    %c0_64 = arith.constant 0 : index
    %338 = vector.load %arg9[%c0_63, %c0_64] : memref<256x512xbf16, #tpu.memory_space<vmem>>, vector<256x512xbf16>
    %cst_65 = arith.constant dense<0.000000e+00> : vector<8x512xf32>
    %339 = tpu.matmul %337, %338, %cst_65 {dimension_numbers = #tpu.dot_dimension_numbers<[1], [0], [0], [1], [0, 0, 1, 1], [], []>} : vector<8x256xbf16>, vector<256x512xbf16>, vector<8x512xf32> -> vector<8x512xf32>
    %340 = arith.addf %339, %13 : vector<8x512xf32>
    %341 = vector.extract_strided_slice %340 {offsets = [0, 0], sizes = [8, 384], strides = [1, 1]} : vector<8x512xf32> to vector<8x384xf32>
    %342 = arith.negf %341 : vector<8x384xf32>
    %343 = math.exp %342 : vector<8x384xf32>
    %cst_66 = arith.constant 1.000000e+00 : f32
    %344 = vector.broadcast %cst_66 : f32 to vector<8x384xf32>
    %345 = arith.addf %344, %343 : vector<8x384xf32>
    %346 = arith.divf %344, %345 : vector<8x384xf32>
    %347 = vector.extract_strided_slice %346 {offsets = [0, 0], sizes = [8, 128], strides = [1, 1]} : vector<8x384xf32> to vector<8x128xf32>
    %348 = vector.extract_strided_slice %346 {offsets = [0, 128], sizes = [8, 128], strides = [1, 1]} : vector<8x384xf32> to vector<8x128xf32>
    %349 = vector.extract_strided_slice %346 {offsets = [0, 256], sizes = [8, 128], strides = [1, 1]} : vector<8x384xf32> to vector<8x128xf32>
    %350 = vector.extract_strided_slice %340 {offsets = [0, 384], sizes = [8, 128], strides = [1, 1]} : vector<8x512xf32> to vector<8x128xf32>
    %351 = math.tanh %350 : vector<8x128xf32>
    %352 = arith.mulf %348, %275 : vector<8x128xf32>
    %353 = arith.mulf %347, %351 : vector<8x128xf32>
    %354 = arith.addf %352, %353 : vector<8x128xf32>
    %355 = math.tanh %354 : vector<8x128xf32>
    %356 = arith.mulf %349, %355 : vector<8x128xf32>
    %357 = arith.subf %356, %272 : vector<8x128xf32>
    %358 = arith.mulf %281, %357 : vector<8x128xf32>
    %359 = arith.addf %272, %358 : vector<8x128xf32>
    %360 = arith.subf %354, %275 : vector<8x128xf32>
    %361 = arith.mulf %281, %360 : vector<8x128xf32>
    %362 = arith.addf %275, %361 : vector<8x128xf32>
    %c4_i32 = arith.constant 4 : i32
    %363 = vector.broadcast %c4_i32 : i32 to vector<8x1xi32>
    %364 = arith.cmpi sgt, %7, %363 : vector<8x1xi32>
    %365 = arith.extui %364 : vector<8x1xi1> to vector<8x1xi32>
    %366 = arith.sitofp %365 : vector<8x1xi32> to vector<8x1xf32>
    %367 = vector.shape_cast %366 : vector<8x1xf32> to vector<8x1xf32>
    %368 = vector.broadcast %367 : vector<8x1xf32> to vector<8x128xf32>
    %c32 = arith.constant 32 : index
    %c0_67 = arith.constant 0 : index
    %369 = vector.load %arg16[%c32, %c0_67] : memref<64x512xf32, #tpu.memory_space<vmem>>, vector<8x512xf32>
    %370 = arith.truncf %305 : vector<8x128xf32> to vector<8x128xbf16>
    %c0_68 = arith.constant 0 : index
    %c0_69 = arith.constant 0 : index
    %371 = vector.load %arg5[%c0_68, %c0_69] : memref<128x512xbf16, #tpu.memory_space<vmem>>, vector<128x512xbf16>
    %cst_70 = arith.constant dense<0.000000e+00> : vector<8x512xf32>
    %372 = tpu.matmul %370, %371, %cst_70 {dimension_numbers = #tpu.dot_dimension_numbers<[1], [0], [0], [1], [0, 0, 1, 1], [], []>} : vector<8x128xbf16>, vector<128x512xbf16>, vector<8x512xf32> -> vector<8x512xf32>
    %373 = arith.addf %369, %372 : vector<8x512xf32>
    %374 = vector.extract_strided_slice %373 {offsets = [0, 0], sizes = [8, 384], strides = [1, 1]} : vector<8x512xf32> to vector<8x384xf32>
    %375 = arith.negf %374 : vector<8x384xf32>
    %376 = math.exp %375 : vector<8x384xf32>
    %cst_71 = arith.constant 1.000000e+00 : f32
    %377 = vector.broadcast %cst_71 : f32 to vector<8x384xf32>
    %378 = arith.addf %377, %376 : vector<8x384xf32>
    %379 = arith.divf %377, %378 : vector<8x384xf32>
    %380 = vector.extract_strided_slice %379 {offsets = [0, 0], sizes = [8, 128], strides = [1, 1]} : vector<8x384xf32> to vector<8x128xf32>
    %381 = vector.extract_strided_slice %379 {offsets = [0, 128], sizes = [8, 128], strides = [1, 1]} : vector<8x384xf32> to vector<8x128xf32>
    %382 = vector.extract_strided_slice %379 {offsets = [0, 256], sizes = [8, 128], strides = [1, 1]} : vector<8x384xf32> to vector<8x128xf32>
    %383 = vector.extract_strided_slice %373 {offsets = [0, 384], sizes = [8, 128], strides = [1, 1]} : vector<8x512xf32> to vector<8x128xf32>
    %384 = math.tanh %383 : vector<8x128xf32>
    %385 = arith.mulf %381, %308 : vector<8x128xf32>
    %386 = arith.mulf %380, %384 : vector<8x128xf32>
    %387 = arith.addf %385, %386 : vector<8x128xf32>
    %388 = math.tanh %387 : vector<8x128xf32>
    %389 = arith.mulf %382, %388 : vector<8x128xf32>
    %390 = arith.subf %389, %305 : vector<8x128xf32>
    %391 = arith.mulf %368, %390 : vector<8x128xf32>
    %392 = arith.addf %305, %391 : vector<8x128xf32>
    %393 = arith.subf %387, %308 : vector<8x128xf32>
    %394 = arith.mulf %368, %393 : vector<8x128xf32>
    %395 = arith.addf %308, %394 : vector<8x128xf32>
    %396 = tpu.concatenate %392, %332 in 1 : vector<8x128xf32>, vector<8x128xf32> -> vector<8x256xf32>
    %397 = arith.truncf %396 : vector<8x256xf32> to vector<8x256xbf16>
    %c0_72 = arith.constant 0 : index
    %c0_73 = arith.constant 0 : index
    %398 = vector.load %arg7[%c0_72, %c0_73] : memref<256x512xbf16, #tpu.memory_space<vmem>>, vector<256x512xbf16>
    %cst_74 = arith.constant dense<0.000000e+00> : vector<8x512xf32>
    %399 = tpu.matmul %397, %398, %cst_74 {dimension_numbers = #tpu.dot_dimension_numbers<[1], [0], [0], [1], [0, 0, 1, 1], [], []>} : vector<8x256xbf16>, vector<256x512xbf16>, vector<8x512xf32> -> vector<8x512xf32>
    %400 = arith.addf %399, %10 : vector<8x512xf32>
    %401 = vector.extract_strided_slice %400 {offsets = [0, 0], sizes = [8, 384], strides = [1, 1]} : vector<8x512xf32> to vector<8x384xf32>
    %402 = arith.negf %401 : vector<8x384xf32>
    %403 = math.exp %402 : vector<8x384xf32>
    %cst_75 = arith.constant 1.000000e+00 : f32
    %404 = vector.broadcast %cst_75 : f32 to vector<8x384xf32>
    %405 = arith.addf %404, %403 : vector<8x384xf32>
    %406 = arith.divf %404, %405 : vector<8x384xf32>
    %407 = vector.extract_strided_slice %406 {offsets = [0, 0], sizes = [8, 128], strides = [1, 1]} : vector<8x384xf32> to vector<8x128xf32>
    %408 = vector.extract_strided_slice %406 {offsets = [0, 128], sizes = [8, 128], strides = [1, 1]} : vector<8x384xf32> to vector<8x128xf32>
    %409 = vector.extract_strided_slice %406 {offsets = [0, 256], sizes = [8, 128], strides = [1, 1]} : vector<8x384xf32> to vector<8x128xf32>
    %410 = vector.extract_strided_slice %400 {offsets = [0, 384], sizes = [8, 128], strides = [1, 1]} : vector<8x512xf32> to vector<8x128xf32>
    %411 = math.tanh %410 : vector<8x128xf32>
    %412 = arith.mulf %408, %335 : vector<8x128xf32>
    %413 = arith.mulf %407, %411 : vector<8x128xf32>
    %414 = arith.addf %412, %413 : vector<8x128xf32>
    %415 = math.tanh %414 : vector<8x128xf32>
    %416 = arith.mulf %409, %415 : vector<8x128xf32>
    %417 = arith.subf %416, %332 : vector<8x128xf32>
    %418 = arith.mulf %368, %417 : vector<8x128xf32>
    %419 = arith.addf %332, %418 : vector<8x128xf32>
    %420 = arith.subf %414, %335 : vector<8x128xf32>
    %421 = arith.mulf %368, %420 : vector<8x128xf32>
    %422 = arith.addf %335, %421 : vector<8x128xf32>
    %423 = tpu.concatenate %419, %359 in 1 : vector<8x128xf32>, vector<8x128xf32> -> vector<8x256xf32>
    %424 = arith.truncf %423 : vector<8x256xf32> to vector<8x256xbf16>
    %c0_76 = arith.constant 0 : index
    %c0_77 = arith.constant 0 : index
    %425 = vector.load %arg9[%c0_76, %c0_77] : memref<256x512xbf16, #tpu.memory_space<vmem>>, vector<256x512xbf16>
    %cst_78 = arith.constant dense<0.000000e+00> : vector<8x512xf32>
    %426 = tpu.matmul %424, %425, %cst_78 {dimension_numbers = #tpu.dot_dimension_numbers<[1], [0], [0], [1], [0, 0, 1, 1], [], []>} : vector<8x256xbf16>, vector<256x512xbf16>, vector<8x512xf32> -> vector<8x512xf32>
    %427 = arith.addf %426, %13 : vector<8x512xf32>
    %428 = vector.extract_strided_slice %427 {offsets = [0, 0], sizes = [8, 384], strides = [1, 1]} : vector<8x512xf32> to vector<8x384xf32>
    %429 = arith.negf %428 : vector<8x384xf32>
    %430 = math.exp %429 : vector<8x384xf32>
    %cst_79 = arith.constant 1.000000e+00 : f32
    %431 = vector.broadcast %cst_79 : f32 to vector<8x384xf32>
    %432 = arith.addf %431, %430 : vector<8x384xf32>
    %433 = arith.divf %431, %432 : vector<8x384xf32>
    %434 = vector.extract_strided_slice %433 {offsets = [0, 0], sizes = [8, 128], strides = [1, 1]} : vector<8x384xf32> to vector<8x128xf32>
    %435 = vector.extract_strided_slice %433 {offsets = [0, 128], sizes = [8, 128], strides = [1, 1]} : vector<8x384xf32> to vector<8x128xf32>
    %436 = vector.extract_strided_slice %433 {offsets = [0, 256], sizes = [8, 128], strides = [1, 1]} : vector<8x384xf32> to vector<8x128xf32>
    %437 = vector.extract_strided_slice %427 {offsets = [0, 384], sizes = [8, 128], strides = [1, 1]} : vector<8x512xf32> to vector<8x128xf32>
    %438 = math.tanh %437 : vector<8x128xf32>
    %439 = arith.mulf %435, %362 : vector<8x128xf32>
    %440 = arith.mulf %434, %438 : vector<8x128xf32>
    %441 = arith.addf %439, %440 : vector<8x128xf32>
    %442 = math.tanh %441 : vector<8x128xf32>
    %443 = arith.mulf %436, %442 : vector<8x128xf32>
    %444 = arith.subf %443, %359 : vector<8x128xf32>
    %445 = arith.mulf %368, %444 : vector<8x128xf32>
    %446 = arith.addf %359, %445 : vector<8x128xf32>
    %447 = arith.subf %441, %362 : vector<8x128xf32>
    %448 = arith.mulf %368, %447 : vector<8x128xf32>
    %449 = arith.addf %362, %448 : vector<8x128xf32>
    %c5_i32 = arith.constant 5 : i32
    %450 = vector.broadcast %c5_i32 : i32 to vector<8x1xi32>
    %451 = arith.cmpi sgt, %7, %450 : vector<8x1xi32>
    %452 = arith.extui %451 : vector<8x1xi1> to vector<8x1xi32>
    %453 = arith.sitofp %452 : vector<8x1xi32> to vector<8x1xf32>
    %454 = vector.shape_cast %453 : vector<8x1xf32> to vector<8x1xf32>
    %455 = vector.broadcast %454 : vector<8x1xf32> to vector<8x128xf32>
    %c40 = arith.constant 40 : index
    %c0_80 = arith.constant 0 : index
    %456 = vector.load %arg16[%c40, %c0_80] : memref<64x512xf32, #tpu.memory_space<vmem>>, vector<8x512xf32>
    %457 = arith.truncf %392 : vector<8x128xf32> to vector<8x128xbf16>
    %c0_81 = arith.constant 0 : index
    %c0_82 = arith.constant 0 : index
    %458 = vector.load %arg5[%c0_81, %c0_82] : memref<128x512xbf16, #tpu.memory_space<vmem>>, vector<128x512xbf16>
    %cst_83 = arith.constant dense<0.000000e+00> : vector<8x512xf32>
    %459 = tpu.matmul %457, %458, %cst_83 {dimension_numbers = #tpu.dot_dimension_numbers<[1], [0], [0], [1], [0, 0, 1, 1], [], []>} : vector<8x128xbf16>, vector<128x512xbf16>, vector<8x512xf32> -> vector<8x512xf32>
    %460 = arith.addf %456, %459 : vector<8x512xf32>
    %461 = vector.extract_strided_slice %460 {offsets = [0, 0], sizes = [8, 384], strides = [1, 1]} : vector<8x512xf32> to vector<8x384xf32>
    %462 = arith.negf %461 : vector<8x384xf32>
    %463 = math.exp %462 : vector<8x384xf32>
    %cst_84 = arith.constant 1.000000e+00 : f32
    %464 = vector.broadcast %cst_84 : f32 to vector<8x384xf32>
    %465 = arith.addf %464, %463 : vector<8x384xf32>
    %466 = arith.divf %464, %465 : vector<8x384xf32>
    %467 = vector.extract_strided_slice %466 {offsets = [0, 0], sizes = [8, 128], strides = [1, 1]} : vector<8x384xf32> to vector<8x128xf32>
    %468 = vector.extract_strided_slice %466 {offsets = [0, 128], sizes = [8, 128], strides = [1, 1]} : vector<8x384xf32> to vector<8x128xf32>
    %469 = vector.extract_strided_slice %466 {offsets = [0, 256], sizes = [8, 128], strides = [1, 1]} : vector<8x384xf32> to vector<8x128xf32>
    %470 = vector.extract_strided_slice %460 {offsets = [0, 384], sizes = [8, 128], strides = [1, 1]} : vector<8x512xf32> to vector<8x128xf32>
    %471 = math.tanh %470 : vector<8x128xf32>
    %472 = arith.mulf %468, %395 : vector<8x128xf32>
    %473 = arith.mulf %467, %471 : vector<8x128xf32>
    %474 = arith.addf %472, %473 : vector<8x128xf32>
    %475 = math.tanh %474 : vector<8x128xf32>
    %476 = arith.mulf %469, %475 : vector<8x128xf32>
    %477 = arith.subf %476, %392 : vector<8x128xf32>
    %478 = arith.mulf %455, %477 : vector<8x128xf32>
    %479 = arith.addf %392, %478 : vector<8x128xf32>
    %480 = arith.subf %474, %395 : vector<8x128xf32>
    %481 = arith.mulf %455, %480 : vector<8x128xf32>
    %482 = arith.addf %395, %481 : vector<8x128xf32>
    %483 = tpu.concatenate %479, %419 in 1 : vector<8x128xf32>, vector<8x128xf32> -> vector<8x256xf32>
    %484 = arith.truncf %483 : vector<8x256xf32> to vector<8x256xbf16>
    %c0_85 = arith.constant 0 : index
    %c0_86 = arith.constant 0 : index
    %485 = vector.load %arg7[%c0_85, %c0_86] : memref<256x512xbf16, #tpu.memory_space<vmem>>, vector<256x512xbf16>
    %cst_87 = arith.constant dense<0.000000e+00> : vector<8x512xf32>
    %486 = tpu.matmul %484, %485, %cst_87 {dimension_numbers = #tpu.dot_dimension_numbers<[1], [0], [0], [1], [0, 0, 1, 1], [], []>} : vector<8x256xbf16>, vector<256x512xbf16>, vector<8x512xf32> -> vector<8x512xf32>
    %487 = arith.addf %486, %10 : vector<8x512xf32>
    %488 = vector.extract_strided_slice %487 {offsets = [0, 0], sizes = [8, 384], strides = [1, 1]} : vector<8x512xf32> to vector<8x384xf32>
    %489 = arith.negf %488 : vector<8x384xf32>
    %490 = math.exp %489 : vector<8x384xf32>
    %cst_88 = arith.constant 1.000000e+00 : f32
    %491 = vector.broadcast %cst_88 : f32 to vector<8x384xf32>
    %492 = arith.addf %491, %490 : vector<8x384xf32>
    %493 = arith.divf %491, %492 : vector<8x384xf32>
    %494 = vector.extract_strided_slice %493 {offsets = [0, 0], sizes = [8, 128], strides = [1, 1]} : vector<8x384xf32> to vector<8x128xf32>
    %495 = vector.extract_strided_slice %493 {offsets = [0, 128], sizes = [8, 128], strides = [1, 1]} : vector<8x384xf32> to vector<8x128xf32>
    %496 = vector.extract_strided_slice %493 {offsets = [0, 256], sizes = [8, 128], strides = [1, 1]} : vector<8x384xf32> to vector<8x128xf32>
    %497 = vector.extract_strided_slice %487 {offsets = [0, 384], sizes = [8, 128], strides = [1, 1]} : vector<8x512xf32> to vector<8x128xf32>
    %498 = math.tanh %497 : vector<8x128xf32>
    %499 = arith.mulf %495, %422 : vector<8x128xf32>
    %500 = arith.mulf %494, %498 : vector<8x128xf32>
    %501 = arith.addf %499, %500 : vector<8x128xf32>
    %502 = math.tanh %501 : vector<8x128xf32>
    %503 = arith.mulf %496, %502 : vector<8x128xf32>
    %504 = arith.subf %503, %419 : vector<8x128xf32>
    %505 = arith.mulf %455, %504 : vector<8x128xf32>
    %506 = arith.addf %419, %505 : vector<8x128xf32>
    %507 = arith.subf %501, %422 : vector<8x128xf32>
    %508 = arith.mulf %455, %507 : vector<8x128xf32>
    %509 = arith.addf %422, %508 : vector<8x128xf32>
    %510 = tpu.concatenate %506, %446 in 1 : vector<8x128xf32>, vector<8x128xf32> -> vector<8x256xf32>
    %511 = arith.truncf %510 : vector<8x256xf32> to vector<8x256xbf16>
    %c0_89 = arith.constant 0 : index
    %c0_90 = arith.constant 0 : index
    %512 = vector.load %arg9[%c0_89, %c0_90] : memref<256x512xbf16, #tpu.memory_space<vmem>>, vector<256x512xbf16>
    %cst_91 = arith.constant dense<0.000000e+00> : vector<8x512xf32>
    %513 = tpu.matmul %511, %512, %cst_91 {dimension_numbers = #tpu.dot_dimension_numbers<[1], [0], [0], [1], [0, 0, 1, 1], [], []>} : vector<8x256xbf16>, vector<256x512xbf16>, vector<8x512xf32> -> vector<8x512xf32>
    %514 = arith.addf %513, %13 : vector<8x512xf32>
    %515 = vector.extract_strided_slice %514 {offsets = [0, 0], sizes = [8, 384], strides = [1, 1]} : vector<8x512xf32> to vector<8x384xf32>
    %516 = arith.negf %515 : vector<8x384xf32>
    %517 = math.exp %516 : vector<8x384xf32>
    %cst_92 = arith.constant 1.000000e+00 : f32
    %518 = vector.broadcast %cst_92 : f32 to vector<8x384xf32>
    %519 = arith.addf %518, %517 : vector<8x384xf32>
    %520 = arith.divf %518, %519 : vector<8x384xf32>
    %521 = vector.extract_strided_slice %520 {offsets = [0, 0], sizes = [8, 128], strides = [1, 1]} : vector<8x384xf32> to vector<8x128xf32>
    %522 = vector.extract_strided_slice %520 {offsets = [0, 128], sizes = [8, 128], strides = [1, 1]} : vector<8x384xf32> to vector<8x128xf32>
    %523 = vector.extract_strided_slice %520 {offsets = [0, 256], sizes = [8, 128], strides = [1, 1]} : vector<8x384xf32> to vector<8x128xf32>
    %524 = vector.extract_strided_slice %514 {offsets = [0, 384], sizes = [8, 128], strides = [1, 1]} : vector<8x512xf32> to vector<8x128xf32>
    %525 = math.tanh %524 : vector<8x128xf32>
    %526 = arith.mulf %522, %449 : vector<8x128xf32>
    %527 = arith.mulf %521, %525 : vector<8x128xf32>
    %528 = arith.addf %526, %527 : vector<8x128xf32>
    %529 = math.tanh %528 : vector<8x128xf32>
    %530 = arith.mulf %523, %529 : vector<8x128xf32>
    %531 = arith.subf %530, %446 : vector<8x128xf32>
    %532 = arith.mulf %455, %531 : vector<8x128xf32>
    %533 = arith.addf %446, %532 : vector<8x128xf32>
    %534 = arith.subf %528, %449 : vector<8x128xf32>
    %535 = arith.mulf %455, %534 : vector<8x128xf32>
    %536 = arith.addf %449, %535 : vector<8x128xf32>
    %c6_i32 = arith.constant 6 : i32
    %537 = vector.broadcast %c6_i32 : i32 to vector<8x1xi32>
    %538 = arith.cmpi sgt, %7, %537 : vector<8x1xi32>
    %539 = arith.extui %538 : vector<8x1xi1> to vector<8x1xi32>
    %540 = arith.sitofp %539 : vector<8x1xi32> to vector<8x1xf32>
    %541 = vector.shape_cast %540 : vector<8x1xf32> to vector<8x1xf32>
    %542 = vector.broadcast %541 : vector<8x1xf32> to vector<8x128xf32>
    %c48 = arith.constant 48 : index
    %c0_93 = arith.constant 0 : index
    %543 = vector.load %arg16[%c48, %c0_93] : memref<64x512xf32, #tpu.memory_space<vmem>>, vector<8x512xf32>
    %544 = arith.truncf %479 : vector<8x128xf32> to vector<8x128xbf16>
    %c0_94 = arith.constant 0 : index
    %c0_95 = arith.constant 0 : index
    %545 = vector.load %arg5[%c0_94, %c0_95] : memref<128x512xbf16, #tpu.memory_space<vmem>>, vector<128x512xbf16>
    %cst_96 = arith.constant dense<0.000000e+00> : vector<8x512xf32>
    %546 = tpu.matmul %544, %545, %cst_96 {dimension_numbers = #tpu.dot_dimension_numbers<[1], [0], [0], [1], [0, 0, 1, 1], [], []>} : vector<8x128xbf16>, vector<128x512xbf16>, vector<8x512xf32> -> vector<8x512xf32>
    %547 = arith.addf %543, %546 : vector<8x512xf32>
    %548 = vector.extract_strided_slice %547 {offsets = [0, 0], sizes = [8, 384], strides = [1, 1]} : vector<8x512xf32> to vector<8x384xf32>
    %549 = arith.negf %548 : vector<8x384xf32>
    %550 = math.exp %549 : vector<8x384xf32>
    %cst_97 = arith.constant 1.000000e+00 : f32
    %551 = vector.broadcast %cst_97 : f32 to vector<8x384xf32>
    %552 = arith.addf %551, %550 : vector<8x384xf32>
    %553 = arith.divf %551, %552 : vector<8x384xf32>
    %554 = vector.extract_strided_slice %553 {offsets = [0, 0], sizes = [8, 128], strides = [1, 1]} : vector<8x384xf32> to vector<8x128xf32>
    %555 = vector.extract_strided_slice %553 {offsets = [0, 128], sizes = [8, 128], strides = [1, 1]} : vector<8x384xf32> to vector<8x128xf32>
    %556 = vector.extract_strided_slice %553 {offsets = [0, 256], sizes = [8, 128], strides = [1, 1]} : vector<8x384xf32> to vector<8x128xf32>
    %557 = vector.extract_strided_slice %547 {offsets = [0, 384], sizes = [8, 128], strides = [1, 1]} : vector<8x512xf32> to vector<8x128xf32>
    %558 = math.tanh %557 : vector<8x128xf32>
    %559 = arith.mulf %555, %482 : vector<8x128xf32>
    %560 = arith.mulf %554, %558 : vector<8x128xf32>
    %561 = arith.addf %559, %560 : vector<8x128xf32>
    %562 = math.tanh %561 : vector<8x128xf32>
    %563 = arith.mulf %556, %562 : vector<8x128xf32>
    %564 = arith.subf %563, %479 : vector<8x128xf32>
    %565 = arith.mulf %542, %564 : vector<8x128xf32>
    %566 = arith.addf %479, %565 : vector<8x128xf32>
    %567 = arith.subf %561, %482 : vector<8x128xf32>
    %568 = arith.mulf %542, %567 : vector<8x128xf32>
    %569 = arith.addf %482, %568 : vector<8x128xf32>
    %570 = tpu.concatenate %566, %506 in 1 : vector<8x128xf32>, vector<8x128xf32> -> vector<8x256xf32>
    %571 = arith.truncf %570 : vector<8x256xf32> to vector<8x256xbf16>
    %c0_98 = arith.constant 0 : index
    %c0_99 = arith.constant 0 : index
    %572 = vector.load %arg7[%c0_98, %c0_99] : memref<256x512xbf16, #tpu.memory_space<vmem>>, vector<256x512xbf16>
    %cst_100 = arith.constant dense<0.000000e+00> : vector<8x512xf32>
    %573 = tpu.matmul %571, %572, %cst_100 {dimension_numbers = #tpu.dot_dimension_numbers<[1], [0], [0], [1], [0, 0, 1, 1], [], []>} : vector<8x256xbf16>, vector<256x512xbf16>, vector<8x512xf32> -> vector<8x512xf32>
    %574 = arith.addf %573, %10 : vector<8x512xf32>
    %575 = vector.extract_strided_slice %574 {offsets = [0, 0], sizes = [8, 384], strides = [1, 1]} : vector<8x512xf32> to vector<8x384xf32>
    %576 = arith.negf %575 : vector<8x384xf32>
    %577 = math.exp %576 : vector<8x384xf32>
    %cst_101 = arith.constant 1.000000e+00 : f32
    %578 = vector.broadcast %cst_101 : f32 to vector<8x384xf32>
    %579 = arith.addf %578, %577 : vector<8x384xf32>
    %580 = arith.divf %578, %579 : vector<8x384xf32>
    %581 = vector.extract_strided_slice %580 {offsets = [0, 0], sizes = [8, 128], strides = [1, 1]} : vector<8x384xf32> to vector<8x128xf32>
    %582 = vector.extract_strided_slice %580 {offsets = [0, 128], sizes = [8, 128], strides = [1, 1]} : vector<8x384xf32> to vector<8x128xf32>
    %583 = vector.extract_strided_slice %580 {offsets = [0, 256], sizes = [8, 128], strides = [1, 1]} : vector<8x384xf32> to vector<8x128xf32>
    %584 = vector.extract_strided_slice %574 {offsets = [0, 384], sizes = [8, 128], strides = [1, 1]} : vector<8x512xf32> to vector<8x128xf32>
    %585 = math.tanh %584 : vector<8x128xf32>
    %586 = arith.mulf %582, %509 : vector<8x128xf32>
    %587 = arith.mulf %581, %585 : vector<8x128xf32>
    %588 = arith.addf %586, %587 : vector<8x128xf32>
    %589 = math.tanh %588 : vector<8x128xf32>
    %590 = arith.mulf %583, %589 : vector<8x128xf32>
    %591 = arith.subf %590, %506 : vector<8x128xf32>
    %592 = arith.mulf %542, %591 : vector<8x128xf32>
    %593 = arith.addf %506, %592 : vector<8x128xf32>
    %594 = arith.subf %588, %509 : vector<8x128xf32>
    %595 = arith.mulf %542, %594 : vector<8x128xf32>
    %596 = arith.addf %509, %595 : vector<8x128xf32>
    %597 = tpu.concatenate %593, %533 in 1 : vector<8x128xf32>, vector<8x128xf32> -> vector<8x256xf32>
    %598 = arith.truncf %597 : vector<8x256xf32> to vector<8x256xbf16>
    %c0_102 = arith.constant 0 : index
    %c0_103 = arith.constant 0 : index
    %599 = vector.load %arg9[%c0_102, %c0_103] : memref<256x512xbf16, #tpu.memory_space<vmem>>, vector<256x512xbf16>
    %cst_104 = arith.constant dense<0.000000e+00> : vector<8x512xf32>
    %600 = tpu.matmul %598, %599, %cst_104 {dimension_numbers = #tpu.dot_dimension_numbers<[1], [0], [0], [1], [0, 0, 1, 1], [], []>} : vector<8x256xbf16>, vector<256x512xbf16>, vector<8x512xf32> -> vector<8x512xf32>
    %601 = arith.addf %600, %13 : vector<8x512xf32>
    %602 = vector.extract_strided_slice %601 {offsets = [0, 0], sizes = [8, 384], strides = [1, 1]} : vector<8x512xf32> to vector<8x384xf32>
    %603 = arith.negf %602 : vector<8x384xf32>
    %604 = math.exp %603 : vector<8x384xf32>
    %cst_105 = arith.constant 1.000000e+00 : f32
    %605 = vector.broadcast %cst_105 : f32 to vector<8x384xf32>
    %606 = arith.addf %605, %604 : vector<8x384xf32>
    %607 = arith.divf %605, %606 : vector<8x384xf32>
    %608 = vector.extract_strided_slice %607 {offsets = [0, 0], sizes = [8, 128], strides = [1, 1]} : vector<8x384xf32> to vector<8x128xf32>
    %609 = vector.extract_strided_slice %607 {offsets = [0, 128], sizes = [8, 128], strides = [1, 1]} : vector<8x384xf32> to vector<8x128xf32>
    %610 = vector.extract_strided_slice %607 {offsets = [0, 256], sizes = [8, 128], strides = [1, 1]} : vector<8x384xf32> to vector<8x128xf32>
    %611 = vector.extract_strided_slice %601 {offsets = [0, 384], sizes = [8, 128], strides = [1, 1]} : vector<8x512xf32> to vector<8x128xf32>
    %612 = math.tanh %611 : vector<8x128xf32>
    %613 = arith.mulf %609, %536 : vector<8x128xf32>
    %614 = arith.mulf %608, %612 : vector<8x128xf32>
    %615 = arith.addf %613, %614 : vector<8x128xf32>
    %616 = math.tanh %615 : vector<8x128xf32>
    %617 = arith.mulf %610, %616 : vector<8x128xf32>
    %618 = arith.subf %617, %533 : vector<8x128xf32>
    %619 = arith.mulf %542, %618 : vector<8x128xf32>
    %620 = arith.addf %533, %619 : vector<8x128xf32>
    %621 = arith.subf %615, %536 : vector<8x128xf32>
    %622 = arith.mulf %542, %621 : vector<8x128xf32>
    %623 = arith.addf %536, %622 : vector<8x128xf32>
    %c7_i32 = arith.constant 7 : i32
    %624 = vector.broadcast %c7_i32 : i32 to vector<8x1xi32>
    %625 = arith.cmpi sgt, %7, %624 : vector<8x1xi32>
    %626 = arith.extui %625 : vector<8x1xi1> to vector<8x1xi32>
    %627 = arith.sitofp %626 : vector<8x1xi32> to vector<8x1xf32>
    %628 = vector.shape_cast %627 : vector<8x1xf32> to vector<8x1xf32>
    %629 = vector.broadcast %628 : vector<8x1xf32> to vector<8x128xf32>
    %c56 = arith.constant 56 : index
    %c0_106 = arith.constant 0 : index
    %630 = vector.load %arg16[%c56, %c0_106] : memref<64x512xf32, #tpu.memory_space<vmem>>, vector<8x512xf32>
    %631 = arith.truncf %566 : vector<8x128xf32> to vector<8x128xbf16>
    %c0_107 = arith.constant 0 : index
    %c0_108 = arith.constant 0 : index
    %632 = vector.load %arg5[%c0_107, %c0_108] : memref<128x512xbf16, #tpu.memory_space<vmem>>, vector<128x512xbf16>
    %cst_109 = arith.constant dense<0.000000e+00> : vector<8x512xf32>
    %633 = tpu.matmul %631, %632, %cst_109 {dimension_numbers = #tpu.dot_dimension_numbers<[1], [0], [0], [1], [0, 0, 1, 1], [], []>} : vector<8x128xbf16>, vector<128x512xbf16>, vector<8x512xf32> -> vector<8x512xf32>
    %634 = arith.addf %630, %633 : vector<8x512xf32>
    %635 = vector.extract_strided_slice %634 {offsets = [0, 0], sizes = [8, 384], strides = [1, 1]} : vector<8x512xf32> to vector<8x384xf32>
    %636 = arith.negf %635 : vector<8x384xf32>
    %637 = math.exp %636 : vector<8x384xf32>
    %cst_110 = arith.constant 1.000000e+00 : f32
    %638 = vector.broadcast %cst_110 : f32 to vector<8x384xf32>
    %639 = arith.addf %638, %637 : vector<8x384xf32>
    %640 = arith.divf %638, %639 : vector<8x384xf32>
    %641 = vector.extract_strided_slice %640 {offsets = [0, 0], sizes = [8, 128], strides = [1, 1]} : vector<8x384xf32> to vector<8x128xf32>
    %642 = vector.extract_strided_slice %640 {offsets = [0, 128], sizes = [8, 128], strides = [1, 1]} : vector<8x384xf32> to vector<8x128xf32>
    %643 = vector.extract_strided_slice %640 {offsets = [0, 256], sizes = [8, 128], strides = [1, 1]} : vector<8x384xf32> to vector<8x128xf32>
    %644 = vector.extract_strided_slice %634 {offsets = [0, 384], sizes = [8, 128], strides = [1, 1]} : vector<8x512xf32> to vector<8x128xf32>
    %645 = math.tanh %644 : vector<8x128xf32>
    %646 = arith.mulf %642, %569 : vector<8x128xf32>
    %647 = arith.mulf %641, %645 : vector<8x128xf32>
    %648 = arith.addf %646, %647 : vector<8x128xf32>
    %649 = math.tanh %648 : vector<8x128xf32>
    %650 = arith.mulf %643, %649 : vector<8x128xf32>
    %651 = arith.subf %650, %566 : vector<8x128xf32>
    %652 = arith.mulf %629, %651 : vector<8x128xf32>
    %653 = arith.addf %566, %652 : vector<8x128xf32>
    %654 = tpu.concatenate %653, %593 in 1 : vector<8x128xf32>, vector<8x128xf32> -> vector<8x256xf32>
    %655 = arith.truncf %654 : vector<8x256xf32> to vector<8x256xbf16>
    %c0_111 = arith.constant 0 : index
    %c0_112 = arith.constant 0 : index
    %656 = vector.load %arg7[%c0_111, %c0_112] : memref<256x512xbf16, #tpu.memory_space<vmem>>, vector<256x512xbf16>
    %cst_113 = arith.constant dense<0.000000e+00> : vector<8x512xf32>
    %657 = tpu.matmul %655, %656, %cst_113 {dimension_numbers = #tpu.dot_dimension_numbers<[1], [0], [0], [1], [0, 0, 1, 1], [], []>} : vector<8x256xbf16>, vector<256x512xbf16>, vector<8x512xf32> -> vector<8x512xf32>
    %658 = arith.addf %657, %10 : vector<8x512xf32>
    %659 = vector.extract_strided_slice %658 {offsets = [0, 0], sizes = [8, 384], strides = [1, 1]} : vector<8x512xf32> to vector<8x384xf32>
    %660 = arith.negf %659 : vector<8x384xf32>
    %661 = math.exp %660 : vector<8x384xf32>
    %cst_114 = arith.constant 1.000000e+00 : f32
    %662 = vector.broadcast %cst_114 : f32 to vector<8x384xf32>
    %663 = arith.addf %662, %661 : vector<8x384xf32>
    %664 = arith.divf %662, %663 : vector<8x384xf32>
    %665 = vector.extract_strided_slice %664 {offsets = [0, 0], sizes = [8, 128], strides = [1, 1]} : vector<8x384xf32> to vector<8x128xf32>
    %666 = vector.extract_strided_slice %664 {offsets = [0, 128], sizes = [8, 128], strides = [1, 1]} : vector<8x384xf32> to vector<8x128xf32>
    %667 = vector.extract_strided_slice %664 {offsets = [0, 256], sizes = [8, 128], strides = [1, 1]} : vector<8x384xf32> to vector<8x128xf32>
    %668 = vector.extract_strided_slice %658 {offsets = [0, 384], sizes = [8, 128], strides = [1, 1]} : vector<8x512xf32> to vector<8x128xf32>
    %669 = math.tanh %668 : vector<8x128xf32>
    %670 = arith.mulf %666, %596 : vector<8x128xf32>
    %671 = arith.mulf %665, %669 : vector<8x128xf32>
    %672 = arith.addf %670, %671 : vector<8x128xf32>
    %673 = math.tanh %672 : vector<8x128xf32>
    %674 = arith.mulf %667, %673 : vector<8x128xf32>
    %675 = arith.subf %674, %593 : vector<8x128xf32>
    %676 = arith.mulf %629, %675 : vector<8x128xf32>
    %677 = arith.addf %593, %676 : vector<8x128xf32>
    %678 = tpu.concatenate %677, %620 in 1 : vector<8x128xf32>, vector<8x128xf32> -> vector<8x256xf32>
    %679 = arith.truncf %678 : vector<8x256xf32> to vector<8x256xbf16>
    %c0_115 = arith.constant 0 : index
    %c0_116 = arith.constant 0 : index
    %680 = vector.load %arg9[%c0_115, %c0_116] : memref<256x512xbf16, #tpu.memory_space<vmem>>, vector<256x512xbf16>
    %cst_117 = arith.constant dense<0.000000e+00> : vector<8x512xf32>
    %681 = tpu.matmul %679, %680, %cst_117 {dimension_numbers = #tpu.dot_dimension_numbers<[1], [0], [0], [1], [0, 0, 1, 1], [], []>} : vector<8x256xbf16>, vector<256x512xbf16>, vector<8x512xf32> -> vector<8x512xf32>
    %682 = arith.addf %681, %13 : vector<8x512xf32>
    %683 = vector.extract_strided_slice %682 {offsets = [0, 0], sizes = [8, 384], strides = [1, 1]} : vector<8x512xf32> to vector<8x384xf32>
    %684 = arith.negf %683 : vector<8x384xf32>
    %685 = math.exp %684 : vector<8x384xf32>
    %cst_118 = arith.constant 1.000000e+00 : f32
    %686 = vector.broadcast %cst_118 : f32 to vector<8x384xf32>
    %687 = arith.addf %686, %685 : vector<8x384xf32>
    %688 = arith.divf %686, %687 : vector<8x384xf32>
    %689 = vector.extract_strided_slice %688 {offsets = [0, 0], sizes = [8, 128], strides = [1, 1]} : vector<8x384xf32> to vector<8x128xf32>
    %690 = vector.extract_strided_slice %688 {offsets = [0, 128], sizes = [8, 128], strides = [1, 1]} : vector<8x384xf32> to vector<8x128xf32>
    %691 = vector.extract_strided_slice %688 {offsets = [0, 256], sizes = [8, 128], strides = [1, 1]} : vector<8x384xf32> to vector<8x128xf32>
    %692 = vector.extract_strided_slice %682 {offsets = [0, 384], sizes = [8, 128], strides = [1, 1]} : vector<8x512xf32> to vector<8x128xf32>
    %693 = math.tanh %692 : vector<8x128xf32>
    %694 = arith.mulf %690, %623 : vector<8x128xf32>
    %695 = arith.mulf %689, %693 : vector<8x128xf32>
    %696 = arith.addf %694, %695 : vector<8x128xf32>
    %697 = math.tanh %696 : vector<8x128xf32>
    %698 = arith.mulf %691, %697 : vector<8x128xf32>
    %699 = arith.subf %698, %620 : vector<8x128xf32>
    %700 = arith.mulf %629, %699 : vector<8x128xf32>
    %701 = arith.addf %620, %700 : vector<8x128xf32>
    %c0_119 = arith.constant 0 : index
    %c0_120 = arith.constant 0 : index
    %702 = vector.load %arg2[%c0_119, %c0_120] : memref<8x1xf32, #tpu.memory_space<vmem>>, vector<8x1xf32>
    %703 = vector.broadcast %702 : vector<8x1xf32> to vector<8x128xf32>
    %704 = arith.mulf %701, %703 : vector<8x128xf32>
    %c0_121 = arith.constant 0 : index
    %c0_122 = arith.constant 0 : index
    %705 = vector.load %arg11[%c0_121, %c0_122] : memref<128x128xf32, #tpu.memory_space<vmem>>, vector<128x128xf32>
    %cst_123 = arith.constant dense<0.000000e+00> : vector<8x128xf32>
    %706 = tpu.matmul %704, %705, %cst_123 {dimension_numbers = #tpu.dot_dimension_numbers<[1], [0], [0], [1], [0, 0, 1, 1], [], []>} : vector<8x128xf32>, vector<128x128xf32>, vector<8x128xf32> -> vector<8x128xf32>
    %c0_124 = arith.constant 0 : index
    %c0_125 = arith.constant 0 : index
    %707 = vector.load %arg12[%c0_124, %c0_125] : memref<1x128xf32, #tpu.memory_space<vmem>>, vector<1x128xf32>
    %708 = vector.broadcast %707 : vector<1x128xf32> to vector<8x128xf32>
    %709 = arith.addf %706, %708 : vector<8x128xf32>
    %cst_126 = arith.constant 0.000000e+00 : f32
    %710 = vector.broadcast %cst_126 : f32 to vector<8x128xf32>
    %711 = arith.maximumf %709, %710 : vector<8x128xf32>
    %c0_127 = arith.constant 0 : index
    %c0_128 = arith.constant 0 : index
    %712 = vector.load %arg13[%c0_127, %c0_128] : memref<128x16xf32, #tpu.memory_space<vmem>>, vector<128x16xf32>
    %cst_129 = arith.constant dense<0.000000e+00> : vector<8x16xf32>
    %713 = tpu.matmul %711, %712, %cst_129 {dimension_numbers = #tpu.dot_dimension_numbers<[1], [0], [0], [1], [0, 0, 1, 1], [], []>} : vector<8x128xf32>, vector<128x16xf32>, vector<8x16xf32> -> vector<8x16xf32>
    %c0_130 = arith.constant 0 : index
    %c0_131 = arith.constant 0 : index
    %714 = vector.load %arg14[%c0_130, %c0_131] : memref<1x16xf32, #tpu.memory_space<vmem>>, vector<1x16xf32>
    %715 = vector.broadcast %714 : vector<1x16xf32> to vector<8x16xf32>
    %716 = arith.addf %713, %715 : vector<8x16xf32>
    %c0_132 = arith.constant 0 : index
    %c0_133 = arith.constant 0 : index
    %717 = vector.load %arg15[%c0_132, %c0_133] : memref<8x16xf32, #tpu.memory_space<vmem>>, vector<8x16xf32>
    tpu.vector_store %arg15[%c0_132, %c0_133], %716 {strides = array<i32>} : memref<8x16xf32, #tpu.memory_space<vmem>>, vector<8x16xf32>,
    return
  }
  func.func @transform_0(%arg0: i32) -> (i32, i32) {
    %c0_i32 = arith.constant 0 : i32
    %c0_i32_0 = arith.constant 0 : i32
    %c0_i32_1 = arith.constant 0 : i32
    return %c0_i32, %c0_i32_0 : i32, i32
  }
  func.func @transform_1(%arg0: i32) -> (i32, i32) {
    %c0_i32 = arith.constant 0 : i32
    %c0_i32_0 = arith.constant 0 : i32
    %c0_i32_1 = arith.constant 0 : i32
    return %c0_i32, %c0_i32_0 : i32, i32
  }
  func.func @transform_2(%arg0: i32) -> (i32, i32) {
    %c0_i32 = arith.constant 0 : i32
    %c0_i32_0 = arith.constant 0 : i32
    %c0_i32_1 = arith.constant 0 : i32
    return %c0_i32, %c0_i32_0 : i32, i32
  }
  func.func @transform_3(%arg0: i32) -> (i32, i32) {
    %c0_i32 = arith.constant 0 : i32
    %c0_i32_0 = arith.constant 0 : i32
    %c0_i32_1 = arith.constant 0 : i32
    return %c0_i32, %c0_i32_0 : i32, i32
  }
  func.func @transform_4(%arg0: i32) -> (i32, i32) {
    %c0_i32 = arith.constant 0 : i32
    %c0_i32_0 = arith.constant 0 : i32
    %c0_i32_1 = arith.constant 0 : i32
    return %c0_i32, %c0_i32_0 : i32, i32
  }
  func.func @transform_5(%arg0: i32) -> (i32, i32) {
    %c0_i32 = arith.constant 0 : i32
    %c0_i32_0 = arith.constant 0 : i32
    %c0_i32_1 = arith.constant 0 : i32
    return %c0_i32, %c0_i32_0 : i32, i32
  }
  func.func @transform_6(%arg0: i32) -> (i32, i32) {
    %c0_i32 = arith.constant 0 : i32
    %c0_i32_0 = arith.constant 0 : i32
    %c0_i32_1 = arith.constant 0 : i32
    return %c0_i32, %c0_i32_0 : i32, i32
  }
  func.func @transform_7(%arg0: i32) -> (i32, i32) {
    %c0_i32 = arith.constant 0 : i32
    %c0_i32_0 = arith.constant 0 : i32
    %c0_i32_1 = arith.constant 0 : i32
    return %c0_i32, %c0_i32_0 : i32, i32
  }
  func.func @transform_8(%arg0: i32) -> (i32, i32) {
    %c0_i32 = arith.constant 0 : i32
    %c0_i32_0 = arith.constant 0 : i32
    %c0_i32_1 = arith.constant 0 : i32
    return %c0_i32, %c0_i32_0 : i32, i32
  }
  func.func @transform_9(%arg0: i32) -> (i32, i32) {
    %c0_i32 = arith.constant 0 : i32
    %c0_i32_0 = arith.constant 0 : i32
    %c0_i32_1 = arith.constant 0 : i32
    return %c0_i32, %c0_i32_0 : i32, i32
  }
  func.func @transform_10(%arg0: i32) -> (i32, i32) {
    %c0_i32 = arith.constant 0 : i32
    %c0_i32_0 = arith.constant 0 : i32
    %c0_i32_1 = arith.constant 0 : i32
    return %c0_i32, %c0_i32_0 : i32, i32
  }
  func.func @transform_11(%arg0: i32) -> (i32, i32) {
    %c0_i32 = arith.constant 0 : i32
    %c0_i32_0 = arith.constant 0 : i32
    %c0_i32_1 = arith.constant 0 : i32
    return %c0_i32, %c0_i32_0 : i32, i32
  }
  func.func @transform_12(%arg0: i32) -> (i32, i32) {
    %c0_i32 = arith.constant 0 : i32
    %c0_i32_0 = arith.constant 0 : i32
    %c0_i32_1 = arith.constant 0 : i32
    return %c0_i32, %c0_i32_0 : i32, i32
  }
  func.func @transform_13(%arg0: i32) -> (i32, i32) {
    %c0_i32 = arith.constant 0 : i32
    %c0_i32_0 = arith.constant 0 : i32
    %c0_i32_1 = arith.constant 0 : i32
    return %c0_i32, %c0_i32_0 : i32, i32
  }
  func.func @transform_14(%arg0: i32) -> (i32, i32) {
    %c0_i32 = arith.constant 0 : i32
    %c0_i32_0 = arith.constant 0 : i32
    %c0_i32_1 = arith.constant 0 : i32
    return %c0_i32, %c0_i32_0 : i32, i32
  }
}

</mosaic_0001>

<bundles_post_ra>
// kernel: tpu_custom_call.1
= control target key start
LH: loop header
LB: loop body
LE: loop exit
PB: predicated region body
PF: predicated region fallthrough
CT: control target
= control target key end

     0   :  { %19 = vsyncpa [#allocation4], 0  ;;  %s9685_s0 = inlined_call_operand.vmem [shape: s32[8,1], index: 0, kind: input, shape index: {}]   ;;  %s9686_s1 = inlined_call_operand.vmem [shape: f32[8,1], index: 1, kind: input, shape index: {}]   ;;  %s9687_s2 = inlined_call_operand.vmem [shape: bf16[64,32], index: 2, kind: input, shape index: {}]   ;;  %s9688_s3 = inlined_call_operand.hbm [shape: bf16[32,512], index: 3, kind: input, shape index: {}]   ;;  %s9689_s4 = inlined_call_operand.hbm [shape: bf16[128,512], index: 4, kind: input, shape index: {}]   ;;  %s9690_s5 = inlined_call_operand.vmem [shape: f32[1,512], index: 5, kind: input, shape index: {}]   ;;  %s9691_s6 = inlined_call_operand.hbm [shape: bf16[256,512], index: 6, kind: input, shape index: {}]   ;;  %s9692_s7 = inlined_call_operand.vmem [shape: f32[1,512], index: 7, kind: input, shape index: {}]   ;;  %s9693_s8 = inlined_call_operand.hbm [shape: bf16[256,512], index: 8, kind: input, shape index: {}]   ;;  %s9694_s9 = inlined_call_operand.vmem [shape: f32[1,512], index: 9, kind: input, shape index: {}]   ;;  %s9695_s10 = inlined_call_operand.vmem [shape: f32[128,128], index: 10, kind: input, shape index: {}]   ;;  %s9696_s11 = inlined_call_operand.vmem [shape: f32[1,128], index: 11, kind: input, shape index: {}]   ;;  %s9697_s12 = inlined_call_operand.vmem [shape: f32[128,16], index: 12, kind: input, shape index: {}]   ;;  %s9698_s13 = inlined_call_operand.vmem [shape: f32[1,16], index: 13, kind: input, shape index: {}]   ;;  %s9699_s14 = inlined_call_operand.hbm [shape: f32[8,16], index: 14, kind: output, shape index: {}]  }
   0x1   :  { %20 = vsyncpa [#allocation7], 0 }
   0x2   :  { %21 = vsyncpa [#allocation10], 0 }
   0x3   :  { %22 = vsyncpa [#allocation5], 0  ;;  %s46_s15 = sshll.u32 %s9689_s4, 4  ;;  %s6807_s16 = smov [#allocation6]   ;;  %s47_s15 = int_to_ptr.hbm [resolvable:$true] %s46_s15 }
   0x4   :  { %s48_s17 = sshll.u32 %s6807_s16, 4  ;;  %s33_s20 = sshll.u32 %s9688_s3, 4  ;;  %s49_s17 = int_to_ptr.vmem [resolvable:$true] %s48_s17  ;;  %s34_s20 = int_to_ptr.hbm [resolvable:$true] %s33_s20 }
   0x5   :  { %s6808_s21 = smov 256   ;;  %s6809_s22 = smov 16  }
   0x6   :  { %54 = dma.hbm_to_vmem [thread:$0]  %s47_s15, 4096, %s49_s17, [#allocation7], %s6808_s21, %s6808_s21, %s6809_s22  }
   0x7   :  { %s6810_s23 = smov [#allocation3]   ;;  %s61_s27 = sshll.u32 %s9691_s6, 4  ;;  %s62_s27 = int_to_ptr.hbm [resolvable:$true] %s61_s27 }
   0x8   :  { %s35_s24 = sshll.u32 %s6810_s23, 4  ;;  %s76_s29 = sshll.u32 %s9693_s8, 4  ;;  %s36_s24 = int_to_ptr.vmem [resolvable:$true] %s35_s24  ;;  %s77_s29 = int_to_ptr.hbm [resolvable:$true] %s76_s29 }
   0x9   :  { %41 = dma.hbm_to_vmem [thread:$0]  %s34_s20, 1024, %s36_s24, [#allocation4], %s6808_s21, %s6808_s21, %s6809_s22  }
   0xa   :  { %s6811_s30 = smov [#allocation8]   ;;  %s6812_s3 = smov [#allocation9]  }
   0xb   :  { %s63_s16 = sshll.u32 %s6811_s30, 4  ;;  %s78_s15 = sshll.u32 %s6812_s3, 4  ;;  %s64_s16 = int_to_ptr.vmem [resolvable:$true] %s63_s16  ;;  %s79_s15 = int_to_ptr.vmem [resolvable:$true] %s78_s15 }
   0xc   :  { %69 = dma.hbm_to_vmem [thread:$0]  %s62_s27, 8192, %s64_s16, [#allocation7], %s6808_s21, %s6808_s21, %s6809_s22  }
   0xd   :  { %84 = dma.hbm_to_vmem [thread:$0]  %s77_s29, 8192, %s79_s15, [#allocation10], %s6808_s21, %s6808_s21, %s6809_s22  }
   0xe   :  { %6799 = dma.done.wait [#allocation4], 1024  }
   0xf   :  { %6800 = vsyncadd [#allocation4], 4294966272 }
  0x10   :  { %6801 = dma.done.wait [#allocation7], 12288  }
  0x11   :  { %6802 = vsyncadd [#allocation7], 4294955008 }
  0x12   :  { %6803 = dma.done.wait [#allocation10], 8192  }
  0x13   :  { %6804 = vsyncadd [#allocation10], 4294959104  ;;  %v5356_v0 = vld [vmem:[#allocation3 + $0x20] sm:$0xf]  ;;  %v6116_v1 = vld [vmem:[#allocation3 + $0x2c] sm:$0xf0] }
  0x14   :  { %v6114_v2 = vld [vmem:[#allocation3 + $0x24] sm:$0xf]  ;;  %v5357_v3 = vor.u32 %v6116_v1, %v5356_v0  ;;  %v5358_v4 = vld [vmem:[#allocation3 + $0x30] sm:$0xf0]  ;;  %v5364_v5 = vld [vmem:[#allocation3 + $0x28] sm:$0xf] }
  0x15   :  { %v6117_v6 = vld [vmem:[#allocation3 + $0x34] sm:$0xf0]  ;;  %v5361_v7 = vor.u32 %v6114_v2, %v5358_v4  ;;  %v6115_v9 = vld [vmem:[#allocation3 + $0x2c] sm:$0xf]  ;;  %v5366_v10 = vld [vmem:[#allocation3 + $0x38] sm:$0xf0] }
  0x16   :  { %v5365_v8 = vor.u32 %v6117_v6, %v5364_v5  ;;  %v5340_v11 = vld [vmem:[#allocation3] sm:$0xf]  ;;  %217 = vmatpush.bf16.msra.mxu0 %v5357_v3  ;;  %v5369_v12 = vor.u32 %v6115_v9, %v5366_v10  ;;  %v6112_v13 = vld [vmem:[#allocation3 + $0xc] sm:$0xf0]  ;;  %v6110_v14 = vld [vmem:[#allocation3 + $0x4] sm:$0xf] }
  0x17   :  { %v5342_v15 = vld [vmem:[#allocation3 + $0x10] sm:$0xf0]  ;;  %246 = vmatpush.bf16.msra.mxu1 %v5361_v7  ;;  %v5341_v16 = vor.u32 %v6112_v13, %v5340_v11  ;;  %v5348_v18 = vld [vmem:[#allocation3 + $0x8] sm:$0xf]  ;;  %v6113_v19 = vld [vmem:[#allocation3 + $0x14] sm:$0xf0] }
  0x18   :  { %275 = vmatpush.bf16.msra.mxu2 %v5365_v8  ;;  %v5345_v17 = vor.u32 %v6110_v14, %v5342_v15  ;;  %v6111_v20 = vld [vmem:[#allocation3 + $0xc] sm:$0xf]  ;;  %304 = vmatpush.bf16.msra.mxu3 %v5369_v12  ;;  %v5349_v21 = vor.u32 %v6113_v19, %v5348_v18  ;;  %v5350_v22 = vld [vmem:[#allocation3 + $0x18] sm:$0xf0]  ;;  %v6106_v23 = vld [vmem:[%s9687_s2] sm:$0xff]  ;;  %vm198_vm0 = vcmask 261120  }
  0x19   :  { %v5501_v24 = vld [vmem:[#allocation6 + $0xe0] sm:$0xf]  ;;  %v5353_v25 = vor.u32 %v6111_v20, %v5350_v22  ;;  %v6148_v26 = vld [vmem:[#allocation6 + $0xec] sm:$0xf0]  ;;  %v6146_v27 = vld [vmem:[#allocation6 + $0xe4] sm:$0xf] }
  0x1a   :  { %v5503_v28 = vld [vmem:[#allocation6 + $0xf0] sm:$0xf0]  ;;  %218 = vmatpush.bf16.msra.mxu0 %v5341_v16  ;;  %v6907_v29 = vor.u32 %v6148_v26, %v5501_v24  ;;  %v5509_v31 = vld [vmem:[#allocation6 + $0xe8] sm:$0xf]  ;;  %v6149_v32 = vld [vmem:[#allocation6 + $0xf4] sm:$0xf0] }
  0x1b   :  { %v6909_v30 = vor.u32 %v6146_v27, %v5503_v28  ;;  %v5485_v33 = vld [vmem:[#allocation6 + $0xc0] sm:$0xf]  ;;  %247 = vmatpush.bf16.msra.mxu1 %v5345_v17  ;;  %v6911_v34 = vor.u32 %v6149_v32, %v5509_v31  ;;  %v6144_v35 = vld [vmem:[#allocation6 + $0xcc] sm:$0xf0]  ;;  %v6142_v36 = vld [vmem:[#allocation6 + $0xc4] sm:$0xf] }
  0x1c   :  { %10073 = vst [vmem:[#allocation16_spill] sm:$0xff] %v6907_v29  ;;  %276 = vmatpush.bf16.msra.mxu2 %v5349_v21  ;;  %v5487_v37 = vld [vmem:[#allocation6 + $0xd0] sm:$0xf0]  ;;  %305 = vmatpush.bf16.msra.mxu3 %v5353_v25  ;;  %v6914_v38 = vor.u32 %v6144_v35, %v5485_v33  ;;  %v5493_v39 = vld [vmem:[#allocation6 + $0xc8] sm:$0xf] }
  0x1d   :  { %10074 = vst [vmem:[#allocation17_spill] sm:$0xff] %v6909_v30  ;;  %v6145_v40 = vld [vmem:[#allocation6 + $0xd4] sm:$0xf0]  ;;  %v6147_v41 = vld [vmem:[#allocation6 + $0xec] sm:$0xf]  ;;  %5370 = vmatmul.msk.bf16.vlgmr.msra.gmra.mxu0 %vm198_vm0, %v6106_v23  ;;  %v6918_v42 = vor.u32 %v6142_v36, %v5487_v37 }
  0x1e   :  { %10075 = vst [vmem:[#allocation18_spill] sm:$0xff] %v6911_v34  ;;  %584 = vmatpush.bf16.msrb.mxu0 %v6907_v29  ;;  %v5511_v43 = vld [vmem:[#allocation6 + $0xf8] sm:$0xf0]  ;;  %v5469_v44 = vld [vmem:[#allocation6 + $0xa0] sm:$0xf]  ;;  %5374 = vmatmul.msk.bf16.vlgmr.msra.gmra.mxu1 %vm198_vm0, %v6106_v23  ;;  %v6926_v49 = vor.u32 %v6145_v40, %v5493_v39  ;;  %v6107_v11 = vld [vmem:[%s9687_s2 + $0x8] sm:$0xff] }
  0x1f   :  { %10076 = vst [vmem:[#allocation19_spill] sm:$0xff] %v6914_v38  ;;  %597 = vmatpush.bf16.msrb.mxu1 %v6909_v30  ;;  %5378 = vmatmul.msk.bf16.vlgmr.msra.gmra.mxu2 %vm198_vm0, %v6106_v23  ;;  %v6922_v45 = vor.u32 %v6147_v41, %v5511_v43  ;;  %v6140_v46 = vld [vmem:[#allocation6 + $0xac] sm:$0xf0]  ;;  %v6138_v47 = vld [vmem:[#allocation6 + $0xa4] sm:$0xf] }
  0x20   :  { %10077 = vst [vmem:[#allocation20_spill] sm:$0xff] %v6918_v42  ;;  %v5471_v48 = vld [vmem:[#allocation6 + $0xb0] sm:$0xf0]  ;;  %5382 = vmatmul.msk.bf16.vlgmr.msra.gmra.mxu3 %vm198_vm0, %v6106_v23  ;;  %610 = vmatpush.bf16.msrb.mxu2 %v6911_v34  ;;  %v6143_v50 = vld [vmem:[#allocation6 + $0xcc] sm:$0xf]  ;;  %v6930_v51 = vor.u32 %v6140_v46, %v5469_v44 }
  0x21   :  { %10078 = vst [vmem:[#allocation21_spill] sm:$0xff] %v6922_v45  ;;  %623 = vmatpush.bf16.msrb.mxu3 %v6922_v45  ;;  %v5477_v52 = vld [vmem:[#allocation6 + $0xa8] sm:$0xf]  ;;  %v6141_v53 = vld [vmem:[#allocation6 + $0xb4] sm:$0xf0]  ;;  %v6933_v55 = vor.u32 %v6138_v47, %v5471_v48 }
  0x22   :  { %10079 = vst [vmem:[#allocation22_spill] sm:$0xff] %v6926_v49  ;;  %585 = vmatpush.bf16.msrb.mxu0 %v6914_v38  ;;  %v5495_v54 = vld [vmem:[#allocation6 + $0xd8] sm:$0xf0]  ;;  %v5453_v57 = vld [vmem:[#allocation6 + $0x80] sm:$0xf]  ;;  %v6938_v63 = vor.u32 %v6141_v53, %v5477_v52 }
  0x23   :  { %10080 = vst [vmem:[#allocation23_spill] sm:$0xff] %v6930_v51  ;;  %598 = vmatpush.bf16.msrb.mxu1 %v6918_v42  ;;  %v6935_v56 = vor.u32 %v6143_v50, %v5495_v54  ;;  %v6136_v58 = vld [vmem:[#allocation6 + $0x8c] sm:$0xf0]  ;;  %v6134_v59 = vld [vmem:[#allocation6 + $0x84] sm:$0xf] }
  0x24   :  { %10081 = vst [vmem:[#allocation24_spill] sm:$0xff] %v6933_v55  ;;  %v5455_v60 = vld [vmem:[#allocation6 + $0x90] sm:$0xf0]  ;;  %v6139_v61 = vld [vmem:[#allocation6 + $0xac] sm:$0xf]  ;;  %611 = vmatpush.bf16.msrb.mxu2 %v6926_v49  ;;  %v6942_v0 = vor.u32 %v6136_v58, %v5453_v57 }
  0x25   :  { %10082 = vst [vmem:[#allocation25_spill] sm:$0xff] %v6935_v56  ;;  %v5479_v62 = vld [vmem:[#allocation6 + $0xb8] sm:$0xf0]  ;;  %624 = vmatpush.bf16.msrb.mxu3 %v6935_v56  ;;  %v5461_v1 = vld [vmem:[#allocation6 + $0x88] sm:$0xf]  ;;  %v6947_v5 = vor.u32 %v6134_v59, %v5455_v60 }
  0x26   :  { %10083 = vst [vmem:[#allocation26_spill] sm:$0xff] %v6938_v63  ;;  %586 = vmatpush.bf16.msrb.mxu0 %v6930_v51  ;;  %v6137_v2 = vld [vmem:[#allocation6 + $0x94] sm:$0xf0]  ;;  %v6944_v3 = vor.u32 %v6139_v61, %v5479_v62  ;;  %v5437_v4 = vld [vmem:[#allocation6 + $0x60] sm:$0xf] }
  0x27   :  { %10084 = vst [vmem:[#allocation27_spill] sm:$0xff] %v6942_v0  ;;  %599 = vmatpush.bf16.msrb.mxu1 %v6933_v55  ;;  %v6132_v6 = vld [vmem:[#allocation6 + $0x6c] sm:$0xf0]  ;;  %v6135_v7 = vld [vmem:[#allocation6 + $0x8c] sm:$0xf]  ;;  %v6953_v12 = vor.u32 %v6137_v2, %v5461_v1 }
  0x28   :  { %10085 = vst [vmem:[#allocation28_spill] sm:$0xff] %v6944_v3  ;;  %v5463_v8 = vld [vmem:[#allocation6 + $0x98] sm:$0xf0]  ;;  %v6130_v9 = vld [vmem:[#allocation6 + $0x64] sm:$0xf]  ;;  %612 = vmatpush.bf16.msrb.mxu2 %v6938_v63  ;;  %v6957_v15 = vor.u32 %v6132_v6, %v5437_v4  ;;  %v6813_v6 = vmov 0  }
  0x29   :  { %10086 = vst [vmem:[#allocation29_spill] sm:$0xff] %v6947_v5  ;;  %v5439_v10 = vld [vmem:[#allocation6 + $0x70] sm:$0xf0]  ;;  %v5445_v13 = vld [vmem:[#allocation6 + $0x68] sm:$0xf]  ;;  %625 = vmatpush.bf16.msrb.mxu3 %v6944_v3  ;;  %v6959_v16 = vor.u32 %v6135_v7, %v5463_v8  ;;  %6288 = vset.pattern.permute.xlu0 %v6813_v6 }
  0x2a   :  { %10087 = vst [vmem:[#allocation30_spill] sm:$0xff] %v6953_v12  ;;  %v6133_v14 = vld [vmem:[#allocation6 + $0x74] sm:$0xf0]  ;;  %587 = vmatpush.bf16.msrb.mxu0 %v6942_v0  ;;  %v5421_v17 = vld [vmem:[#allocation6 + $0x40] sm:$0xf]  ;;  %v6962_v20 = vor.u32 %v6130_v9, %v5439_v10  ;;  %6289 = vset.pattern.permute.xlu1 %v6813_v6  ;;  %v6108_v9 = vld [vmem:[%s9687_s2 + $0x10] sm:$0xff] }
  0x2b   :  { %10088 = vst [vmem:[#allocation31_spill] sm:$0xff] %v6957_v15  ;;  %v6128_v18 = vld [vmem:[#allocation6 + $0x4c] sm:$0xf0]  ;;  %v6131_v19 = vld [vmem:[#allocation6 + $0x6c] sm:$0xf]  ;;  %600 = vmatpush.bf16.msrb.mxu1 %v6947_v5  ;;  %v6965_v24 = vor.u32 %v6133_v14, %v5445_v13  ;;  %6290 = vset.pattern.permute.xlu2 %v6813_v6 }
  0x2c   :  { %10089 = vst [vmem:[#allocation32_spill] sm:$0xff] %v6959_v16  ;;  %v5447_v21 = vld [vmem:[#allocation6 + $0x78] sm:$0xf0]  ;;  %v6126_v22 = vld [vmem:[#allocation6 + $0x44] sm:$0xf]  ;;  %613 = vmatpush.bf16.msrb.mxu2 %v6953_v12  ;;  %v6969_v25 = vor.u32 %v6128_v18, %v5421_v17 }
  0x2d   :  { %10090 = vst [vmem:[#allocation33_spill] sm:$0xff] %v6962_v20  ;;  %v5423_v23 = vld [vmem:[#allocation6 + $0x50] sm:$0xf0]  ;;  %626 = vmatpush.bf16.msrb.mxu3 %v6959_v16  ;;  %v5429_v26 = vld [vmem:[#allocation6 + $0x48] sm:$0xf]  ;;  %v6971_v28 = vor.u32 %v6131_v19, %v5447_v21  ;;  %5371 = vmatmul.msk.bf16.gmra.mxu0 %vm198_vm0, %v6107_v11 }
  0x2e   :  { %10091 = vst [vmem:[#allocation34_spill] sm:$0xff] %v6965_v24  ;;  %588 = vmatpush.bf16.msrb.mxu0 %v6957_v15  ;;  %v6129_v27 = vld [vmem:[#allocation6 + $0x54] sm:$0xf0]  ;;  %v6975_v31 = vor.u32 %v6126_v22, %v5423_v23  ;;  %5375 = vmatmul.msk.bf16.gmra.mxu1 %vm198_vm0, %v6107_v11  ;;  %v5405_v33 = vld [vmem:[#allocation6 + $0x20] sm:$0xf] }
  0x2f   :  { %10092 = vst [vmem:[#allocation35_spill] sm:$0xff] %v6969_v25  ;;  %601 = vmatpush.bf16.msrb.mxu1 %v6962_v20  ;;  %5379 = vmatmul.msk.bf16.gmra.mxu2 %vm198_vm0, %v6107_v11  ;;  %v6981_v32 = vor.u32 %v6129_v27, %v5429_v26  ;;  %v6124_v35 = vld [vmem:[#allocation6 + $0x2c] sm:$0xf0]  ;;  %v6122_v36 = vld [vmem:[#allocation6 + $0x24] sm:$0xf] }
  0x30   :  { %10093 = vst [vmem:[#allocation36_spill] sm:$0xff] %v6971_v28  ;;  %5383 = vmatmul.msk.bf16.gmra.mxu3 %vm198_vm0, %v6107_v11  ;;  %614 = vmatpush.bf16.msrb.mxu2 %v6965_v24  ;;  %v6985_v37 = vor.u32 %v6124_v35, %v5405_v33  ;;  %v5407_v39 = vld [vmem:[#allocation6 + $0x30] sm:$0xf0]  ;;  %v5413_v40 = vld [vmem:[#allocation6 + $0x28] sm:$0xf] }
  0x31   :  { %10094 = vst [vmem:[#allocation37_spill] sm:$0xff] %v6975_v31  ;;  %627 = vmatpush.bf16.msrb.mxu3 %v6971_v28  ;;  %v6125_v41 = vld [vmem:[#allocation6 + $0x34] sm:$0xf0]  ;;  %v6988_v43 = vor.u32 %v6122_v36, %v5407_v39  ;;  %v6127_v44 = vld [vmem:[#allocation6 + $0x4c] sm:$0xf]  ;;  %v359_v36 = vld [vmem:[%s9685_s0] sm:$0xff] }
  0x32   :  { %10095 = vst [vmem:[#allocation38_spill] sm:$0xff] %v6981_v32  ;;  %589 = vmatpush.bf16.msrb.mxu0 %v6969_v25  ;;  %v5431_v46 = vld [vmem:[#allocation6 + $0x58] sm:$0xf0]  ;;  %v5389_v47 = vld [vmem:[#allocation6] sm:$0xf]  ;;  %v6993_v54 = vor.u32 %v6125_v41, %v5413_v40  ;;  %vm380_vm1 = vcmp.gt.s32.totalorder %v359_v36, 0 }
  0x33   :  { %10096 = vst [vmem:[#allocation39_spill] sm:$0xff] %v6985_v37  ;;  %602 = vmatpush.bf16.msrb.mxu1 %v6975_v31  ;;  %v6990_v48 = vor.u32 %v6127_v44, %v5431_v46  ;;  %v6120_v50 = vld [vmem:[#allocation6 + $0xc] sm:$0xf0]  ;;  %v6118_v52 = vld [vmem:[#allocation6 + $0x4] sm:$0xf]  ;;  %v9700_v41 = vmov 0.0  }
  0x34   :  { %10097 = vst [vmem:[#allocation40_spill] sm:$0xff] %v6988_v43  ;;  %v5391_v53 = vld [vmem:[#allocation6 + $0x10] sm:$0xf0]  ;;  %615 = vmatpush.bf16.msrb.mxu2 %v6981_v32  ;;  %v6123_v57 = vld [vmem:[#allocation6 + $0x2c] sm:$0xf]  ;;  %v6997_v59 = vor.u32 %v6120_v50, %v5389_v47  ;;  %v5386_v44 = vsel %vm380_vm1, 1.0, %v9700_v41 }
  0x35   :  { %10098 = vst [vmem:[#allocation41_spill] sm:$0xff] %v6990_v48  ;;  %v5415_v58 = vld [vmem:[#allocation6 + $0x38] sm:$0xf0]  ;;  %628 = vmatpush.bf16.msrb.mxu3 %v6990_v48  ;;  %v5397_v61 = vld [vmem:[#allocation6 + $0x8] sm:$0xf]  ;;  %v7002_v1 = vor.u32 %v6118_v52, %v5391_v53  ;;  %385 = vperm.xlu0 %6288, %v5386_v44   ;;  %vm1820_vm2 = vcmp.gt.s32.totalorder %v359_v36, 1 }
  0x36   :  { %10099 = vst [vmem:[#allocation42_spill] sm:$0xff] %v6993_v54  ;;  %590 = vmatpush.bf16.msrb.mxu0 %v6985_v37  ;;  %v6999_v60 = vor.u32 %v6123_v57, %v5415_v58  ;;  %v6121_v62 = vld [vmem:[#allocation6 + $0x14] sm:$0xf0]  ;;  %v6119_v2 = vld [vmem:[#allocation6 + $0xc] sm:$0xf]  ;;  %vm4250_vm3 = vcmp.gt.s32.totalorder %v359_v36, 6 }
  0x37   :  { %10100 = vst [vmem:[#allocation43_spill] sm:$0xff] %v6997_v59  ;;  %603 = vmatpush.bf16.msrb.mxu1 %v6988_v43  ;;  %v5399_v4 = vld [vmem:[#allocation6 + $0x18] sm:$0xf0]  ;;  %v7007_v7 = vor.u32 %v6121_v62, %v5397_v61  ;;  %v5760_v10 = vld [vmem:[#allocation8 + $0x1e0] sm:$0xf] }
  0x38   :  { %10101 = vst [vmem:[#allocation44_spill] sm:$0xff] %v6999_v60  ;;  %616 = vmatpush.bf16.msrb.mxu2 %v6993_v54  ;;  %v7012_v8 = vor.u32 %v6119_v2, %v5399_v4  ;;  %v6212_v11 = vld [vmem:[#allocation8 + $0x1ec] sm:$0xf0]  ;;  %v6210_v13 = vld [vmem:[#allocation8 + $0x1e4] sm:$0xf]  ;;  %v6109_v53 = vld [vmem:[%s9687_s2 + $0x18] sm:$0xff] }
  0x39   :  { %10102 = vst [vmem:[#allocation45_spill] sm:$0xff] %v7002_v1  ;;  %629 = vmatpush.bf16.msrb.mxu3 %v6999_v60  ;;  %v7024_v14 = vor.u32 %v6212_v11, %v5760_v10  ;;  %v5762_v17 = vld [vmem:[#allocation8 + $0x1f0] sm:$0xf0]  ;;  %v5744_v18 = vld [vmem:[#allocation8 + $0x1c0] sm:$0xf]  ;;  %v6036_v11 = vsel %vm1820_vm2, 1.0, %v9700_v41 }
  0x3a   :  { %10103 = vst [vmem:[#allocation46_spill] sm:$0xff] %v7007_v7  ;;  %591 = vmatpush.bf16.msrb.mxu0 %v6997_v59  ;;  %v6208_v19 = vld [vmem:[#allocation8 + $0x1cc] sm:$0xf0]  ;;  %v7026_v21 = vor.u32 %v6210_v13, %v5762_v17  ;;  %v6206_v22 = vld [vmem:[#allocation8 + $0x1c4] sm:$0xf]  ;;  %s6816_s2 = smov [#allocation11]  }
  0x3b   :  { %10104 = vst [vmem:[#allocation47_spill] sm:$0xff] %v7012_v8  ;;  %604 = vmatpush.bf16.msrb.mxu1 %v7002_v1  ;;  %v5746_v23 = vld [vmem:[#allocation8 + $0x1d0] sm:$0xf0]  ;;  %v7029_v26 = vor.u32 %v6208_v19, %v5744_v18  ;;  %v5728_v33 = vld [vmem:[#allocation8 + $0x1a0] sm:$0xf]  ;;  %s5308_s25 = sshll.u32 %s6816_s2, 4  ;;  %s5309_s25 = int_to_ptr.vmem [resolvable:$true] %s5308_s25 }
  0x3c   :  { %617 = vmatpush.bf16.msrb.mxu2 %v7007_v7  ;;  %10105 = vst [vmem:[#allocation48_spill] sm:$0xff] %v7024_v14  ;;  %v7032_v27 = vor.u32 %v6206_v22, %v5746_v23  ;;  %v6204_v35 = vld [vmem:[#allocation8 + $0x1ac] sm:$0xf0]  ;;  %v6202_v39 = vld [vmem:[#allocation8 + $0x1a4] sm:$0xf] }
  0x3d   :  { %630 = vmatpush.bf16.msrb.mxu3 %v7012_v8  ;;  %5372 = vmatmul.msk.bf16.gmra.mxu0 %vm198_vm0, %v6108_v9  ;;  %10106 = vst [vmem:[#allocation49_spill] sm:$0xff] %v7026_v21  ;;  %v5730_v40 = vld [vmem:[#allocation8 + $0x1b0] sm:$0xf0]  ;;  %v7039_v46 = vor.u32 %v6204_v35, %v5728_v33  ;;  %v5712_v50 = vld [vmem:[#allocation8 + $0x180] sm:$0xf] }
  0x3e   :  { %5376 = vmatmul.msk.bf16.gmra.mxu1 %vm198_vm0, %v6108_v9  ;;  %10107 = vst [vmem:[#allocation50_spill] sm:$0xff] %v7029_v26  ;;  %v7042_v47 = vor.u32 %v6202_v39, %v5730_v40  ;;  %v6200_v52 = vld [vmem:[#allocation8 + $0x18c] sm:$0xf0]  ;;  %v6198_v57 = vld [vmem:[#allocation8 + $0x184] sm:$0xf]  ;;  %1825 = vperm.xlu0 %6288, %v6036_v11  }
  0x3f   :  { %5380 = vmatmul.msk.bf16.gmra.mxu2 %vm198_vm0, %v6108_v9  ;;  %1106 = vmatpush.bf16.msra.mxu1 %v7024_v14  ;;  %10108 = vst [vmem:[#allocation51_spill] sm:$0xff] %v7032_v27  ;;  %v5714_v58 = vld [vmem:[#allocation8 + $0x190] sm:$0xf0]  ;;  %v7049_v61 = vor.u32 %v6200_v52, %v5712_v50  ;;  %v5696_v2 = vld [vmem:[#allocation8 + $0x160] sm:$0xf]  ;;  %v6086_v52 = vsel %vm4250_vm3, 1.0, %v9700_v41 }
  0x40   :  { %5384 = vmatmul.msk.bf16.gmra.mxu3 %vm198_vm0, %v6108_v9  ;;  %10109 = vst [vmem:[#allocation52_spill] sm:$0xff] %v7039_v46  ;;  %v7051_v62 = vor.u32 %v6198_v57, %v5714_v58  ;;  %v6196_v4 = vld [vmem:[#allocation8 + $0x16c] sm:$0xf0]  ;;  %v6194_v9 = vld [vmem:[#allocation8 + $0x164] sm:$0xf] }
  0x41   :  { %1132 = vmatpush.bf16.msra.mxu3 %v7026_v21  ;;  %10110 = vst [vmem:[#allocation53_spill] sm:$0xff] %v7042_v47  ;;  %v5698_v10 = vld [vmem:[#allocation8 + $0x170] sm:$0xf0]  ;;  %v7059_v13 = vor.u32 %v6196_v4, %v5696_v2  ;;  %v5680_v18 = vld [vmem:[#allocation8 + $0x140] sm:$0xf] }
  0x42   :  { %10111 = vst [vmem:[#allocation54_spill] sm:$0xff] %v7049_v61  ;;  %v7062_v17 = vor.u32 %v6194_v9, %v5698_v10  ;;  %v6192_v19 = vld [vmem:[#allocation8 + $0x14c] sm:$0xf0]  ;;  %v6190_v22 = vld [vmem:[#allocation8 + $0x144] sm:$0xf] }
  0x43   :  { %1107 = vmatpush.bf16.msra.mxu1 %v7029_v26  ;;  %10112 = vst [vmem:[#allocation55_spill] sm:$0xff] %v7051_v62  ;;  %v5682_v23 = vld [vmem:[#allocation8 + $0x150] sm:$0xf0]  ;;  %v7065_v33 = vor.u32 %v6192_v19, %v5680_v18  ;;  %v5664_v39 = vld [vmem:[#allocation8 + $0x120] sm:$0xf] }
  0x44   :  { %10113 = vst [vmem:[#allocation56_spill] sm:$0xff] %v7059_v13  ;;  %v7068_v35 = vor.u32 %v6190_v22, %v5682_v23  ;;  %v6188_v40 = vld [vmem:[#allocation8 + $0x12c] sm:$0xf0]  ;;  %v6186_v44 = vld [vmem:[#allocation8 + $0x124] sm:$0xf] }
  0x45   :  { %1133 = vmatpush.bf16.msra.mxu3 %v7032_v27  ;;  %10114 = vst [vmem:[#allocation57_spill] sm:$0xff] %v7062_v17  ;;  %v5666_v50 = vld [vmem:[#allocation8 + $0x130] sm:$0xf0]  ;;  %v5648_v57 = vld [vmem:[#allocation8 + $0x100] sm:$0xf] }
  0x46   :  { %10115 = vst [vmem:[#allocation58_spill] sm:$0xff] %v7065_v33  ;;  %v7075_v36 = vor.u32 %v6186_v44, %v5666_v50  ;;  %4255 = vperm.xlu0 %6288, %v6086_v52   ;;  %v6184_v58 = vld [vmem:[#allocation8 + $0x10c] sm:$0xf0]  ;;  %v6182_v2 = vld [vmem:[#allocation8 + $0x104] sm:$0xf] }
  0x47   :  { %1108 = vmatpush.bf16.msra.mxu1 %v7039_v46  ;;  %10116 = vst [vmem:[#allocation59_spill] sm:$0xff] %v7068_v35  ;;  %v5650_v4 = vld [vmem:[#allocation8 + $0x110] sm:$0xf0]  ;;  %v5768_v9 = vld [vmem:[#allocation8 + $0x1e8] sm:$0xf]  ;;  %v7078_v19 = vor.u32 %v6184_v58, %v5648_v57 }
  0x48   :  { %10118 = vst [vmem:[#allocation61_spill] sm:$0xff] %v7075_v36  ;;  %v6213_v10 = vld [vmem:[#allocation8 + $0x1f4] sm:$0xf0]  ;;  %v6211_v11 = vld [vmem:[#allocation8 + $0x1ec] sm:$0xf]  ;;  %v7081_v22 = vor.u32 %v6182_v2, %v5650_v4 }
  0x49   :  { %1134 = vmatpush.bf16.msra.mxu3 %v7042_v47  ;;  %v5770_v18 = vld [vmem:[#allocation8 + $0x1f8] sm:$0xf0]  ;;  %10119 = vst [vmem:[#allocation62_spill] sm:$0xff] %v7078_v19  ;;  %v7083_v23 = vor.u32 %v6213_v10, %v5768_v9  ;;  %v6209_v44 = vld [vmem:[#allocation8 + $0x1d4] sm:$0xf0] }
  0x4a   :  { %10120 = vst [vmem:[#allocation63_spill] sm:$0xff] %v7081_v22  ;;  %v6207_v50 = vld [vmem:[#allocation8 + $0x1cc] sm:$0xf]  ;;  %v5754_v52 = vld [vmem:[#allocation8 + $0x1d8] sm:$0xf0] }
  0x4b   :  { %1109 = vmatpush.bf16.msra.mxu1 %v7049_v61  ;;  %10121 = vst [vmem:[#allocation64_spill] sm:$0xff] %v7083_v23  ;;  %v7097_v58 = vor.u32 %v6207_v50, %v5754_v52  ;;  %v5736_v2 = vld [vmem:[#allocation8 + $0x1a8] sm:$0xf]  ;;  %v6205_v4 = vld [vmem:[#allocation8 + $0x1b4] sm:$0xf0] }
  0x4c   :  { %v7101_v9 = vor.u32 %v6205_v4, %v5736_v2  ;;  %v5738_v10 = vld [vmem:[#allocation8 + $0x1b8] sm:$0xf0]  ;;  %v5704_v2 = vld [vmem:[#allocation8 + $0x168] sm:$0xf]  ;;  %v6197_v4 = vld [vmem:[#allocation8 + $0x174] sm:$0xf0] }
  0x4d   :  { %5373 = vmatmul.msk.bf16.gmra.mxu0 %vm198_vm0, %v6109_v53  ;;  %1135 = vmatpush.bf16.msra.mxu3 %v7051_v62  ;;  %10124 = vst [vmem:[#allocation67_spill] sm:$0xff] %v7097_v58  ;;  %v5722_v52 = vld [vmem:[#allocation8 + $0x198] sm:$0xf0]  ;;  %v6019_v15 = vld [vmem:[#allocation9 + $0x1e0] sm:$0xf] }
  0x4e   :  { %5377 = vmatmul.msk.bf16.gmra.mxu1 %vm198_vm0, %v6109_v53  ;;  %10125 = vst [vmem:[#allocation68_spill] sm:$0xff] %v7101_v9  ;;  %v5706_v7 = vld [vmem:[#allocation8 + $0x178] sm:$0xf0]  ;;  %v6276_v12 = vld [vmem:[#allocation9 + $0x1ec] sm:$0xf0] }
  0x4f   :  { %5381 = vmatmul.msk.bf16.gmra.mxu2 %vm198_vm0, %v6109_v53  ;;  %1110 = vmatpush.bf16.msra.mxu1 %v7059_v13  ;;  %v5690_v54 = vld [vmem:[#allocation8 + $0x158] sm:$0xf0]  ;;  %v7135_v63 = vor.u32 %v6276_v12, %v6019_v15  ;;  %v6005_v15 = vld [vmem:[#allocation9 + $0x1d0] sm:$0xf0]  ;;  %v6266_v51 = vld [vmem:[#allocation9 + $0x1a4] sm:$0xf] }
  0x50   :  { %5385 = vmatmul.msk.bf16.gmra.mxu3 %vm198_vm0, %v6109_v53  ;;  %v7072_v53 = vor.u32 %v6188_v40, %v5664_v39  ;;  %v7086_v39 = vor.u32 %v6211_v11, %v5770_v18  ;;  %v5752_v40 = vld [vmem:[#allocation8 + $0x1c8] sm:$0xf]  ;;  %v5674_v32 = vld [vmem:[#allocation8 + $0x138] sm:$0xf0]  ;;  %v5989_v49 = vld [vmem:[#allocation9 + $0x1b0] sm:$0xf0] }
  0x51   :  { %1136 = vmatpush.bf16.msra.mxu3 %v7062_v17  ;;  %v7094_v57 = vor.u32 %v6209_v44, %v5752_v40  ;;  %v5720_v18 = vld [vmem:[#allocation8 + $0x188] sm:$0xf]  ;;  %v6201_v40 = vld [vmem:[#allocation8 + $0x194] sm:$0xf0]  ;;  %v6199_v44 = vld [vmem:[#allocation8 + $0x18c] sm:$0xf] }
  0x52   :  { %10117 = vst [vmem:[#allocation60_spill] sm:$0xff] %v7072_v53  ;;  %v7107_v50 = vor.u32 %v6201_v40, %v5720_v18  ;;  %v7109_v41 = vor.u32 %v6199_v44, %v5722_v52  ;;  %v5688_v18 = vld [vmem:[#allocation8 + $0x148] sm:$0xf]  ;;  %v6193_v40 = vld [vmem:[#allocation8 + $0x154] sm:$0xf0] }
  0x53   :  { %1111 = vmatpush.bf16.msra.mxu1 %v7065_v33  ;;  %10122 = vst [vmem:[#allocation65_spill] sm:$0xff] %v7086_v39  ;;  %v6191_v44 = vld [vmem:[#allocation8 + $0x14c] sm:$0xf]  ;;  %v7119_v52 = vor.u32 %v6193_v40, %v5688_v18  ;;  %v5656_v18 = vld [vmem:[#allocation8 + $0x108] sm:$0xf] }
  0x54   :  { %10123 = vst [vmem:[#allocation66_spill] sm:$0xff] %v7094_v57  ;;  %v7121_v37 = vor.u32 %v6191_v44, %v5690_v54  ;;  %v6185_v40 = vld [vmem:[#allocation8 + $0x114] sm:$0xf0]  ;;  %v6183_v54 = vld [vmem:[#allocation8 + $0x10c] sm:$0xf] }
  0x55   :  { %1137 = vmatpush.bf16.msra.mxu3 %v7068_v35  ;;  %10127 = vst [vmem:[#allocation70_spill] sm:$0xff] %v7107_v50  ;;  %v7131_v44 = vor.u32 %v6185_v40, %v5656_v18  ;;  %v5658_v24 = vld [vmem:[#allocation8 + $0x118] sm:$0xf0]  ;;  %v6003_v18 = vld [vmem:[#allocation9 + $0x1c0] sm:$0xf] }
  0x56   :  { %10128 = vst [vmem:[#allocation71_spill] sm:$0xff] %v7109_v41  ;;  %v7133_v0 = vor.u32 %v6183_v54, %v5658_v24  ;;  %v6272_v24 = vld [vmem:[#allocation9 + $0x1cc] sm:$0xf0]  ;;  %v6270_v40 = vld [vmem:[#allocation9 + $0x1c4] sm:$0xf] }
  0x57   :  { %1112 = vmatpush.bf16.msra.mxu1 %v7072_v53  ;;  %10131 = vst [vmem:[#allocation74_spill] sm:$0xff] %v7119_v52  ;;  %v7145_v12 = vor.u32 %v6272_v24, %v6003_v18  ;;  %v7147_v54 = vor.u32 %v6270_v40, %v6005_v15  ;;  %v5971_v18 = vld [vmem:[#allocation9 + $0x180] sm:$0xf]  ;;  %v6264_v24 = vld [vmem:[#allocation9 + $0x18c] sm:$0xf0] }
  0x58   :  { %10132 = vst [vmem:[#allocation75_spill] sm:$0xff] %v7121_v37  ;;  %v6262_v40 = vld [vmem:[#allocation9 + $0x184] sm:$0xf]  ;;  %v7161_v15 = vor.u32 %v6264_v24, %v5971_v18  ;;  %v5957_v34 = vld [vmem:[#allocation9 + $0x170] sm:$0xf0]  ;;  %v10149_v24 = vmov 0.0|0.0  }
  0x59   :  { %1138 = vmatpush.bf16.msra.mxu3 %v7075_v36  ;;  %10135 = vst [vmem:[#allocation78_spill] sm:$0xff] %v7131_v44 }
  0x5a   :  { %10136 = vst [vmem:[#allocation79_spill] sm:$0xff] %v7133_v0 }
  0x5b   :  { %1113 = vmatpush.bf16.msra.mxu1 %v7078_v19  ;;  %10137 = vst [vmem:[#allocation80_spill] sm:$0xff] %v7135_v63 }
  0x5c   :  { %10139 = vst [vmem:[#allocation82_spill] sm:$0xff] %v7145_v12 }
  0x5d   :  { %592 = vmatmul.bf16.vlgmr.msrb.gmra.mxu0 %v6813_v6  ;;  %1139 = vmatpush.bf16.msra.mxu3 %v7081_v22  ;;  %10140 = vst [vmem:[#allocation83_spill] sm:$0xff] %v7147_v54 }
  0x5e   :  { %605 = vmatmul.bf16.vlgmr.msrb.gmra.mxu1 %v6813_v6  ;;  %10143 = vst [vmem:[#allocation86_spill] sm:$0xff] %v7161_v15 }
  0x5f   :  { %618 = vmatmul.bf16.vlgmr.msrb.gmra.mxu2 %v6813_v6  ;;  %1158 = vmatpush.bf16.msrb.mxu1 %v7083_v23 }
  0x60   :  { %631 = vmatmul.bf16.vlgmr.msrb.gmra.mxu3 %v6813_v6  ;;  %v6203_v6 = vld [vmem:[#allocation8 + $0x1ac] sm:$0xf] }
  0x61   :  { %1184 = vmatpush.bf16.msrb.mxu3 %v7086_v39  ;;  %v7103_v11 = vor.u32 %v6203_v6, %v5738_v10  ;;  %v6195_v6 = vld [vmem:[#allocation8 + $0x16c] sm:$0xf]  ;;  %v7113_v10 = vor.u32 %v6197_v4, %v5704_v2  ;;  %v5672_v2 = vld [vmem:[#allocation8 + $0x128] sm:$0xf]  ;;  %v6189_v4 = vld [vmem:[#allocation8 + $0x134] sm:$0xf0] }
  0x62   :  { %v7115_v59 = vor.u32 %v6195_v6, %v5706_v7  ;;  %v6187_v7 = vld [vmem:[#allocation8 + $0x12c] sm:$0xf]  ;;  %v7125_v6 = vor.u32 %v6189_v4, %v5672_v2  ;;  %v6274_v2 = vld [vmem:[#allocation9 + $0x1e4] sm:$0xf]  ;;  %v6021_v4 = vld [vmem:[#allocation9 + $0x1f0] sm:$0xf0] }
  0x63   :  { %1159 = vmatpush.bf16.msrb.mxu1 %v7094_v57  ;;  %10126 = vst [vmem:[#allocation69_spill] sm:$0xff] %v7103_v11  ;;  %v7127_v25 = vor.u32 %v6187_v7, %v5674_v32  ;;  %v7138_v32 = vor.u32 %v6274_v2, %v6021_v4  ;;  %v9726_v7 = vmov 0.0|0.0   ;;  %v5987_v2 = vld [vmem:[#allocation9 + $0x1a0] sm:$0xf]  ;;  %v6268_v4 = vld [vmem:[#allocation9 + $0x1ac] sm:$0xf0] }
  0x64   :  { %10129 = vst [vmem:[#allocation72_spill] sm:$0xff] %v7113_v10 }
  0x65   :  { %1185 = vmatpush.bf16.msrb.mxu3 %v7097_v58  ;;  %10130 = vst [vmem:[#allocation73_spill] sm:$0xff] %v7115_v59 }
  0x66   :  { %10133 = vst [vmem:[#allocation76_spill] sm:$0xff] %v7125_v6 }
  0x67   :  { %1160 = vmatpush.bf16.msrb.mxu1 %v7101_v9  ;;  %10134 = vst [vmem:[#allocation77_spill] sm:$0xff] %v7127_v25 }
  0x68   :  { %10138 = vst [vmem:[#allocation81_spill] sm:$0xff] %v7138_v32 }
  0x69   :  { %1186 = vmatpush.bf16.msrb.mxu3 %v7103_v11 }
  0x6b   :  { %1161 = vmatpush.bf16.msrb.mxu1 %v7107_v50 }
  0x6d   :  { %1187 = vmatpush.bf16.msrb.mxu3 %v7109_v41 }
  0x6e   :  { %1114 = vmatmul.bf16.vlgmr.msra.gmra.mxu1 %v9726_v7 }
  0x6f   :  { %1162 = vmatpush.bf16.msrb.mxu1 %v7113_v10  ;;  %v6261_v10 = vld [vmem:[#allocation9 + $0x174] sm:$0xf0] }
  0x70   :  { %1140 = vmatmul.bf16.vlgmr.msra.gmra.mxu3 %v9726_v7  ;;  %v7151_v7 = vor.u32 %v6268_v4, %v5987_v2  ;;  %v5955_v2 = vld [vmem:[#allocation9 + $0x160] sm:$0xf]  ;;  %v6260_v4 = vld [vmem:[#allocation9 + $0x16c] sm:$0xf0] }
  0x71   :  { %1188 = vmatpush.bf16.msrb.mxu3 %v7115_v59  ;;  %v6029_v59 = vld [vmem:[#allocation9 + $0x1f8] sm:$0xf0] }
  0x72   :  { %10141 = vst [vmem:[#allocation84_spill] sm:$0xff] %v7151_v7 }
  0x73   :  { %1163 = vmatpush.bf16.msrb.mxu1 %v7119_v52  ;;  %v6027_v52 = vld [vmem:[#allocation9 + $0x1e8] sm:$0xf] }
  0x75   :  { %1189 = vmatpush.bf16.msrb.mxu3 %v7121_v37 }
  0x77   :  { %1164 = vmatpush.bf16.msrb.mxu1 %v7125_v6 }
  0x79   :  { %1190 = vmatpush.bf16.msrb.mxu3 %v7127_v25 }
  0x7b   :  { %1165 = vmatpush.bf16.msrb.mxu1 %v7131_v44 }
  0x7d   :  { %1191 = vmatpush.bf16.msrb.mxu3 %v7133_v0  ;;  %v6254_v0 = vld [vmem:[#allocation9 + $0x144] sm:$0xf] }
  0x7e   :  { %1166 = vmatmul.bf16.vlgmr.msrb.gmra.mxu1 %v10149_v24 }
  0x7f   :  { %1662 = vmatpush.bf16.msra.mxu1 %v7135_v63  ;;  %v7155_v63 = vor.u32 %v6266_v51, %v5989_v49  ;;  %v6258_v49 = vld [vmem:[#allocation9 + $0x164] sm:$0xf] }
  0x80   :  { %v7175_v18 = vor.u32 %v6258_v49, %v5957_v34  ;;  %1192 = vmatmul.bf16.vlgmr.msrb.gmra.mxu3 %v10149_v24  ;;  %v128_v34 = vld [vmem:[%s9690_s5] sm:$0xf] }
  0x81   :  { %1688 = vmatpush.bf16.msra.mxu3 %v7138_v32  ;;  %10142 = vst [vmem:[#allocation85_spill] sm:$0xff] %v7155_v63 }
  0x82   :  { %10147 = vst [vmem:[#allocation90_spill] sm:$0xff] %v7175_v18 }
  0x83   :  { %1663 = vmatpush.bf16.msra.mxu1 %v7145_v12  ;;  %v5973_v12 = vld [vmem:[#allocation9 + $0x190] sm:$0xf0] }
  0x85   :  { %1689 = vmatpush.bf16.msra.mxu3 %v7147_v54  ;;  %v7163_v54 = vor.u32 %v6262_v40, %v5973_v12  ;;  %v5939_v40 = vld [vmem:[#allocation9 + $0x140] sm:$0xf] }
  0x87   :  { %1664 = vmatpush.bf16.msra.mxu1 %v7151_v7  ;;  %10144 = vst [vmem:[#allocation87_spill] sm:$0xff] %v7163_v54  ;;  %v7169_v7 = vor.u32 %v6260_v4, %v5955_v2  ;;  %v5941_v4 = vld [vmem:[#allocation9 + $0x150] sm:$0xf0] }
  0x88   :  { %v7188_v49 = vor.u32 %v6254_v0, %v5941_v4 }
  0x89   :  { %1690 = vmatpush.bf16.msra.mxu3 %v7155_v63  ;;  %10145 = vst [vmem:[#allocation88_spill] sm:$0xff] %v7169_v7 }
  0x8a   :  { %10151 = vst [vmem:[#allocation93_spill] sm:$0xff] %v7188_v49 }
  0x8b   :  { %1665 = vmatpush.bf16.msra.mxu1 %v7161_v15  ;;  %v6256_v15 = vld [vmem:[#allocation9 + $0x14c] sm:$0xf0] }
  0x8c   :  { %v7183_v2 = vor.u32 %v6256_v15, %v5939_v40  ;;  %v5925_v40 = vld [vmem:[#allocation9 + $0x130] sm:$0xf0] }
  0x8d   :  { %1691 = vmatpush.bf16.msra.mxu3 %v7163_v54  ;;  %v6250_v54 = vld [vmem:[#allocation9 + $0x124] sm:$0xf] }
  0x8e   :  { %10150 = vst [vmem:[#allocation92_spill] sm:$0xff] %v7183_v2  ;;  %v7202_v4 = vor.u32 %v6250_v54, %v5925_v40  ;;  %v6277_v54 = vld [vmem:[#allocation9 + $0x1f4] sm:$0xf0] }
  0x8f   :  { %1666 = vmatpush.bf16.msra.mxu1 %v7169_v7  ;;  %v6252_v7 = vld [vmem:[#allocation9 + $0x12c] sm:$0xf0] }
  0x90   :  { %10157 = vst [vmem:[#allocation99_spill] sm:$0xff] %v7202_v4 }
  0x91   :  { %1692 = vmatpush.bf16.msra.mxu3 %v7175_v18  ;;  %v7198_v18 = vperm.slane %v128_v34, 1 }
  0x93   :  { %1667 = vmatpush.bf16.msra.mxu1 %v7183_v2  ;;  %10155 = vst [vmem:[#allocation97_spill] sm:$0xff] %v7198_v18 }
  0x95   :  { %1693 = vmatpush.bf16.msra.mxu3 %v7188_v49 }
  0x99   :  { %1694 = vmatpush.bf16.msra.mxu3 %v7202_v4 }
  0x9a   :  { %v7153_v38 = vpop.f32.mrf.mxu0 }
  0x9b   :  { %v7157_v32 = vpop.f32.mrf.mxu1 }
  0xa2   :  { %v7166_v51 = vpop.f32.mrf.mxu2  ;;  %v7173_v63 = vpop.f32.mrf.mxu0 }
  0xa3   :  { %v7171_v29 = vpop.f32.mrf.mxu3  ;;  %10146 = vst [vmem:[#allocation89_spill] sm:$0xff] %v7173_v63  ;;  %v7177_v12 = vpop.f32.mrf.mxu1  ;;  %v5923_v63 = vld [vmem:[#allocation9 + $0x120] sm:$0xf] }
  0xa4   :  { %10148 = vst [vmem:[#allocation91_spill] sm:$0xff] %v7177_v12  ;;  %v7191_v12 = vperm.slane %v128_v34, 0  ;;  %v7196_v15 = vor.u32 %v6252_v7, %v5923_v63  ;;  %v6248_v63 = vld [vmem:[#allocation9 + $0x10c] sm:$0xf0]  ;;  %v6246_v7 = vld [vmem:[#allocation9 + $0x104] sm:$0xf] }
  0xa6   :  { %10152 = vst [vmem:[#allocation94_spill] sm:$0xff] %v7191_v12  ;;  %1668 = vmatpush.bf16.msra.mxu1 %v7196_v15 }
  0xa7   :  { %10154 = vst [vmem:[#allocation96_spill] sm:$0xff] %v7196_v15  ;;  %v7222_v15 = vperm.slane %v128_v34, 3 }
  0xa9   :  { %10165 = vst [vmem:[#allocation107_spill] sm:$0xff] %v7222_v15 }
  0xaa   :  { %v7193_v44 = vpop.f32.mrf.mxu2  ;;  %v225_v0 = vpop.f32.mrf.mxu0 }
  0xab   :  { %10153 = vst [vmem:[#allocation95_spill] sm:$0xff] %v7193_v44  ;;  %v7200_v25 = vpop.f32.mrf.mxu3  ;;  %v7205_v2 = vadd.f32 %v225_v0, %v7191_v12  ;;  %v254_v6 = vpop.f32.mrf.mxu1  ;;  %v5907_v44 = vld [vmem:[#allocation9 + $0x100] sm:$0xf]  ;;  %v7216_v0 = vor.u32 %v6277_v54, %v6027_v52 }
  0xac   :  { %10156 = vst [vmem:[#allocation98_spill] sm:$0xff] %v7200_v25  ;;  %v7208_v37 = vadd.f32 %v254_v6, %v7198_v18  ;;  %v7212_v49 = vor.u32 %v6248_v63, %v5907_v44  ;;  %v5909_v25 = vld [vmem:[#allocation9 + $0x110] sm:$0xf0]  ;;  %v6011_v44 = vld [vmem:[#allocation9 + $0x1c8] sm:$0xf] }
  0xad   :  { %10158 = vst [vmem:[#allocation100_spill] sm:$0xff] %v7205_v2  ;;  %v7214_v40 = vor.u32 %v6246_v7, %v5909_v25  ;;  %v6275_v2 = vld [vmem:[#allocation9 + $0x1ec] sm:$0xf]  ;;  %v6273_v25 = vld [vmem:[#allocation9 + $0x1d4] sm:$0xf0] }
  0xae   :  { %10159 = vst [vmem:[#allocation101_spill] sm:$0xff] %v7208_v37  ;;  %v7218_v6 = vor.u32 %v6275_v2, %v6029_v59  ;;  %v7220_v37 = vperm.slane %v128_v34, 2  ;;  %1669 = vmatpush.bf16.msra.mxu1 %v7212_v49  ;;  %v6271_v63 = vld [vmem:[#allocation9 + $0x1cc] sm:$0xf]  ;;  %v7233_v2 = vor.u32 %v6273_v25, %v6011_v44  ;;  %v6013_v34 = vld [vmem:[#allocation9 + $0x1d8] sm:$0xf0] }
  0xaf   :  { %10160 = vst [vmem:[#allocation102_spill] sm:$0xff] %v7212_v49  ;;  %1695 = vmatpush.bf16.msra.mxu3 %v7214_v40  ;;  %v5995_v49 = vld [vmem:[#allocation9 + $0x1a8] sm:$0xf]  ;;  %v5997_v44 = vld [vmem:[#allocation9 + $0x1b8] sm:$0xf0] }
  0xb0   :  { %10161 = vst [vmem:[#allocation103_spill] sm:$0xff] %v7214_v40 }
  0xb1   :  { %10162 = vst [vmem:[#allocation104_spill] sm:$0xff] %v7216_v0  ;;  %1670 = vmatmul.bf16.vlgmr.msra.gmra.mxu1 %v10149_v24 }
  0xb2   :  { %10163 = vst [vmem:[#allocation105_spill] sm:$0xff] %v7218_v6  ;;  %v283_v4 = vpop.f32.mrf.mxu2  ;;  %1714 = vmatpush.bf16.msrb.mxu1 %v7216_v0  ;;  %v7230_v59 = vpop.f32.mrf.mxu0  ;;  %v7240_v0 = vor.u32 %v6271_v63, %v6013_v34  ;;  %1696 = vmatmul.bf16.vlgmr.msra.gmra.mxu3 %v10149_v24  ;;  %v5979_v63 = vld [vmem:[#allocation9 + $0x188] sm:$0xf]  ;;  %v6265_v34 = vld [vmem:[#allocation9 + $0x194] sm:$0xf0] }
  0xb3   :  { %10164 = vst [vmem:[#allocation106_spill] sm:$0xff] %v7220_v37  ;;  %v7228_v52 = vadd.f32 %v283_v4, %v7220_v37  ;;  %v312_v7 = vpop.f32.mrf.mxu3  ;;  %1740 = vmatpush.bf16.msrb.mxu3 %v7218_v6  ;;  %v7238_v40 = vpop.f32.mrf.mxu1  ;;  %v6269_v4 = vld [vmem:[#allocation9 + $0x1b4] sm:$0xf0] }
  0xb4   :  { %10167 = vst [vmem:[#allocation109_spill] sm:$0xff] %v7230_v59  ;;  %v7236_v54 = vadd.f32 %v312_v7, %v7222_v15  ;;  %v7245_v59 = vor.u32 %v6269_v4, %v5995_v49  ;;  %v5981_v49 = vld [vmem:[#allocation9 + $0x198] sm:$0xf0] }
  0xb5   :  { %10166 = vst [vmem:[#allocation108_spill] sm:$0xff] %v7228_v52  ;;  %v6267_v52 = vld [vmem:[#allocation9 + $0x1ac] sm:$0xf] }
  0xb6   :  { %10168 = vst [vmem:[#allocation110_spill] sm:$0xff] %v7233_v2  ;;  %1715 = vmatpush.bf16.msrb.mxu1 %v7233_v2  ;;  %v7248_v25 = vor.u32 %v6267_v52, %v5997_v44  ;;  %v7256_v2 = vor.u32 %v6265_v34, %v5979_v63  ;;  %v5634_v63 = vld [vmem:[#allocation8 + $0xf0] sm:$0xf0]  ;;  %v5963_v34 = vld [vmem:[#allocation9 + $0x168] sm:$0xf] }
  0xb7   :  { %10169 = vst [vmem:[#allocation111_spill] sm:$0xff] %v7236_v54  ;;  %1741 = vmatpush.bf16.msrb.mxu3 %v7240_v0 }
  0xb8   :  { %10170 = vst [vmem:[#allocation112_spill] sm:$0xff] %v7238_v40  ;;  %v6263_v40 = vld [vmem:[#allocation9 + $0x18c] sm:$0xf] }
  0xb9   :  { %10171 = vst [vmem:[#allocation113_spill] sm:$0xff] %v7240_v0  ;;  %v7261_v44 = vor.u32 %v6263_v40, %v5981_v49  ;;  %v6180_v0 = vld [vmem:[#allocation8 + $0xec] sm:$0xf0]  ;;  %v6259_v40 = vld [vmem:[#allocation9 + $0x16c] sm:$0xf] }
  0xba   :  { %10172 = vst [vmem:[#allocation114_spill] sm:$0xff] %v7245_v59  ;;  %v7250_v7 = vpop.f32.mrf.mxu2  ;;  %1716 = vmatpush.bf16.msrb.mxu1 %v7245_v59  ;;  %v230_v6 = vpop.f32.mrf.mxu0  ;;  %v5632_v59 = vld [vmem:[#allocation8 + $0xe0] sm:$0xf]  ;;  %v5965_v49 = vld [vmem:[#allocation9 + $0x178] sm:$0xf0] }
  0xbb   :  { %10173 = vst [vmem:[#allocation115_spill] sm:$0xff] %v7248_v25  ;;  %v7253_v54 = vpop.f32.mrf.mxu3  ;;  %1742 = vmatpush.bf16.msrb.mxu3 %v7248_v25  ;;  %v7259_v4 = vadd.f32 %v230_v6, %v7191_v12  ;;  %v259_v52 = vpop.f32.mrf.mxu1  ;;  %v7268_v25 = vor.u32 %v6180_v0, %v5632_v59  ;;  %v5616_v0 = vld [vmem:[#allocation8 + $0xc0] sm:$0xf]  ;;  %v6176_v59 = vld [vmem:[#allocation8 + $0xcc] sm:$0xf0] }
  0xbc   :  { %10174 = vst [vmem:[#allocation116_spill] sm:$0xff] %v7250_v7  ;;  %v7264_v7 = vadd.f32 %v259_v52, %v7198_v18  ;;  %v7275_v52 = vor.u32 %v6259_v40, %v5965_v49  ;;  %v5947_v40 = vld [vmem:[#allocation9 + $0x148] sm:$0xf]  ;;  %v6257_v49 = vld [vmem:[#allocation9 + $0x154] sm:$0xf0] }
  0xbd   :  { %10175 = vst [vmem:[#allocation117_spill] sm:$0xff] %v7253_v54  ;;  %v6178_v54 = vld [vmem:[#allocation8 + $0xe4] sm:$0xf]  ;;  %1093 = vmatpush.bf16.msra.mxu0 %v7268_v25  ;;  %v7294_v41 = vor.u32 %v6257_v49, %v5947_v40  ;;  %v6253_v40 = vld [vmem:[#allocation9 + $0x134] sm:$0xf0] }
  0xbe   :  { %10176 = vst [vmem:[#allocation118_spill] sm:$0xff] %v7256_v2  ;;  %1717 = vmatpush.bf16.msrb.mxu1 %v7256_v2  ;;  %v7270_v6 = vor.u32 %v6178_v54, %v5634_v63  ;;  %v7285_v63 = vor.u32 %v6176_v59, %v5616_v0  ;;  %v5600_v0 = vld [vmem:[#allocation8 + $0xa0] sm:$0xf]  ;;  %v6172_v59 = vld [vmem:[#allocation8 + $0xac] sm:$0xf0] }
  0xbf   :  { %10177 = vst [vmem:[#allocation119_spill] sm:$0xff] %v7259_v4  ;;  %1743 = vmatpush.bf16.msrb.mxu3 %v7261_v44  ;;  %v7272_v4 = vor.u32 %v6261_v10, %v5963_v34  ;;  %v5618_v34 = vld [vmem:[#allocation8 + $0xd0] sm:$0xf0] }
  0xc0   :  { %10178 = vst [vmem:[#allocation120_spill] sm:$0xff] %v7261_v44  ;;  %1119 = vmatpush.bf16.msra.mxu2 %v7270_v6  ;;  %v6174_v44 = vld [vmem:[#allocation8 + $0xc4] sm:$0xf] }
  0xc1   :  { %10179 = vst [vmem:[#allocation121_spill] sm:$0xff] %v7264_v7  ;;  %1094 = vmatpush.bf16.msra.mxu0 %v7285_v63 }
  0xc2   :  { %10180 = vst [vmem:[#allocation122_spill] sm:$0xff] %v7268_v25  ;;  %v288_v7 = vpop.f32.mrf.mxu2  ;;  %1718 = vmatpush.bf16.msrb.mxu1 %v7272_v4  ;;  %v7282_v10 = vpop.f32.mrf.mxu0  ;;  %v7292_v25 = vor.u32 %v6174_v44, %v5618_v34  ;;  %v5602_v44 = vld [vmem:[#allocation8 + $0xb0] sm:$0xf0]  ;;  %v5931_v34 = vld [vmem:[#allocation9 + $0x128] sm:$0xf] }
  0xc3   :  { %10181 = vst [vmem:[#allocation123_spill] sm:$0xff] %v7270_v6  ;;  %v7280_v2 = vadd.f32 %v288_v7, %v7220_v37  ;;  %v317_v54 = vpop.f32.mrf.mxu3  ;;  %1744 = vmatpush.bf16.msrb.mxu3 %v7275_v52  ;;  %v6255_v7 = vld [vmem:[#allocation9 + $0x14c] sm:$0xf] }
  0xc4   :  { %10182 = vst [vmem:[#allocation124_spill] sm:$0xff] %v7272_v4  ;;  %v7288_v6 = vadd.f32 %v317_v54, %v7222_v15  ;;  %v7290_v4 = vpop.f32.mrf.mxu1  ;;  %1120 = vmatpush.bf16.msra.mxu2 %v7292_v25  ;;  %v6170_v54 = vld [vmem:[#allocation8 + $0xa4] sm:$0xf] }
  0xc5   :  { %10183 = vst [vmem:[#allocation125_spill] sm:$0xff] %v7275_v52  ;;  %v7304_v49 = vor.u32 %v6170_v54, %v5602_v44 }
  0xc6   :  { %10184 = vst [vmem:[#allocation126_spill] sm:$0xff] %v7280_v2  ;;  %v5949_v2 = vld [vmem:[#allocation9 + $0x158] sm:$0xf0]  ;;  %1719 = vmatpush.bf16.msrb.mxu1 %v7294_v41 }
  0xc7   :  { %10185 = vst [vmem:[#allocation127_spill] sm:$0xff] %v7282_v10  ;;  %v7297_v10 = vor.u32 %v6255_v7, %v5949_v2  ;;  %v6251_v2 = vld [vmem:[#allocation9 + $0x12c] sm:$0xf]  ;;  %v5933_v7 = vld [vmem:[#allocation9 + $0x138] sm:$0xf0] }
  0xc8   :  { %10186 = vst [vmem:[#allocation128_spill] sm:$0xff] %v7285_v63  ;;  %v7309_v52 = vor.u32 %v6251_v2, %v5933_v7  ;;  %1121 = vmatpush.bf16.msra.mxu2 %v7304_v49  ;;  %v6249_v2 = vld [vmem:[#allocation9 + $0x114] sm:$0xf0]  ;;  %v5917_v63 = vld [vmem:[#allocation9 + $0x118] sm:$0xf0] }
  0xc9   :  { %10187 = vst [vmem:[#allocation129_spill] sm:$0xff] %v7288_v6  ;;  %1745 = vmatpush.bf16.msrb.mxu3 %v7297_v10  ;;  %v7306_v6 = vor.u32 %v6253_v40, %v5931_v34  ;;  %v5586_v34 = vld [vmem:[#allocation8 + $0x90] sm:$0xf0]  ;;  %v5915_v40 = vld [vmem:[#allocation9 + $0x108] sm:$0xf] }
  0xca   :  { %10188 = vst [vmem:[#allocation130_spill] sm:$0xff] %v7290_v4  ;;  %v7302_v4 = vor.u32 %v6172_v59, %v5600_v0  ;;  %v5584_v0 = vld [vmem:[#allocation8 + $0x80] sm:$0xf]  ;;  %v6168_v59 = vld [vmem:[#allocation8 + $0x8c] sm:$0xf0]  ;;  %v235_v54 = vpop.f32.mrf.mxu0 }
  0xcb   :  { %10189 = vst [vmem:[#allocation131_spill] sm:$0xff] %v7292_v25  ;;  %1720 = vmatpush.bf16.msrb.mxu1 %v7306_v6  ;;  %v7315_v25 = vpop.f32.mrf.mxu3  ;;  %v7318_v44 = vor.u32 %v6168_v59, %v5584_v0  ;;  %v7321_v7 = vadd.f32 %v235_v54, %v7191_v12  ;;  %v5568_v59 = vld [vmem:[#allocation8 + $0x60] sm:$0xf]  ;;  %v6164_v54 = vld [vmem:[#allocation8 + $0x6c] sm:$0xf0] }
  0xcc   :  { %10190 = vst [vmem:[#allocation132_spill] sm:$0xff] %v7294_v41  ;;  %1095 = vmatpush.bf16.msra.mxu0 %v7302_v4  ;;  %v7311_v41 = vpop.f32.mrf.mxu2 }
  0xcd   :  { %10191 = vst [vmem:[#allocation133_spill] sm:$0xff] %v7297_v10  ;;  %v6166_v10 = vld [vmem:[#allocation8 + $0x84] sm:$0xf]  ;;  %1746 = vmatpush.bf16.msrb.mxu3 %v7309_v52 }
  0xce   :  { %10192 = vst [vmem:[#allocation134_spill] sm:$0xff] %v7302_v4  ;;  %v6247_v4 = vld [vmem:[#allocation9 + $0x10c] sm:$0xf] }
  0xcf   :  { %10193 = vst [vmem:[#allocation135_spill] sm:$0xff] %v7304_v49  ;;  %v7323_v49 = vor.u32 %v6166_v10, %v5586_v34  ;;  %v7331_v0 = vor.u32 %v6247_v4, %v5917_v63  ;;  %v7337_v10 = vor.u32 %v6164_v54, %v5568_v59  ;;  %v5570_v34 = vld [vmem:[#allocation8 + $0x70] sm:$0xf0]  ;;  %v5552_v63 = vld [vmem:[#allocation8 + $0x40] sm:$0xf] }
  0xd0   :  { %10194 = vst [vmem:[#allocation136_spill] sm:$0xff] %v7306_v6  ;;  %v7325_v6 = vor.u32 %v6249_v2, %v5915_v40  ;;  %1096 = vmatpush.bf16.msra.mxu0 %v7318_v44  ;;  %v6160_v40 = vld [vmem:[#allocation8 + $0x4c] sm:$0xf0]  ;;  %v6158_v2 = vld [vmem:[#allocation8 + $0x44] sm:$0xf] }
  0xd1   :  { %10195 = vst [vmem:[#allocation137_spill] sm:$0xff] %v7309_v52  ;;  %1122 = vmatpush.bf16.msra.mxu2 %v7323_v49  ;;  %1747 = vmatpush.bf16.msrb.mxu3 %v7331_v0 }
  0xd2   :  { %10196 = vst [vmem:[#allocation138_spill] sm:$0xff] %v7311_v41  ;;  %v264_v41 = vpop.f32.mrf.mxu1  ;;  %1721 = vmatpush.bf16.msrb.mxu1 %v7325_v6 }
  0xd3   :  { %10197 = vst [vmem:[#allocation139_spill] sm:$0xff] %v7315_v25  ;;  %v7328_v25 = vadd.f32 %v264_v41, %v7198_v18  ;;  %v322_v54 = vpop.f32.mrf.mxu3 }
  0xd4   :  { %10198 = vst [vmem:[#allocation140_spill] sm:$0xff] %v7318_v44  ;;  %1097 = vmatpush.bf16.msra.mxu0 %v7337_v10  ;;  %v293_v4 = vpop.f32.mrf.mxu2  ;;  %1748 = vmatmul.bf16.vlgmr.msrb.gmra.mxu3 %v10149_v24 }
  0xd5   :  { %10199 = vst [vmem:[#allocation141_spill] sm:$0xff] %v7321_v7  ;;  %v6162_v7 = vld [vmem:[#allocation8 + $0x64] sm:$0xf]  ;;  %1871 = vmatpush.bf16.msra.mxu3 %v6922_v45  ;;  %1722 = vmatmul.bf16.vlgmr.msrb.gmra.mxu1 %v10149_v24  ;;  %v7347_v59 = vadd.f32 %v293_v4, %v7220_v37  ;;  %v7355_v45 = vadd.f32 %v322_v54, %v7222_v15  ;;  %v5536_v24 = vld [vmem:[#allocation8 + $0x20] sm:$0xf] }
  0xd6   :  { %10200 = vst [vmem:[#allocation142_spill] sm:$0xff] %v7323_v49  ;;  %1845 = vmatpush.bf16.msra.mxu1 %v6909_v30  ;;  %v7340_v41 = vor.u32 %v6162_v7, %v5570_v34  ;;  %v7352_v7 = vor.u32 %v6160_v40, %v5552_v63  ;;  %v5554_v34 = vld [vmem:[#allocation8 + $0x50] sm:$0xf0]  ;;  %v6156_v4 = vld [vmem:[#allocation8 + $0x2c] sm:$0xf0] }
  0xd7   :  { %10201 = vst [vmem:[#allocation143_spill] sm:$0xff] %v7325_v6  ;;  %v7365_v63 = vor.u32 %v6156_v4, %v5536_v24  ;;  %v5538_v40 = vld [vmem:[#allocation8 + $0x30] sm:$0xf0]  ;;  %v250_v24 = vadd.f32 %v7157_v32, %v7198_v18  ;;  %v6179_v6 = vld [vmem:[#allocation8 + $0xec] sm:$0xf] }
  0xd8   :  { %10202 = vst [vmem:[#allocation144_spill] sm:$0xff] %v7328_v25  ;;  %1123 = vmatpush.bf16.msra.mxu2 %v7340_v41  ;;  %v7349_v25 = vpop.f32.mrf.mxu0  ;;  %1098 = vmatpush.bf16.msra.mxu0 %v7352_v7  ;;  %v5642_v32 = vld [vmem:[#allocation8 + $0xf8] sm:$0xf0] }
  0xd9   :  { %10203 = vst [vmem:[#allocation145_spill] sm:$0xff] %v7331_v0  ;;  %1872 = vmatpush.bf16.msra.mxu3 %v6935_v56  ;;  %v7360_v0 = vor.u32 %v6158_v2, %v5554_v34  ;;  %v221_v2 = vadd.f32 %v7153_v38, %v7191_v12  ;;  %v6181_v38 = vld [vmem:[#allocation8 + $0xf4] sm:$0xf0] }
  0xda   :  { %10204 = vst [vmem:[#allocation146_spill] sm:$0xff] %v7337_v10  ;;  %1846 = vmatpush.bf16.msra.mxu1 %v6918_v42  ;;  %v7357_v30 = vpop.f32.mrf.mxu1 }
  0xdb   :  { %10205 = vst [vmem:[#allocation147_spill] sm:$0xff] %v7340_v41  ;;  %v7378_v4 = vpop.f32.mrf.mxu3 }
  0xdc   :  { %10206 = vst [vmem:[#allocation148_spill] sm:$0xff] %v7347_v59  ;;  %1124 = vmatpush.bf16.msra.mxu2 %v7360_v0  ;;  %1099 = vmatpush.bf16.msra.mxu0 %v7365_v63  ;;  %v7373_v34 = vpop.f32.mrf.mxu2  ;;  %v6152_v59 = vld [vmem:[#allocation8 + $0xc] sm:$0xf0] }
  0xdd   :  { %10207 = vst [vmem:[#allocation149_spill] sm:$0xff] %v7349_v25  ;;  %v6154_v25 = vld [vmem:[#allocation8 + $0x24] sm:$0xf]  ;;  %1873 = vmatpush.bf16.msra.mxu3 %v6944_v3 }
  0xde   :  { %10208 = vst [vmem:[#allocation150_spill] sm:$0xff] %v7352_v7  ;;  %1847 = vmatpush.bf16.msra.mxu1 %v6933_v55  ;;  %v7368_v54 = vor.u32 %v6154_v25, %v5538_v40  ;;  %v5522_v40 = vld [vmem:[#allocation8 + $0x10] sm:$0xf0]  ;;  %v5640_v55 = vld [vmem:[#allocation8 + $0xe8] sm:$0xf] }
  0xdf   :  { %10209 = vst [vmem:[#allocation151_spill] sm:$0xff] %v7355_v45  ;;  %v6150_v45 = vld [vmem:[#allocation8 + $0x4] sm:$0xf]  ;;  %v7386_v12 = vor.u32 %v6181_v38, %v5640_v55  ;;  %v6177_v55 = vld [vmem:[#allocation8 + $0xd4] sm:$0xf0] }
  0xe0   :  { %10210 = vst [vmem:[#allocation152_spill] sm:$0xff] %v7357_v30  ;;  %1125 = vmatpush.bf16.msra.mxu2 %v7368_v54  ;;  %v5520_v30 = vld [vmem:[#allocation8] sm:$0xf]  ;;  %v593_v3 = vpop.f32.mrf.mxu0  ;;  %v7384_v42 = vor.u32 %v6150_v45, %v5522_v40  ;;  %v5624_v45 = vld [vmem:[#allocation8 + $0xc8] sm:$0xf] }
  0xe1   :  { %10211 = vst [vmem:[#allocation153_spill] sm:$0xff] %v7360_v0  ;;  %v7381_v25 = vor.u32 %v6152_v59, %v5520_v30  ;;  %v636_v56 = vadd.f32 %v593_v3, %v221_v2  ;;  %1874 = vmatpush.bf16.msra.mxu3 %v6959_v16  ;;  %v7396_v59 = vor.u32 %v6177_v55, %v5624_v45  ;;  %v6175_v2 = vld [vmem:[#allocation8 + $0xcc] sm:$0xf] }
  0xe2   :  { %10212 = vst [vmem:[#allocation154_spill] sm:$0xff] %v7365_v63  ;;  %1848 = vmatpush.bf16.msra.mxu1 %v6947_v5  ;;  %v6171_v45 = vld [vmem:[#allocation8 + $0xac] sm:$0xf] }
  0xe3   :  { %10213 = vst [vmem:[#allocation155_spill] sm:$0xff] %v7368_v54  ;;  %1100 = vmatpush.bf16.msra.mxu0 %v7381_v25  ;;  %v5515_v30 = vmul.f32 -1.442695, %v636_v56  ;;  %v279_v56 = vadd.f32 %v7166_v51, %v7220_v37  ;;  %v632_v40 = vpop.f32.mrf.mxu3  ;;  %v5528_v37 = vld [vmem:[#allocation8 + $0x8] sm:$0xf] }
  0xe4   :  { %10214 = vst [vmem:[#allocation156_spill] sm:$0xff] %v7373_v34  ;;  %v606_v34 = vpop.f32.mrf.mxu1  ;;  %1126 = vmatpush.bf16.msra.mxu2 %v7384_v42 }
  0xe5   :  { %10215 = vst [vmem:[#allocation157_spill] sm:$0xff] %v7378_v4  ;;  %v637_v54 = vadd.f32 %v606_v34, %v250_v24  ;;  %v7389_v4 = vor.u32 %v6179_v6, %v5642_v32  ;;  %6293 = vpow2.f32 %v5515_v30  ;;  %1875 = vmatpush.bf16.msra.mxu3 %v6971_v28  ;;  %v5626_v6 = vld [vmem:[#allocation8 + $0xd8] sm:$0xf0]  ;;  %v5608_v32 = vld [vmem:[#allocation8 + $0xa8] sm:$0xf] }
  0xe6   :  { %10216 = vst [vmem:[#allocation158_spill] sm:$0xff] %v7381_v25  ;;  %1849 = vmatpush.bf16.msra.mxu1 %v6962_v20  ;;  %v7400_v34 = vor.u32 %v6175_v2, %v5626_v6  ;;  %v6173_v30 = vld [vmem:[#allocation8 + $0xb4] sm:$0xf0]  ;;  %v5544_v20 = vld [vmem:[#allocation8 + $0x28] sm:$0xf] }
  0xe7   :  { %10217 = vst [vmem:[#allocation159_spill] sm:$0xff] %v7384_v42  ;;  %1145 = vmatpush.bf16.msrb.mxu0 %v7386_v12  ;;  %v5516_v3 = vmul.f32 -1.442695, %v637_v54  ;;  %v619_v54 = vpop.f32.mrf.mxu2  ;;  %v7406_v51 = vor.u32 %v6173_v30, %v5608_v32  ;;  %v6167_v32 = vld [vmem:[#allocation8 + $0x8c] sm:$0xf] }
  0xe8   :  { %10218 = vst [vmem:[#allocation160_spill] sm:$0xff] %v7386_v12  ;;  %1171 = vmatpush.bf16.msrb.mxu2 %v7389_v4  ;;  %v638_v24 = vadd.f32 %v619_v54, %v279_v56  ;;  %v595_v38 = vpop.f32.mrf.mxu0  ;;  %v5594_v30 = vld [vmem:[#allocation8 + $0x98] sm:$0xf0] }
  0xe9   :  { %10219 = vst [vmem:[#allocation161_spill] sm:$0xff] %v7389_v4  ;;  %6295 = vpow2.f32 %v5516_v3  ;;  %1876 = vmatpush.bf16.msra.mxu3 %v6990_v48  ;;  %v5610_v3 = vld [vmem:[#allocation8 + $0xb8] sm:$0xf0]  ;;  %v5592_v38 = vld [vmem:[#allocation8 + $0x88] sm:$0xf] }
  0xea   :  { %10220 = vst [vmem:[#allocation162_spill] sm:$0xff] %v7396_v59  ;;  %1850 = vmatpush.bf16.msra.mxu1 %v6975_v31  ;;  %v5517_v2 = vmul.f32 -1.442695, %v638_v24  ;;  %v7408_v6 = vor.u32 %v6171_v45, %v5610_v3  ;;  %v7423_v3 = vor.u32 %v6167_v32, %v5594_v30  ;;  %v5560_v30 = vld [vmem:[#allocation8 + $0x48] sm:$0xf] }
  0xeb   :  { %10221 = vst [vmem:[#allocation163_spill] sm:$0xff] %v7400_v34  ;;  %1146 = vmatpush.bf16.msrb.mxu0 %v7396_v59  ;;  %v6294_v28 = vpop.eup %6293  ;;  %v634_v45 = vpop.f32.mrf.mxu3 }
  0xec   :  { %1172 = vmatpush.bf16.msrb.mxu2 %v7400_v34  ;;  %v608_v55 = vpop.f32.mrf.mxu1  ;;  %10222 = vst [vmem:[#allocation164_spill] sm:$0xff] %v7406_v51  ;;  %v7411_v54 = vadd.f32 1.0, %v6294_v28  ;;  %6297 = vpow2.f32 %v5517_v2  ;;  %v5576_v2 = vld [vmem:[#allocation8 + $0x68] sm:$0xf]  ;;  %v6161_v45 = vld [vmem:[#allocation8 + $0x54] sm:$0xf0] }
  0xed   :  { %10223 = vst [vmem:[#allocation165_spill] sm:$0xff] %v7408_v6  ;;  %v6169_v55 = vld [vmem:[#allocation8 + $0x94] sm:$0xf0]  ;;  %1877 = vmatpush.bf16.msra.mxu3 %v6999_v60  ;;  %v5578_v60 = vld [vmem:[#allocation8 + $0x78] sm:$0xf0] }
  0xee   :  { %1851 = vmatpush.bf16.msra.mxu1 %v6988_v43  ;;  %v7418_v24 = vor.u32 %v6169_v55, %v5592_v38  ;;  %6299 = vrcp.f32 %v7411_v54  ;;  %10225 = vst [vmem:[#allocation167_spill] sm:$0xff] %v7423_v3  ;;  %v6163_v55 = vld [vmem:[#allocation8 + $0x6c] sm:$0xf]  ;;  %vm657_vm6 = vweird.f32 %v7411_v54 }
  0xef   :  { %1147 = vmatpush.bf16.msrb.mxu0 %v7406_v51  ;;  %v6296_v56 = vpop.eup %6295  ;;  %v621_v28 = vpop.f32.mrf.mxu2  ;;  %v7433_v32 = vor.u32 %v6163_v55, %v5578_v60  ;;  %v661_v55 = vand.u32 2147483647, %v7411_v54 }
  0xf0   :  { %1173 = vmatpush.bf16.msrb.mxu2 %v7408_v6  ;;  %v7415_v48 = vadd.f32 1.0, %v6296_v56  ;;  %10224 = vst [vmem:[#allocation166_spill] sm:$0xff] %v7418_v24  ;;  %v6165_v56 = vld [vmem:[#allocation8 + $0x74] sm:$0xf0]  ;;  %v308_v28 = vadd.f32 %v7171_v29, %v7222_v15 }
  0xf1   :  { %1878 = vmatpush.bf16.msra.mxu3 %v7012_v8  ;;  %v7427_v38 = vor.u32 %v6165_v56, %v5576_v2  ;;  %10227 = vst [vmem:[#allocation169_spill] sm:$0xff] %v7433_v32  ;;  %v7439_v2 = vor.u32 %v6161_v45, %v5560_v30  ;;  %v6159_v56 = vld [vmem:[#allocation8 + $0x4c] sm:$0xf]  ;;  %v6157_v29 = vld [vmem:[#allocation8 + $0x34] sm:$0xf0]  ;;  %vm662_vm9 = vcmp.eq.f32.partialorder %v661_v55, 8.507059e+37 }
  0xf2   :  { %6301 = vrcp.f32 %v7415_v48  ;;  %1852 = vmatpush.bf16.msra.mxu1 %v7002_v1  ;;  %v6298_v43 = vpop.eup %6297  ;;  %v639_v31 = vadd.f32 %v632_v40, %v308_v28  ;;  %v7451_v28 = vor.u32 %v6157_v29, %v5544_v20  ;;  %v6155_v45 = vld [vmem:[#allocation8 + $0x2c] sm:$0xf]  ;;  %vm672_vm7 = vweird.f32 %v7415_v48 }
  0xf3   :  { %1148 = vmatpush.bf16.msrb.mxu0 %v7418_v24  ;;  %10226 = vst [vmem:[#allocation168_spill] sm:$0xff] %v7427_v38  ;;  %v7436_v1 = vadd.f32 1.0, %v6298_v43 }
  0xf4   :  { %1174 = vmatpush.bf16.msrb.mxu2 %v7423_v3  ;;  %10228 = vst [vmem:[#allocation170_spill] sm:$0xff] %v7439_v2  ;;  %v6300_v8 = vpop.eup %6299  ;;  %v678_v3 = vand.u32 2147483648, %v7415_v48 }
  0xf5   :  { %1997 = vmatpush.bf16.msrb.mxu3 %v7026_v21  ;;  %v653_v60 = vmul.f32 %v6300_v8, %v7411_v54  ;;  %6303 = vrcp.f32 %v7436_v1  ;;  %10230 = vst [vmem:[#allocation172_spill] sm:$0xff] %v7451_v28  ;;  %v5546_v21 = vld [vmem:[#allocation8 + $0x38] sm:$0xf0]  ;;  %vm658_vm4 = vweird.f32 %v6300_v8  ;;  %vm687_vm13 = vweird.f32 %v7436_v1 }
  0xf6   :  { %1971 = vmatpush.bf16.msrb.mxu1 %v7024_v14  ;;  %v5562_v14 = vld [vmem:[#allocation8 + $0x58] sm:$0xf0]  ;;  %6305 = vtanh.f32 %v639_v31  ;;  %v7458_v20 = vor.u32 %v6155_v45, %v5546_v21  ;;  %vm659_vm8 = vmor %vm657_vm6, %vm658_vm4 }
  0xf7   :  { %1149 = vmatpush.bf16.msrb.mxu0 %v7427_v38  ;;  %v7447_v30 = vor.u32 %v6159_v56, %v5562_v14  ;;  %v654_v40 = vsub.f32 1.0, %v653_v60  ;;  %v6153_v38 = vld [vmem:[#allocation8 + $0x14] sm:$0xf0]  ;;  %v676_v14 = vand.u32 2147483647, %v7415_v48 }
  0xf8   :  { %v6302_v16 = vpop.eup %6301  ;;  %1175 = vmatpush.bf16.msrb.mxu2 %v7433_v32  ;;  %10231 = vst [vmem:[#allocation173_spill] sm:$0xff] %v7458_v20  ;;  %v7463_v60 = vor.u32 %v6153_v38, %v5528_v37 }
  0xf9   :  { %v668_v43 = vmul.f32 %v6302_v16, %v7415_v48  ;;  %10229 = vst [vmem:[#allocation171_spill] sm:$0xff] %v7447_v30  ;;  %1998 = vmatpush.bf16.msrb.mxu3 %v7032_v27  ;;  %v655_v32 = vmul.f32 %v6300_v8, %v654_v40  ;;  %vm673_vm5 = vweird.f32 %v6302_v16  ;;  %v5530_v40 = vld [vmem:[#allocation8 + $0x18] sm:$0xf0]  ;;  %vm677_vm11 = vcmp.eq.f32.partialorder %v676_v14, 8.507059e+37 }
  0xfa   :  { %1972 = vmatpush.bf16.msrb.mxu1 %v7029_v26  ;;  %v663_v26 = vand.u32 2147483648, %v7411_v54  ;;  %10232 = vst [vmem:[#allocation174_spill] sm:$0xff] %v7463_v60  ;;  %vm674_vm10 = vmor %vm672_vm7, %vm673_vm5 }
  0xfb   :  { %1150 = vmatpush.bf16.msrb.mxu0 %v7439_v2  ;;  %v669_v5 = vsub.f32 1.0, %v668_v43  ;;  %v6304_v29 = vpop.eup %6303  ;;  %v656_v31 = vadd.f32 %v6300_v8, %v655_v32  ;;  %v6151_v43 = vld [vmem:[#allocation8 + $0xc] sm:$0xf] }
  0xfc   :  { %1176 = vmatpush.bf16.msrb.mxu2 %v7447_v30  ;;  %v664_v21 = vor.u32 1.1754944e-38, %v663_v26  ;;  %v6306_v37 = vpop.eup %6305  ;;  %v7471_v48 = vor.u32 %v6151_v43, %v5530_v40  ;;  %vm688_vm12 = vweird.f32 %v6304_v29 }
  0xfd   :  { %v670_v56 = vmul.f32 %v6302_v16, %v669_v5  ;;  %1999 = vmatpush.bf16.msrb.mxu3 %v7042_v47  ;;  %v683_v5 = vmul.f32 %v6304_v29, %v7436_v1  ;;  %v660_v47 = vsel %vm659_vm8, %v6300_v8, %v656_v31  ;;  %vm689_vm14 = vmor %vm687_vm13, %vm688_vm12 }
  0xfe   :  { %1973 = vmatpush.bf16.msrb.mxu1 %v7039_v46  ;;  %v679_v46 = vor.u32 1.1754944e-38, %v678_v3  ;;  %v665_v38 = vsel %vm662_vm9, %v664_v21, %v660_v47  ;;  %10233 = vst [vmem:[#allocation175_spill] sm:$0xff] %v7471_v48  ;;  %v693_v47 = vand.u32 2147483648, %v7436_v1  ;;  %v7488_v21 = vpop.permute.xlu0 %385 }
  0xff   :  { %1151 = vmatpush.bf16.msrb.mxu0 %v7451_v28  ;;  %v671_v45 = vadd.f32 %v6302_v16, %v670_v56  ;;  %v684_v54 = vsub.f32 1.0, %v683_v5  ;;  %v699_v56 = vmul.f32 %v6306_v37, %v665_v38  ;;  %v7511_v37 = vpop.f32.mrf.mxu3  ;;  %v10234_v38 = vld [vmem:[#allocation71_spill] sm:$0xff] }
 0x100   :  { %1177 = vmatpush.bf16.msrb.mxu2 %v7458_v20  ;;  %v694_v31 = vor.u32 1.1754944e-38, %v693_v47  ;;  %v10239_v47 = vld [vmem:[#allocation76_spill] sm:$0xff] }
 0x101   :  { %v675_v32 = vsel %vm674_vm10, %v6302_v16, %v671_v45  ;;  %2000 = vmatpush.bf16.msrb.mxu3 %v7051_v62  ;;  %v685_v8 = vmul.f32 %v6304_v29, %v684_v54 }
 0x102   :  { %1974 = vmatpush.bf16.msrb.mxu1 %v7049_v61  ;;  %v680_v26 = vsel %vm677_vm11, %v679_v46, %v675_v32  ;;  %v691_v46 = vand.u32 2147483647, %v7436_v1  ;;  %v10235_v32 = vld [vmem:[#allocation72_spill] sm:$0xff] }
 0x103   :  { %1152 = vmatpush.bf16.msrb.mxu0 %v7463_v60  ;;  %v698_v3 = vmul.f32 0.0, %v680_v26  ;;  %v686_v16 = vadd.f32 %v6304_v29, %v685_v8  ;;  %v10236_v26 = vld [vmem:[#allocation73_spill] sm:$0xff] }
 0x104   :  { %1178 = vmatpush.bf16.msrb.mxu2 %v7471_v48  ;;  %vm692_vm15 = vcmp.eq.f32.partialorder %v691_v46, 8.507059e+37  ;;  %v10240_v46 = vld [vmem:[#allocation77_spill] sm:$0xff] }
 0x105   :  { %v7476_v55 = vadd.f32 %v699_v56, %v698_v3  ;;  %2001 = vmatpush.bf16.msrb.mxu3 %v7062_v17  ;;  %v690_v14 = vsel %vm689_vm14, %v6304_v29, %v686_v16  ;;  %v7505_v29 = vpop.f32.mrf.mxu1  ;;  %v10237_v3 = vld [vmem:[#allocation74_spill] sm:$0xff]  ;;  %v10238_v16 = vld [vmem:[#allocation75_spill] sm:$0xff] }
 0x106   :  { %1975 = vmatpush.bf16.msrb.mxu1 %v7059_v13  ;;  %v695_v40 = vsel %vm692_vm15, %v694_v31, %v690_v14  ;;  %v5901_v13 = vld [vmem:[#allocation9 + $0xf8] sm:$0xf0] }
 0x107   :  { %6307 = vtanh.f32 %v7476_v55  ;;  %v1143_v56 = vpop.f32.mrf.mxu3 }
 0x109   :  { %2002 = vmatpush.bf16.msrb.mxu3 %v7068_v35  ;;  %v5797_v35 = vld [vmem:[#allocation9 + $0x30] sm:$0xf0] }
 0x10a   :  { %1976 = vmatpush.bf16.msrb.mxu1 %v7065_v33 }
 0x10d   :  { %v6308_v43 = vpop.eup %6307  ;;  %2003 = vmatpush.bf16.msrb.mxu3 %v7075_v36  ;;  %v1117_v54 = vpop.f32.mrf.mxu1  ;;  %v5813_v36 = vld [vmem:[#allocation9 + $0x50] sm:$0xf0] }
 0x10e   :  { %1977 = vmatpush.bf16.msrb.mxu1 %v7072_v53  ;;  %v702_v5 = vmul.f32 %v6308_v43, %v695_v40  ;;  %v10241_v43 = vld [vmem:[#allocation78_spill] sm:$0xff]  ;;  %v10242_v40 = vld [vmem:[#allocation79_spill] sm:$0xff] }
 0x10f   :  { %v7525_v14 = vpop.f32.mrf.mxu3 }
 0x110   :  { %v7491_v45 = vmul.f32 %v702_v5, %v7488_v21 }
 0x111   :  { %2004 = vmatpush.bf16.msrb.mxu3 %v7081_v22  ;;  %v5829_v22 = vld [vmem:[#allocation9 + $0x70] sm:$0xf0] }
 0x112   :  { %1978 = vmatpush.bf16.msrb.mxu1 %v7078_v19  ;;  %v7497_v1 = vpack.c.bf16 %v7491_v45, %v7491_v45 }
 0x114   :  { %1101 = vmatmul.bf16.vlgmr.msra.gmra.mxu0 %v7497_v1  ;;  %1127 = vmatmul.bf16.vlgmr.msra.gmra.mxu2 %v7497_v1 }
 0x115   :  { %1853 = vmatmul.bf16.vlgmr.msra.gmra.mxu1 %v7497_v1  ;;  %1879 = vmatmul.bf16.vlgmr.msra.gmra.mxu3 %v7497_v1  ;;  %v7519_v8 = vpop.f32.mrf.mxu1 }
 0x116   :  { %2023 = vmatpush.bf16.msra.mxu1 %v7083_v23  ;;  %2049 = vmatpush.bf16.msra.mxu3 %v7086_v39  ;;  %v5861_v39 = vld [vmem:[#allocation9 + $0xb0] sm:$0xf0] }
 0x117   :  { %v1195_v5 = vpop.f32.mrf.mxu3 }
 0x11a   :  { %2024 = vmatpush.bf16.msra.mxu1 %v7094_v57  ;;  %2050 = vmatpush.bf16.msra.mxu3 %v7097_v58 }
 0x11d   :  { %v1169_v31 = vpop.f32.mrf.mxu1 }
 0x11e   :  { %2025 = vmatpush.bf16.msra.mxu1 %v7101_v9  ;;  %2051 = vmatpush.bf16.msra.mxu3 %v7103_v11  ;;  %v6240_v11 = vld [vmem:[#allocation9 + $0xcc] sm:$0xf0]  ;;  %v6238_v9 = vld [vmem:[#allocation9 + $0xc4] sm:$0xf] }
 0x122   :  { %2026 = vmatpush.bf16.msra.mxu1 %v7107_v50  ;;  %2052 = vmatpush.bf16.msra.mxu3 %v10234_v38 }
 0x124   :  { %1153 = vmatmul.bf16.vlgmr.msrb.gmra.mxu0 %v7497_v1  ;;  %1179 = vmatmul.bf16.vlgmr.msrb.gmra.mxu2 %v7497_v1 }
 0x126   :  { %2027 = vmatpush.bf16.msra.mxu1 %v10235_v32  ;;  %2053 = vmatpush.bf16.msra.mxu3 %v10236_v26  ;;  %v6244_v32 = vld [vmem:[#allocation9 + $0xec] sm:$0xf0] }
 0x12a   :  { %2028 = vmatpush.bf16.msra.mxu1 %v10237_v3  ;;  %2054 = vmatpush.bf16.msra.mxu3 %v10238_v16  ;;  %v5891_v3 = vld [vmem:[#allocation9 + $0xe0] sm:$0xf]  ;;  %v6242_v16 = vld [vmem:[#allocation9 + $0xe4] sm:$0xf] }
 0x12b   :  { %v7533_v38 = vor.u32 %v6244_v32, %v5891_v3  ;;  %v5877_v32 = vld [vmem:[#allocation9 + $0xd0] sm:$0xf0] }
 0x12c   :  { %v7545_v3 = vor.u32 %v6238_v9, %v5877_v32  ;;  %v6230_v9 = vld [vmem:[#allocation9 + $0x84] sm:$0xf]  ;;  %v5845_v32 = vld [vmem:[#allocation9 + $0x90] sm:$0xf0] }
 0x12d   :  { %10243 = vst [vmem:[#allocation176_spill] sm:$0xff] %v7533_v38  ;;  %1649 = vmatpush.bf16.msra.mxu0 %v7533_v38  ;;  %v7557_v23 = vor.u32 %v6230_v9, %v5845_v32  ;;  %v6222_v9 = vld [vmem:[#allocation9 + $0x44] sm:$0xf] }
 0x12e   :  { %2029 = vmatpush.bf16.msra.mxu1 %v10239_v47  ;;  %2055 = vmatpush.bf16.msra.mxu3 %v10240_v46  ;;  %v7529_v54 = vpop.f32.mrf.mxu1  ;;  %v5893_v47 = vld [vmem:[#allocation9 + $0xf0] sm:$0xf0]  ;;  %10246 = vst [vmem:[#allocation179_spill] sm:$0xff] %v7545_v3  ;;  %v7569_v53 = vor.u32 %v6222_v9, %v5813_v36  ;;  %v5779_v36 = vld [vmem:[#allocation9] sm:$0xf] }
 0x12f   :  { %v7535_v46 = vor.u32 %v6242_v16, %v5893_v47  ;;  %v6236_v16 = vld [vmem:[#allocation9 + $0xac] sm:$0xf0]  ;;  %v6234_v47 = vld [vmem:[#allocation9 + $0xa4] sm:$0xf]  ;;  %10250 = vst [vmem:[#allocation183_spill] sm:$0xff] %v7557_v23 }
 0x130   :  { %10254 = vst [vmem:[#allocation187_spill] sm:$0xff] %v7569_v53  ;;  %v6214_v9 = vld [vmem:[#allocation9 + $0x4] sm:$0xf] }
 0x131   :  { %10244 = vst [vmem:[#allocation177_spill] sm:$0xff] %v7535_v46  ;;  %1675 = vmatpush.bf16.msra.mxu2 %v7535_v46 }
 0x132   :  { %2030 = vmatpush.bf16.msra.mxu1 %v10241_v43  ;;  %2056 = vmatpush.bf16.msra.mxu3 %v10242_v40 }
 0x135   :  { %v7531_v56 = vpop.f32.mrf.mxu3  ;;  %1676 = vmatpush.bf16.msra.mxu2 %v7545_v3 }
 0x136   :  { %v1673_v26 = vpop.f32.mrf.mxu1 }
 0x137   :  { %v5875_v26 = vld [vmem:[#allocation9 + $0xc0] sm:$0xf] }
 0x138   :  { %v7543_v58 = vor.u32 %v6240_v11, %v5875_v26  ;;  %v5843_v11 = vld [vmem:[#allocation9 + $0x80] sm:$0xf] }
 0x13a   :  { %10245 = vst [vmem:[#allocation178_spill] sm:$0xff] %v7543_v58  ;;  %1650 = vmatpush.bf16.msra.mxu0 %v7543_v58 }
 0x13d   :  { %v1699_v50 = vpop.f32.mrf.mxu3 }
 0x13e   :  { %v5859_v50 = vld [vmem:[#allocation9 + $0xa0] sm:$0xf] }
 0x13f   :  { %v7549_v57 = vor.u32 %v6236_v16, %v5859_v50  ;;  %v5827_v50 = vld [vmem:[#allocation9 + $0x60] sm:$0xf]  ;;  %v6228_v16 = vld [vmem:[#allocation9 + $0x6c] sm:$0xf0] }
 0x141   :  { %10247 = vst [vmem:[#allocation180_spill] sm:$0xff] %v7549_v57  ;;  %1651 = vmatpush.bf16.msra.mxu0 %v7549_v57 }
 0x152   :  { %v7539_v31 = vpop.f32.mrf.mxu1 }
 0x157   :  { %v7541_v5 = vpop.f32.mrf.mxu3 }
 0x15a   :  { %v1725_v40 = vpop.f32.mrf.mxu1 }
 0x15b   :  { %v7551_v40 = vor.u32 %v6234_v47, %v5861_v39  ;;  %v6226_v39 = vld [vmem:[#allocation9 + $0x64] sm:$0xf]  ;;  %v7561_v47 = vor.u32 %v6228_v16, %v5827_v50  ;;  %v5795_v50 = vld [vmem:[#allocation9 + $0x20] sm:$0xf]  ;;  %v6220_v16 = vld [vmem:[#allocation9 + $0x2c] sm:$0xf0] }
 0x15c   :  { %v7563_v19 = vor.u32 %v6226_v39, %v5829_v22  ;;  %v7573_v22 = vor.u32 %v6220_v16, %v5795_v50  ;;  %v6218_v39 = vld [vmem:[#allocation9 + $0x24] sm:$0xf]  ;;  %v5781_v50 = vld [vmem:[#allocation9 + $0x10] sm:$0xf0]  ;;  %v5899_v16 = vld [vmem:[#allocation9 + $0xe8] sm:$0xf] }
 0x15d   :  { %10248 = vst [vmem:[#allocation181_spill] sm:$0xff] %v7551_v40  ;;  %1677 = vmatpush.bf16.msra.mxu2 %v7551_v40  ;;  %v7575_v33 = vor.u32 %v6218_v39, %v5797_v35  ;;  %v7586_v17 = vor.u32 %v6214_v9, %v5781_v50  ;;  %v6243_v39 = vld [vmem:[#allocation9 + $0xec] sm:$0xf] }
 0x15e   :  { %10251 = vst [vmem:[#allocation184_spill] sm:$0xff] %v7561_v47  ;;  %v6239_v9 = vld [vmem:[#allocation9 + $0xcc] sm:$0xf] }
 0x15f   :  { %v1751_v43 = vpop.f32.mrf.mxu3  ;;  %10252 = vst [vmem:[#allocation185_spill] sm:$0xff] %v7563_v19 }
 0x160   :  { %v6232_v43 = vld [vmem:[#allocation9 + $0x8c] sm:$0xf0]  ;;  %10255 = vst [vmem:[#allocation188_spill] sm:$0xff] %v7573_v22 }
 0x161   :  { %v7555_v26 = vor.u32 %v6232_v43, %v5843_v11  ;;  %1678 = vmatpush.bf16.msra.mxu2 %v7557_v23  ;;  %v5811_v11 = vld [vmem:[#allocation9 + $0x40] sm:$0xf]  ;;  %v6224_v43 = vld [vmem:[#allocation9 + $0x4c] sm:$0xf0]  ;;  %10256 = vst [vmem:[#allocation189_spill] sm:$0xff] %v7575_v33 }
 0x162   :  { %v7567_v32 = vor.u32 %v6224_v43, %v5811_v11  ;;  %v7580_v11 = vld [vmem:[%s9692_s7] sm:$0xf]  ;;  %v6216_v43 = vld [vmem:[#allocation9 + $0xc] sm:$0xf0]  ;;  %10258 = vst [vmem:[#allocation191_spill] sm:$0xff] %v7586_v17  ;;  %s5310_s7 = sshll.u32 %s9699_s14, 4  ;;  %s5311_s7 = int_to_ptr.hbm [resolvable:$true] %s5310_s7 }
 0x163   :  { %10249 = vst [vmem:[#allocation182_spill] sm:$0xff] %v7555_v26  ;;  %1652 = vmatpush.bf16.msra.mxu0 %v7555_v26 }
 0x164   :  { %10253 = vst [vmem:[#allocation186_spill] sm:$0xff] %v7567_v32 }
 0x165   :  { %1679 = vmatpush.bf16.msra.mxu2 %v7563_v19  ;;  %v7591_v19 = vperm.slane %v7580_v11, 0 }
 0x167   :  { %1653 = vmatpush.bf16.msra.mxu0 %v7561_v47  ;;  %10260 = vst [vmem:[#allocation193_spill] sm:$0xff] %v7591_v19  ;;  %v5885_v47 = vld [vmem:[#allocation9 + $0xd8] sm:$0xf0] }
 0x169   :  { %1680 = vmatpush.bf16.msra.mxu2 %v7569_v53  ;;  %v7584_v53 = vor.u32 %v6216_v43, %v5779_v36  ;;  %v5883_v36 = vld [vmem:[#allocation9 + $0xc8] sm:$0xf]  ;;  %v6241_v43 = vld [vmem:[#allocation9 + $0xd4] sm:$0xf0] }
 0x16b   :  { %1654 = vmatpush.bf16.msra.mxu0 %v7567_v32  ;;  %10257 = vst [vmem:[#allocation190_spill] sm:$0xff] %v7584_v53  ;;  %v6245_v32 = vld [vmem:[#allocation9 + $0xf4] sm:$0xf0] }
 0x16c   :  { %v7588_v35 = vor.u32 %v6245_v32, %v5899_v16  ;;  %v10262_v32 = vld [vmem:[#allocation91_spill] sm:$0xff] }
 0x16d   :  { %1681 = vmatpush.bf16.msra.mxu2 %v7575_v33  ;;  %v7594_v33 = vor.u32 %v6243_v39, %v5901_v13  ;;  %v252_v50 = vadd.f32 %v10262_v32, %v7198_v18  ;;  %v7604_v39 = vor.u32 %v6239_v9, %v5885_v47  ;;  %v5867_v32 = vld [vmem:[#allocation9 + $0xa8] sm:$0xf]  ;;  %v10268_v9 = vld [vmem:[#allocation98_spill] sm:$0xff] }
 0x16e   :  { %10259 = vst [vmem:[#allocation192_spill] sm:$0xff] %v7588_v35 }
 0x16f   :  { %1655 = vmatpush.bf16.msra.mxu0 %v7573_v22  ;;  %10261 = vst [vmem:[#allocation194_spill] sm:$0xff] %v7594_v33  ;;  %v7601_v22 = vor.u32 %v6241_v43, %v5883_v36  ;;  %v6237_v36 = vld [vmem:[#allocation9 + $0xb4] sm:$0xf0]  ;;  %v6235_v43 = vld [vmem:[#allocation9 + $0xac] sm:$0xf] }
 0x170   :  { %10264 = vst [vmem:[#allocation195_spill] sm:$0xff] %v7604_v39  ;;  %v7614_v18 = vor.u32 %v6237_v36, %v5867_v32  ;;  %v6231_v32 = vld [vmem:[#allocation9 + $0x8c] sm:$0xf] }
 0x171   :  { %1682 = vmatpush.bf16.msra.mxu2 %v7586_v17  ;;  %10263 = vst [vmem:[#allocation91_spill] sm:$0xff] %v7601_v22 }
 0x172   :  { %10266 = vst [vmem:[#allocation197_spill] sm:$0xff] %v7614_v18 }
 0x173   :  { %1656 = vmatpush.bf16.msra.mxu0 %v7584_v53 }
 0x175   :  { %1727 = vmatpush.bf16.msrb.mxu2 %v7594_v33 }
 0x177   :  { %1701 = vmatpush.bf16.msrb.mxu0 %v7588_v35  ;;  %v7609_v35 = vperm.slane %v7580_v11, 1 }
 0x179   :  { %10265 = vst [vmem:[#allocation196_spill] sm:$0xff] %v7609_v35  ;;  %1728 = vmatpush.bf16.msrb.mxu2 %v7604_v39  ;;  %v5851_v39 = vld [vmem:[#allocation9 + $0x88] sm:$0xf] }
 0x17b   :  { %1702 = vmatpush.bf16.msrb.mxu0 %v7601_v22  ;;  %v6233_v22 = vld [vmem:[#allocation9 + $0x94] sm:$0xf0] }
 0x17f   :  { %1703 = vmatpush.bf16.msrb.mxu0 %v7614_v18 }
 0x191   :  { %v1102_v16 = vpop.f32.mrf.mxu0 }
 0x192   :  { %v1103_v53 = vadd.f32 %v1102_v16, %v7591_v19  ;;  %v1854_v13 = vpop.f32.mrf.mxu1  ;;  %v5869_v16 = vld [vmem:[#allocation9 + $0xb8] sm:$0xf0] }
 0x193   :  { %v7606_v17 = vadd.f32 %v1854_v13, %v252_v50  ;;  %v7616_v47 = vor.u32 %v6235_v43, %v5869_v16  ;;  %v310_v50 = vadd.f32 %v10268_v9, %v7222_v15  ;;  %v7625_v43 = vor.u32 %v6233_v22, %v5851_v39  ;;  %v5853_v16 = vld [vmem:[#allocation9 + $0x98] sm:$0xf0] }
 0x194   :  { %v1116_v33 = vadd.f32 %v7505_v29, %v1103_v53  ;;  %v7628_v62 = vor.u32 %v6231_v32, %v5853_v16  ;;  %v7635_v22 = vperm.slane %v7580_v11, 2  ;;  %v5819_v32 = vld [vmem:[#allocation9 + $0x48] sm:$0xf]  ;;  %v6225_v16 = vld [vmem:[#allocation9 + $0x54] sm:$0xf0] }
 0x195   :  { %10267 = vst [vmem:[#allocation198_spill] sm:$0xff] %v7616_v47  ;;  %1729 = vmatpush.bf16.msrb.mxu2 %v7616_v47  ;;  %1704 = vmatpush.bf16.msrb.mxu0 %v7625_v43 }
 0x196   :  { %v5774_v19 = vmul.f32 -1.442695, %v1116_v33  ;;  %10269 = vst [vmem:[#allocation98_spill] sm:$0xff] %v7625_v43 }
 0x197   :  { %v1128_v13 = vpop.f32.mrf.mxu2  ;;  %10270 = vst [vmem:[#allocation199_spill] sm:$0xff] %v7628_v62 }
 0x198   :  { %6309 = vpow2.f32 %v5774_v19  ;;  %v1129_v53 = vadd.f32 %v1128_v13, %v7609_v35  ;;  %v1880_v29 = vpop.f32.mrf.mxu3  ;;  %v5835_v13 = vld [vmem:[#allocation9 + $0x68] sm:$0xf]  ;;  %v6229_v35 = vld [vmem:[#allocation9 + $0x74] sm:$0xf0]  ;;  %10272 = vst [vmem:[#allocation201_spill] sm:$0xff] %v7635_v22 }
 0x199   :  { %v7623_v36 = vadd.f32 %v1880_v29, %v310_v50  ;;  %v1104_v33 = vpop.f32.mrf.mxu0  ;;  %1730 = vmatpush.bf16.msrb.mxu2 %v7628_v62  ;;  %v7632_v47 = vor.u32 %v6229_v35, %v5835_v13  ;;  %v6227_v50 = vld [vmem:[#allocation9 + $0x6c] sm:$0xf]  ;;  %v5837_v29 = vld [vmem:[#allocation9 + $0x78] sm:$0xf0] }
 0x19a   :  { %v1142_v9 = vadd.f32 %v7511_v37, %v1129_v53  ;;  %v1856_v15 = vpop.f32.mrf.mxu1  ;;  %v7637_v37 = vor.u32 %v6227_v50, %v5837_v29  ;;  %v6223_v13 = vld [vmem:[#allocation9 + $0x4c] sm:$0xf]  ;;  %v5821_v50 = vld [vmem:[#allocation9 + $0x58] sm:$0xf0]  ;;  %v7648_v29 = vperm.slane %v7580_v11, 3 }
 0x19b   :  { %10271 = vst [vmem:[#allocation200_spill] sm:$0xff] %v7632_v47  ;;  %1705 = vmatpush.bf16.msrb.mxu0 %v7632_v47  ;;  %v6221_v47 = vld [vmem:[#allocation9 + $0x34] sm:$0xf0]  ;;  %v6219_v62 = vld [vmem:[#allocation9 + $0x2c] sm:$0xf] }
 0x19c   :  { %v5775_v19 = vmul.f32 -1.442695, %v1142_v9  ;;  %10273 = vst [vmem:[#allocation202_spill] sm:$0xff] %v7637_v37 }
 0x19d   :  { %1731 = vmatpush.bf16.msrb.mxu2 %v7637_v37  ;;  %10275 = vst [vmem:[#allocation204_spill] sm:$0xff] %v7648_v29  ;;  %v5803_v37 = vld [vmem:[#allocation9 + $0x28] sm:$0xf] }
 0x19e   :  { %v6310_v33 = vpop.eup %6309  ;;  %6311 = vpow2.f32 %v5775_v19  ;;  %v7645_v19 = vor.u32 %v6225_v16, %v5819_v32  ;;  %v7655_v32 = vor.u32 %v6221_v47, %v5803_v37  ;;  %v6215_v37 = vld [vmem:[#allocation9 + $0xc] sm:$0xf] }
 0x19f   :  { %v7639_v15 = vadd.f32 1.0, %v6310_v33  ;;  %v1130_v39 = vpop.f32.mrf.mxu2  ;;  %v7650_v33 = vor.u32 %v6223_v13, %v5821_v50 }
 0x1a0   :  { %v1882_v53 = vpop.f32.mrf.mxu3  ;;  %10274 = vst [vmem:[#allocation203_spill] sm:$0xff] %v7645_v19  ;;  %1706 = vmatpush.bf16.msrb.mxu0 %v7645_v19 }
 0x1a1   :  { %6313 = vrcp.f32 %v7639_v15  ;;  %v1154_v35 = vpop.f32.mrf.mxu0  ;;  %10276 = vst [vmem:[#allocation205_spill] sm:$0xff] %v7650_v33  ;;  %1732 = vmatpush.bf16.msrb.mxu2 %v7650_v33  ;;  %vm1214_vm1 = vweird.f32 %v7639_v15 }
 0x1a2   :  { %v1155_v9 = vadd.f32 %v1154_v35, %v7635_v22  ;;  %10277 = vst [vmem:[#allocation206_spill] sm:$0xff] %v7655_v32  ;;  %v5805_v35 = vld [vmem:[#allocation9 + $0x38] sm:$0xf0] }
 0x1a3   :  { %v7657_v22 = vor.u32 %v6219_v62, %v5805_v35 }
 0x1a4   :  { %v6312_v39 = vpop.eup %6311  ;;  %v1168_v53 = vadd.f32 %v7519_v8, %v1155_v9  ;;  %1707 = vmatpush.bf16.msrb.mxu0 %v7655_v32  ;;  %v5787_v9 = vld [vmem:[#allocation9 + $0x8] sm:$0xf] }
 0x1a5   :  { %v1207_v43 = vadd.f32 1.0, %v6312_v39  ;;  %10278 = vst [vmem:[#allocation207_spill] sm:$0xff] %v7657_v22  ;;  %v6217_v39 = vld [vmem:[#allocation9 + $0x14] sm:$0xf0]  ;;  %1733 = vmatpush.bf16.msrb.mxu2 %v7657_v22 }
 0x1a6   :  { %v5776_v16 = vmul.f32 -1.442695, %v1168_v53  ;;  %v7663_v47 = vor.u32 %v6217_v39, %v5787_v9  ;;  %v5789_v53 = vld [vmem:[#allocation9 + $0x18] sm:$0xf0]  ;;  %v1220_v9 = vand.u32 2147483648, %v7639_v15 }
 0x1a7   :  { %v6314_v11 = vpop.eup %6313  ;;  %6315 = vrcp.f32 %v1207_v43  ;;  %v1180_v13 = vpop.f32.mrf.mxu2  ;;  %v7666_v33 = vor.u32 %v6215_v37, %v5789_v53  ;;  %v1233_v53 = vand.u32 2147483647, %v1207_v43  ;;  %vm1229_vm4 = vweird.f32 %v1207_v43 }
 0x1a8   :  { %v1210_v50 = vmul.f32 %v6314_v11, %v7639_v15  ;;  %6317 = vpow2.f32 %v5776_v16  ;;  %v1181_v8 = vadd.f32 %v1180_v13, %v7648_v29  ;;  %10279 = vst [vmem:[#allocation208_spill] sm:$0xff] %v7663_v47  ;;  %1708 = vmatpush.bf16.msrb.mxu0 %v7663_v47  ;;  %vm1215_vm0 = vweird.f32 %v6314_v11 }
 0x1a9   :  { %v1156_v19 = vpop.f32.mrf.mxu0  ;;  %10280 = vst [vmem:[#allocation209_spill] sm:$0xff] %v7666_v33  ;;  %1734 = vmatpush.bf16.msrb.mxu2 %v7666_v33  ;;  %vm1216_vm2 = vmor %vm1214_vm1, %vm1215_vm0  ;;  %v1221_v33 = vor.u32 1.1754944e-38, %v1220_v9  ;;  %vm1234_vm7 = vcmp.eq.f32.partialorder %v1233_v53, 8.507059e+37  ;;  %v10286_v53 = vld [vmem:[#allocation22_spill] sm:$0xff] }
 0x1aa   :  { %v1211_v62 = vsub.f32 1.0, %v1210_v50  ;;  %v1194_v35 = vadd.f32 %v7525_v14, %v1181_v8  ;;  %v1218_v14 = vand.u32 2147483647, %v7639_v15  ;;  %v1235_v8 = vand.u32 2147483648, %v1207_v43 }
 0x1ac   :  { %v1212_v18 = vmul.f32 %v6314_v11, %v1211_v62  ;;  %6319 = vtanh.f32 %v1194_v35  ;;  %vm1219_vm5 = vcmp.eq.f32.partialorder %v1218_v14, 8.507059e+37  ;;  %v1236_v47 = vor.u32 1.1754944e-38, %v1235_v8 }
 0x1ad   :  { %v6316_v16 = vpop.eup %6315 }
 0x1ae   :  { %v6318_v13 = vpop.eup %6317  ;;  %v1225_v29 = vmul.f32 %v6316_v16, %v1207_v43  ;;  %v1213_v19 = vadd.f32 %v6314_v11, %v1212_v18  ;;  %vm1230_vm3 = vweird.f32 %v6316_v16 }
 0x1af   :  { %v1208_v22 = vadd.f32 1.0, %v6318_v13  ;;  %v1182_v50 = vpop.f32.mrf.mxu2  ;;  %vm1231_vm6 = vmor %vm1229_vm4, %vm1230_vm3 }
 0x1b0   :  { %v1226_v39 = vsub.f32 1.0, %v1225_v29  ;;  %v1217_v62 = vsel %vm1216_vm2, %v6314_v11, %v1213_v19 }
 0x1b1   :  { %6321 = vrcp.f32 %v1208_v22  ;;  %v1222_v35 = vsel %vm1219_vm5, %v1221_v33, %v1217_v62  ;;  %v1250_v11 = vand.u32 2147483648, %v1208_v22  ;;  %v1248_v43 = vand.u32 2147483647, %v1208_v22  ;;  %v10285_v62 = vld [vmem:[#allocation19_spill] sm:$0xff] }
 0x1b2   :  { %v1227_v37 = vmul.f32 %v6316_v16, %v1226_v39  ;;  %v6320_v13 = vpop.eup %6319  ;;  %vm1244_vm9 = vweird.f32 %v1208_v22 }
 0x1b3   :  { %v1256_v23 = vmul.f32 %v6320_v13, %v1222_v35  ;;  %v1251_v33 = vor.u32 1.1754944e-38, %v1250_v11  ;;  %vm1249_vm11 = vcmp.eq.f32.partialorder %v1248_v43, 8.507059e+37  ;;  %v10288_v13 = vld [vmem:[#allocation83_spill] sm:$0xff]  ;;  %v10295_v43 = vld [vmem:[#allocation86_spill] sm:$0xff] }
 0x1b4   :  { %v1228_v18 = vadd.f32 %v6316_v16, %v1227_v37  ;;  %v10284_v37 = vld [vmem:[#allocation81_spill] sm:$0xff]  ;;  %v10289_v35 = vld [vmem:[#allocation23_spill] sm:$0xff] }
 0x1b5   :  { %v10293_v11 = vld [vmem:[#allocation27_spill] sm:$0xff] }
 0x1b6   :  { %v1232_v29 = vsel %vm1231_vm6, %v6316_v16, %v1228_v18  ;;  %v10287_v18 = vld [vmem:[#allocation82_spill] sm:$0xff] }
 0x1b7   :  { %v6322_v50 = vpop.eup %6321  ;;  %v1237_v32 = vsel %vm1234_vm7, %v1236_v47, %v1232_v29  ;;  %v10290_v29 = vld [vmem:[#allocation26_spill] sm:$0xff] }
 0x1b8   :  { %v1240_v15 = vmul.f32 %v6322_v50, %v1208_v22  ;;  %v1255_v61 = vmul.f32 0.0, %v1237_v32  ;;  %vm1245_vm8 = vweird.f32 %v6322_v50  ;;  %v10283_v22 = vld [vmem:[#allocation80_spill] sm:$0xff] }
 0x1b9   :  { %vm1246_vm10 = vmor %vm1244_vm9, %vm1245_vm8 }
 0x1ba   :  { %v1241_v26 = vsub.f32 1.0, %v1240_v15  ;;  %v7673_v39 = vadd.f32 %v1256_v23, %v1255_v61  ;;  %v10281_v23 = vld [vmem:[#allocation16_spill] sm:$0xff]  ;;  %v10292_v15 = vld [vmem:[#allocation85_spill] sm:$0xff] }
 0x1bc   :  { %v1242_v19 = vmul.f32 %v6322_v50, %v1241_v26  ;;  %6323 = vtanh.f32 %v7673_v39  ;;  %v10282_v26 = vld [vmem:[#allocation18_spill] sm:$0xff] }
 0x1be   :  { %v1243_v9 = vadd.f32 %v6322_v50, %v1242_v19  ;;  %v10294_v19 = vld [vmem:[#allocation30_spill] sm:$0xff] }
 0x1c0   :  { %v1247_v16 = vsel %vm1246_vm10, %v6322_v50, %v1243_v9  ;;  %v10291_v50 = vld [vmem:[#allocation84_spill] sm:$0xff]  ;;  %v10296_v9 = vld [vmem:[#allocation87_spill] sm:$0xff] }
 0x1c1   :  { %v1252_v14 = vsel %vm1249_vm11, %v1251_v33, %v1247_v16  ;;  %v10297_v33 = vld [vmem:[#allocation31_spill] sm:$0xff]  ;;  %v10298_v16 = vld [vmem:[#allocation34_spill] sm:$0xff] }
 0x1c2   :  { %v6324_v47 = vpop.eup %6323 }
 0x1c3   :  { %v1259_v8 = vmul.f32 %v6324_v47, %v1252_v14  ;;  %v10299_v14 = vld [vmem:[#allocation88_spill] sm:$0xff]  ;;  %v10300_v47 = vld [vmem:[#allocation90_spill] sm:$0xff] }
 0x1c5   :  { %v7677_v32 = vmul.f32 %v1259_v8, %v7488_v21  ;;  %v10301_v8 = vld [vmem:[#allocation35_spill] sm:$0xff] }
 0x1c7   :  { %v1264_v61 = vpack.c.bf16 %v7677_v32, %v7677_v32 }
 0x1c9   :  { %1657 = vmatmul.bf16.vlgmr.msra.gmra.mxu0 %v1264_v61  ;;  %1683 = vmatmul.bf16.vlgmr.msra.gmra.mxu2 %v1264_v61 }
 0x1ca   :  { %1979 = vmatmul.bf16.vlgmr.msrb.gmra.mxu1 %v1264_v61  ;;  %2005 = vmatmul.bf16.vlgmr.msrb.gmra.mxu3 %v1264_v61 }
 0x1cb   :  { %1832 = vmatpush.bf16.msra.mxu0 %v10281_v23  ;;  %1858 = vmatpush.bf16.msra.mxu2 %v10282_v26 }
 0x1cc   :  { %2146 = vmatpush.bf16.msrb.mxu1 %v10283_v22  ;;  %2172 = vmatpush.bf16.msrb.mxu3 %v10284_v37 }
 0x1cf   :  { %1833 = vmatpush.bf16.msra.mxu0 %v10285_v62  ;;  %1859 = vmatpush.bf16.msra.mxu2 %v10286_v53 }
 0x1d0   :  { %2147 = vmatpush.bf16.msrb.mxu1 %v10287_v18  ;;  %2173 = vmatpush.bf16.msrb.mxu3 %v10288_v13 }
 0x1d3   :  { %1834 = vmatpush.bf16.msra.mxu0 %v10289_v35  ;;  %1860 = vmatpush.bf16.msra.mxu2 %v10290_v29 }
 0x1d4   :  { %2148 = vmatpush.bf16.msrb.mxu1 %v10291_v50  ;;  %2174 = vmatpush.bf16.msrb.mxu3 %v10292_v15  ;;  %v10306_v15 = vld [vmem:[#allocation42_spill] sm:$0xff] }
 0x1d7   :  { %1835 = vmatpush.bf16.msra.mxu0 %v10293_v11  ;;  %1861 = vmatpush.bf16.msra.mxu2 %v10294_v19  ;;  %v10302_v11 = vld [vmem:[#allocation38_spill] sm:$0xff]  ;;  %v10303_v19 = vld [vmem:[#allocation92_spill] sm:$0xff] }
 0x1d8   :  { %2149 = vmatpush.bf16.msrb.mxu1 %v10295_v43  ;;  %2175 = vmatpush.bf16.msrb.mxu3 %v10296_v9  ;;  %v10304_v43 = vld [vmem:[#allocation93_spill] sm:$0xff]  ;;  %v10305_v9 = vld [vmem:[#allocation39_spill] sm:$0xff] }
 0x1d9   :  { %1709 = vmatmul.bf16.vlgmr.msrb.gmra.mxu0 %v1264_v61  ;;  %1735 = vmatmul.bf16.vlgmr.msrb.gmra.mxu2 %v1264_v61 }
 0x1da   :  { %2031 = vmatmul.bf16.vlgmr.msra.gmra.mxu1 %v1264_v61  ;;  %2057 = vmatmul.bf16.vlgmr.msra.gmra.mxu3 %v1264_v61  ;;  %v10307_v61 = vld [vmem:[#allocation96_spill] sm:$0xff] }
 0x1db   :  { %1836 = vmatpush.bf16.msra.mxu0 %v10297_v33  ;;  %1862 = vmatpush.bf16.msra.mxu2 %v10298_v16  ;;  %v10308_v33 = vld [vmem:[#allocation99_spill] sm:$0xff] }
 0x1dc   :  { %2150 = vmatpush.bf16.msrb.mxu1 %v10299_v14  ;;  %2176 = vmatpush.bf16.msrb.mxu3 %v10300_v47  ;;  %v10309_v16 = vld [vmem:[#allocation43_spill] sm:$0xff]  ;;  %v10310_v14 = vld [vmem:[#allocation46_spill] sm:$0xff] }
 0x1dd   :  { %v10311_v47 = vld [vmem:[#allocation102_spill] sm:$0xff] }
 0x1df   :  { %1837 = vmatpush.bf16.msra.mxu0 %v10301_v8  ;;  %1863 = vmatpush.bf16.msra.mxu2 %v10302_v11  ;;  %v10312_v8 = vld [vmem:[#allocation103_spill] sm:$0xff]  ;;  %v10313_v11 = vld [vmem:[#allocation104_spill] sm:$0xff] }
 0x1e0   :  { %2151 = vmatpush.bf16.msrb.mxu1 %v10303_v19  ;;  %2177 = vmatpush.bf16.msrb.mxu3 %v10304_v43  ;;  %v10314_v19 = vld [vmem:[#allocation105_spill] sm:$0xff]  ;;  %v10315_v43 = vld [vmem:[#allocation122_spill] sm:$0xff] }
 0x1e3   :  { %1838 = vmatpush.bf16.msra.mxu0 %v10305_v9  ;;  %1864 = vmatpush.bf16.msra.mxu2 %v10306_v15  ;;  %v10324_v15 = vld [vmem:[#allocation135_spill] sm:$0xff] }
 0x1e4   :  { %2152 = vmatpush.bf16.msrb.mxu1 %v10307_v61  ;;  %2178 = vmatpush.bf16.msrb.mxu3 %v10308_v33  ;;  %v10316_v61 = vld [vmem:[#allocation123_spill] sm:$0xff]  ;;  %v10317_v33 = vld [vmem:[#allocation110_spill] sm:$0xff] }
 0x1e7   :  { %1839 = vmatpush.bf16.msra.mxu0 %v10309_v16  ;;  %1865 = vmatpush.bf16.msra.mxu2 %v10310_v14  ;;  %v10318_v16 = vld [vmem:[#allocation113_spill] sm:$0xff]  ;;  %v10319_v14 = vld [vmem:[#allocation128_spill] sm:$0xff] }
 0x1e8   :  { %2153 = vmatpush.bf16.msrb.mxu1 %v10311_v47  ;;  %2179 = vmatpush.bf16.msrb.mxu3 %v10312_v8  ;;  %v10320_v47 = vld [vmem:[#allocation131_spill] sm:$0xff]  ;;  %v10321_v8 = vld [vmem:[#allocation114_spill] sm:$0xff] }
 0x1ea   :  { %1840 = vmatmul.bf16.vlgmr.msra.gmra.mxu0 %v7497_v1  ;;  %1866 = vmatmul.bf16.vlgmr.msra.gmra.mxu2 %v7497_v1  ;;  %v10325_v1 = vld [vmem:[#allocation118_spill] sm:$0xff] }
 0x1eb   :  { %1958 = vmatpush.bf16.msrb.mxu0 %v10315_v43  ;;  %1984 = vmatpush.bf16.msrb.mxu2 %v10316_v61  ;;  %v10326_v43 = vld [vmem:[#allocation120_spill] sm:$0xff] }
 0x1ec   :  { %2198 = vmatpush.bf16.msra.mxu1 %v10313_v11  ;;  %2224 = vmatpush.bf16.msra.mxu3 %v10314_v19  ;;  %v10322_v11 = vld [vmem:[#allocation115_spill] sm:$0xff]  ;;  %v10323_v19 = vld [vmem:[#allocation134_spill] sm:$0xff] }
 0x1ef   :  { %1959 = vmatpush.bf16.msrb.mxu0 %v10319_v14  ;;  %1985 = vmatpush.bf16.msrb.mxu2 %v10320_v47 }
 0x1f0   :  { %2199 = vmatpush.bf16.msra.mxu1 %v10317_v33  ;;  %2225 = vmatpush.bf16.msra.mxu3 %v10318_v16  ;;  %v10327_v16 = vld [vmem:[#allocation124_spill] sm:$0xff]  ;;  %v10328_v33 = vld [vmem:[#allocation125_spill] sm:$0xff] }
 0x1f3   :  { %1960 = vmatpush.bf16.msrb.mxu0 %v10323_v19  ;;  %1986 = vmatpush.bf16.msrb.mxu2 %v10324_v15 }
 0x1f4   :  { %2200 = vmatpush.bf16.msra.mxu1 %v10321_v8  ;;  %2226 = vmatpush.bf16.msra.mxu3 %v10322_v11  ;;  %v10329_v11 = vld [vmem:[#allocation132_spill] sm:$0xff]  ;;  %v10330_v8 = vld [vmem:[#allocation133_spill] sm:$0xff] }
 0x1f7   :  { %1961 = vmatpush.bf16.msrb.mxu0 %v7318_v44  ;;  %1987 = vmatpush.bf16.msrb.mxu2 %v7323_v49 }
 0x1f8   :  { %2201 = vmatpush.bf16.msra.mxu1 %v10325_v1  ;;  %2227 = vmatpush.bf16.msra.mxu3 %v10326_v43  ;;  %v10331_v43 = vld [vmem:[#allocation136_spill] sm:$0xff] }
 0x1fb   :  { %1962 = vmatpush.bf16.msrb.mxu0 %v7337_v10  ;;  %1988 = vmatpush.bf16.msrb.mxu2 %v7340_v41  ;;  %v10334_v10 = vld [vmem:[#allocation145_spill] sm:$0xff] }
 0x1fc   :  { %2202 = vmatpush.bf16.msra.mxu1 %v10327_v16  ;;  %2228 = vmatpush.bf16.msra.mxu3 %v10328_v33  ;;  %v10332_v16 = vld [vmem:[#allocation155_spill] sm:$0xff] }
 0x1fd   :  { %v10333_v33 = vld [vmem:[#allocation143_spill] sm:$0xff] }
 0x1ff   :  { %1963 = vmatpush.bf16.msrb.mxu0 %v7352_v7  ;;  %1989 = vmatpush.bf16.msrb.mxu2 %v7360_v0 }
 0x200   :  { %2203 = vmatpush.bf16.msra.mxu1 %v10329_v11  ;;  %2229 = vmatpush.bf16.msra.mxu3 %v10330_v8 }
 0x203   :  { %1964 = vmatpush.bf16.msrb.mxu0 %v7365_v63  ;;  %1990 = vmatpush.bf16.msrb.mxu2 %v10332_v16 }
 0x204   :  { %2204 = vmatpush.bf16.msra.mxu1 %v10331_v43  ;;  %2230 = vmatpush.bf16.msra.mxu3 %v7309_v52  ;;  %v10337_v52 = vld [vmem:[#allocation169_spill] sm:$0xff] }
 0x207   :  { %1965 = vmatpush.bf16.msrb.mxu0 %v7381_v25  ;;  %1991 = vmatpush.bf16.msrb.mxu2 %v7384_v42 }
 0x208   :  { %2205 = vmatpush.bf16.msra.mxu1 %v10333_v33  ;;  %2231 = vmatpush.bf16.msra.mxu3 %v10334_v10  ;;  %v10335_v33 = vld [vmem:[#allocation167_spill] sm:$0xff]  ;;  %v10336_v10 = vld [vmem:[#allocation168_spill] sm:$0xff] }
 0x20b   :  { %2010 = vmatpush.bf16.msra.mxu0 %v7386_v12  ;;  %2036 = vmatpush.bf16.msra.mxu2 %v7389_v4 }
 0x20f   :  { %2011 = vmatpush.bf16.msra.mxu0 %v7396_v59  ;;  %2037 = vmatpush.bf16.msra.mxu2 %v7400_v34 }
 0x213   :  { %2012 = vmatpush.bf16.msra.mxu0 %v7406_v51  ;;  %2038 = vmatpush.bf16.msra.mxu2 %v7408_v6 }
 0x217   :  { %2013 = vmatpush.bf16.msra.mxu0 %v7418_v24  ;;  %2039 = vmatpush.bf16.msra.mxu2 %v10335_v33  ;;  %v370_v33 = vld [vmem:[%s9694_s9] sm:$0xf] }
 0x218   :  { %v7766_v24 = vperm.slane %v370_v33, 0 }
 0x21a   :  { %10338 = vst [vmem:[#allocation16_spill] sm:$0xff] %v7766_v24 }
 0x21b   :  { %2014 = vmatpush.bf16.msra.mxu0 %v10336_v10  ;;  %2040 = vmatpush.bf16.msra.mxu2 %v10337_v52 }
 0x21f   :  { %2015 = vmatpush.bf16.msra.mxu0 %v7439_v2  ;;  %2041 = vmatpush.bf16.msra.mxu2 %v7447_v30 }
 0x223   :  { %2016 = vmatpush.bf16.msra.mxu0 %v7451_v28  ;;  %2042 = vmatpush.bf16.msra.mxu2 %v7458_v20  ;;  %v7772_v28 = vperm.slane %v370_v33, 1 }
 0x225   :  { %10339 = vst [vmem:[#allocation18_spill] sm:$0xff] %v7772_v28 }
 0x227   :  { %2017 = vmatpush.bf16.msra.mxu0 %v7463_v60  ;;  %2043 = vmatpush.bf16.msra.mxu2 %v7471_v48 }
 0x246   :  { %v1658_v10 = vpop.f32.mrf.mxu0 }
 0x247   :  { %v1659_v52 = vadd.f32 %v1658_v10, %v7766_v24  ;;  %v7769_v2 = vpop.f32.mrf.mxu1  ;;  %v7778_v10 = vperm.slane %v370_v33, 2 }
 0x249   :  { %v1672_v30 = vadd.f32 %v7529_v54, %v1659_v52  ;;  %10340 = vst [vmem:[#allocation80_spill] sm:$0xff] %v7778_v10  ;;  %v6038_v52 = vmul.f32 -1.442695, %v7606_v17 }
 0x24b   :  { %v6033_v20 = vmul.f32 -1.442695, %v1672_v30 }
 0x24c   :  { %v1684_v6 = vpop.f32.mrf.mxu2 }
 0x24d   :  { %6325 = vpow2.f32 %v6033_v20  ;;  %v1685_v48 = vadd.f32 %v1684_v6, %v7772_v28  ;;  %v7775_v60 = vpop.f32.mrf.mxu3 }
 0x24e   :  { %v1660_v51 = vpop.f32.mrf.mxu0 }
 0x24f   :  { %v1698_v34 = vadd.f32 %v7531_v56, %v1685_v48  ;;  %v1982_v59 = vpop.f32.mrf.mxu1 }
 0x251   :  { %v6034_v4 = vmul.f32 -1.442695, %v1698_v34  ;;  %v7785_v34 = vperm.slane %v370_v33, 3 }
 0x253   :  { %v6326_v12 = vpop.eup %6325  ;;  %6327 = vpow2.f32 %v6034_v4  ;;  %10341 = vst [vmem:[#allocation81_spill] sm:$0xff] %v7785_v34 }
 0x254   :  { %v1762_v54 = vadd.f32 1.0, %v6326_v12  ;;  %v1686_v24 = vpop.f32.mrf.mxu2 }
 0x255   :  { %v2008_v30 = vpop.f32.mrf.mxu3 }
 0x256   :  { %6329 = vrcp.f32 %v1762_v54  ;;  %v1710_v20 = vpop.f32.mrf.mxu0  ;;  %vm1770_vm13 = vweird.f32 %v1762_v54 }
 0x257   :  { %v1711_v6 = vadd.f32 %v1710_v20, %v7778_v10  ;;  %v7782_v28 = vpop.f32.mrf.mxu1  ;;  %6331 = vpow2.f32 %v6038_v52 }
 0x259   :  { %v6328_v51 = vpop.eup %6327  ;;  %v1724_v59 = vadd.f32 %v7539_v31, %v1711_v6 }
 0x25a   :  { %v1763_v4 = vadd.f32 1.0, %v6328_v51 }
 0x25b   :  { %v6035_v48 = vmul.f32 -1.442695, %v1724_v59 }
 0x25c   :  { %v6330_v56 = vpop.eup %6329  ;;  %6333 = vrcp.f32 %v1763_v4  ;;  %v1736_v17 = vpop.f32.mrf.mxu2  ;;  %vm1785_vm0 = vweird.f32 %v1763_v4 }
 0x25d   :  { %v1766_v12 = vmul.f32 %v6330_v56, %v1762_v54  ;;  %6335 = vpow2.f32 %v6035_v48  ;;  %v1737_v24 = vadd.f32 %v1736_v17, %v7785_v34  ;;  %v7788_v30 = vpop.f32.mrf.mxu3  ;;  %v6332_v20 = vpop.eup %6331  ;;  %vm1771_vm12 = vweird.f32 %v6330_v56 }
 0x25e   :  { %v1712_v10 = vpop.f32.mrf.mxu0  ;;  %v7791_v31 = vadd.f32 1.0, %v6332_v20  ;;  %v1776_v48 = vand.u32 2147483648, %v1762_v54  ;;  %v1791_v20 = vand.u32 2147483648, %v1763_v4  ;;  %vm1772_vm14 = vmor %vm1770_vm13, %vm1771_vm12 }
 0x25f   :  { %v1767_v42 = vsub.f32 1.0, %v1766_v12  ;;  %v2034_v52 = vpop.f32.mrf.mxu1  ;;  %v1750_v25 = vadd.f32 %v7541_v5, %v1737_v24  ;;  %v1774_v10 = vand.u32 2147483647, %v1762_v54  ;;  %v10343_v5 = vld [vmem:[#allocation89_spill] sm:$0xff] }
 0x260   :  { %v10342_v52 = vld [vmem:[#allocation94_spill] sm:$0xff]  ;;  %v1777_v63 = vor.u32 1.1754944e-38, %v1776_v48  ;;  %v1792_v11 = vor.u32 1.1754944e-38, %v1791_v20  ;;  %vm1920_vm9 = vweird.f32 %v7791_v31 }
 0x261   :  { %v1768_v33 = vmul.f32 %v6330_v56, %v1767_v42  ;;  %6337 = vtanh.f32 %v1750_v25  ;;  %v223_v24 = vadd.f32 %v10343_v5, %v10342_v52  ;;  %vm1775_vm1 = vcmp.eq.f32.partialorder %v1774_v10, 8.507059e+37 }
 0x262   :  { %v6334_v6 = vpop.eup %6333  ;;  %6339 = vrcp.f32 %v7791_v31 }
 0x263   :  { %v6336_v51 = vpop.eup %6335  ;;  %v1781_v59 = vmul.f32 %v6334_v6, %v1763_v4  ;;  %v1769_v43 = vadd.f32 %v6330_v56, %v1768_v33  ;;  %vm1786_vm15 = vweird.f32 %v6334_v6  ;;  %v1789_v33 = vand.u32 2147483647, %v1763_v4 }
 0x264   :  { %v1764_v16 = vadd.f32 1.0, %v6336_v51  ;;  %v1738_v17 = vpop.f32.mrf.mxu2  ;;  %vm1787_vm2 = vmor %vm1785_vm0, %vm1786_vm15 }
 0x265   :  { %v1782_v34 = vsub.f32 1.0, %v1781_v59  ;;  %v2060_v12 = vpop.f32.mrf.mxu3  ;;  %v1773_v8 = vsel %vm1772_vm14, %v6330_v56, %v1769_v43  ;;  %vm1790_vm3 = vcmp.eq.f32.partialorder %v1789_v33, 8.507059e+37  ;;  %v10345_v43 = vld [vmem:[#allocation95_spill] sm:$0xff] }
 0x266   :  { %6341 = vrcp.f32 %v1764_v16  ;;  %v1778_v54 = vsel %vm1775_vm1, %v1777_v63, %v1773_v8  ;;  %vm1800_vm5 = vweird.f32 %v1764_v16 }
 0x267   :  { %v1783_v42 = vmul.f32 %v6334_v6, %v1782_v34  ;;  %v1841_v51 = vpop.f32.mrf.mxu0  ;;  %v6338_v59 = vpop.eup %6337  ;;  %v10344_v34 = vld [vmem:[#allocation106_spill] sm:$0xff] }
 0x268   :  { %v1884_v25 = vadd.f32 %v1841_v51, %v223_v24  ;;  %v7796_v0 = vpop.eup %6339  ;;  %v281_v56 = vadd.f32 %v10345_v43, %v10344_v34  ;;  %v1812_v4 = vmul.f32 %v6338_v59, %v1778_v54 }
 0x269   :  { %v1784_v17 = vadd.f32 %v6334_v6, %v1783_v42  ;;  %v1916_v8 = vmul.f32 %v7796_v0, %v7791_v31  ;;  %vm1921_vm8 = vweird.f32 %v7796_v0 }
 0x26a   :  { %v6037_v12 = vmul.f32 -1.442695, %v1884_v25  ;;  %vm7816_vm10 = vmor %vm1920_vm9, %vm1921_vm8 }
 0x26b   :  { %v1788_v5 = vsel %vm1787_vm2, %v6334_v6, %v1784_v17  ;;  %v1806_v6 = vand.u32 2147483648, %v1764_v16  ;;  %v1804_v17 = vand.u32 2147483647, %v1764_v16  ;;  %v1917_v54 = vsub.f32 1.0, %v1916_v8 }
 0x26c   :  { %v6342_v52 = vpop.eup %6341  ;;  %v1793_v7 = vsel %vm1790_vm3, %v1792_v11, %v1788_v5  ;;  %6343 = vpow2.f32 %v6037_v12 }
 0x26d   :  { %v1796_v48 = vmul.f32 %v6342_v52, %v1764_v16  ;;  %v1811_v24 = vmul.f32 0.0, %v1793_v7  ;;  %v1867_v10 = vpop.f32.mrf.mxu2  ;;  %vm1801_vm4 = vweird.f32 %v6342_v52  ;;  %v1807_v12 = vor.u32 1.1754944e-38, %v1806_v6 }
 0x26e   :  { %v1886_v42 = vadd.f32 %v1867_v10, %v281_v56  ;;  %vm1802_vm6 = vmor %vm1800_vm5, %vm1801_vm4  ;;  %vm1805_vm7 = vcmp.eq.f32.partialorder %v1804_v17, 8.507059e+37  ;;  %v1926_v6 = vand.u32 2147483648, %v7791_v31  ;;  %v7830_v17 = vmul.f32 %v7476_v55, %v7488_v21 }
 0x26f   :  { %v1797_v51 = vsub.f32 1.0, %v1796_v48  ;;  %v7800_v20 = vadd.f32 %v1812_v4, %v1811_v24  ;;  %v1843_v63 = vpop.f32.mrf.mxu0  ;;  %v1918_v4 = vmul.f32 %v7796_v0, %v1917_v54  ;;  %v10349_v54 = vld [vmem:[#allocation21_spill] sm:$0xff] }
 0x270   :  { %v6039_v33 = vmul.f32 -1.442695, %v1886_v42 }
 0x271   :  { %v1798_v25 = vmul.f32 %v6342_v52, %v1797_v51  ;;  %6345 = vtanh.f32 %v7800_v20  ;;  %v1919_v16 = vadd.f32 %v7796_v0, %v1918_v4 }
 0x272   :  { %v6344_v11 = vpop.eup %6343  ;;  %6347 = vpow2.f32 %v6039_v33  ;;  %v1924_v33 = vand.u32 2147483647, %v7791_v31 }
 0x273   :  { %v1799_v7 = vadd.f32 %v6342_v52, %v1798_v25  ;;  %v1897_v59 = vadd.f32 1.0, %v6344_v11 }
 0x274   :  { %vm1925_vm12 = vcmp.eq.f32.partialorder %v1924_v33, 8.507059e+37 }
 0x275   :  { %v1803_v5 = vsel %vm1802_vm6, %v6342_v52, %v1799_v7  ;;  %6349 = vrcp.f32 %v1897_v59  ;;  %v1869_v43 = vpop.f32.mrf.mxu2  ;;  %v1911_v11 = vand.u32 2147483648, %v1897_v59  ;;  %v10348_v7 = vld [vmem:[#allocation17_spill] sm:$0xff]  ;;  %v1909_v31 = vand.u32 2147483647, %v1897_v59 }
 0x276   :  { %v1808_v56 = vsel %vm1805_vm7, %v1807_v12, %v1803_v5  ;;  %v1923_v12 = vsel %vm7816_vm10, %v7796_v0, %v1919_v16  ;;  %vm1905_vm13 = vweird.f32 %v1897_v59 }
 0x277   :  { %v6346_v48 = vpop.eup %6345  ;;  %vm1910_vm15 = vcmp.eq.f32.partialorder %v1909_v31, 8.507059e+37  ;;  %v10354_v31 = vld [vmem:[#allocation29_spill] sm:$0xff] }
 0x278   :  { %v6348_v24 = vpop.eup %6347  ;;  %v1815_v10 = vmul.f32 %v6346_v48, %v1808_v56  ;;  %v1927_v56 = vor.u32 1.1754944e-38, %v1926_v6 }
 0x279   :  { %v1899_v42 = vadd.f32 1.0, %v6348_v24 }
 0x27a   :  { %v7807_v51 = vmul.f32 %v1815_v10, %v7488_v21  ;;  %v1928_v4 = vsel %vm1925_vm12, %v1927_v56, %v1923_v12  ;;  %v10350_v10 = vld [vmem:[#allocation20_spill] sm:$0xff] }
 0x27b   :  { %v6350_v63 = vpop.eup %6349  ;;  %6351 = vrcp.f32 %v1899_v42  ;;  %v1946_v33 = vmul.f32 %v1928_v4, %v7830_v17  ;;  %v10352_v12 = vld [vmem:[#allocation24_spill] sm:$0xff]  ;;  %v1941_v55 = vand.u32 2147483648, %v1899_v42  ;;  %vm1935_vm1 = vweird.f32 %v1899_v42 }
 0x27c   :  { %v1901_v52 = vmul.f32 %v6350_v63, %v1897_v59  ;;  %v2132_v8 = vpack.c.bf16 %v7807_v51, %v7807_v51  ;;  %6353 = vtanh.f32 %v7623_v36  ;;  %vm1906_vm11 = vweird.f32 %v6350_v63 }
 0x27d   :  { %vm1907_vm14 = vmor %vm1905_vm13, %vm1906_vm11  ;;  %v1912_v36 = vor.u32 1.1754944e-38, %v1911_v11  ;;  %v10353_v11 = vld [vmem:[#allocation28_spill] sm:$0xff]  ;;  %v1942_v4 = vor.u32 1.1754944e-38, %v1941_v55 }
 0x27e   :  { %v1902_v25 = vsub.f32 1.0, %v1901_v52  ;;  %2154 = vmatmul.bf16.vlgmr.msrb.gmra.mxu1 %v2132_v8  ;;  %2180 = vmatmul.bf16.vlgmr.msrb.gmra.mxu3 %v2132_v8  ;;  %v10351_v52 = vld [vmem:[#allocation25_spill] sm:$0xff]  ;;  %v10362_v55 = vld [vmem:[#allocation44_spill] sm:$0xff] }
 0x27f   :  { %2331 = vmatpush.bf16.msrb.mxu1 %v10348_v7  ;;  %2357 = vmatpush.bf16.msrb.mxu3 %v10349_v54 }
 0x280   :  { %v1903_v5 = vmul.f32 %v6350_v63, %v1902_v25 }
 0x281   :  { %v6352_v43 = vpop.eup %6351 }
 0x282   :  { %v1904_v48 = vadd.f32 %v6350_v63, %v1903_v5  ;;  %v1931_v24 = vmul.f32 %v6352_v43, %v1899_v42  ;;  %v6354_v25 = vpop.eup %6353  ;;  %vm1936_vm0 = vweird.f32 %v6352_v43 }
 0x283   :  { %2332 = vmatpush.bf16.msrb.mxu1 %v10350_v10  ;;  %2358 = vmatpush.bf16.msrb.mxu3 %v10351_v52  ;;  %vm1937_vm2 = vmor %vm1935_vm1, %vm1936_vm0 }
 0x284   :  { %v1908_v0 = vsel %vm1907_vm14, %v6350_v63, %v1904_v48  ;;  %v1932_v16 = vsub.f32 1.0, %v1931_v24  ;;  %v1939_v63 = vand.u32 2147483647, %v1899_v42  ;;  %v10355_v48 = vld [vmem:[#allocation32_spill] sm:$0xff]  ;;  %v10358_v42 = vld [vmem:[#allocation37_spill] sm:$0xff] }
 0x285   :  { %v1913_v6 = vsel %vm1910_vm15, %v1912_v36, %v1908_v0  ;;  %v10356_v36 = vld [vmem:[#allocation33_spill] sm:$0xff]  ;;  %v10357_v0 = vld [vmem:[#allocation36_spill] sm:$0xff] }
 0x286   :  { %v1947_v59 = vmul.f32 %v6354_v25, %v1913_v6  ;;  %v1933_v5 = vmul.f32 %v6352_v43, %v1932_v16  ;;  %vm1940_vm3 = vcmp.eq.f32.partialorder %v1939_v63, 8.507059e+37 }
 0x287   :  { %2333 = vmatpush.bf16.msrb.mxu1 %v10352_v12  ;;  %2359 = vmatpush.bf16.msrb.mxu3 %v10353_v11 }
 0x288   :  { %v7835_v56 = vadd.f32 %v1947_v59, %v1946_v33  ;;  %v1934_v34 = vadd.f32 %v6352_v43, %v1933_v5  ;;  %v10359_v59 = vld [vmem:[#allocation41_spill] sm:$0xff]  ;;  %v7845_v5 = vpop.permute.xlu0 %1825 }
 0x28a   :  { %6355 = vtanh.f32 %v7835_v56  ;;  %v1938_v24 = vsel %vm1937_vm2, %v6352_v43, %v1934_v34  ;;  %v10361_v43 = vld [vmem:[#allocation40_spill] sm:$0xff] }
 0x28b   :  { %2334 = vmatpush.bf16.msrb.mxu1 %v10354_v31  ;;  %2360 = vmatpush.bf16.msrb.mxu3 %v10355_v48  ;;  %v1943_v25 = vsel %vm1940_vm3, %v1942_v4, %v1938_v24  ;;  %v10363_v24 = vld [vmem:[#allocation45_spill] sm:$0xff]  ;;  %v10364_v4 = vld [vmem:[#allocation47_spill] sm:$0xff] }
 0x28e   :  { %2206 = vmatmul.bf16.vlgmr.msra.gmra.mxu1 %v2132_v8  ;;  %2232 = vmatmul.bf16.vlgmr.msra.gmra.mxu3 %v2132_v8 }
 0x28f   :  { %2335 = vmatpush.bf16.msrb.mxu1 %v10356_v36  ;;  %2361 = vmatpush.bf16.msrb.mxu3 %v10357_v0  ;;  %v10425_v36 = vld [vmem:[#allocation111_spill] sm:$0xff] }
 0x290   :  { %v6356_v16 = vpop.eup %6355 }
 0x291   :  { %v1950_v6 = vmul.f32 %v6356_v16, %v1943_v25  ;;  %v10366_v16 = vld [vmem:[#allocation49_spill] sm:$0xff]  ;;  %v10367_v25 = vld [vmem:[#allocation50_spill] sm:$0xff] }
 0x293   :  { %v1951_v33 = vsub.f32 %v1950_v6, %v7491_v45  ;;  %2336 = vmatpush.bf16.msrb.mxu1 %v10358_v42  ;;  %2362 = vmatpush.bf16.msrb.mxu3 %v10359_v59  ;;  %v10368_v6 = vld [vmem:[#allocation52_spill] sm:$0xff] }
 0x295   :  { %v1952_v34 = vmul.f32 %v1951_v33, %v7845_v5  ;;  %v10369_v33 = vld [vmem:[#allocation53_spill] sm:$0xff] }
 0x297   :  { %v7849_v8 = vadd.f32 %v1952_v34, %v7491_v45  ;;  %2337 = vmatpush.bf16.msrb.mxu1 %v10361_v43  ;;  %2363 = vmatpush.bf16.msrb.mxu3 %v10362_v55  ;;  %v10365_v45 = vld [vmem:[#allocation48_spill] sm:$0xff]  ;;  %v10370_v34 = vld [vmem:[#allocation182_spill] sm:$0xff] }
 0x299   :  { %10360 = vst [vmem:[#allocation19_spill] sm:$0xff] %v7849_v8  ;;  %v7855_v63 = vpack.c.bf16 %v7849_v8, %v7849_v8 }
 0x29b   :  { %1966 = vmatmul.bf16.vlgmr.msrb.gmra.mxu0 %v7855_v63  ;;  %1992 = vmatmul.bf16.vlgmr.msrb.gmra.mxu2 %v7855_v63 }
 0x29c   :  { %2338 = vmatpush.bf16.msrb.mxu1 %v10363_v24  ;;  %2364 = vmatpush.bf16.msrb.mxu3 %v10364_v4  ;;  %v10422_v24 = vld [vmem:[#allocation193_spill] sm:$0xff] }
 0x29d   :  { %2133 = vmatpush.bf16.msrb.mxu0 %v7533_v38  ;;  %2159 = vmatpush.bf16.msrb.mxu2 %v7535_v46 }
 0x29f   :  { %2339 = vmatmul.bf16.vlgmr.msrb.gmra.mxu1 %v7855_v63  ;;  %2365 = vmatmul.bf16.vlgmr.msrb.gmra.mxu3 %v7855_v63 }
 0x2a0   :  { %2457 = vmatpush.bf16.msra.mxu1 %v10365_v45  ;;  %2483 = vmatpush.bf16.msra.mxu3 %v10366_v16  ;;  %v10371_v16 = vld [vmem:[#allocation183_spill] sm:$0xff]  ;;  %v10372_v45 = vld [vmem:[#allocation54_spill] sm:$0xff] }
 0x2a1   :  { %2134 = vmatpush.bf16.msrb.mxu0 %v7543_v58  ;;  %2160 = vmatpush.bf16.msrb.mxu2 %v7545_v3  ;;  %v10373_v58 = vld [vmem:[#allocation55_spill] sm:$0xff]  ;;  %v10384_v3 = vld [vmem:[#allocation60_spill] sm:$0xff] }
 0x2a4   :  { %2458 = vmatpush.bf16.msra.mxu1 %v10367_v25  ;;  %2484 = vmatpush.bf16.msra.mxu3 %v7032_v27  ;;  %v10374_v27 = vld [vmem:[#allocation184_spill] sm:$0xff]  ;;  %v10375_v25 = vld [vmem:[#allocation185_spill] sm:$0xff] }
 0x2a5   :  { %2135 = vmatpush.bf16.msrb.mxu0 %v7549_v57  ;;  %2161 = vmatpush.bf16.msrb.mxu2 %v7551_v40  ;;  %v10376_v40 = vld [vmem:[#allocation56_spill] sm:$0xff]  ;;  %v10383_v57 = vld [vmem:[#allocation189_spill] sm:$0xff] }
 0x2a8   :  { %2459 = vmatpush.bf16.msra.mxu1 %v10368_v6  ;;  %2485 = vmatpush.bf16.msra.mxu3 %v10369_v33  ;;  %v10377_v6 = vld [vmem:[#allocation57_spill] sm:$0xff]  ;;  %v10378_v33 = vld [vmem:[#allocation186_spill] sm:$0xff] }
 0x2a9   :  { %2136 = vmatpush.bf16.msrb.mxu0 %v10370_v34  ;;  %2162 = vmatpush.bf16.msrb.mxu2 %v10371_v16  ;;  %v10379_v34 = vld [vmem:[#allocation187_spill] sm:$0xff]  ;;  %v10380_v16 = vld [vmem:[#allocation58_spill] sm:$0xff] }
 0x2ab   :  { %2018 = vmatmul.bf16.vlgmr.msra.gmra.mxu0 %v7855_v63  ;;  %2044 = vmatmul.bf16.vlgmr.msra.gmra.mxu2 %v7855_v63 }
 0x2ac   :  { %2460 = vmatpush.bf16.msra.mxu1 %v10372_v45  ;;  %2486 = vmatpush.bf16.msra.mxu3 %v10373_v58  ;;  %v10381_v45 = vld [vmem:[#allocation59_spill] sm:$0xff]  ;;  %v10382_v58 = vld [vmem:[#allocation188_spill] sm:$0xff] }
 0x2ad   :  { %2137 = vmatpush.bf16.msrb.mxu0 %v10374_v27  ;;  %2163 = vmatpush.bf16.msrb.mxu2 %v10375_v25  ;;  %v10385_v27 = vld [vmem:[#allocation61_spill] sm:$0xff]  ;;  %v10386_v25 = vld [vmem:[#allocation190_spill] sm:$0xff] }
 0x2b0   :  { %2461 = vmatpush.bf16.msra.mxu1 %v10376_v40  ;;  %2487 = vmatpush.bf16.msra.mxu3 %v10377_v6  ;;  %v10387_v40 = vld [vmem:[#allocation191_spill] sm:$0xff]  ;;  %v10388_v6 = vld [vmem:[#allocation192_spill] sm:$0xff] }
 0x2b1   :  { %2138 = vmatpush.bf16.msrb.mxu0 %v10378_v33  ;;  %2164 = vmatpush.bf16.msrb.mxu2 %v10379_v34  ;;  %v10389_v33 = vld [vmem:[#allocation194_spill] sm:$0xff] }
 0x2b2   :  { %v10390_v34 = vld [vmem:[#allocation62_spill] sm:$0xff] }
 0x2b4   :  { %2462 = vmatpush.bf16.msra.mxu1 %v10380_v16  ;;  %2488 = vmatpush.bf16.msra.mxu3 %v10381_v45  ;;  %v10391_v16 = vld [vmem:[#allocation63_spill] sm:$0xff]  ;;  %v10392_v45 = vld [vmem:[#allocation64_spill] sm:$0xff] }
 0x2b5   :  { %2139 = vmatpush.bf16.msrb.mxu0 %v10382_v58  ;;  %2165 = vmatpush.bf16.msrb.mxu2 %v10383_v57  ;;  %v10393_v58 = vld [vmem:[#allocation65_spill] sm:$0xff]  ;;  %v10394_v57 = vld [vmem:[#allocation91_spill] sm:$0xff] }
 0x2b8   :  { %2463 = vmatpush.bf16.msra.mxu1 %v10384_v3  ;;  %2489 = vmatpush.bf16.msra.mxu3 %v10385_v27  ;;  %v10395_v3 = vld [vmem:[#allocation195_spill] sm:$0xff]  ;;  %v10396_v27 = vld [vmem:[#allocation66_spill] sm:$0xff] }
 0x2b9   :  { %2140 = vmatpush.bf16.msrb.mxu0 %v10386_v25  ;;  %2166 = vmatpush.bf16.msrb.mxu2 %v10387_v40  ;;  %v10397_v25 = vld [vmem:[#allocation67_spill] sm:$0xff]  ;;  %v10398_v40 = vld [vmem:[#allocation197_spill] sm:$0xff] }
 0x2bc   :  { %2464 = vmatpush.bf16.msra.mxu1 %v10390_v34  ;;  %2490 = vmatpush.bf16.msra.mxu3 %v10391_v16  ;;  %v10401_v34 = vld [vmem:[#allocation69_spill] sm:$0xff]  ;;  %v10402_v16 = vld [vmem:[#allocation98_spill] sm:$0xff] }
 0x2bd   :  { %2185 = vmatpush.bf16.msra.mxu0 %v10388_v6  ;;  %2211 = vmatpush.bf16.msra.mxu2 %v10389_v33  ;;  %v10399_v6 = vld [vmem:[#allocation198_spill] sm:$0xff]  ;;  %v10400_v33 = vld [vmem:[#allocation68_spill] sm:$0xff] }
 0x2c0   :  { %2509 = vmatpush.bf16.msrb.mxu1 %v10392_v45  ;;  %2535 = vmatpush.bf16.msrb.mxu3 %v10393_v58  ;;  %v10403_v45 = vld [vmem:[#allocation199_spill] sm:$0xff]  ;;  %v10404_v58 = vld [vmem:[#allocation70_spill] sm:$0xff] }
 0x2c1   :  { %2186 = vmatpush.bf16.msra.mxu0 %v10394_v57  ;;  %2212 = vmatpush.bf16.msra.mxu2 %v10395_v3  ;;  %v10405_v57 = vld [vmem:[#allocation71_spill] sm:$0xff]  ;;  %v10406_v3 = vld [vmem:[#allocation200_spill] sm:$0xff] }
 0x2c4   :  { %2510 = vmatpush.bf16.msrb.mxu1 %v10396_v27  ;;  %2536 = vmatpush.bf16.msrb.mxu3 %v10397_v25  ;;  %v10407_v27 = vld [vmem:[#allocation202_spill] sm:$0xff]  ;;  %v10408_v25 = vld [vmem:[#allocation72_spill] sm:$0xff] }
 0x2c5   :  { %2187 = vmatpush.bf16.msra.mxu0 %v10398_v40  ;;  %2213 = vmatpush.bf16.msra.mxu2 %v10399_v6  ;;  %v10409_v40 = vld [vmem:[#allocation73_spill] sm:$0xff]  ;;  %v10410_v6 = vld [vmem:[#allocation203_spill] sm:$0xff] }
 0x2c8   :  { %2511 = vmatpush.bf16.msrb.mxu1 %v10400_v33  ;;  %2537 = vmatpush.bf16.msrb.mxu3 %v10401_v34  ;;  %v10411_v33 = vld [vmem:[#allocation205_spill] sm:$0xff]  ;;  %v10412_v34 = vld [vmem:[#allocation74_spill] sm:$0xff] }
 0x2c9   :  { %2188 = vmatpush.bf16.msra.mxu0 %v10402_v16  ;;  %2214 = vmatpush.bf16.msra.mxu2 %v10403_v45  ;;  %v10413_v16 = vld [vmem:[#allocation75_spill] sm:$0xff]  ;;  %v10414_v45 = vld [vmem:[#allocation206_spill] sm:$0xff] }
 0x2cc   :  { %2512 = vmatpush.bf16.msrb.mxu1 %v10404_v58  ;;  %2538 = vmatpush.bf16.msrb.mxu3 %v10405_v57  ;;  %v10415_v58 = vld [vmem:[#allocation207_spill] sm:$0xff]  ;;  %v10416_v57 = vld [vmem:[#allocation76_spill] sm:$0xff] }
 0x2cd   :  { %2189 = vmatpush.bf16.msra.mxu0 %v10406_v3  ;;  %2215 = vmatpush.bf16.msra.mxu2 %v10407_v27  ;;  %v10417_v3 = vld [vmem:[#allocation77_spill] sm:$0xff]  ;;  %v10418_v27 = vld [vmem:[#allocation208_spill] sm:$0xff] }
 0x2d0   :  { %2513 = vmatpush.bf16.msrb.mxu1 %v10408_v25  ;;  %2539 = vmatpush.bf16.msrb.mxu3 %v10409_v40  ;;  %v10419_v25 = vld [vmem:[#allocation209_spill] sm:$0xff]  ;;  %v10420_v40 = vld [vmem:[#allocation78_spill] sm:$0xff] }
 0x2d1   :  { %2190 = vmatpush.bf16.msra.mxu0 %v10410_v6  ;;  %2216 = vmatpush.bf16.msra.mxu2 %v10411_v33  ;;  %v10421_v6 = vld [vmem:[#allocation79_spill] sm:$0xff] }
 0x2d4   :  { %2514 = vmatpush.bf16.msrb.mxu1 %v10412_v34  ;;  %2540 = vmatpush.bf16.msrb.mxu3 %v10413_v16 }
 0x2d5   :  { %2191 = vmatpush.bf16.msra.mxu0 %v10414_v45  ;;  %2217 = vmatpush.bf16.msra.mxu2 %v10415_v58 }
 0x2d8   :  { %2515 = vmatpush.bf16.msrb.mxu1 %v10416_v57  ;;  %2541 = vmatpush.bf16.msrb.mxu3 %v10417_v3 }
 0x2d9   :  { %2192 = vmatpush.bf16.msra.mxu0 %v10418_v27  ;;  %2218 = vmatpush.bf16.msra.mxu2 %v10419_v25 }
 0x2dc   :  { %2516 = vmatpush.bf16.msrb.mxu1 %v10420_v40  ;;  %2542 = vmatpush.bf16.msrb.mxu3 %v10421_v6  ;;  %v10423_v6 = vld [vmem:[#allocation101_spill] sm:$0xff] }
 0x2fb   :  { %v7929_v33 = vpop.f32.mrf.mxu1 }
 0x301   :  { %v7931_v34 = vpop.f32.mrf.mxu3 }
 0x303   :  { %v2157_v16 = vpop.f32.mrf.mxu1 }
 0x304   :  { %v10424_v16 = vld [vmem:[#allocation196_spill] sm:$0xff] }
 0x309   :  { %v2183_v45 = vpop.f32.mrf.mxu3 }
 0x30b   :  { %v7933_v4 = vpop.f32.mrf.mxu1 }
 0x311   :  { %v7935_v58 = vpop.f32.mrf.mxu3 }
 0x313   :  { %v2209_v57 = vpop.f32.mrf.mxu1 }
 0x318   :  { %v1967_v3 = vpop.f32.mrf.mxu0 }
 0x319   :  { %v1968_v27 = vadd.f32 %v1967_v3, %v10422_v24  ;;  %v2235_v46 = vpop.f32.mrf.mxu3 }
 0x31b   :  { %v1981_v25 = vadd.f32 %v7769_v2, %v1968_v27 }
 0x31c   :  { %v2340_v40 = vpop.f32.mrf.mxu1 }
 0x31d   :  { %v6040_v38 = vmul.f32 -1.442695, %v1981_v25  ;;  %v7940_v55 = vadd.f32 %v2340_v40, %v10423_v6  ;;  %v10426_v25 = vld [vmem:[#allocation201_spill] sm:$0xff] }
 0x31e   :  { %v1993_v43 = vpop.f32.mrf.mxu2 }
 0x31f   :  { %6357 = vpow2.f32 %v6040_v38  ;;  %v1994_v45 = vadd.f32 %v1993_v43, %v10424_v16 }
 0x320   :  { %v1969_v59 = vpop.f32.mrf.mxu0 }
 0x321   :  { %v2007_v42 = vadd.f32 %v7775_v60, %v1994_v45 }
 0x322   :  { %v2366_v0 = vpop.f32.mrf.mxu3 }
 0x323   :  { %v6041_v57 = vmul.f32 -1.442695, %v2007_v42  ;;  %v7945_v8 = vadd.f32 %v2366_v0, %v10425_v36  ;;  %v10427_v0 = vld [vmem:[#allocation204_spill] sm:$0xff] }
 0x324   :  { %v2342_v46 = vpop.f32.mrf.mxu1 }
 0x325   :  { %v6358_v3 = vpop.eup %6357  ;;  %6359 = vpow2.f32 %v6041_v57 }
 0x326   :  { %v2071_v27 = vadd.f32 1.0, %v6358_v3  ;;  %v1995_v2 = vpop.f32.mrf.mxu2 }
 0x328   :  { %6361 = vrcp.f32 %v2071_v27  ;;  %v2019_v40 = vpop.f32.mrf.mxu0  ;;  %vm2079_vm5 = vweird.f32 %v2071_v27  ;;  %v2083_v31 = vand.u32 2147483647, %v2071_v27 }
 0x329   :  { %v2020_v6 = vadd.f32 %v2019_v40, %v10426_v25 }
 0x32a   :  { %v2368_v38 = vpop.f32.mrf.mxu3  ;;  %vm2084_vm9 = vcmp.eq.f32.partialorder %v2083_v31, 8.507059e+37 }
 0x32b   :  { %v6360_v24 = vpop.eup %6359  ;;  %v2033_v59 = vadd.f32 %v7782_v28, %v2020_v6 }
 0x32c   :  { %v2072_v43 = vadd.f32 1.0, %v6360_v24  ;;  %v2085_v24 = vand.u32 2147483648, %v2071_v27 }
 0x32d   :  { %v6042_v60 = vmul.f32 -1.442695, %v2033_v59 }
 0x32e   :  { %v6362_v45 = vpop.eup %6361  ;;  %6363 = vrcp.f32 %v2072_v43  ;;  %v2045_v42 = vpop.f32.mrf.mxu2  ;;  %vm2094_vm8 = vweird.f32 %v2072_v43 }
 0x32f   :  { %v2075_v36 = vmul.f32 %v6362_v45, %v2071_v27  ;;  %6365 = vpow2.f32 %v6042_v60  ;;  %v2046_v46 = vadd.f32 %v2045_v42, %v10427_v0  ;;  %vm2080_vm4 = vweird.f32 %v6362_v45 }
 0x330   :  { %v2021_v57 = vpop.f32.mrf.mxu0  ;;  %v2100_v60 = vand.u32 2147483648, %v2072_v43  ;;  %vm2081_vm6 = vmor %vm2079_vm5, %vm2080_vm4 }
 0x331   :  { %v2076_v3 = vsub.f32 1.0, %v2075_v36  ;;  %v2059_v2 = vadd.f32 %v7788_v30, %v2046_v46  ;;  %v2098_v30 = vand.u32 2147483647, %v2072_v43  ;;  %v2086_v46 = vor.u32 1.1754944e-38, %v2085_v24 }
 0x333   :  { %v2077_v16 = vmul.f32 %v6362_v45, %v2076_v3  ;;  %6367 = vtanh.f32 %v2059_v2  ;;  %v2101_v3 = vor.u32 1.1754944e-38, %v2100_v60  ;;  %v1262_v2 = vmul.f32 %v7673_v39, %v7488_v21 }
 0x334   :  { %v6364_v48 = vpop.eup %6363  ;;  %vm2099_vm11 = vcmp.eq.f32.partialorder %v2098_v30, 8.507059e+37 }
 0x335   :  { %v6366_v40 = vpop.eup %6365  ;;  %v2090_v38 = vmul.f32 %v6364_v48, %v2072_v43  ;;  %v2078_v25 = vadd.f32 %v6362_v45, %v2077_v16  ;;  %vm2095_vm7 = vweird.f32 %v6364_v48 }
 0x336   :  { %v2073_v28 = vadd.f32 1.0, %v6366_v40  ;;  %v2047_v6 = vpop.f32.mrf.mxu2  ;;  %vm2096_vm10 = vmor %vm2094_vm8, %vm2095_vm7 }
 0x337   :  { %v2091_v59 = vsub.f32 1.0, %v2090_v38  ;;  %v2082_v36 = vsel %vm2081_vm6, %v6362_v45, %v2078_v25 }
 0x338   :  { %6369 = vrcp.f32 %v2073_v28  ;;  %v2087_v40 = vsel %vm2084_vm9, %v2086_v46, %v2082_v36  ;;  %v2113_v24 = vand.u32 2147483647, %v2073_v28  ;;  %v2115_v43 = vand.u32 2147483648, %v2073_v28 }
 0x339   :  { %v2092_v42 = vmul.f32 %v6364_v48, %v2091_v59  ;;  %v6368_v16 = vpop.eup %6367  ;;  %vm2109_vm13 = vweird.f32 %v2073_v28 }
 0x33a   :  { %v2121_v11 = vmul.f32 %v6368_v16, %v2087_v40  ;;  %v2116_v39 = vor.u32 1.1754944e-38, %v2115_v43  ;;  %vm2114_vm15 = vcmp.eq.f32.partialorder %v2113_v24, 8.507059e+37  ;;  %v6677_v40 = vld [vmem:[%s9685_s0] sm:$0xff]  ;;  %v10434_v43 = vld [vmem:[#allocation34_spill] sm:$0xff] }
 0x33b   :  { %v2093_v57 = vadd.f32 %v6364_v48, %v2092_v42  ;;  %vm2306_vm0 = vcmp.gt.s32.totalorder %v6677_v40, 2  ;;  %vm2792_vm1 = vcmp.gt.s32.totalorder %v6677_v40, 3  ;;  %vm4736_vm2 = vcmp.gt.s32.totalorder %v6677_v40, 7  ;;  %v10433_v24 = vld [vmem:[#allocation31_spill] sm:$0xff]  ;;  %v10447_v40 = vld [vmem:[#allocation122_spill] sm:$0xff] }
 0x33d   :  { %v2097_v38 = vsel %vm2096_vm10, %v6364_v48, %v2093_v57 }
 0x33e   :  { %v6370_v27 = vpop.eup %6369  ;;  %v2102_v6 = vsel %vm2099_vm11, %v2101_v3, %v2097_v38 }
 0x33f   :  { %v2105_v0 = vmul.f32 %v6370_v27, %v2073_v28  ;;  %v2120_v59 = vmul.f32 %v2102_v6, %v1262_v2  ;;  %vm2110_vm12 = vweird.f32 %v6370_v27  ;;  %v10430_v6 = vld [vmem:[#allocation27_spill] sm:$0xff] }
 0x340   :  { %vm2111_vm14 = vmor %vm2109_vm13, %vm2110_vm12 }
 0x341   :  { %v2106_v25 = vsub.f32 1.0, %v2105_v0  ;;  %v2122_v45 = vadd.f32 %v2121_v11, %v2120_v59  ;;  %v10431_v59 = vld [vmem:[#allocation30_spill] sm:$0xff] }
 0x343   :  { %v2107_v31 = vmul.f32 %v6370_v27, %v2106_v25  ;;  %6371 = vtanh.f32 %v2122_v45  ;;  %v2128_v42 = vsub.f32 %v2122_v45, %v1262_v2  ;;  %v10432_v25 = vld [vmem:[#allocation86_spill] sm:$0xff] }
 0x345   :  { %v2108_v60 = vadd.f32 %v6370_v27, %v2107_v31  ;;  %v2129_v36 = vmul.f32 %v2128_v42, %v7845_v5  ;;  %v10435_v31 = vld [vmem:[#allocation87_spill] sm:$0xff]  ;;  %v10436_v42 = vld [vmem:[#allocation88_spill] sm:$0xff] }
 0x347   :  { %v2112_v48 = vsel %vm2111_vm14, %v6370_v27, %v2108_v60  ;;  %v7954_v30 = vadd.f32 %v2129_v36, %v1262_v2  ;;  %v10428_v2 = vmov 0.0   ;;  %v10429_v27 = vld [vmem:[#allocation85_spill] sm:$0xff]  ;;  %v10437_v60 = vld [vmem:[#allocation35_spill] sm:$0xff]  ;;  %v10438_v36 = vld [vmem:[#allocation38_spill] sm:$0xff] }
 0x348   :  { %v2117_v46 = vsel %vm2114_vm15, %v2116_v39, %v2112_v48  ;;  %v6046_v38 = vsel %vm2306_vm0, 1.0, %v10428_v2  ;;  %v6096_v45 = vsel %vm4736_vm2, 1.0, %v10428_v2  ;;  %v10439_v39 = vld [vmem:[#allocation90_spill] sm:$0xff]  ;;  %v10440_v48 = vld [vmem:[#allocation92_spill] sm:$0xff] }
 0x349   :  { %v6372_v57 = vpop.eup %6371  ;;  %2311 = vperm.xlu1 %6289, %v6046_v38   ;;  %v10448_v38 = vld [vmem:[#allocation102_spill] sm:$0xff] }
 0x34a   :  { %v2124_v0 = vmul.f32 %v6372_v57, %v2117_v46  ;;  %v10441_v46 = vld [vmem:[#allocation42_spill] sm:$0xff]  ;;  %v10442_v57 = vld [vmem:[#allocation93_spill] sm:$0xff] }
 0x34c   :  { %v2125_v11 = vsub.f32 %v2124_v0, %v7677_v32  ;;  %v10443_v0 = vld [vmem:[#allocation96_spill] sm:$0xff] }
 0x34e   :  { %v2126_v16 = vmul.f32 %v2125_v11, %v7845_v5  ;;  %v10444_v11 = vld [vmem:[#allocation43_spill] sm:$0xff] }
 0x350   :  { %v7959_v3 = vadd.f32 %v2126_v16, %v7677_v32  ;;  %v6056_v32 = vsel %vm2792_vm1, 1.0, %v10428_v2  ;;  %v10445_v16 = vld [vmem:[#allocation46_spill] sm:$0xff]  ;;  %v10451_v2 = vld [vmem:[#allocation105_spill] sm:$0xff] }
 0x351   :  { %2797 = vperm.xlu1 %6289, %v6056_v32   ;;  %v10449_v32 = vld [vmem:[#allocation104_spill] sm:$0xff] }
 0x352   :  { %v2131_v28 = vpack.c.bf16 %v7959_v3, %v7959_v3 }
 0x354   :  { %2141 = vmatmul.bf16.vlgmr.msrb.gmra.mxu0 %v2131_v28  ;;  %2167 = vmatmul.bf16.vlgmr.msrb.gmra.mxu2 %v2131_v28 }
 0x355   :  { %2465 = vmatmul.bf16.vlgmr.msra.gmra.mxu1 %v2131_v28  ;;  %2491 = vmatmul.bf16.vlgmr.msra.gmra.mxu3 %v2131_v28 }
 0x356   :  { %2318 = vmatpush.bf16.msrb.mxu0 %v10281_v23  ;;  %2344 = vmatpush.bf16.msrb.mxu2 %v10282_v26 }
 0x357   :  { %2632 = vmatpush.bf16.msra.mxu1 %v10283_v22  ;;  %2658 = vmatpush.bf16.msra.mxu3 %v10284_v37 }
 0x359   :  { %4741 = vperm.xlu1 %6289, %v6096_v45   ;;  %v10450_v45 = vld [vmem:[#allocation103_spill] sm:$0xff] }
 0x35a   :  { %2319 = vmatpush.bf16.msrb.mxu0 %v10285_v62  ;;  %2345 = vmatpush.bf16.msrb.mxu2 %v10286_v53 }
 0x35b   :  { %2633 = vmatpush.bf16.msra.mxu1 %v10287_v18  ;;  %2659 = vmatpush.bf16.msra.mxu3 %v10288_v13 }
 0x35e   :  { %2320 = vmatpush.bf16.msrb.mxu0 %v10289_v35  ;;  %2346 = vmatpush.bf16.msrb.mxu2 %v10290_v29 }
 0x35f   :  { %2634 = vmatpush.bf16.msra.mxu1 %v10291_v50  ;;  %2660 = vmatpush.bf16.msra.mxu3 %v10429_v27 }
 0x362   :  { %2321 = vmatpush.bf16.msrb.mxu0 %v10430_v6  ;;  %2347 = vmatpush.bf16.msrb.mxu2 %v10431_v59 }
 0x363   :  { %2635 = vmatpush.bf16.msra.mxu1 %v10432_v25  ;;  %2661 = vmatpush.bf16.msra.mxu3 %v10435_v31 }
 0x364   :  { %2193 = vmatmul.bf16.vlgmr.msra.gmra.mxu0 %v2131_v28  ;;  %2219 = vmatmul.bf16.vlgmr.msra.gmra.mxu2 %v2131_v28 }
 0x365   :  { %2517 = vmatmul.bf16.vlgmr.msrb.gmra.mxu1 %v2131_v28  ;;  %2543 = vmatmul.bf16.vlgmr.msrb.gmra.mxu3 %v2131_v28  ;;  %v10446_v28 = vld [vmem:[#allocation99_spill] sm:$0xff] }
 0x366   :  { %2322 = vmatpush.bf16.msrb.mxu0 %v10433_v24  ;;  %2348 = vmatpush.bf16.msrb.mxu2 %v10434_v43 }
 0x367   :  { %2636 = vmatpush.bf16.msra.mxu1 %v10436_v42  ;;  %2662 = vmatpush.bf16.msra.mxu3 %v10439_v39 }
 0x36a   :  { %2323 = vmatpush.bf16.msrb.mxu0 %v10437_v60  ;;  %2349 = vmatpush.bf16.msrb.mxu2 %v10438_v36 }
 0x36b   :  { %2637 = vmatpush.bf16.msra.mxu1 %v10440_v48  ;;  %2663 = vmatpush.bf16.msra.mxu3 %v10442_v57 }
 0x36e   :  { %2324 = vmatpush.bf16.msrb.mxu0 %v10305_v9  ;;  %2350 = vmatpush.bf16.msrb.mxu2 %v10441_v46  ;;  %v10492_v9 = vld [vmem:[#allocation100_spill] sm:$0xff] }
 0x36f   :  { %2638 = vmatpush.bf16.msra.mxu1 %v10443_v0  ;;  %2664 = vmatpush.bf16.msra.mxu3 %v10446_v28 }
 0x372   :  { %2325 = vmatpush.bf16.msrb.mxu0 %v10444_v11  ;;  %2351 = vmatpush.bf16.msrb.mxu2 %v10445_v16  ;;  %v10452_v16 = vld [vmem:[#allocation110_spill] sm:$0xff] }
 0x373   :  { %2639 = vmatpush.bf16.msra.mxu1 %v10448_v38  ;;  %2665 = vmatpush.bf16.msra.mxu3 %v10450_v45 }
 0x375   :  { %2326 = vmatmul.bf16.vlgmr.msrb.gmra.mxu0 %v7855_v63  ;;  %2352 = vmatmul.bf16.vlgmr.msrb.gmra.mxu2 %v7855_v63  ;;  %v10455_v63 = vld [vmem:[#allocation115_spill] sm:$0xff] }
 0x376   :  { %2444 = vmatpush.bf16.msra.mxu0 %v10447_v40  ;;  %2470 = vmatpush.bf16.msra.mxu2 %v10316_v61  ;;  %v10453_v40 = vld [vmem:[#allocation113_spill] sm:$0xff]  ;;  %v10454_v61 = vld [vmem:[#allocation114_spill] sm:$0xff] }
 0x377   :  { %2684 = vmatpush.bf16.msrb.mxu1 %v10449_v32  ;;  %2710 = vmatpush.bf16.msrb.mxu3 %v10451_v2 }
 0x37a   :  { %2445 = vmatpush.bf16.msra.mxu0 %v10319_v14  ;;  %2471 = vmatpush.bf16.msra.mxu2 %v10320_v47  ;;  %v10456_v14 = vld [vmem:[#allocation146_spill] sm:$0xff]  ;;  %v10457_v47 = vld [vmem:[#allocation120_spill] sm:$0xff] }
 0x37b   :  { %2685 = vmatpush.bf16.msrb.mxu1 %v10452_v16  ;;  %2711 = vmatpush.bf16.msrb.mxu3 %v10453_v40  ;;  %v10459_v40 = vld [vmem:[#allocation150_spill] sm:$0xff] }
 0x37e   :  { %2446 = vmatpush.bf16.msra.mxu0 %v10323_v19  ;;  %2472 = vmatpush.bf16.msra.mxu2 %v10324_v15  ;;  %v10458_v19 = vld [vmem:[#allocation124_spill] sm:$0xff]  ;;  %v10460_v15 = vld [vmem:[#allocation125_spill] sm:$0xff] }
 0x37f   :  { %2686 = vmatpush.bf16.msrb.mxu1 %v10454_v61  ;;  %2712 = vmatpush.bf16.msrb.mxu3 %v10455_v63  ;;  %v10461_v61 = vld [vmem:[#allocation153_spill] sm:$0xff]  ;;  %v10463_v63 = vld [vmem:[#allocation154_spill] sm:$0xff] }
 0x382   :  { %2447 = vmatpush.bf16.msra.mxu0 %v7318_v44  ;;  %2473 = vmatpush.bf16.msra.mxu2 %v7323_v49  ;;  %v10462_v44 = vld [vmem:[#allocation132_spill] sm:$0xff]  ;;  %v10464_v49 = vld [vmem:[#allocation133_spill] sm:$0xff] }
 0x383   :  { %2687 = vmatpush.bf16.msrb.mxu1 %v10325_v1  ;;  %2713 = vmatpush.bf16.msrb.mxu3 %v10457_v47  ;;  %v10465_v1 = vld [vmem:[#allocation155_spill] sm:$0xff]  ;;  %v10467_v47 = vld [vmem:[#allocation158_spill] sm:$0xff] }
 0x386   :  { %2448 = vmatpush.bf16.msra.mxu0 %v10456_v14  ;;  %2474 = vmatpush.bf16.msra.mxu2 %v7340_v41  ;;  %v10466_v14 = vld [vmem:[#allocation136_spill] sm:$0xff]  ;;  %v10468_v41 = vld [vmem:[#allocation137_spill] sm:$0xff] }
 0x387   :  { %2688 = vmatpush.bf16.msrb.mxu1 %v10458_v19  ;;  %2714 = vmatpush.bf16.msrb.mxu3 %v10460_v15  ;;  %v10469_v19 = vld [vmem:[#allocation159_spill] sm:$0xff]  ;;  %v10471_v15 = vld [vmem:[#allocation161_spill] sm:$0xff] }
 0x38a   :  { %2449 = vmatpush.bf16.msra.mxu0 %v10459_v40  ;;  %2475 = vmatpush.bf16.msra.mxu2 %v10461_v61  ;;  %v10470_v40 = vld [vmem:[#allocation160_spill] sm:$0xff]  ;;  %v10472_v61 = vld [vmem:[#allocation143_spill] sm:$0xff] }
 0x38b   :  { %2689 = vmatpush.bf16.msrb.mxu1 %v10462_v44  ;;  %2715 = vmatpush.bf16.msrb.mxu3 %v10464_v49  ;;  %v10473_v44 = vld [vmem:[#allocation145_spill] sm:$0xff]  ;;  %v10475_v49 = vld [vmem:[#allocation163_spill] sm:$0xff] }
 0x38e   :  { %2450 = vmatpush.bf16.msra.mxu0 %v10463_v63  ;;  %2476 = vmatpush.bf16.msra.mxu2 %v10465_v1  ;;  %v10474_v63 = vld [vmem:[#allocation162_spill] sm:$0xff]  ;;  %v10476_v1 = vld [vmem:[#allocation164_spill] sm:$0xff] }
 0x38f   :  { %2690 = vmatpush.bf16.msrb.mxu1 %v10466_v14  ;;  %2716 = vmatpush.bf16.msrb.mxu3 %v10468_v41  ;;  %v10477_v14 = vld [vmem:[#allocation165_spill] sm:$0xff]  ;;  %v10479_v41 = vld [vmem:[#allocation167_spill] sm:$0xff] }
 0x392   :  { %2451 = vmatpush.bf16.msra.mxu0 %v10467_v47  ;;  %2477 = vmatpush.bf16.msra.mxu2 %v10469_v19  ;;  %v10478_v47 = vld [vmem:[#allocation166_spill] sm:$0xff]  ;;  %v10480_v19 = vld [vmem:[#allocation168_spill] sm:$0xff] }
 0x393   :  { %2691 = vmatpush.bf16.msrb.mxu1 %v10472_v61  ;;  %2717 = vmatpush.bf16.msrb.mxu3 %v10473_v44  ;;  %v10483_v61 = vld [vmem:[#allocation171_spill] sm:$0xff]  ;;  %v10484_v44 = vld [vmem:[#allocation172_spill] sm:$0xff] }
 0x396   :  { %2496 = vmatpush.bf16.msrb.mxu0 %v10470_v40  ;;  %2522 = vmatpush.bf16.msrb.mxu2 %v10471_v15  ;;  %v10481_v40 = vld [vmem:[#allocation169_spill] sm:$0xff]  ;;  %v10482_v15 = vld [vmem:[#allocation170_spill] sm:$0xff] }
 0x39a   :  { %2497 = vmatpush.bf16.msrb.mxu0 %v10474_v63  ;;  %2523 = vmatpush.bf16.msrb.mxu2 %v10475_v49  ;;  %v10485_v63 = vld [vmem:[#allocation173_spill] sm:$0xff]  ;;  %v10486_v49 = vld [vmem:[#allocation174_spill] sm:$0xff] }
 0x39e   :  { %2498 = vmatpush.bf16.msrb.mxu0 %v10476_v1  ;;  %2524 = vmatpush.bf16.msrb.mxu2 %v10477_v14  ;;  %v10487_v1 = vld [vmem:[#allocation175_spill] sm:$0xff] }
 0x3a2   :  { %2499 = vmatpush.bf16.msrb.mxu0 %v10478_v47  ;;  %2525 = vmatpush.bf16.msrb.mxu2 %v10479_v41  ;;  %v10488_v47 = vld [vmem:[#allocation16_spill] sm:$0xff] }
 0x3a6   :  { %2500 = vmatpush.bf16.msrb.mxu0 %v10480_v19  ;;  %2526 = vmatpush.bf16.msrb.mxu2 %v10481_v40 }
 0x3aa   :  { %2501 = vmatpush.bf16.msrb.mxu0 %v10482_v15  ;;  %2527 = vmatpush.bf16.msrb.mxu2 %v10483_v61  ;;  %v10489_v15 = vld [vmem:[#allocation18_spill] sm:$0xff] }
 0x3ae   :  { %2502 = vmatpush.bf16.msrb.mxu0 %v10484_v44  ;;  %2528 = vmatpush.bf16.msrb.mxu2 %v10485_v63 }
 0x3b2   :  { %2503 = vmatpush.bf16.msrb.mxu0 %v10486_v49  ;;  %2529 = vmatpush.bf16.msrb.mxu2 %v10487_v1 }
 0x3d1   :  { %v2142_v14 = vpop.f32.mrf.mxu0 }
 0x3d2   :  { %v2143_v16 = vadd.f32 %v2142_v14, %v10488_v47  ;;  %v8052_v41 = vpop.f32.mrf.mxu1  ;;  %v6048_v14 = vmul.f32 -1.442695, %v7940_v55 }
 0x3d4   :  { %v2156_v19 = vadd.f32 %v7929_v33, %v2143_v16  ;;  %v10490_v33 = vld [vmem:[#allocation80_spill] sm:$0xff] }
 0x3d6   :  { %v6043_v40 = vmul.f32 -1.442695, %v2156_v19 }
 0x3d7   :  { %v2168_v2 = vpop.f32.mrf.mxu2 }
 0x3d8   :  { %6373 = vpow2.f32 %v6043_v40  ;;  %v2169_v61 = vadd.f32 %v2168_v2, %v10489_v15  ;;  %v8056_v32 = vpop.f32.mrf.mxu3 }
 0x3d9   :  { %v2144_v44 = vpop.f32.mrf.mxu0 }
 0x3da   :  { %v2182_v63 = vadd.f32 %v7931_v34, %v2169_v61  ;;  %v2468_v49 = vpop.f32.mrf.mxu1 }
 0x3dc   :  { %v6044_v45 = vmul.f32 -1.442695, %v2182_v63 }
 0x3de   :  { %v6374_v1 = vpop.eup %6373  ;;  %6375 = vpow2.f32 %v6044_v45 }
 0x3df   :  { %v2246_v47 = vadd.f32 1.0, %v6374_v1  ;;  %v2170_v38 = vpop.f32.mrf.mxu2  ;;  %v10491_v1 = vld [vmem:[#allocation81_spill] sm:$0xff] }
 0x3e0   :  { %v2494_v11 = vpop.f32.mrf.mxu3 }
 0x3e1   :  { %6377 = vrcp.f32 %v2246_v47  ;;  %v2194_v19 = vpop.f32.mrf.mxu0  ;;  %vm2254_vm4 = vweird.f32 %v2246_v47 }
 0x3e2   :  { %v2195_v16 = vadd.f32 %v2194_v19, %v10490_v33  ;;  %v8061_v40 = vpop.f32.mrf.mxu1  ;;  %6379 = vpow2.f32 %v6048_v14 }
 0x3e4   :  { %v6376_v2 = vpop.eup %6375  ;;  %v2208_v44 = vadd.f32 %v7933_v4, %v2195_v16 }
 0x3e5   :  { %v2247_v61 = vadd.f32 1.0, %v6376_v2 }
 0x3e6   :  { %v6045_v49 = vmul.f32 -1.442695, %v2208_v44 }
 0x3e7   :  { %v6378_v34 = vpop.eup %6377  ;;  %6381 = vrcp.f32 %v2247_v61  ;;  %v2220_v45 = vpop.f32.mrf.mxu2  ;;  %vm2269_vm7 = vweird.f32 %v2247_v61 }
 0x3e8   :  { %v2250_v63 = vmul.f32 %v6378_v34, %v2246_v47  ;;  %6383 = vpow2.f32 %v6045_v49  ;;  %v2221_v55 = vadd.f32 %v2220_v45, %v10491_v1  ;;  %v8065_v11 = vpop.f32.mrf.mxu3  ;;  %v6380_v38 = vpop.eup %6379  ;;  %vm2255_vm3 = vweird.f32 %v6378_v34 }
 0x3e9   :  { %v2196_v15 = vpop.f32.mrf.mxu0  ;;  %v8068_v28 = vadd.f32 1.0, %v6380_v38  ;;  %v2260_v49 = vand.u32 2147483648, %v2246_v47  ;;  %vm2256_vm5 = vmor %vm2254_vm4, %vm2255_vm3  ;;  %v2273_v38 = vand.u32 2147483647, %v2247_v61 }
 0x3ea   :  { %v2251_v19 = vsub.f32 1.0, %v2250_v63  ;;  %v2520_v33 = vpop.f32.mrf.mxu1  ;;  %v2234_v14 = vadd.f32 %v7935_v58, %v2221_v55  ;;  %v2258_v15 = vand.u32 2147483647, %v2246_v47  ;;  %v2275_v63 = vand.u32 2147483648, %v2247_v61 }
 0x3eb   :  { %vm2274_vm10 = vcmp.eq.f32.partialorder %v2273_v38, 8.507059e+37  ;;  %vm2406_vm0 = vweird.f32 %v8068_v28 }
 0x3ec   :  { %v2252_v4 = vmul.f32 %v6378_v34, %v2251_v19  ;;  %6385 = vtanh.f32 %v2234_v14  ;;  %vm2259_vm8 = vcmp.eq.f32.partialorder %v2258_v15, 8.507059e+37 }
 0x3ed   :  { %v6382_v16 = vpop.eup %6381  ;;  %6387 = vrcp.f32 %v8068_v28 }
 0x3ee   :  { %v6384_v2 = vpop.eup %6383  ;;  %v2265_v44 = vmul.f32 %v6382_v16, %v2247_v61  ;;  %v2253_v0 = vadd.f32 %v6378_v34, %v2252_v4  ;;  %vm2270_vm6 = vweird.f32 %v6382_v16  ;;  %v2261_v4 = vor.u32 1.1754944e-38, %v2260_v49 }
 0x3ef   :  { %v2248_v46 = vadd.f32 1.0, %v6384_v2  ;;  %v2222_v45 = vpop.f32.mrf.mxu2  ;;  %vm2271_vm9 = vmor %vm2269_vm7, %vm2270_vm6 }
 0x3f0   :  { %v2266_v1 = vsub.f32 1.0, %v2265_v44  ;;  %v2546_v33 = vpop.f32.mrf.mxu3  ;;  %v2257_v55 = vsel %vm2256_vm5, %v6378_v34, %v2253_v0  ;;  %v2276_v44 = vor.u32 1.1754944e-38, %v2275_v63  ;;  %v10493_v63 = vld [vmem:[#allocation108_spill] sm:$0xff] }
 0x3f1   :  { %6389 = vrcp.f32 %v2248_v46  ;;  %v2262_v57 = vsel %vm2259_vm8, %v2261_v4, %v2257_v55  ;;  %v2288_v36 = vand.u32 2147483647, %v2248_v46  ;;  %v2290_v60 = vand.u32 2147483648, %v2248_v46 }
 0x3f2   :  { %v2267_v58 = vmul.f32 %v6382_v16, %v2266_v1  ;;  %v2327_v19 = vpop.f32.mrf.mxu0  ;;  %v6386_v45 = vpop.eup %6385  ;;  %v1818_v1 = vmul.f32 %v7800_v20, %v7488_v21  ;;  %vm2284_vm12 = vweird.f32 %v2248_v46 }
 0x3f3   :  { %v2370_v2 = vadd.f32 %v2327_v19, %v10492_v9  ;;  %v8072_v33 = vpop.eup %6387  ;;  %v2296_v61 = vmul.f32 %v6386_v45, %v2262_v57  ;;  %vm2289_vm14 = vcmp.eq.f32.partialorder %v2288_v36, 8.507059e+37 }
 0x3f4   :  { %v2268_v14 = vadd.f32 %v6382_v16, %v2267_v58  ;;  %v2402_v58 = vmul.f32 %v8072_v33, %v8068_v28  ;;  %vm2407_vm15 = vweird.f32 %v8072_v33 }
 0x3f5   :  { %v6047_v47 = vmul.f32 -1.442695, %v2370_v2  ;;  %vm8091_vm1 = vmor %vm2406_vm0, %vm2407_vm15 }
 0x3f6   :  { %v2272_v48 = vsel %vm2271_vm9, %v6382_v16, %v2268_v14  ;;  %v2403_v38 = vsub.f32 1.0, %v2402_v58 }
 0x3f7   :  { %v6390_v0 = vpop.eup %6389  ;;  %v2277_v34 = vsel %vm2274_vm10, %v2276_v44, %v2272_v48  ;;  %6391 = vpow2.f32 %v6047_v47  ;;  %v2291_v44 = vor.u32 1.1754944e-38, %v2290_v60  ;;  %v1954_v60 = vsub.f32 %v7835_v56, %v7830_v17 }
 0x3f8   :  { %v2280_v49 = vmul.f32 %v6390_v0, %v2248_v46  ;;  %v2295_v9 = vmul.f32 %v2277_v34, %v1818_v1  ;;  %v2353_v15 = vpop.f32.mrf.mxu2  ;;  %vm2285_vm11 = vweird.f32 %v6390_v0 }
 0x3f9   :  { %v2372_v55 = vadd.f32 %v2353_v15, %v10493_v63  ;;  %vm2286_vm13 = vmor %vm2284_vm12, %vm2285_vm11  ;;  %v2404_v15 = vmul.f32 %v8072_v33, %v2403_v38  ;;  %v1955_v38 = vmul.f32 %v1954_v60, %v7845_v5 }
 0x3fa   :  { %v2281_v19 = vsub.f32 1.0, %v2280_v49  ;;  %v2297_v4 = vadd.f32 %v2296_v61, %v2295_v9  ;;  %v2329_v2 = vpop.f32.mrf.mxu0 }
 0x3fb   :  { %v6049_v21 = vmul.f32 -1.442695, %v2372_v55  ;;  %v10497_v2 = vld [vmem:[#allocation29_spill] sm:$0xff] }
 0x3fc   :  { %v2282_v20 = vmul.f32 %v6390_v0, %v2281_v19  ;;  %6393 = vtanh.f32 %v2297_v4  ;;  %v2303_v48 = vsub.f32 %v2297_v4, %v1818_v1  ;;  %v2405_v4 = vadd.f32 %v8072_v33, %v2404_v15 }
 0x3fd   :  { %v6392_v16 = vpop.eup %6391  ;;  %6395 = vpow2.f32 %v6049_v21  ;;  %v2410_v21 = vand.u32 2147483647, %v8068_v28 }
 0x3fe   :  { %v2283_v57 = vadd.f32 %v6390_v0, %v2282_v20  ;;  %v2304_v14 = vmul.f32 %v2303_v48, %v7845_v5  ;;  %v2383_v45 = vadd.f32 1.0, %v6392_v16  ;;  %v2409_v56 = vsel %vm8091_vm1, %v8072_v33, %v2405_v4 }
 0x3ff   :  { %vm2411_vm3 = vcmp.eq.f32.partialorder %v2410_v21, 8.507059e+37  ;;  %v10498_v21 = vld [vmem:[#allocation32_spill] sm:$0xff] }
 0x400   :  { %v2287_v47 = vsel %vm2286_vm13, %v6390_v0, %v2283_v57  ;;  %v8080_v34 = vadd.f32 %v2304_v14, %v1818_v1  ;;  %6397 = vrcp.f32 %v2383_v45  ;;  %v2355_v49 = vpop.f32.mrf.mxu2  ;;  %v2412_v0 = vand.u32 2147483648, %v8068_v28 }
 0x401   :  { %v2292_v9 = vsel %vm2289_vm14, %v2291_v44, %v2287_v47  ;;  %v2397_v16 = vand.u32 2147483648, %v2383_v45  ;;  %v2395_v14 = vand.u32 2147483647, %v2383_v45  ;;  %vm2391_vm4 = vweird.f32 %v2383_v45 }
 0x402   :  { %v6394_v61 = vpop.eup %6393  ;;  %v2413_v47 = vor.u32 1.1754944e-38, %v2412_v0 }
 0x403   :  { %v6396_v63 = vpop.eup %6395  ;;  %v2299_v58 = vmul.f32 %v6394_v61, %v2292_v9  ;;  %vm2396_vm6 = vcmp.eq.f32.partialorder %v2395_v14, 8.507059e+37  ;;  %v8109_v61 = vadd.f32 %v1955_v38, %v7830_v17  ;;  %v10499_v38 = vld [vmem:[#allocation19_spill] sm:$0xff]  ;;  %v10501_v14 = vld [vmem:[#allocation36_spill] sm:$0xff] }
 0x404   :  { %v2385_v55 = vadd.f32 1.0, %v6396_v63  ;;  %v2414_v33 = vsel %vm2411_vm3, %v2413_v47, %v2409_v56  ;;  %v8124_v47 = vpop.permute.xlu1 %2311 }
 0x405   :  { %v2300_v46 = vsub.f32 %v2299_v58, %v7807_v51 }
 0x406   :  { %v6398_v19 = vpop.eup %6397  ;;  %6399 = vrcp.f32 %v2385_v55  ;;  %vm2421_vm8 = vweird.f32 %v2385_v55  ;;  %v2425_v17 = vand.u32 2147483647, %v2385_v55 }
 0x407   :  { %v2387_v36 = vmul.f32 %v6398_v19, %v2383_v45  ;;  %v2301_v1 = vmul.f32 %v2300_v46, %v7845_v5  ;;  %6401 = vtanh.f32 %v7945_v8  ;;  %vm2392_vm2 = vweird.f32 %v6398_v19 }
 0x408   :  { %vm2393_vm5 = vmor %vm2391_vm4, %vm2392_vm2  ;;  %v2398_v8 = vor.u32 1.1754944e-38, %v2397_v16  ;;  %v2432_v45 = vmul.f32 %v2414_v33, %v8109_v61  ;;  %vm2426_vm10 = vcmp.eq.f32.partialorder %v2425_v17, 8.507059e+37  ;;  %v10504_v33 = vld [vmem:[#allocation41_spill] sm:$0xff]  ;;  %v10515_v17 = vld [vmem:[#allocation180_spill] sm:$0xff] }
 0x409   :  { %v2388_v20 = vsub.f32 1.0, %v2387_v36  ;;  %v8097_v48 = vadd.f32 %v2301_v1, %v7807_v51  ;;  %v10496_v36 = vld [vmem:[#allocation28_spill] sm:$0xff] }
 0x40b   :  { %v2389_v57 = vmul.f32 %v6398_v19, %v2388_v20  ;;  %v2618_v44 = vpack.c.bf16 %v8097_v48, %v8097_v48 }
 0x40c   :  { %v6400_v28 = vpop.eup %6399 }
 0x40d   :  { %v2390_v51 = vadd.f32 %v6398_v19, %v2389_v57  ;;  %v2417_v49 = vmul.f32 %v6400_v28, %v2385_v55  ;;  %2640 = vmatmul.bf16.vlgmr.msra.gmra.mxu1 %v2618_v44  ;;  %2666 = vmatmul.bf16.vlgmr.msra.gmra.mxu3 %v2618_v44  ;;  %v6402_v15 = vpop.eup %6401  ;;  %vm2422_vm7 = vweird.f32 %v6400_v28 }
 0x40e   :  { %2817 = vmatpush.bf16.msra.mxu1 %v10348_v7  ;;  %2843 = vmatpush.bf16.msra.mxu3 %v10349_v54  ;;  %vm2423_vm9 = vmor %vm2421_vm8, %vm2422_vm7 }
 0x40f   :  { %v2394_v5 = vsel %vm2393_vm5, %v6398_v19, %v2390_v51  ;;  %v2418_v9 = vsub.f32 1.0, %v2417_v49  ;;  %v2427_v19 = vand.u32 2147483648, %v2385_v55  ;;  %v10500_v55 = vld [vmem:[#allocation33_spill] sm:$0xff] }
 0x410   :  { %v2399_v63 = vsel %vm2396_vm6, %v2398_v8, %v2394_v5  ;;  %v10503_v49 = vld [vmem:[#allocation37_spill] sm:$0xff]  ;;  %v10505_v8 = vld [vmem:[#allocation40_spill] sm:$0xff] }
 0x411   :  { %v2419_v58 = vmul.f32 %v6400_v28, %v2418_v9  ;;  %v2433_v46 = vmul.f32 %v6402_v15, %v2399_v63  ;;  %v2428_v0 = vor.u32 1.1754944e-38, %v2427_v19  ;;  %v10506_v5 = vld [vmem:[#allocation44_spill] sm:$0xff]  ;;  %v10508_v15 = vld [vmem:[#allocation177_spill] sm:$0xff] }
 0x412   :  { %2818 = vmatpush.bf16.msra.mxu1 %v10350_v10  ;;  %2844 = vmatpush.bf16.msra.mxu3 %v10351_v52  ;;  %v10507_v9 = vld [vmem:[#allocation176_spill] sm:$0xff]  ;;  %v10509_v63 = vld [vmem:[#allocation45_spill] sm:$0xff] }
 0x413   :  { %v8114_v4 = vadd.f32 %v2433_v46, %v2432_v45  ;;  %v2420_v60 = vadd.f32 %v6400_v28, %v2419_v58  ;;  %v10510_v58 = vld [vmem:[#allocation47_spill] sm:$0xff]  ;;  %v10511_v45 = vld [vmem:[#allocation178_spill] sm:$0xff]  ;;  %v10514_v19 = vld [vmem:[#allocation49_spill] sm:$0xff] }
 0x414   :  { %v10512_v46 = vld [vmem:[#allocation179_spill] sm:$0xff] }
 0x415   :  { %6403 = vtanh.f32 %v8114_v4  ;;  %v2424_v1 = vsel %vm2423_vm9, %v6400_v28, %v2420_v60  ;;  %v10513_v60 = vld [vmem:[#allocation48_spill] sm:$0xff] }
 0x416   :  { %2819 = vmatpush.bf16.msra.mxu1 %v10352_v12  ;;  %2845 = vmatpush.bf16.msra.mxu3 %v10496_v36  ;;  %v2429_v56 = vsel %vm2426_vm10, %v2428_v0, %v2424_v1  ;;  %v10516_v1 = vld [vmem:[#allocation181_spill] sm:$0xff]  ;;  %v10517_v0 = vld [vmem:[#allocation50_spill] sm:$0xff] }
 0x41a   :  { %2820 = vmatpush.bf16.msra.mxu1 %v10497_v2  ;;  %2846 = vmatpush.bf16.msra.mxu3 %v10498_v21 }
 0x41b   :  { %v6404_v20 = vpop.eup %6403 }
 0x41c   :  { %v2436_v16 = vmul.f32 %v6404_v20, %v2429_v56  ;;  %v10518_v20 = vld [vmem:[#allocation51_spill] sm:$0xff]  ;;  %v10519_v56 = vld [vmem:[#allocation182_spill] sm:$0xff] }
 0x41d   :  { %2692 = vmatmul.bf16.vlgmr.msrb.gmra.mxu1 %v2618_v44  ;;  %2718 = vmatmul.bf16.vlgmr.msrb.gmra.mxu3 %v2618_v44 }
 0x41e   :  { %v2437_v57 = vsub.f32 %v2436_v16, %v10499_v38  ;;  %2821 = vmatpush.bf16.msra.mxu1 %v10500_v55  ;;  %2847 = vmatpush.bf16.msra.mxu3 %v10501_v14  ;;  %v10520_v16 = vld [vmem:[#allocation183_spill] sm:$0xff] }
 0x420   :  { %v2438_v28 = vmul.f32 %v2437_v57, %v8124_v47  ;;  %v10522_v57 = vld [vmem:[#allocation53_spill] sm:$0xff] }
 0x422   :  { %v8128_v51 = vadd.f32 %v2438_v28, %v10499_v38  ;;  %2822 = vmatpush.bf16.msra.mxu1 %v10503_v49  ;;  %2848 = vmatpush.bf16.msra.mxu3 %v10504_v33  ;;  %v10521_v38 = vld [vmem:[#allocation52_spill] sm:$0xff] }
 0x423   :  { %v10523_v28 = vld [vmem:[#allocation184_spill] sm:$0xff] }
 0x424   :  { %10502 = vst [vmem:[#allocation22_spill] sm:$0xff] %v8128_v51  ;;  %v8134_v44 = vpack.c.bf16 %v8128_v51, %v8128_v51 }
 0x426   :  { %2452 = vmatmul.bf16.vlgmr.msra.gmra.mxu0 %v8134_v44  ;;  %2478 = vmatmul.bf16.vlgmr.msra.gmra.mxu2 %v8134_v44 }
 0x427   :  { %2823 = vmatpush.bf16.msra.mxu1 %v10505_v8  ;;  %2849 = vmatpush.bf16.msra.mxu3 %v10506_v5  ;;  %v10576_v5 = vld [vmem:[#allocation196_spill] sm:$0xff] }
 0x428   :  { %2619 = vmatpush.bf16.msra.mxu0 %v10507_v9  ;;  %2645 = vmatpush.bf16.msra.mxu2 %v10508_v15  ;;  %v10575_v15 = vld [vmem:[#allocation112_spill] sm:$0xff] }
 0x42b   :  { %2824 = vmatpush.bf16.msra.mxu1 %v10509_v63  ;;  %2850 = vmatpush.bf16.msra.mxu3 %v10510_v58 }
 0x42c   :  { %2620 = vmatpush.bf16.msra.mxu0 %v10511_v45  ;;  %2646 = vmatpush.bf16.msra.mxu2 %v10512_v46  ;;  %v10573_v45 = vld [vmem:[#allocation193_spill] sm:$0xff] }
 0x42e   :  { %2825 = vmatmul.bf16.vlgmr.msra.gmra.mxu1 %v8134_v44  ;;  %2851 = vmatmul.bf16.vlgmr.msra.gmra.mxu3 %v8134_v44 }
 0x42f   :  { %2943 = vmatpush.bf16.msrb.mxu1 %v10513_v60  ;;  %2969 = vmatpush.bf16.msrb.mxu3 %v10514_v19  ;;  %v10532_v19 = vld [vmem:[#allocation189_spill] sm:$0xff]  ;;  %v10533_v60 = vld [vmem:[#allocation58_spill] sm:$0xff] }
 0x430   :  { %2621 = vmatpush.bf16.msra.mxu0 %v10515_v17  ;;  %2647 = vmatpush.bf16.msra.mxu2 %v10516_v1  ;;  %v10524_v17 = vld [vmem:[#allocation185_spill] sm:$0xff]  ;;  %v10525_v1 = vld [vmem:[#allocation54_spill] sm:$0xff] }
 0x433   :  { %2944 = vmatpush.bf16.msrb.mxu1 %v10517_v0  ;;  %2970 = vmatpush.bf16.msrb.mxu3 %v10518_v20  ;;  %v10526_v0 = vld [vmem:[#allocation55_spill] sm:$0xff]  ;;  %v10527_v20 = vld [vmem:[#allocation186_spill] sm:$0xff] }
 0x434   :  { %2622 = vmatpush.bf16.msra.mxu0 %v10519_v56  ;;  %2648 = vmatpush.bf16.msra.mxu2 %v10520_v16  ;;  %v10528_v56 = vld [vmem:[#allocation187_spill] sm:$0xff]  ;;  %v10529_v16 = vld [vmem:[#allocation56_spill] sm:$0xff] }
 0x436   :  { %2504 = vmatmul.bf16.vlgmr.msrb.gmra.mxu0 %v8134_v44  ;;  %2530 = vmatmul.bf16.vlgmr.msrb.gmra.mxu2 %v8134_v44 }
 0x437   :  { %2945 = vmatpush.bf16.msrb.mxu1 %v10521_v38  ;;  %2971 = vmatpush.bf16.msrb.mxu3 %v10522_v57  ;;  %v10530_v38 = vld [vmem:[#allocation57_spill] sm:$0xff]  ;;  %v10531_v57 = vld [vmem:[#allocation188_spill] sm:$0xff] }
 0x438   :  { %2623 = vmatpush.bf16.msra.mxu0 %v10523_v28  ;;  %2649 = vmatpush.bf16.msra.mxu2 %v10524_v17  ;;  %v10534_v28 = vld [vmem:[#allocation59_spill] sm:$0xff]  ;;  %v10535_v17 = vld [vmem:[#allocation190_spill] sm:$0xff] }
 0x43b   :  { %2946 = vmatpush.bf16.msrb.mxu1 %v10525_v1  ;;  %2972 = vmatpush.bf16.msrb.mxu3 %v10526_v0  ;;  %v10536_v1 = vld [vmem:[#allocation191_spill] sm:$0xff]  ;;  %v10537_v0 = vld [vmem:[#allocation192_spill] sm:$0xff] }
 0x43c   :  { %2624 = vmatpush.bf16.msra.mxu0 %v10527_v20  ;;  %2650 = vmatpush.bf16.msra.mxu2 %v10528_v56  ;;  %v10538_v20 = vld [vmem:[#allocation194_spill] sm:$0xff]  ;;  %v10539_v56 = vld [vmem:[#allocation60_spill] sm:$0xff] }
 0x43f   :  { %2947 = vmatpush.bf16.msrb.mxu1 %v10529_v16  ;;  %2973 = vmatpush.bf16.msrb.mxu3 %v10530_v38  ;;  %v10540_v16 = vld [vmem:[#allocation61_spill] sm:$0xff]  ;;  %v10541_v38 = vld [vmem:[#allocation91_spill] sm:$0xff] }
 0x440   :  { %2625 = vmatpush.bf16.msra.mxu0 %v10531_v57  ;;  %2651 = vmatpush.bf16.msra.mxu2 %v10532_v19  ;;  %v10542_v57 = vld [vmem:[#allocation195_spill] sm:$0xff]  ;;  %v10543_v19 = vld [vmem:[#allocation62_spill] sm:$0xff] }
 0x443   :  { %2948 = vmatpush.bf16.msrb.mxu1 %v10533_v60  ;;  %2974 = vmatpush.bf16.msrb.mxu3 %v10534_v28  ;;  %v10544_v60 = vld [vmem:[#allocation63_spill] sm:$0xff]  ;;  %v10545_v28 = vld [vmem:[#allocation64_spill] sm:$0xff] }
 0x444   :  { %2626 = vmatpush.bf16.msra.mxu0 %v10535_v17  ;;  %2652 = vmatpush.bf16.msra.mxu2 %v10536_v1  ;;  %v10546_v17 = vld [vmem:[#allocation65_spill] sm:$0xff] }
 0x445   :  { %v10547_v1 = vld [vmem:[#allocation197_spill] sm:$0xff] }
 0x447   :  { %2949 = vmatpush.bf16.msrb.mxu1 %v10539_v56  ;;  %2975 = vmatpush.bf16.msrb.mxu3 %v10540_v16  ;;  %v10550_v56 = vld [vmem:[#allocation67_spill] sm:$0xff]  ;;  %v10551_v16 = vld [vmem:[#allocation98_spill] sm:$0xff] }
 0x448   :  { %2671 = vmatpush.bf16.msrb.mxu0 %v10537_v0  ;;  %2697 = vmatpush.bf16.msrb.mxu2 %v10538_v20  ;;  %v10548_v0 = vld [vmem:[#allocation198_spill] sm:$0xff] }
 0x449   :  { %v10549_v20 = vld [vmem:[#allocation66_spill] sm:$0xff] }
 0x44b   :  { %2950 = vmatpush.bf16.msrb.mxu1 %v10543_v19  ;;  %2976 = vmatpush.bf16.msrb.mxu3 %v10544_v60  ;;  %v10554_v19 = vld [vmem:[#allocation69_spill] sm:$0xff]  ;;  %v10555_v60 = vld [vmem:[#allocation200_spill] sm:$0xff] }
 0x44c   :  { %2672 = vmatpush.bf16.msrb.mxu0 %v10541_v38  ;;  %2698 = vmatpush.bf16.msrb.mxu2 %v10542_v57  ;;  %v10552_v38 = vld [vmem:[#allocation199_spill] sm:$0xff]  ;;  %v10553_v57 = vld [vmem:[#allocation68_spill] sm:$0xff] }
 0x44f   :  { %2995 = vmatpush.bf16.msra.mxu1 %v10545_v28  ;;  %3021 = vmatpush.bf16.msra.mxu3 %v10546_v17  ;;  %v10556_v28 = vld [vmem:[#allocation202_spill] sm:$0xff] }
 0x450   :  { %2673 = vmatpush.bf16.msrb.mxu0 %v10547_v1  ;;  %2699 = vmatpush.bf16.msrb.mxu2 %v10548_v0  ;;  %v10557_v17 = vld [vmem:[#allocation70_spill] sm:$0xff]  ;;  %v10558_v1 = vld [vmem:[#allocation71_spill] sm:$0xff] }
 0x451   :  { %v10559_v0 = vld [vmem:[#allocation203_spill] sm:$0xff] }
 0x453   :  { %2996 = vmatpush.bf16.msra.mxu1 %v10549_v20  ;;  %3022 = vmatpush.bf16.msra.mxu3 %v10550_v56  ;;  %v10560_v20 = vld [vmem:[#allocation205_spill] sm:$0xff]  ;;  %v10561_v56 = vld [vmem:[#allocation72_spill] sm:$0xff] }
 0x454   :  { %2674 = vmatpush.bf16.msrb.mxu0 %v10551_v16  ;;  %2700 = vmatpush.bf16.msrb.mxu2 %v10552_v38  ;;  %v10562_v16 = vld [vmem:[#allocation73_spill] sm:$0xff]  ;;  %v10563_v38 = vld [vmem:[#allocation206_spill] sm:$0xff] }
 0x457   :  { %2997 = vmatpush.bf16.msra.mxu1 %v10553_v57  ;;  %3023 = vmatpush.bf16.msra.mxu3 %v10554_v19  ;;  %v10564_v57 = vld [vmem:[#allocation207_spill] sm:$0xff]  ;;  %v10565_v19 = vld [vmem:[#allocation74_spill] sm:$0xff] }
 0x458   :  { %2675 = vmatpush.bf16.msrb.mxu0 %v10555_v60  ;;  %2701 = vmatpush.bf16.msrb.mxu2 %v10556_v28  ;;  %v10566_v60 = vld [vmem:[#allocation75_spill] sm:$0xff]  ;;  %v10567_v28 = vld [vmem:[#allocation208_spill] sm:$0xff] }
 0x45b   :  { %2998 = vmatpush.bf16.msra.mxu1 %v10557_v17  ;;  %3024 = vmatpush.bf16.msra.mxu3 %v10558_v1  ;;  %v10568_v17 = vld [vmem:[#allocation209_spill] sm:$0xff]  ;;  %v10569_v1 = vld [vmem:[#allocation76_spill] sm:$0xff] }
 0x45c   :  { %2676 = vmatpush.bf16.msrb.mxu0 %v10559_v0  ;;  %2702 = vmatpush.bf16.msrb.mxu2 %v10560_v20  ;;  %v10570_v0 = vld [vmem:[#allocation77_spill] sm:$0xff]  ;;  %v10571_v20 = vld [vmem:[#allocation78_spill] sm:$0xff] }
 0x45f   :  { %2999 = vmatpush.bf16.msra.mxu1 %v10561_v56  ;;  %3025 = vmatpush.bf16.msra.mxu3 %v10562_v16  ;;  %v10572_v56 = vld [vmem:[#allocation79_spill] sm:$0xff] }
 0x460   :  { %2677 = vmatpush.bf16.msrb.mxu0 %v10563_v38  ;;  %2703 = vmatpush.bf16.msrb.mxu2 %v10564_v57 }
 0x463   :  { %3000 = vmatpush.bf16.msra.mxu1 %v10565_v19  ;;  %3026 = vmatpush.bf16.msra.mxu3 %v10566_v60 }
 0x464   :  { %2678 = vmatpush.bf16.msrb.mxu0 %v10567_v28  ;;  %2704 = vmatpush.bf16.msrb.mxu2 %v10568_v17 }
 0x467   :  { %3001 = vmatpush.bf16.msra.mxu1 %v10569_v1  ;;  %3027 = vmatpush.bf16.msra.mxu3 %v10570_v0 }
 0x46b   :  { %3002 = vmatpush.bf16.msra.mxu1 %v10571_v20  ;;  %3028 = vmatpush.bf16.msra.mxu3 %v10572_v56  ;;  %v10574_v56 = vld [vmem:[#allocation97_spill] sm:$0xff] }
 0x46c   :  { %v257_v9 = vadd.f32 %v10575_v15, %v10574_v56 }
 0x48a   :  { %v8210_v16 = vpop.f32.mrf.mxu1 }
 0x490   :  { %v8212_v38 = vpop.f32.mrf.mxu3 }
 0x492   :  { %v2643_v57 = vpop.f32.mrf.mxu1 }
 0x498   :  { %v2669_v19 = vpop.f32.mrf.mxu3 }
 0x49a   :  { %v8214_v46 = vpop.f32.mrf.mxu1 }
 0x4a0   :  { %v8216_v60 = vpop.f32.mrf.mxu3 }
 0x4a2   :  { %v2695_v28 = vpop.f32.mrf.mxu1 }
 0x4a3   :  { %v2453_v17 = vpop.f32.mrf.mxu0 }
 0x4a4   :  { %v2454_v1 = vadd.f32 %v2453_v17, %v10573_v45  ;;  %v10577_v17 = vld [vmem:[#allocation107_spill] sm:$0xff]  ;;  %v10578_v45 = vld [vmem:[#allocation117_spill] sm:$0xff] }
 0x4a6   :  { %v2467_v0 = vadd.f32 %v8052_v41, %v2454_v1  ;;  %v315_v41 = vadd.f32 %v10578_v45, %v10577_v17 }
 0x4a8   :  { %v6050_v58 = vmul.f32 -1.442695, %v2467_v0  ;;  %v2721_v20 = vpop.f32.mrf.mxu3 }
 0x4a9   :  { %v2479_v63 = vpop.f32.mrf.mxu2 }
 0x4aa   :  { %6405 = vpow2.f32 %v6050_v58  ;;  %v2480_v57 = vadd.f32 %v2479_v63, %v10576_v5  ;;  %v10579_v58 = vld [vmem:[#allocation201_spill] sm:$0xff] }
 0x4ab   :  { %v2455_v19 = vpop.f32.mrf.mxu0  ;;  %v2826_v8 = vpop.f32.mrf.mxu1 }
 0x4ac   :  { %v2493_v33 = vadd.f32 %v8056_v32, %v2480_v57  ;;  %v8224_v49 = vadd.f32 %v2826_v8, %v257_v9 }
 0x4ae   :  { %v6051_v28 = vmul.f32 -1.442695, %v2493_v33 }
 0x4b0   :  { %v6406_v14 = vpop.eup %6405  ;;  %6407 = vpow2.f32 %v6051_v28 }
 0x4b1   :  { %v2557_v1 = vadd.f32 1.0, %v6406_v14  ;;  %v2481_v0 = vpop.f32.mrf.mxu2  ;;  %v2852_v20 = vpop.f32.mrf.mxu3  ;;  %v10580_v14 = vld [vmem:[#allocation204_spill] sm:$0xff] }
 0x4b2   :  { %v8228_v55 = vadd.f32 %v2852_v20, %v315_v41 }
 0x4b3   :  { %6409 = vrcp.f32 %v2557_v1  ;;  %v2505_v15 = vpop.f32.mrf.mxu0  ;;  %v2828_v63 = vpop.f32.mrf.mxu1  ;;  %vm2565_vm12 = vweird.f32 %v2557_v1 }
 0x4b4   :  { %v2506_v19 = vadd.f32 %v2505_v15, %v10579_v58 }
 0x4b6   :  { %v6408_v56 = vpop.eup %6407  ;;  %v2519_v32 = vadd.f32 %v8061_v40, %v2506_v19 }
 0x4b7   :  { %v2558_v8 = vadd.f32 1.0, %v6408_v56  ;;  %v2571_v56 = vand.u32 2147483648, %v2557_v1 }
 0x4b8   :  { %v6052_v33 = vmul.f32 -1.442695, %v2519_v32 }
 0x4b9   :  { %v6410_v9 = vpop.eup %6409  ;;  %6411 = vrcp.f32 %v2558_v8  ;;  %v2531_v57 = vpop.f32.mrf.mxu2  ;;  %vm2580_vm15 = vweird.f32 %v2558_v8 }
 0x4ba   :  { %v2854_v45 = vpop.f32.mrf.mxu3  ;;  %v2561_v28 = vmul.f32 %v6410_v9, %v2557_v1  ;;  %6413 = vpow2.f32 %v6052_v33  ;;  %v2532_v0 = vadd.f32 %v2531_v57, %v10580_v14  ;;  %vm2566_vm11 = vweird.f32 %v6410_v9 }
 0x4bb   :  { %v2507_v41 = vpop.f32.mrf.mxu0  ;;  %v2569_v45 = vand.u32 2147483647, %v2557_v1  ;;  %v2586_v33 = vand.u32 2147483648, %v2558_v8  ;;  %vm2567_vm13 = vmor %vm2565_vm12, %vm2566_vm11  ;;  %v2584_v57 = vand.u32 2147483647, %v2558_v8 }
 0x4bc   :  { %v2562_v20 = vsub.f32 1.0, %v2561_v28  ;;  %v2545_v17 = vadd.f32 %v8065_v11, %v2532_v0  ;;  %v2572_v28 = vor.u32 1.1754944e-38, %v2571_v56 }
 0x4bd   :  { %vm2570_vm0 = vcmp.eq.f32.partialorder %v2569_v45, 8.507059e+37  ;;  %vm2585_vm2 = vcmp.eq.f32.partialorder %v2584_v57, 8.507059e+37 }
 0x4be   :  { %v2563_v63 = vmul.f32 %v6410_v9, %v2562_v20  ;;  %6415 = vtanh.f32 %v2545_v17 }
 0x4bf   :  { %v6412_v5 = vpop.eup %6411 }
 0x4c0   :  { %v2576_v15 = vmul.f32 %v6412_v5, %v2558_v8  ;;  %v2564_v58 = vadd.f32 %v6410_v9, %v2563_v63  ;;  %v6414_v40 = vpop.eup %6413  ;;  %vm2581_vm14 = vweird.f32 %v6412_v5  ;;  %v2587_v63 = vor.u32 1.1754944e-38, %v2586_v33 }
 0x4c1   :  { %v2533_v19 = vpop.f32.mrf.mxu2  ;;  %v2559_v51 = vadd.f32 1.0, %v6414_v40  ;;  %vm2582_vm1 = vmor %vm2580_vm15, %vm2581_vm14 }
 0x4c2   :  { %v2577_v32 = vsub.f32 1.0, %v2576_v15  ;;  %v2568_v11 = vsel %vm2567_vm13, %v6410_v9, %v2564_v58 }
 0x4c3   :  { %6417 = vrcp.f32 %v2559_v51  ;;  %v2573_v17 = vsel %vm2570_vm0, %v2572_v28, %v2568_v11  ;;  %v2601_v36 = vand.u32 2147483648, %v2559_v51  ;;  %v2599_v9 = vand.u32 2147483647, %v2559_v51 }
 0x4c4   :  { %v2578_v41 = vmul.f32 %v6412_v5, %v2577_v32  ;;  %v6416_v20 = vpop.eup %6415  ;;  %vm2595_vm4 = vweird.f32 %v2559_v51 }
 0x4c5   :  { %v2607_v14 = vmul.f32 %v6416_v20, %v2573_v17  ;;  %vm2600_vm6 = vcmp.eq.f32.partialorder %v2599_v9, 8.507059e+37  ;;  %v10585_v20 = vld [vmem:[#allocation39_spill] sm:$0xff]  ;;  %v10587_v17 = vld [vmem:[#allocation96_spill] sm:$0xff]  ;;  %v10595_v9 = vld [vmem:[#allocation122_spill] sm:$0xff] }
 0x4c6   :  { %v2579_v0 = vadd.f32 %v6412_v5, %v2578_v41 }
 0x4c8   :  { %v2583_v19 = vsel %vm2582_vm1, %v6412_v5, %v2579_v0  ;;  %v2602_v5 = vor.u32 1.1754944e-38, %v2601_v36  ;;  %v10583_v36 = vld [vmem:[#allocation92_spill] sm:$0xff]  ;;  %v10584_v0 = vld [vmem:[#allocation93_spill] sm:$0xff] }
 0x4c9   :  { %v2588_v15 = vsel %vm2585_vm2, %v2587_v63, %v2583_v19  ;;  %v6418_v40 = vpop.eup %6417  ;;  %v10586_v63 = vld [vmem:[#allocation42_spill] sm:$0xff]  ;;  %v10588_v19 = vld [vmem:[#allocation99_spill] sm:$0xff] }
 0x4ca   :  { %v2606_v1 = vmul.f32 %v2588_v15, %v7954_v30  ;;  %v2591_v21 = vmul.f32 %v6418_v40, %v2559_v51  ;;  %vm2596_vm3 = vweird.f32 %v6418_v40  ;;  %v10589_v15 = vld [vmem:[#allocation43_spill] sm:$0xff] }
 0x4cb   :  { %vm2597_vm5 = vmor %vm2595_vm4, %vm2596_vm3 }
 0x4cc   :  { %v2608_v32 = vadd.f32 %v2607_v14, %v2606_v1  ;;  %v2592_v2 = vsub.f32 1.0, %v2591_v21  ;;  %v10591_v1 = vld [vmem:[#allocation102_spill] sm:$0xff] }
 0x4ce   :  { %6419 = vtanh.f32 %v2608_v32  ;;  %v2614_v58 = vsub.f32 %v2608_v32, %v7954_v30  ;;  %v2593_v8 = vmul.f32 %v6418_v40, %v2592_v2  ;;  %v10592_v32 = vld [vmem:[#allocation103_spill] sm:$0xff] }
 0x4d0   :  { %v2615_v56 = vmul.f32 %v2614_v58, %v8124_v47  ;;  %v2594_v45 = vadd.f32 %v6418_v40, %v2593_v8  ;;  %v10593_v58 = vld [vmem:[#allocation104_spill] sm:$0xff]  ;;  %v10594_v8 = vld [vmem:[#allocation105_spill] sm:$0xff] }
 0x4d2   :  { %v8238_v33 = vadd.f32 %v2615_v56, %v7954_v30  ;;  %v2598_v57 = vsel %vm2597_vm5, %v6418_v40, %v2594_v45  ;;  %v10581_v30 = vld [vmem:[#allocation35_spill] sm:$0xff]  ;;  %v10590_v40 = vld [vmem:[#allocation46_spill] sm:$0xff] }
 0x4d3   :  { %v2603_v21 = vsel %vm2600_vm6, %v2602_v5, %v2598_v57  ;;  %v10596_v56 = vld [vmem:[#allocation123_spill] sm:$0xff]  ;;  %v10597_v45 = vld [vmem:[#allocation110_spill] sm:$0xff]  ;;  %v10598_v5 = vld [vmem:[#allocation113_spill] sm:$0xff] }
 0x4d4   :  { %v6420_v14 = vpop.eup %6419  ;;  %v10599_v57 = vld [vmem:[#allocation128_spill] sm:$0xff] }
 0x4d5   :  { %v2610_v41 = vmul.f32 %v6420_v14, %v2603_v21  ;;  %v10600_v14 = vld [vmem:[#allocation131_spill] sm:$0xff]  ;;  %v10601_v21 = vld [vmem:[#allocation114_spill] sm:$0xff] }
 0x4d7   :  { %v2611_v11 = vsub.f32 %v2610_v41, %v7959_v3  ;;  %v10602_v41 = vld [vmem:[#allocation115_spill] sm:$0xff] }
 0x4d9   :  { %v2612_v2 = vmul.f32 %v2611_v11, %v8124_v47  ;;  %v10603_v11 = vld [vmem:[#allocation134_spill] sm:$0xff] }
 0x4db   :  { %v8243_v28 = vadd.f32 %v2612_v2, %v7959_v3  ;;  %v10582_v3 = vld [vmem:[#allocation38_spill] sm:$0xff]  ;;  %v10604_v2 = vld [vmem:[#allocation135_spill] sm:$0xff] }
 0x4dd   :  { %v2617_v51 = vpack.c.bf16 %v8243_v28, %v8243_v28 }
 0x4df   :  { %2627 = vmatmul.bf16.vlgmr.msra.gmra.mxu0 %v2617_v51  ;;  %2653 = vmatmul.bf16.vlgmr.msra.gmra.mxu2 %v2617_v51 }
 0x4e0   :  { %2951 = vmatmul.bf16.vlgmr.msrb.gmra.mxu1 %v2617_v51  ;;  %2977 = vmatmul.bf16.vlgmr.msrb.gmra.mxu3 %v2617_v51 }
 0x4e1   :  { %2804 = vmatpush.bf16.msra.mxu0 %v10281_v23  ;;  %2830 = vmatpush.bf16.msra.mxu2 %v10282_v26 }
 0x4e2   :  { %3118 = vmatpush.bf16.msrb.mxu1 %v10283_v22  ;;  %3144 = vmatpush.bf16.msrb.mxu3 %v10284_v37 }
 0x4e5   :  { %2805 = vmatpush.bf16.msra.mxu0 %v10285_v62  ;;  %2831 = vmatpush.bf16.msra.mxu2 %v10286_v53 }
 0x4e6   :  { %3119 = vmatpush.bf16.msrb.mxu1 %v10287_v18  ;;  %3145 = vmatpush.bf16.msrb.mxu3 %v10288_v13 }
 0x4e9   :  { %2806 = vmatpush.bf16.msra.mxu0 %v10289_v35  ;;  %2832 = vmatpush.bf16.msra.mxu2 %v10290_v29 }
 0x4ea   :  { %3120 = vmatpush.bf16.msrb.mxu1 %v10291_v50  ;;  %3146 = vmatpush.bf16.msrb.mxu3 %v10429_v27 }
 0x4ed   :  { %2807 = vmatpush.bf16.msra.mxu0 %v10430_v6  ;;  %2833 = vmatpush.bf16.msra.mxu2 %v10431_v59 }
 0x4ee   :  { %3121 = vmatpush.bf16.msrb.mxu1 %v10432_v25  ;;  %3147 = vmatpush.bf16.msrb.mxu3 %v10435_v31 }
 0x4ef   :  { %2679 = vmatmul.bf16.vlgmr.msrb.gmra.mxu0 %v2617_v51  ;;  %2705 = vmatmul.bf16.vlgmr.msrb.gmra.mxu2 %v2617_v51 }
 0x4f0   :  { %3003 = vmatmul.bf16.vlgmr.msra.gmra.mxu1 %v2617_v51  ;;  %3029 = vmatmul.bf16.vlgmr.msra.gmra.mxu3 %v2617_v51  ;;  %v10606_v51 = vld [vmem:[#allocation120_spill] sm:$0xff] }
 0x4f1   :  { %2808 = vmatpush.bf16.msra.mxu0 %v10433_v24  ;;  %2834 = vmatpush.bf16.msra.mxu2 %v10434_v43 }
 0x4f2   :  { %3122 = vmatpush.bf16.msrb.mxu1 %v10436_v42  ;;  %3148 = vmatpush.bf16.msrb.mxu3 %v10439_v39  ;;  %v10648_v39 = vld [vmem:[#allocation116_spill] sm:$0xff] }
 0x4f5   :  { %2809 = vmatpush.bf16.msra.mxu0 %v10581_v30  ;;  %2835 = vmatpush.bf16.msra.mxu2 %v10582_v3 }
 0x4f6   :  { %3123 = vmatpush.bf16.msrb.mxu1 %v10583_v36  ;;  %3149 = vmatpush.bf16.msrb.mxu3 %v10584_v0 }
 0x4f9   :  { %2810 = vmatpush.bf16.msra.mxu0 %v10585_v20  ;;  %2836 = vmatpush.bf16.msra.mxu2 %v10586_v63 }
 0x4fa   :  { %3124 = vmatpush.bf16.msrb.mxu1 %v10587_v17  ;;  %3150 = vmatpush.bf16.msrb.mxu3 %v10588_v19 }
 0x4fd   :  { %2811 = vmatpush.bf16.msra.mxu0 %v10589_v15  ;;  %2837 = vmatpush.bf16.msra.mxu2 %v10590_v40 }
 0x4fe   :  { %3125 = vmatpush.bf16.msrb.mxu1 %v10591_v1  ;;  %3151 = vmatpush.bf16.msrb.mxu3 %v10592_v32 }
 0x500   :  { %2812 = vmatmul.bf16.vlgmr.msra.gmra.mxu0 %v8134_v44  ;;  %2838 = vmatmul.bf16.vlgmr.msra.gmra.mxu2 %v8134_v44  ;;  %v10605_v44 = vld [vmem:[#allocation118_spill] sm:$0xff] }
 0x501   :  { %2930 = vmatpush.bf16.msrb.mxu0 %v10595_v9  ;;  %2956 = vmatpush.bf16.msrb.mxu2 %v10596_v56 }
 0x502   :  { %3170 = vmatpush.bf16.msra.mxu1 %v10593_v58  ;;  %3196 = vmatpush.bf16.msra.mxu3 %v10594_v8  ;;  %v10607_v8 = vld [vmem:[#allocation140_spill] sm:$0xff] }
 0x505   :  { %2931 = vmatpush.bf16.msrb.mxu0 %v10599_v57  ;;  %2957 = vmatpush.bf16.msrb.mxu2 %v10600_v14  ;;  %v10610_v57 = vld [vmem:[#allocation125_spill] sm:$0xff]  ;;  %v10611_v14 = vld [vmem:[#allocation146_spill] sm:$0xff] }
 0x506   :  { %3171 = vmatpush.bf16.msra.mxu1 %v10597_v45  ;;  %3197 = vmatpush.bf16.msra.mxu3 %v10598_v5  ;;  %v10608_v45 = vld [vmem:[#allocation142_spill] sm:$0xff]  ;;  %v10609_v5 = vld [vmem:[#allocation124_spill] sm:$0xff] }
 0x509   :  { %2932 = vmatpush.bf16.msrb.mxu0 %v10603_v11  ;;  %2958 = vmatpush.bf16.msrb.mxu2 %v10604_v2  ;;  %v10614_v11 = vld [vmem:[#allocation133_spill] sm:$0xff]  ;;  %v10615_v2 = vld [vmem:[#allocation150_spill] sm:$0xff] }
 0x50a   :  { %3172 = vmatpush.bf16.msra.mxu1 %v10601_v21  ;;  %3198 = vmatpush.bf16.msra.mxu3 %v10602_v41  ;;  %v10612_v21 = vld [vmem:[#allocation147_spill] sm:$0xff]  ;;  %v10613_v41 = vld [vmem:[#allocation132_spill] sm:$0xff] }
 0x50d   :  { %2933 = vmatpush.bf16.msrb.mxu0 %v10607_v8  ;;  %2959 = vmatpush.bf16.msrb.mxu2 %v10608_v45  ;;  %v10618_v8 = vld [vmem:[#allocation137_spill] sm:$0xff]  ;;  %v10619_v45 = vld [vmem:[#allocation154_spill] sm:$0xff] }
 0x50e   :  { %3173 = vmatpush.bf16.msra.mxu1 %v10605_v44  ;;  %3199 = vmatpush.bf16.msra.mxu3 %v10606_v51  ;;  %v10616_v44 = vld [vmem:[#allocation153_spill] sm:$0xff]  ;;  %v10617_v51 = vld [vmem:[#allocation136_spill] sm:$0xff] }
 0x511   :  { %2934 = vmatpush.bf16.msrb.mxu0 %v10611_v14  ;;  %2960 = vmatpush.bf16.msrb.mxu2 %v10612_v21  ;;  %v10622_v14 = vld [vmem:[#allocation145_spill] sm:$0xff]  ;;  %v10623_v21 = vld [vmem:[#allocation158_spill] sm:$0xff] }
 0x512   :  { %3174 = vmatpush.bf16.msra.mxu1 %v10609_v5  ;;  %3200 = vmatpush.bf16.msra.mxu3 %v10610_v57  ;;  %v10620_v5 = vld [vmem:[#allocation155_spill] sm:$0xff] }
 0x513   :  { %v10621_v57 = vld [vmem:[#allocation143_spill] sm:$0xff] }
 0x515   :  { %2935 = vmatpush.bf16.msrb.mxu0 %v10615_v2  ;;  %2961 = vmatpush.bf16.msrb.mxu2 %v10616_v44  ;;  %v10626_v2 = vld [vmem:[#allocation161_spill] sm:$0xff]  ;;  %v10627_v44 = vld [vmem:[#allocation162_spill] sm:$0xff] }
 0x516   :  { %3175 = vmatpush.bf16.msra.mxu1 %v10613_v41  ;;  %3201 = vmatpush.bf16.msra.mxu3 %v10614_v11  ;;  %v10624_v41 = vld [vmem:[#allocation159_spill] sm:$0xff]  ;;  %v10625_v11 = vld [vmem:[#allocation160_spill] sm:$0xff] }
 0x519   :  { %2936 = vmatpush.bf16.msrb.mxu0 %v10619_v45  ;;  %2962 = vmatpush.bf16.msrb.mxu2 %v10620_v5  ;;  %v10630_v45 = vld [vmem:[#allocation165_spill] sm:$0xff]  ;;  %v10631_v5 = vld [vmem:[#allocation166_spill] sm:$0xff] }
 0x51a   :  { %3176 = vmatpush.bf16.msra.mxu1 %v10617_v51  ;;  %3202 = vmatpush.bf16.msra.mxu3 %v10618_v8  ;;  %v10628_v51 = vld [vmem:[#allocation163_spill] sm:$0xff]  ;;  %v10629_v8 = vld [vmem:[#allocation164_spill] sm:$0xff] }
 0x51d   :  { %2937 = vmatpush.bf16.msrb.mxu0 %v10623_v21  ;;  %2963 = vmatpush.bf16.msrb.mxu2 %v10624_v41  ;;  %v10634_v21 = vld [vmem:[#allocation169_spill] sm:$0xff]  ;;  %v10635_v41 = vld [vmem:[#allocation170_spill] sm:$0xff] }
 0x51e   :  { %3177 = vmatpush.bf16.msra.mxu1 %v10621_v57  ;;  %3203 = vmatpush.bf16.msra.mxu3 %v10622_v14  ;;  %v10632_v57 = vld [vmem:[#allocation167_spill] sm:$0xff]  ;;  %v10633_v14 = vld [vmem:[#allocation168_spill] sm:$0xff] }
 0x521   :  { %2982 = vmatpush.bf16.msra.mxu0 %v10625_v11  ;;  %3008 = vmatpush.bf16.msra.mxu2 %v10626_v2  ;;  %v10636_v11 = vld [vmem:[#allocation171_spill] sm:$0xff]  ;;  %v10637_v2 = vld [vmem:[#allocation172_spill] sm:$0xff] }
 0x525   :  { %2983 = vmatpush.bf16.msra.mxu0 %v10627_v44  ;;  %3009 = vmatpush.bf16.msra.mxu2 %v10628_v51  ;;  %v10638_v44 = vld [vmem:[#allocation173_spill] sm:$0xff]  ;;  %v10639_v51 = vld [vmem:[#allocation174_spill] sm:$0xff] }
 0x529   :  { %2984 = vmatpush.bf16.msra.mxu0 %v10629_v8  ;;  %3010 = vmatpush.bf16.msra.mxu2 %v10630_v45  ;;  %v10640_v8 = vld [vmem:[#allocation175_spill] sm:$0xff] }
 0x52d   :  { %2985 = vmatpush.bf16.msra.mxu0 %v10631_v5  ;;  %3011 = vmatpush.bf16.msra.mxu2 %v10632_v57  ;;  %v10641_v5 = vld [vmem:[#allocation16_spill] sm:$0xff] }
 0x531   :  { %2986 = vmatpush.bf16.msra.mxu0 %v10633_v14  ;;  %3012 = vmatpush.bf16.msra.mxu2 %v10634_v21 }
 0x535   :  { %2987 = vmatpush.bf16.msra.mxu0 %v10635_v41  ;;  %3013 = vmatpush.bf16.msra.mxu2 %v10636_v11  ;;  %v10642_v41 = vld [vmem:[#allocation18_spill] sm:$0xff] }
 0x539   :  { %2988 = vmatpush.bf16.msra.mxu0 %v10637_v2  ;;  %3014 = vmatpush.bf16.msra.mxu2 %v10638_v44 }
 0x53d   :  { %2989 = vmatpush.bf16.msra.mxu0 %v10639_v51  ;;  %3015 = vmatpush.bf16.msra.mxu2 %v10640_v8 }
 0x55c   :  { %v2628_v45 = vpop.f32.mrf.mxu0 }
 0x55d   :  { %v2629_v32 = vadd.f32 %v2628_v45, %v10641_v5  ;;  %v8330_v57 = vpop.f32.mrf.mxu1  ;;  %v6058_v45 = vmul.f32 -1.442695, %v8224_v49  ;;  %v10644_v49 = vld [vmem:[#allocation81_spill] sm:$0xff] }
 0x55f   :  { %v2642_v14 = vadd.f32 %v8210_v16, %v2629_v32  ;;  %v10643_v32 = vld [vmem:[#allocation80_spill] sm:$0xff] }
 0x561   :  { %v6053_v21 = vmul.f32 -1.442695, %v2642_v14 }
 0x562   :  { %v2654_v58 = vpop.f32.mrf.mxu2 }
 0x563   :  { %6421 = vpow2.f32 %v6053_v21  ;;  %v2655_v11 = vadd.f32 %v2654_v58, %v10642_v41  ;;  %v8334_v56 = vpop.f32.mrf.mxu3 }
 0x564   :  { %v2630_v2 = vpop.f32.mrf.mxu0 }
 0x565   :  { %v2668_v44 = vadd.f32 %v8212_v38, %v2655_v11  ;;  %v2954_v51 = vpop.f32.mrf.mxu1 }
 0x567   :  { %v6054_v1 = vmul.f32 -1.442695, %v2668_v44 }
 0x569   :  { %v6422_v8 = vpop.eup %6421  ;;  %6423 = vpow2.f32 %v6054_v1 }
 0x56a   :  { %v2732_v5 = vadd.f32 1.0, %v6422_v8  ;;  %v2656_v9 = vpop.f32.mrf.mxu2 }
 0x56b   :  { %v2980_v19 = vpop.f32.mrf.mxu3 }
 0x56c   :  { %6425 = vrcp.f32 %v2732_v5  ;;  %v2680_v16 = vpop.f32.mrf.mxu0  ;;  %vm2740_vm8 = vweird.f32 %v2732_v5 }
 0x56d   :  { %v2681_v14 = vadd.f32 %v2680_v16, %v10643_v32  ;;  %v8339_v21 = vpop.f32.mrf.mxu1  ;;  %6427 = vpow2.f32 %v6058_v45 }
 0x56f   :  { %v6424_v58 = vpop.eup %6423  ;;  %v2694_v2 = vadd.f32 %v8214_v46, %v2681_v14 }
 0x570   :  { %v2733_v38 = vadd.f32 1.0, %v6424_v58 }
 0x571   :  { %v6055_v11 = vmul.f32 -1.442695, %v2694_v2 }
 0x572   :  { %v6426_v44 = vpop.eup %6425  ;;  %6429 = vrcp.f32 %v2733_v38  ;;  %v2706_v1 = vpop.f32.mrf.mxu2  ;;  %v2759_v0 = vand.u32 2147483647, %v2733_v38  ;;  %vm2755_vm11 = vweird.f32 %v2733_v38 }
 0x573   :  { %v2736_v51 = vmul.f32 %v6426_v44, %v2732_v5  ;;  %6431 = vpow2.f32 %v6055_v11  ;;  %v2707_v8 = vadd.f32 %v2706_v1, %v10644_v49  ;;  %v8343_v19 = vpop.f32.mrf.mxu3  ;;  %v6428_v9 = vpop.eup %6427  ;;  %vm2741_vm7 = vweird.f32 %v6426_v44 }
 0x574   :  { %v2682_v41 = vpop.f32.mrf.mxu0  ;;  %v8346_v40 = vadd.f32 1.0, %v6428_v9  ;;  %v2746_v11 = vand.u32 2147483648, %v2732_v5  ;;  %v2761_v9 = vand.u32 2147483648, %v2733_v38  ;;  %vm2742_vm9 = vmor %vm2740_vm8, %vm2741_vm7  ;;  %vm2760_vm14 = vcmp.eq.f32.partialorder %v2759_v0, 8.507059e+37 }
 0x575   :  { %v2737_v16 = vsub.f32 1.0, %v2736_v51  ;;  %v3006_v32 = vpop.f32.mrf.mxu1  ;;  %v2720_v45 = vadd.f32 %v8216_v60, %v2707_v8  ;;  %v2744_v41 = vand.u32 2147483647, %v2732_v5  ;;  %v10645_v51 = vld [vmem:[#allocation94_spill] sm:$0xff]  ;;  %v10646_v60 = vld [vmem:[#allocation109_spill] sm:$0xff] }
 0x576   :  { %v228_v8 = vadd.f32 %v10646_v60, %v10645_v51  ;;  %v2747_v63 = vor.u32 1.1754944e-38, %v2746_v11  ;;  %v2762_v5 = vor.u32 1.1754944e-38, %v2761_v9  ;;  %vm2892_vm4 = vweird.f32 %v8346_v40 }
 0x577   :  { %v2738_v46 = vmul.f32 %v6426_v44, %v2737_v16  ;;  %6433 = vtanh.f32 %v2720_v45  ;;  %vm2745_vm12 = vcmp.eq.f32.partialorder %v2744_v41, 8.507059e+37 }
 0x578   :  { %v6430_v14 = vpop.eup %6429  ;;  %6435 = vrcp.f32 %v8346_v40 }
 0x579   :  { %v6432_v58 = vpop.eup %6431  ;;  %v2751_v2 = vmul.f32 %v6430_v14, %v2733_v38  ;;  %v2739_v15 = vadd.f32 %v6426_v44, %v2738_v46  ;;  %vm2756_vm10 = vweird.f32 %v6430_v14 }
 0x57a   :  { %v2734_v17 = vadd.f32 1.0, %v6432_v58  ;;  %v2708_v1 = vpop.f32.mrf.mxu2  ;;  %vm2757_vm13 = vmor %vm2755_vm11, %vm2756_vm10 }
 0x57b   :  { %v2752_v49 = vsub.f32 1.0, %v2751_v2  ;;  %v3032_v32 = vpop.f32.mrf.mxu3  ;;  %v2743_v46 = vsel %vm2742_vm9, %v6426_v44, %v2739_v15 }
 0x57c   :  { %6437 = vrcp.f32 %v2734_v17  ;;  %v2748_v32 = vsel %vm2745_vm12, %v2747_v63, %v2743_v46  ;;  %v2776_v0 = vand.u32 2147483648, %v2734_v17  ;;  %vm2770_vm0 = vweird.f32 %v2734_v17 }
 0x57d   :  { %v2753_v16 = vmul.f32 %v6430_v14, %v2752_v49  ;;  %v2813_v58 = vpop.f32.mrf.mxu0  ;;  %v6434_v2 = vpop.eup %6433  ;;  %v10647_v49 = vld [vmem:[#allocation106_spill] sm:$0xff] }
 0x57e   :  { %v2856_v45 = vadd.f32 %v2813_v58, %v228_v8  ;;  %v8351_v36 = vpop.eup %6435  ;;  %v286_v15 = vadd.f32 %v10648_v39, %v10647_v49  ;;  %v2782_v41 = vmul.f32 %v6434_v2, %v2748_v32  ;;  %v10677_v49 = vld [vmem:[#allocation53_spill] sm:$0xff] }
 0x57f   :  { %v2754_v1 = vadd.f32 %v6430_v14, %v2753_v16  ;;  %v2888_v9 = vmul.f32 %v8351_v36, %v8346_v40  ;;  %vm2893_vm3 = vweird.f32 %v8351_v36 }
 0x580   :  { %v6057_v20 = vmul.f32 -1.442695, %v2856_v45  ;;  %vm8372_vm5 = vmor %vm2892_vm4, %vm2893_vm3 }
 0x581   :  { %v2758_v60 = vsel %vm2757_vm13, %v6430_v14, %v2754_v1  ;;  %v2774_v14 = vand.u32 2147483647, %v2734_v17 }
 0x582   :  { %v6438_v51 = vpop.eup %6437  ;;  %v2763_v44 = vsel %vm2760_vm14, %v2762_v5, %v2758_v60  ;;  %6439 = vpow2.f32 %v6057_v20  ;;  %v2889_v5 = vsub.f32 1.0, %v2888_v9 }
 0x583   :  { %v2766_v11 = vmul.f32 %v6438_v51, %v2734_v17  ;;  %v2781_v38 = vmul.f32 %v2763_v44, %v8080_v34  ;;  %v2839_v8 = vpop.f32.mrf.mxu2  ;;  %vm2771_vm15 = vweird.f32 %v6438_v51  ;;  %vm2775_vm2 = vcmp.eq.f32.partialorder %v2774_v14, 8.507059e+37 }
 0x584   :  { %v2858_v63 = vadd.f32 %v2839_v8, %v286_v15  ;;  %vm2772_vm1 = vmor %vm2770_vm0, %vm2771_vm15  ;;  %v2777_v15 = vor.u32 1.1754944e-38, %v2776_v0  ;;  %v2440_v0 = vsub.f32 %v8114_v4, %v8109_v61 }
 0x585   :  { %v2767_v16 = vsub.f32 1.0, %v2766_v11  ;;  %v2783_v46 = vadd.f32 %v2782_v41, %v2781_v38  ;;  %v2815_v58 = vpop.f32.mrf.mxu0 }
 0x586   :  { %v6059_v45 = vmul.f32 -1.442695, %v2858_v63  ;;  %v2890_v63 = vmul.f32 %v8351_v36, %v2889_v5  ;;  %v2441_v5 = vmul.f32 %v2440_v0, %v8124_v47 }
 0x587   :  { %v2768_v1 = vmul.f32 %v6438_v51, %v2767_v16  ;;  %6441 = vtanh.f32 %v2783_v46  ;;  %v2789_v39 = vsub.f32 %v2783_v46, %v8080_v34 }
 0x588   :  { %v6440_v20 = vpop.eup %6439  ;;  %6443 = vpow2.f32 %v6059_v45  ;;  %v2898_v45 = vand.u32 2147483648, %v8346_v40 }
 0x589   :  { %v2769_v2 = vadd.f32 %v6438_v51, %v2768_v1  ;;  %v2790_v32 = vmul.f32 %v2789_v39, %v8124_v47  ;;  %v2869_v60 = vadd.f32 1.0, %v6440_v20  ;;  %v2896_v39 = vand.u32 2147483647, %v8346_v40 }
 0x58b   :  { %v2773_v44 = vsel %vm2772_vm1, %v6438_v51, %v2769_v2  ;;  %v8361_v11 = vadd.f32 %v2790_v32, %v8080_v34  ;;  %6445 = vrcp.f32 %v2869_v60  ;;  %v2841_v38 = vpop.f32.mrf.mxu2  ;;  %v2891_v51 = vadd.f32 %v8351_v36, %v2890_v63 }
 0x58c   :  { %v2778_v41 = vsel %vm2775_vm2, %v2777_v15, %v2773_v44  ;;  %v2883_v32 = vand.u32 2147483648, %v2869_v60  ;;  %v2881_v44 = vand.u32 2147483647, %v2869_v60  ;;  %vm2897_vm7 = vcmp.eq.f32.partialorder %v2896_v39, 8.507059e+37 }
 0x58d   :  { %v6442_v8 = vpop.eup %6441  ;;  %v2895_v2 = vsel %vm8372_vm5, %v8351_v36, %v2891_v51  ;;  %vm2877_vm8 = vweird.f32 %v2869_v60 }
 0x58e   :  { %v6444_v9 = vpop.eup %6443  ;;  %v2785_v16 = vmul.f32 %v6442_v8, %v2778_v41  ;;  %v2899_v41 = vor.u32 1.1754944e-38, %v2898_v45  ;;  %v2884_v36 = vor.u32 1.1754944e-38, %v2883_v32  ;;  %vm2882_vm10 = vcmp.eq.f32.partialorder %v2881_v44, 8.507059e+37  ;;  %v10651_v45 = vld [vmem:[#allocation28_spill] sm:$0xff]  ;;  %v10654_v44 = vld [vmem:[#allocation22_spill] sm:$0xff] }
 0x58f   :  { %v2871_v46 = vadd.f32 1.0, %v6444_v9 }
 0x590   :  { %v2786_v17 = vsub.f32 %v2785_v16, %v8097_v48 }
 0x591   :  { %v6446_v58 = vpop.eup %6445  ;;  %6447 = vrcp.f32 %v2871_v46  ;;  %vm2907_vm12 = vweird.f32 %v2871_v46 }
 0x592   :  { %v2873_v34 = vmul.f32 %v6446_v58, %v2869_v60  ;;  %v2787_v14 = vmul.f32 %v2786_v17, %v8124_v47  ;;  %6449 = vtanh.f32 %v8228_v55  ;;  %vm2878_vm6 = vweird.f32 %v6446_v58 }
 0x593   :  { %v2900_v47 = vsel %vm2897_vm7, %v2899_v41, %v2895_v2  ;;  %vm2879_vm9 = vmor %vm2877_vm8, %vm2878_vm6  ;;  %v8390_v55 = vadd.f32 %v2441_v5, %v8109_v61  ;;  %v2913_v61 = vand.u32 2147483648, %v2871_v46  ;;  %v10653_v5 = vld [vmem:[#allocation32_spill] sm:$0xff] }
 0x594   :  { %v2874_v20 = vsub.f32 1.0, %v2873_v34  ;;  %v8378_v4 = vadd.f32 %v2787_v14, %v8097_v48 }
 0x595   :  { %v2918_v60 = vmul.f32 %v2900_v47, %v8390_v55  ;;  %v2914_v39 = vor.u32 1.1754944e-38, %v2913_v61  ;;  %v10667_v61 = vld [vmem:[#allocation179_spill] sm:$0xff] }
 0x596   :  { %v2875_v15 = vmul.f32 %v6446_v58, %v2874_v20  ;;  %v3104_v38 = vpack.c.bf16 %v8378_v4, %v8378_v4  ;;  %v10652_v20 = vld [vmem:[#allocation29_spill] sm:$0xff] }
 0x597   :  { %v6448_v40 = vpop.eup %6447 }
 0x598   :  { %v2876_v48 = vadd.f32 %v6446_v58, %v2875_v15  ;;  %v2903_v8 = vmul.f32 %v6448_v40, %v2871_v46  ;;  %3126 = vmatmul.bf16.vlgmr.msrb.gmra.mxu1 %v3104_v38  ;;  %3152 = vmatmul.bf16.vlgmr.msrb.gmra.mxu3 %v3104_v38  ;;  %v6450_v16 = vpop.eup %6449  ;;  %vm2908_vm11 = vweird.f32 %v6448_v40 }
 0x599   :  { %3303 = vmatpush.bf16.msrb.mxu1 %v10348_v7  ;;  %3329 = vmatpush.bf16.msrb.mxu3 %v10349_v54  ;;  %vm2909_vm13 = vmor %vm2907_vm12, %vm2908_vm11 }
 0x59a   :  { %v2880_v63 = vsel %vm2879_vm9, %v6446_v58, %v2876_v48  ;;  %v2904_v9 = vsub.f32 1.0, %v2903_v8  ;;  %v2911_v58 = vand.u32 2147483647, %v2871_v46  ;;  %v10655_v46 = vld [vmem:[#allocation33_spill] sm:$0xff]  ;;  %v10656_v48 = vld [vmem:[#allocation36_spill] sm:$0xff]  ;;  %v8405_v8 = vpop.permute.xlu1 %2797 }
 0x59b   :  { %v2885_v17 = vsel %vm2882_vm10, %v2884_v36, %v2880_v63  ;;  %v10658_v36 = vld [vmem:[#allocation37_spill] sm:$0xff] }
 0x59c   :  { %v2919_v0 = vmul.f32 %v6450_v16, %v2885_v17  ;;  %v2905_v51 = vmul.f32 %v6448_v40, %v2904_v9  ;;  %vm2912_vm14 = vcmp.eq.f32.partialorder %v2911_v58, 8.507059e+37  ;;  %v10659_v63 = vld [vmem:[#allocation41_spill] sm:$0xff]  ;;  %v10660_v9 = vld [vmem:[#allocation40_spill] sm:$0xff] }
 0x59d   :  { %3304 = vmatpush.bf16.msrb.mxu1 %v10350_v10  ;;  %3330 = vmatpush.bf16.msrb.mxu3 %v10351_v52  ;;  %v10661_v16 = vld [vmem:[#allocation44_spill] sm:$0xff] }
 0x59e   :  { %v8395_v34 = vadd.f32 %v2919_v0, %v2918_v60  ;;  %v2906_v14 = vadd.f32 %v6448_v40, %v2905_v51  ;;  %v10662_v17 = vld [vmem:[#allocation176_spill] sm:$0xff]  ;;  %v10663_v60 = vld [vmem:[#allocation177_spill] sm:$0xff]  ;;  %v10665_v51 = vld [vmem:[#allocation47_spill] sm:$0xff] }
 0x59f   :  { %v10664_v0 = vld [vmem:[#allocation45_spill] sm:$0xff]  ;;  %v10668_v58 = vld [vmem:[#allocation48_spill] sm:$0xff] }
 0x5a0   :  { %6451 = vtanh.f32 %v8395_v34  ;;  %v2910_v1 = vsel %vm2909_vm13, %v6448_v40, %v2906_v14  ;;  %v10666_v14 = vld [vmem:[#allocation178_spill] sm:$0xff] }
 0x5a1   :  { %3305 = vmatpush.bf16.msrb.mxu1 %v10352_v12  ;;  %3331 = vmatpush.bf16.msrb.mxu3 %v10651_v45  ;;  %v2915_v32 = vsel %vm2912_vm14, %v2914_v39, %v2910_v1  ;;  %v10669_v1 = vld [vmem:[#allocation49_spill] sm:$0xff]  ;;  %v10670_v39 = vld [vmem:[#allocation180_spill] sm:$0xff] }
 0x5a5   :  { %3306 = vmatpush.bf16.msrb.mxu1 %v10652_v20  ;;  %3332 = vmatpush.bf16.msrb.mxu3 %v10653_v5 }
 0x5a6   :  { %v6452_v2 = vpop.eup %6451 }
 0x5a7   :  { %v2922_v15 = vmul.f32 %v6452_v2, %v2915_v32  ;;  %v10671_v2 = vld [vmem:[#allocation181_spill] sm:$0xff]  ;;  %v10672_v32 = vld [vmem:[#allocation50_spill] sm:$0xff] }
 0x5a8   :  { %3178 = vmatmul.bf16.vlgmr.msra.gmra.mxu1 %v3104_v38  ;;  %3204 = vmatmul.bf16.vlgmr.msra.gmra.mxu3 %v3104_v38 }
 0x5a9   :  { %v2923_v41 = vsub.f32 %v2922_v15, %v10654_v44  ;;  %3307 = vmatpush.bf16.msrb.mxu1 %v10655_v46  ;;  %3333 = vmatpush.bf16.msrb.mxu3 %v10656_v48  ;;  %v10673_v15 = vld [vmem:[#allocation51_spill] sm:$0xff] }
 0x5ab   :  { %v2924_v40 = vmul.f32 %v2923_v41, %v8405_v8  ;;  %v10675_v41 = vld [vmem:[#allocation183_spill] sm:$0xff] }
 0x5ad   :  { %v8409_v47 = vadd.f32 %v2924_v40, %v10654_v44  ;;  %3308 = vmatpush.bf16.msrb.mxu1 %v10658_v36  ;;  %3334 = vmatpush.bf16.msrb.mxu3 %v10659_v63  ;;  %v10674_v44 = vld [vmem:[#allocation182_spill] sm:$0xff]  ;;  %v10676_v40 = vld [vmem:[#allocation52_spill] sm:$0xff] }
 0x5af   :  { %10657 = vst [vmem:[#allocation82_spill] sm:$0xff] %v8409_v47  ;;  %v8415_v38 = vpack.c.bf16 %v8409_v47, %v8409_v47 }
 0x5b1   :  { %2938 = vmatmul.bf16.vlgmr.msrb.gmra.mxu0 %v8415_v38  ;;  %2964 = vmatmul.bf16.vlgmr.msrb.gmra.mxu2 %v8415_v38 }
 0x5b2   :  { %3309 = vmatpush.bf16.msrb.mxu1 %v10660_v9  ;;  %3335 = vmatpush.bf16.msrb.mxu3 %v10661_v16 }
 0x5b3   :  { %3105 = vmatpush.bf16.msrb.mxu0 %v10662_v17  ;;  %3131 = vmatpush.bf16.msrb.mxu2 %v10663_v60 }
 0x5b6   :  { %3310 = vmatpush.bf16.msrb.mxu1 %v10664_v0  ;;  %3336 = vmatpush.bf16.msrb.mxu3 %v10665_v51  ;;  %v10728_v51 = vld [vmem:[#allocation193_spill] sm:$0xff] }
 0x5b7   :  { %3106 = vmatpush.bf16.msrb.mxu0 %v10666_v14  ;;  %3132 = vmatpush.bf16.msrb.mxu2 %v10667_v61  ;;  %v10688_v61 = vld [vmem:[#allocation58_spill] sm:$0xff] }
 0x5b9   :  { %3311 = vmatmul.bf16.vlgmr.msrb.gmra.mxu1 %v8415_v38  ;;  %3337 = vmatmul.bf16.vlgmr.msrb.gmra.mxu3 %v8415_v38 }
 0x5ba   :  { %3429 = vmatpush.bf16.msra.mxu1 %v10668_v58  ;;  %3455 = vmatpush.bf16.msra.mxu3 %v10669_v1  ;;  %v10678_v1 = vld [vmem:[#allocation184_spill] sm:$0xff]  ;;  %v10687_v58 = vld [vmem:[#allocation189_spill] sm:$0xff] }
 0x5bb   :  { %3107 = vmatpush.bf16.msrb.mxu0 %v10670_v39  ;;  %3133 = vmatpush.bf16.msrb.mxu2 %v10671_v2  ;;  %v10679_v39 = vld [vmem:[#allocation185_spill] sm:$0xff]  ;;  %v10680_v2 = vld [vmem:[#allocation54_spill] sm:$0xff] }
 0x5be   :  { %3430 = vmatpush.bf16.msra.mxu1 %v10672_v32  ;;  %3456 = vmatpush.bf16.msra.mxu3 %v10673_v15  ;;  %v10681_v32 = vld [vmem:[#allocation55_spill] sm:$0xff]  ;;  %v10682_v15 = vld [vmem:[#allocation186_spill] sm:$0xff] }
 0x5bf   :  { %3108 = vmatpush.bf16.msrb.mxu0 %v10674_v44  ;;  %3134 = vmatpush.bf16.msrb.mxu2 %v10675_v41  ;;  %v10683_v44 = vld [vmem:[#allocation187_spill] sm:$0xff]  ;;  %v10684_v41 = vld [vmem:[#allocation56_spill] sm:$0xff] }
 0x5c1   :  { %2990 = vmatmul.bf16.vlgmr.msra.gmra.mxu0 %v8415_v38  ;;  %3016 = vmatmul.bf16.vlgmr.msra.gmra.mxu2 %v8415_v38 }
 0x5c2   :  { %3431 = vmatpush.bf16.msra.mxu1 %v10676_v40  ;;  %3457 = vmatpush.bf16.msra.mxu3 %v10677_v49  ;;  %v10685_v40 = vld [vmem:[#allocation57_spill] sm:$0xff]  ;;  %v10686_v49 = vld [vmem:[#allocation188_spill] sm:$0xff] }
 0x5c3   :  { %3109 = vmatpush.bf16.msrb.mxu0 %v10678_v1  ;;  %3135 = vmatpush.bf16.msrb.mxu2 %v10679_v39  ;;  %v10689_v1 = vld [vmem:[#allocation59_spill] sm:$0xff]  ;;  %v10690_v39 = vld [vmem:[#allocation190_spill] sm:$0xff] }
 0x5c6   :  { %3432 = vmatpush.bf16.msra.mxu1 %v10680_v2  ;;  %3458 = vmatpush.bf16.msra.mxu3 %v10681_v32  ;;  %v10691_v2 = vld [vmem:[#allocation191_spill] sm:$0xff]  ;;  %v10692_v32 = vld [vmem:[#allocation192_spill] sm:$0xff] }
 0x5c7   :  { %3110 = vmatpush.bf16.msrb.mxu0 %v10682_v15  ;;  %3136 = vmatpush.bf16.msrb.mxu2 %v10683_v44  ;;  %v10693_v15 = vld [vmem:[#allocation194_spill] sm:$0xff]  ;;  %v10694_v44 = vld [vmem:[#allocation60_spill] sm:$0xff] }
 0x5ca   :  { %3433 = vmatpush.bf16.msra.mxu1 %v10684_v41  ;;  %3459 = vmatpush.bf16.msra.mxu3 %v10685_v40  ;;  %v10695_v41 = vld [vmem:[#allocation61_spill] sm:$0xff]  ;;  %v10696_v40 = vld [vmem:[#allocation91_spill] sm:$0xff] }
 0x5cb   :  { %3111 = vmatpush.bf16.msrb.mxu0 %v10686_v49  ;;  %3137 = vmatpush.bf16.msrb.mxu2 %v10687_v58  ;;  %v10697_v49 = vld [vmem:[#allocation195_spill] sm:$0xff]  ;;  %v10698_v58 = vld [vmem:[#allocation62_spill] sm:$0xff] }
 0x5ce   :  { %3434 = vmatpush.bf16.msra.mxu1 %v10688_v61  ;;  %3460 = vmatpush.bf16.msra.mxu3 %v10689_v1  ;;  %v10699_v61 = vld [vmem:[#allocation63_spill] sm:$0xff]  ;;  %v10700_v1 = vld [vmem:[#allocation64_spill] sm:$0xff] }
 0x5cf   :  { %3112 = vmatpush.bf16.msrb.mxu0 %v10690_v39  ;;  %3138 = vmatpush.bf16.msrb.mxu2 %v10691_v2  ;;  %v10701_v39 = vld [vmem:[#allocation65_spill] sm:$0xff] }
 0x5d0   :  { %v10702_v2 = vld [vmem:[#allocation197_spill] sm:$0xff] }
 0x5d2   :  { %3435 = vmatpush.bf16.msra.mxu1 %v10694_v44  ;;  %3461 = vmatpush.bf16.msra.mxu3 %v10695_v41  ;;  %v10705_v44 = vld [vmem:[#allocation67_spill] sm:$0xff]  ;;  %v10706_v41 = vld [vmem:[#allocation98_spill] sm:$0xff] }
 0x5d3   :  { %3157 = vmatpush.bf16.msra.mxu0 %v10692_v32  ;;  %3183 = vmatpush.bf16.msra.mxu2 %v10693_v15  ;;  %v10703_v32 = vld [vmem:[#allocation198_spill] sm:$0xff] }
 0x5d4   :  { %v10704_v15 = vld [vmem:[#allocation66_spill] sm:$0xff] }
 0x5d6   :  { %3436 = vmatpush.bf16.msra.mxu1 %v10698_v58  ;;  %3462 = vmatpush.bf16.msra.mxu3 %v10699_v61  ;;  %v10709_v58 = vld [vmem:[#allocation69_spill] sm:$0xff]  ;;  %v10710_v61 = vld [vmem:[#allocation200_spill] sm:$0xff] }
 0x5d7   :  { %3158 = vmatpush.bf16.msra.mxu0 %v10696_v40  ;;  %3184 = vmatpush.bf16.msra.mxu2 %v10697_v49  ;;  %v10707_v40 = vld [vmem:[#allocation199_spill] sm:$0xff]  ;;  %v10708_v49 = vld [vmem:[#allocation68_spill] sm:$0xff] }
 0x5da   :  { %3481 = vmatpush.bf16.msrb.mxu1 %v10700_v1  ;;  %3507 = vmatpush.bf16.msrb.mxu3 %v10701_v39  ;;  %v10711_v1 = vld [vmem:[#allocation202_spill] sm:$0xff] }
 0x5db   :  { %3159 = vmatpush.bf16.msra.mxu0 %v10702_v2  ;;  %3185 = vmatpush.bf16.msra.mxu2 %v10703_v32  ;;  %v10712_v39 = vld [vmem:[#allocation70_spill] sm:$0xff]  ;;  %v10713_v2 = vld [vmem:[#allocation71_spill] sm:$0xff] }
 0x5dc   :  { %v10714_v32 = vld [vmem:[#allocation203_spill] sm:$0xff] }
 0x5de   :  { %3482 = vmatpush.bf16.msrb.mxu1 %v10704_v15  ;;  %3508 = vmatpush.bf16.msrb.mxu3 %v10705_v44  ;;  %v10715_v15 = vld [vmem:[#allocation205_spill] sm:$0xff]  ;;  %v10716_v44 = vld [vmem:[#allocation72_spill] sm:$0xff] }
 0x5df   :  { %3160 = vmatpush.bf16.msra.mxu0 %v10706_v41  ;;  %3186 = vmatpush.bf16.msra.mxu2 %v10707_v40  ;;  %v10717_v41 = vld [vmem:[#allocation73_spill] sm:$0xff]  ;;  %v10718_v40 = vld [vmem:[#allocation206_spill] sm:$0xff] }
 0x5e2   :  { %3483 = vmatpush.bf16.msrb.mxu1 %v10708_v49  ;;  %3509 = vmatpush.bf16.msrb.mxu3 %v10709_v58  ;;  %v10719_v49 = vld [vmem:[#allocation207_spill] sm:$0xff]  ;;  %v10720_v58 = vld [vmem:[#allocation74_spill] sm:$0xff] }
 0x5e3   :  { %3161 = vmatpush.bf16.msra.mxu0 %v10710_v61  ;;  %3187 = vmatpush.bf16.msra.mxu2 %v10711_v1  ;;  %v10721_v61 = vld [vmem:[#allocation75_spill] sm:$0xff]  ;;  %v10722_v1 = vld [vmem:[#allocation208_spill] sm:$0xff] }
 0x5e6   :  { %3484 = vmatpush.bf16.msrb.mxu1 %v10712_v39  ;;  %3510 = vmatpush.bf16.msrb.mxu3 %v10713_v2  ;;  %v10723_v39 = vld [vmem:[#allocation209_spill] sm:$0xff]  ;;  %v10724_v2 = vld [vmem:[#allocation76_spill] sm:$0xff] }
 0x5e7   :  { %3162 = vmatpush.bf16.msra.mxu0 %v10714_v32  ;;  %3188 = vmatpush.bf16.msra.mxu2 %v10715_v15  ;;  %v10725_v32 = vld [vmem:[#allocation77_spill] sm:$0xff]  ;;  %v10726_v15 = vld [vmem:[#allocation78_spill] sm:$0xff] }
 0x5ea   :  { %3485 = vmatpush.bf16.msrb.mxu1 %v10716_v44  ;;  %3511 = vmatpush.bf16.msrb.mxu3 %v10717_v41  ;;  %v10727_v44 = vld [vmem:[#allocation79_spill] sm:$0xff] }
 0x5eb   :  { %3163 = vmatpush.bf16.msra.mxu0 %v10718_v40  ;;  %3189 = vmatpush.bf16.msra.mxu2 %v10719_v49 }
 0x5ee   :  { %3486 = vmatpush.bf16.msrb.mxu1 %v10720_v58  ;;  %3512 = vmatpush.bf16.msrb.mxu3 %v10721_v61 }
 0x5ef   :  { %3164 = vmatpush.bf16.msra.mxu0 %v10722_v1  ;;  %3190 = vmatpush.bf16.msra.mxu2 %v10723_v39 }
 0x5f2   :  { %3487 = vmatpush.bf16.msrb.mxu1 %v10724_v2  ;;  %3513 = vmatpush.bf16.msrb.mxu3 %v10725_v32 }
 0x5f6   :  { %3488 = vmatpush.bf16.msrb.mxu1 %v10726_v15  ;;  %3514 = vmatpush.bf16.msrb.mxu3 %v10727_v44  ;;  %v10729_v44 = vld [vmem:[#allocation196_spill] sm:$0xff] }
 0x615   :  { %v8491_v41 = vpop.f32.mrf.mxu1 }
 0x61b   :  { %v8493_v40 = vpop.f32.mrf.mxu3 }
 0x61d   :  { %v3129_v49 = vpop.f32.mrf.mxu1 }
 0x623   :  { %v3155_v58 = vpop.f32.mrf.mxu3 }
 0x624   :  { %v10730_v58 = vld [vmem:[#allocation121_spill] sm:$0xff] }
 0x625   :  { %v8495_v14 = vpop.f32.mrf.mxu1 }
 0x62b   :  { %v8497_v61 = vpop.f32.mrf.mxu3 }
 0x62d   :  { %v3181_v1 = vpop.f32.mrf.mxu1 }
 0x62e   :  { %v2939_v39 = vpop.f32.mrf.mxu0 }
 0x62f   :  { %v2940_v2 = vadd.f32 %v2939_v39, %v10728_v51 }
 0x631   :  { %v2953_v32 = vadd.f32 %v8330_v57, %v2940_v2  ;;  %v10731_v57 = vld [vmem:[#allocation129_spill] sm:$0xff] }
 0x633   :  { %v6060_v0 = vmul.f32 -1.442695, %v2953_v32  ;;  %v3207_v15 = vpop.f32.mrf.mxu3 }
 0x634   :  { %v2965_v60 = vpop.f32.mrf.mxu2 }
 0x635   :  { %6453 = vpow2.f32 %v6060_v0  ;;  %v2966_v17 = vadd.f32 %v2965_v60, %v10729_v44  ;;  %v10732_v60 = vld [vmem:[#allocation201_spill] sm:$0xff] }
 0x636   :  { %v2941_v16 = vpop.f32.mrf.mxu0  ;;  %v3312_v9 = vpop.f32.mrf.mxu1 }
 0x637   :  { %v2979_v49 = vadd.f32 %v8334_v56, %v2966_v17  ;;  %v8504_v63 = vadd.f32 %v3312_v9, %v10730_v58 }
 0x639   :  { %v6061_v36 = vmul.f32 -1.442695, %v2979_v49 }
 0x63b   :  { %v6454_v1 = vpop.eup %6453  ;;  %6455 = vpow2.f32 %v6061_v36 }
 0x63c   :  { %v3043_v48 = vadd.f32 1.0, %v6454_v1  ;;  %v2967_v39 = vpop.f32.mrf.mxu2  ;;  %v3338_v51 = vpop.f32.mrf.mxu3 }
 0x63d   :  { %v8507_v2 = vadd.f32 %v3338_v51, %v10731_v57  ;;  %v10733_v39 = vld [vmem:[#allocation204_spill] sm:$0xff] }
 0x63e   :  { %6457 = vrcp.f32 %v3043_v48  ;;  %v2991_v0 = vpop.f32.mrf.mxu0  ;;  %v3314_v32 = vpop.f32.mrf.mxu1  ;;  %vm3051_vm0 = vweird.f32 %v3043_v48 }
 0x63f   :  { %v2992_v16 = vadd.f32 %v2991_v0, %v10732_v60 }
 0x641   :  { %v6456_v15 = vpop.eup %6455  ;;  %v3005_v56 = vadd.f32 %v8339_v21, %v2992_v16  ;;  %v3057_v16 = vand.u32 2147483648, %v3043_v48 }
 0x642   :  { %v3044_v17 = vadd.f32 1.0, %v6456_v15 }
 0x643   :  { %v6062_v9 = vmul.f32 -1.442695, %v3005_v56 }
 0x644   :  { %v6458_v58 = vpop.eup %6457  ;;  %6459 = vrcp.f32 %v3044_v17  ;;  %v3017_v49 = vpop.f32.mrf.mxu2  ;;  %vm3066_vm3 = vweird.f32 %v3044_v17 }
 0x645   :  { %v3340_v36 = vpop.f32.mrf.mxu3  ;;  %v3047_v1 = vmul.f32 %v6458_v58, %v3043_v48  ;;  %6461 = vpow2.f32 %v6062_v9  ;;  %v3018_v44 = vadd.f32 %v3017_v49, %v10733_v39  ;;  %vm3052_vm15 = vweird.f32 %v6458_v58 }
 0x646   :  { %v2993_v51 = vpop.f32.mrf.mxu0  ;;  %v3055_v36 = vand.u32 2147483647, %v3043_v48  ;;  %v3072_v9 = vand.u32 2147483648, %v3044_v17  ;;  %vm3053_vm1 = vmor %vm3051_vm0, %vm3052_vm15  ;;  %v3070_v49 = vand.u32 2147483647, %v3044_v17 }
 0x647   :  { %v3048_v57 = vsub.f32 1.0, %v3047_v1  ;;  %v3031_v46 = vadd.f32 %v8343_v19, %v3018_v44  ;;  %v3058_v44 = vor.u32 1.1754944e-38, %v3057_v16 }
 0x648   :  { %vm3056_vm4 = vcmp.eq.f32.partialorder %v3055_v36, 8.507059e+37  ;;  %vm3071_vm6 = vcmp.eq.f32.partialorder %v3070_v49, 8.507059e+37 }
 0x649   :  { %v3049_v32 = vmul.f32 %v6458_v58, %v3048_v57  ;;  %6463 = vtanh.f32 %v3031_v46 }
 0x64a   :  { %v6460_v47 = vpop.eup %6459 }
 0x64b   :  { %v3062_v0 = vmul.f32 %v6460_v47, %v3044_v17  ;;  %v3050_v60 = vadd.f32 %v6458_v58, %v3049_v32  ;;  %v6462_v21 = vpop.eup %6461  ;;  %vm3067_vm2 = vweird.f32 %v6460_v47  ;;  %v3073_v32 = vor.u32 1.1754944e-38, %v3072_v9 }
 0x64c   :  { %v3019_v15 = vpop.f32.mrf.mxu2  ;;  %v3045_v5 = vadd.f32 1.0, %v6462_v21  ;;  %vm3068_vm5 = vmor %vm3066_vm3, %vm3067_vm2 }
 0x64d   :  { %v3063_v56 = vsub.f32 1.0, %v3062_v0  ;;  %v3054_v19 = vsel %vm3053_vm1, %v6458_v58, %v3050_v60 }
 0x64e   :  { %6465 = vrcp.f32 %v3045_v5  ;;  %v3059_v46 = vsel %vm3056_vm4, %v3058_v44, %v3054_v19  ;;  %v3087_v12 = vand.u32 2147483648, %v3045_v5  ;;  %v3085_v58 = vand.u32 2147483647, %v3045_v5 }
 0x64f   :  { %v3064_v51 = vmul.f32 %v6460_v47, %v3063_v56  ;;  %v6464_v57 = vpop.eup %6463  ;;  %vm3081_vm8 = vweird.f32 %v3045_v5 }
 0x650   :  { %v3093_v39 = vmul.f32 %v6464_v57, %v3059_v46  ;;  %vm3086_vm10 = vcmp.eq.f32.partialorder %v3085_v58, 8.507059e+37  ;;  %v5213_v57 = vld [vmem:[%s9686_s1] sm:$0xff]  ;;  %v10736_v46 = vld [vmem:[#allocation92_spill] sm:$0xff]  ;;  %v10744_v58 = vld [vmem:[#allocation122_spill] sm:$0xff] }
 0x651   :  { %v3065_v1 = vadd.f32 %v6460_v47, %v3064_v51 }
 0x653   :  { %v3069_v15 = vsel %vm3068_vm5, %v6460_v47, %v3065_v1  ;;  %v3088_v47 = vor.u32 1.1754944e-38, %v3087_v12  ;;  %v6678_v12 = vld [vmem:[%s9685_s0] sm:$0xff] }
 0x654   :  { %v3074_v0 = vsel %vm3071_vm6, %v3073_v32, %v3069_v15  ;;  %v6466_v21 = vpop.eup %6465  ;;  %vm3278_vm11 = vcmp.gt.s32.totalorder %v6678_v12, 4  ;;  %vm3764_vm12 = vcmp.gt.s32.totalorder %v6678_v12, 5  ;;  %v10735_v32 = vld [vmem:[#allocation90_spill] sm:$0xff]  ;;  %v10737_v15 = vld [vmem:[#allocation39_spill] sm:$0xff] }
 0x655   :  { %v3092_v48 = vmul.f32 %v3074_v0, %v8238_v33  ;;  %v3077_v20 = vmul.f32 %v6466_v21, %v3045_v5  ;;  %vm3082_vm7 = vweird.f32 %v6466_v21  ;;  %v10738_v0 = vld [vmem:[#allocation42_spill] sm:$0xff]  ;;  %v10755_v12 = vld [vmem:[#allocation135_spill] sm:$0xff] }
 0x656   :  { %vm3083_vm9 = vmor %vm3081_vm8, %vm3082_vm7 }
 0x657   :  { %v3094_v56 = vadd.f32 %v3093_v39, %v3092_v48  ;;  %v3078_v45 = vsub.f32 1.0, %v3077_v20  ;;  %v10740_v48 = vld [vmem:[#allocation96_spill] sm:$0xff] }
 0x659   :  { %6467 = vtanh.f32 %v3094_v56  ;;  %v3100_v60 = vsub.f32 %v3094_v56, %v8238_v33  ;;  %v3079_v17 = vmul.f32 %v6466_v21, %v3078_v45  ;;  %v10741_v56 = vld [vmem:[#allocation43_spill] sm:$0xff] }
 0x65b   :  { %v3101_v16 = vmul.f32 %v3100_v60, %v8405_v8  ;;  %v3080_v36 = vadd.f32 %v6466_v21, %v3079_v17  ;;  %v10742_v60 = vld [vmem:[#allocation46_spill] sm:$0xff]  ;;  %v10743_v17 = vld [vmem:[#allocation99_spill] sm:$0xff] }
 0x65d   :  { %v8517_v9 = vadd.f32 %v3101_v16, %v8238_v33  ;;  %v3084_v49 = vsel %vm3083_vm9, %v6466_v21, %v3080_v36  ;;  %v10734_v33 = vmov 0.0   ;;  %v10739_v21 = vld [vmem:[#allocation93_spill] sm:$0xff]  ;;  %v10745_v16 = vld [vmem:[#allocation102_spill] sm:$0xff]  ;;  %v10746_v36 = vld [vmem:[#allocation123_spill] sm:$0xff] }
 0x65e   :  { %v3089_v20 = vsel %vm3086_vm10, %v3088_v47, %v3084_v49  ;;  %v6066_v1 = vsel %vm3278_vm11, 1.0, %v10734_v33  ;;  %v10747_v47 = vld [vmem:[#allocation104_spill] sm:$0xff]  ;;  %v10748_v49 = vld [vmem:[#allocation103_spill] sm:$0xff] }
 0x65f   :  { %v6468_v39 = vpop.eup %6467  ;;  %3283 = vperm.xlu2 %6290, %v6066_v1   ;;  %v10758_v1 = vld [vmem:[#allocation115_spill] sm:$0xff] }
 0x660   :  { %v3096_v51 = vmul.f32 %v6468_v39, %v3089_v20  ;;  %v10749_v39 = vld [vmem:[#allocation128_spill] sm:$0xff]  ;;  %v10750_v20 = vld [vmem:[#allocation105_spill] sm:$0xff] }
 0x662   :  { %v3097_v19 = vsub.f32 %v3096_v51, %v8243_v28  ;;  %v10751_v51 = vld [vmem:[#allocation131_spill] sm:$0xff] }
 0x664   :  { %v3098_v45 = vmul.f32 %v3097_v19, %v8405_v8  ;;  %v10752_v19 = vld [vmem:[#allocation110_spill] sm:$0xff] }
 0x666   :  { %v8522_v44 = vadd.f32 %v3098_v45, %v8243_v28  ;;  %v6076_v28 = vsel %vm3764_vm12, 1.0, %v10734_v33  ;;  %v10753_v45 = vld [vmem:[#allocation134_spill] sm:$0xff] }
 0x667   :  { %3769 = vperm.xlu2 %6290, %v6076_v28   ;;  %v10756_v33 = vld [vmem:[#allocation114_spill] sm:$0xff] }
 0x668   :  { %v3103_v5 = vpack.c.bf16 %v8522_v44, %v8522_v44  ;;  %v10759_v28 = vld [vmem:[#allocation142_spill] sm:$0xff] }
 0x66a   :  { %3113 = vmatmul.bf16.vlgmr.msrb.gmra.mxu0 %v3103_v5  ;;  %3139 = vmatmul.bf16.vlgmr.msrb.gmra.mxu2 %v3103_v5 }
 0x66b   :  { %3437 = vmatmul.bf16.vlgmr.msra.gmra.mxu1 %v3103_v5  ;;  %3463 = vmatmul.bf16.vlgmr.msra.gmra.mxu3 %v3103_v5 }
 0x66c   :  { %3290 = vmatpush.bf16.msrb.mxu0 %v10281_v23  ;;  %3316 = vmatpush.bf16.msrb.mxu2 %v10282_v26 }
 0x66d   :  { %3604 = vmatpush.bf16.msra.mxu1 %v10283_v22  ;;  %3630 = vmatpush.bf16.msra.mxu3 %v10284_v37 }
 0x66f   :  { %5216 = vperm.xlu2 %6290, %v5213_v57   ;;  %v10760_v57 = vld [vmem:[#allocation118_spill] sm:$0xff] }
 0x670   :  { %3291 = vmatpush.bf16.msrb.mxu0 %v10285_v62  ;;  %3317 = vmatpush.bf16.msrb.mxu2 %v10286_v53 }
 0x671   :  { %3605 = vmatpush.bf16.msra.mxu1 %v10287_v18  ;;  %3631 = vmatpush.bf16.msra.mxu3 %v10288_v13 }
 0x674   :  { %3292 = vmatpush.bf16.msrb.mxu0 %v10289_v35  ;;  %3318 = vmatpush.bf16.msrb.mxu2 %v10290_v29 }
 0x675   :  { %3606 = vmatpush.bf16.msra.mxu1 %v10291_v50  ;;  %3632 = vmatpush.bf16.msra.mxu3 %v10429_v27 }
 0x678   :  { %3293 = vmatpush.bf16.msrb.mxu0 %v10430_v6  ;;  %3319 = vmatpush.bf16.msrb.mxu2 %v10431_v59 }
 0x679   :  { %3607 = vmatpush.bf16.msra.mxu1 %v10432_v25  ;;  %3633 = vmatpush.bf16.msra.mxu3 %v10435_v31 }
 0x67a   :  { %3165 = vmatmul.bf16.vlgmr.msra.gmra.mxu0 %v3103_v5  ;;  %3191 = vmatmul.bf16.vlgmr.msra.gmra.mxu2 %v3103_v5 }
 0x67b   :  { %3489 = vmatmul.bf16.vlgmr.msrb.gmra.mxu1 %v3103_v5  ;;  %3515 = vmatmul.bf16.vlgmr.msrb.gmra.mxu3 %v3103_v5  ;;  %v10754_v5 = vld [vmem:[#allocation113_spill] sm:$0xff] }
 0x67c   :  { %3294 = vmatpush.bf16.msrb.mxu0 %v10433_v24  ;;  %3320 = vmatpush.bf16.msrb.mxu2 %v10434_v43 }
 0x67d   :  { %3608 = vmatpush.bf16.msra.mxu1 %v10436_v42  ;;  %3634 = vmatpush.bf16.msra.mxu3 %v10735_v32 }
 0x680   :  { %3295 = vmatpush.bf16.msrb.mxu0 %v10581_v30  ;;  %3321 = vmatpush.bf16.msrb.mxu2 %v10582_v3 }
 0x681   :  { %3609 = vmatpush.bf16.msra.mxu1 %v10736_v46  ;;  %3635 = vmatpush.bf16.msra.mxu3 %v10739_v21 }
 0x684   :  { %3296 = vmatpush.bf16.msrb.mxu0 %v10737_v15  ;;  %3322 = vmatpush.bf16.msrb.mxu2 %v10738_v0 }
 0x685   :  { %3610 = vmatpush.bf16.msra.mxu1 %v10740_v48  ;;  %3636 = vmatpush.bf16.msra.mxu3 %v10743_v17  ;;  %v10798_v48 = vld [vmem:[#allocation119_spill] sm:$0xff] }
 0x688   :  { %3297 = vmatpush.bf16.msrb.mxu0 %v10741_v56  ;;  %3323 = vmatpush.bf16.msrb.mxu2 %v10742_v60 }
 0x689   :  { %3611 = vmatpush.bf16.msra.mxu1 %v10745_v16  ;;  %3637 = vmatpush.bf16.msra.mxu3 %v10748_v49 }
 0x68b   :  { %3298 = vmatmul.bf16.vlgmr.msrb.gmra.mxu0 %v8415_v38  ;;  %3324 = vmatmul.bf16.vlgmr.msrb.gmra.mxu2 %v8415_v38  ;;  %v10757_v38 = vld [vmem:[#allocation140_spill] sm:$0xff] }
 0x68c   :  { %3416 = vmatpush.bf16.msra.mxu0 %v10744_v58  ;;  %3442 = vmatpush.bf16.msra.mxu2 %v10746_v36 }
 0x68d   :  { %3656 = vmatpush.bf16.msrb.mxu1 %v10747_v47  ;;  %3682 = vmatpush.bf16.msrb.mxu3 %v10750_v20 }
 0x690   :  { %3417 = vmatpush.bf16.msra.mxu0 %v10749_v39  ;;  %3443 = vmatpush.bf16.msra.mxu2 %v10751_v51  ;;  %v10761_v39 = vld [vmem:[#allocation146_spill] sm:$0xff]  ;;  %v10762_v51 = vld [vmem:[#allocation120_spill] sm:$0xff] }
 0x691   :  { %3657 = vmatpush.bf16.msrb.mxu1 %v10752_v19  ;;  %3683 = vmatpush.bf16.msrb.mxu3 %v10754_v5  ;;  %v10763_v19 = vld [vmem:[#allocation147_spill] sm:$0xff]  ;;  %v10765_v5 = vld [vmem:[#allocation150_spill] sm:$0xff] }
 0x694   :  { %3418 = vmatpush.bf16.msra.mxu0 %v10753_v45  ;;  %3444 = vmatpush.bf16.msra.mxu2 %v10755_v12  ;;  %v10764_v45 = vld [vmem:[#allocation124_spill] sm:$0xff]  ;;  %v10766_v12 = vld [vmem:[#allocation125_spill] sm:$0xff] }
 0x695   :  { %3658 = vmatpush.bf16.msrb.mxu1 %v10756_v33  ;;  %3684 = vmatpush.bf16.msrb.mxu3 %v10758_v1  ;;  %v10767_v33 = vld [vmem:[#allocation153_spill] sm:$0xff]  ;;  %v10769_v1 = vld [vmem:[#allocation154_spill] sm:$0xff] }
 0x698   :  { %3419 = vmatpush.bf16.msra.mxu0 %v10757_v38  ;;  %3445 = vmatpush.bf16.msra.mxu2 %v10759_v28  ;;  %v10768_v38 = vld [vmem:[#allocation132_spill] sm:$0xff]  ;;  %v10770_v28 = vld [vmem:[#allocation133_spill] sm:$0xff] }
 0x699   :  { %3659 = vmatpush.bf16.msrb.mxu1 %v10760_v57  ;;  %3685 = vmatpush.bf16.msrb.mxu3 %v10762_v51  ;;  %v10771_v57 = vld [vmem:[#allocation155_spill] sm:$0xff]  ;;  %v10773_v51 = vld [vmem:[#allocation158_spill] sm:$0xff] }
 0x69c   :  { %3420 = vmatpush.bf16.msra.mxu0 %v10761_v39  ;;  %3446 = vmatpush.bf16.msra.mxu2 %v10763_v19  ;;  %v10772_v39 = vld [vmem:[#allocation136_spill] sm:$0xff]  ;;  %v10774_v19 = vld [vmem:[#allocation137_spill] sm:$0xff] }
 0x69d   :  { %3660 = vmatpush.bf16.msrb.mxu1 %v10764_v45  ;;  %3686 = vmatpush.bf16.msrb.mxu3 %v10766_v12  ;;  %v10775_v45 = vld [vmem:[#allocation159_spill] sm:$0xff]  ;;  %v10777_v12 = vld [vmem:[#allocation161_spill] sm:$0xff] }
 0x6a0   :  { %3421 = vmatpush.bf16.msra.mxu0 %v10765_v5  ;;  %3447 = vmatpush.bf16.msra.mxu2 %v10767_v33  ;;  %v10776_v5 = vld [vmem:[#allocation160_spill] sm:$0xff]  ;;  %v10778_v33 = vld [vmem:[#allocation143_spill] sm:$0xff] }
 0x6a1   :  { %3661 = vmatpush.bf16.msrb.mxu1 %v10768_v38  ;;  %3687 = vmatpush.bf16.msrb.mxu3 %v10770_v28  ;;  %v10779_v38 = vld [vmem:[#allocation145_spill] sm:$0xff]  ;;  %v10781_v28 = vld [vmem:[#allocation163_spill] sm:$0xff] }
 0x6a4   :  { %3422 = vmatpush.bf16.msra.mxu0 %v10769_v1  ;;  %3448 = vmatpush.bf16.msra.mxu2 %v10771_v57  ;;  %v10780_v1 = vld [vmem:[#allocation162_spill] sm:$0xff]  ;;  %v10782_v57 = vld [vmem:[#allocation164_spill] sm:$0xff] }
 0x6a5   :  { %3662 = vmatpush.bf16.msrb.mxu1 %v10772_v39  ;;  %3688 = vmatpush.bf16.msrb.mxu3 %v10774_v19  ;;  %v10783_v39 = vld [vmem:[#allocation165_spill] sm:$0xff]  ;;  %v10785_v19 = vld [vmem:[#allocation167_spill] sm:$0xff] }
 0x6a8   :  { %3423 = vmatpush.bf16.msra.mxu0 %v10773_v51  ;;  %3449 = vmatpush.bf16.msra.mxu2 %v10775_v45  ;;  %v10784_v51 = vld [vmem:[#allocation166_spill] sm:$0xff]  ;;  %v10786_v45 = vld [vmem:[#allocation168_spill] sm:$0xff] }
 0x6a9   :  { %3663 = vmatpush.bf16.msrb.mxu1 %v10778_v33  ;;  %3689 = vmatpush.bf16.msrb.mxu3 %v10779_v38  ;;  %v10789_v33 = vld [vmem:[#allocation171_spill] sm:$0xff]  ;;  %v10790_v38 = vld [vmem:[#allocation172_spill] sm:$0xff] }
 0x6ac   :  { %3468 = vmatpush.bf16.msrb.mxu0 %v10776_v5  ;;  %3494 = vmatpush.bf16.msrb.mxu2 %v10777_v12  ;;  %v10787_v5 = vld [vmem:[#allocation169_spill] sm:$0xff]  ;;  %v10788_v12 = vld [vmem:[#allocation170_spill] sm:$0xff] }
 0x6b0   :  { %3469 = vmatpush.bf16.msrb.mxu0 %v10780_v1  ;;  %3495 = vmatpush.bf16.msrb.mxu2 %v10781_v28  ;;  %v10791_v1 = vld [vmem:[#allocation173_spill] sm:$0xff]  ;;  %v10792_v28 = vld [vmem:[#allocation174_spill] sm:$0xff] }
 0x6b4   :  { %3470 = vmatpush.bf16.msrb.mxu0 %v10782_v57  ;;  %3496 = vmatpush.bf16.msrb.mxu2 %v10783_v39  ;;  %v10793_v57 = vld [vmem:[#allocation175_spill] sm:$0xff] }
 0x6b8   :  { %3471 = vmatpush.bf16.msrb.mxu0 %v10784_v51  ;;  %3497 = vmatpush.bf16.msrb.mxu2 %v10785_v19  ;;  %v10794_v51 = vld [vmem:[#allocation16_spill] sm:$0xff] }
 0x6bc   :  { %3472 = vmatpush.bf16.msrb.mxu0 %v10786_v45  ;;  %3498 = vmatpush.bf16.msrb.mxu2 %v10787_v5 }
 0x6c0   :  { %3473 = vmatpush.bf16.msrb.mxu0 %v10788_v12  ;;  %3499 = vmatpush.bf16.msrb.mxu2 %v10789_v33  ;;  %v10795_v12 = vld [vmem:[#allocation18_spill] sm:$0xff] }
 0x6c4   :  { %3474 = vmatpush.bf16.msrb.mxu0 %v10790_v38  ;;  %3500 = vmatpush.bf16.msrb.mxu2 %v10791_v1 }
 0x6c8   :  { %3475 = vmatpush.bf16.msrb.mxu0 %v10792_v28  ;;  %3501 = vmatpush.bf16.msrb.mxu2 %v10793_v57 }
 0x6e7   :  { %v3114_v39 = vpop.f32.mrf.mxu0 }
 0x6e8   :  { %v3115_v36 = vadd.f32 %v3114_v39, %v10794_v51  ;;  %v8617_v19 = vpop.f32.mrf.mxu1  ;;  %v6068_v39 = vmul.f32 -1.442695, %v8504_v63  ;;  %v10797_v63 = vld [vmem:[#allocation81_spill] sm:$0xff] }
 0x6ea   :  { %v3128_v45 = vadd.f32 %v8491_v41, %v3115_v36  ;;  %v10796_v36 = vld [vmem:[#allocation80_spill] sm:$0xff] }
 0x6ec   :  { %v6063_v5 = vmul.f32 -1.442695, %v3128_v45 }
 0x6ed   :  { %v3140_v58 = vpop.f32.mrf.mxu2 }
 0x6ee   :  { %6469 = vpow2.f32 %v6063_v5  ;;  %v3141_v33 = vadd.f32 %v3140_v58, %v10795_v12  ;;  %v8621_v20 = vpop.f32.mrf.mxu3 }
 0x6ef   :  { %v3116_v38 = vpop.f32.mrf.mxu0 }
 0x6f0   :  { %v3154_v1 = vadd.f32 %v8493_v40, %v3141_v33  ;;  %v3440_v28 = vpop.f32.mrf.mxu1 }
 0x6f2   :  { %v6064_v47 = vmul.f32 -1.442695, %v3154_v1 }
 0x6f4   :  { %v6470_v57 = vpop.eup %6469  ;;  %6471 = vpow2.f32 %v6064_v47 }
 0x6f5   :  { %v3218_v51 = vadd.f32 1.0, %v6470_v57  ;;  %v3142_v49 = vpop.f32.mrf.mxu2 }
 0x6f6   :  { %v3466_v16 = vpop.f32.mrf.mxu3 }
 0x6f7   :  { %6473 = vrcp.f32 %v3218_v51  ;;  %v3166_v41 = vpop.f32.mrf.mxu0  ;;  %vm3226_vm14 = vweird.f32 %v3218_v51 }
 0x6f8   :  { %v3167_v45 = vadd.f32 %v3166_v41, %v10796_v36  ;;  %v8626_v5 = vpop.f32.mrf.mxu1  ;;  %6475 = vpow2.f32 %v6068_v39 }
 0x6fa   :  { %v6472_v58 = vpop.eup %6471  ;;  %v3180_v38 = vadd.f32 %v8495_v14, %v3167_v45 }
 0x6fb   :  { %v3219_v40 = vadd.f32 1.0, %v6472_v58 }
 0x6fc   :  { %v6065_v33 = vmul.f32 -1.442695, %v3180_v38 }
 0x6fd   :  { %v6474_v1 = vpop.eup %6473  ;;  %6477 = vrcp.f32 %v3219_v40  ;;  %v3192_v47 = vpop.f32.mrf.mxu2  ;;  %vm3241_vm1 = vweird.f32 %v3219_v40 }
 0x6fe   :  { %v3222_v28 = vmul.f32 %v6474_v1, %v3218_v51  ;;  %6479 = vpow2.f32 %v6065_v33  ;;  %v3193_v49 = vadd.f32 %v3192_v47, %v10797_v63  ;;  %v8630_v16 = vpop.f32.mrf.mxu3  ;;  %v6476_v57 = vpop.eup %6475  ;;  %vm3227_vm13 = vweird.f32 %v6474_v1 }
 0x6ff   :  { %v3168_v12 = vpop.f32.mrf.mxu0  ;;  %v8633_v60 = vadd.f32 1.0, %v6476_v57  ;;  %v3232_v33 = vand.u32 2147483648, %v3218_v51  ;;  %vm3228_vm15 = vmor %vm3226_vm14, %vm3227_vm13  ;;  %v3245_v57 = vand.u32 2147483647, %v3219_v40 }
 0x700   :  { %v3223_v41 = vsub.f32 1.0, %v3222_v28  ;;  %v3492_v36 = vpop.f32.mrf.mxu1  ;;  %v3206_v39 = vadd.f32 %v8497_v61, %v3193_v49  ;;  %v3230_v12 = vand.u32 2147483647, %v3218_v51  ;;  %v3247_v28 = vand.u32 2147483648, %v3219_v40 }
 0x701   :  { %vm3246_vm4 = vcmp.eq.f32.partialorder %v3245_v57, 8.507059e+37  ;;  %vm3378_vm10 = vweird.f32 %v8633_v60 }
 0x702   :  { %v3224_v14 = vmul.f32 %v6474_v1, %v3223_v41  ;;  %6481 = vtanh.f32 %v3206_v39  ;;  %vm3231_vm2 = vcmp.eq.f32.partialorder %v3230_v12, 8.507059e+37  ;;  %v10799_v12 = vld [vmem:[#allocation126_spill] sm:$0xff] }
 0x703   :  { %v6478_v45 = vpop.eup %6477  ;;  %6483 = vrcp.f32 %v8633_v60 }
 0x704   :  { %v6480_v58 = vpop.eup %6479  ;;  %v3237_v38 = vmul.f32 %v6478_v45, %v3219_v40  ;;  %v3225_v56 = vadd.f32 %v6474_v1, %v3224_v14  ;;  %vm3242_vm0 = vweird.f32 %v6478_v45  ;;  %v3233_v14 = vor.u32 1.1754944e-38, %v3232_v33 }
 0x705   :  { %v3220_v17 = vadd.f32 1.0, %v6480_v58  ;;  %v3194_v47 = vpop.f32.mrf.mxu2  ;;  %vm3243_vm3 = vmor %vm3241_vm1, %vm3242_vm0 }
 0x706   :  { %v3238_v63 = vsub.f32 1.0, %v3237_v38  ;;  %v3518_v36 = vpop.f32.mrf.mxu3  ;;  %v3229_v49 = vsel %vm3228_vm15, %v6474_v1, %v3225_v56  ;;  %v3248_v38 = vor.u32 1.1754944e-38, %v3247_v28 }
 0x707   :  { %6485 = vrcp.f32 %v3220_v17  ;;  %v3234_v0 = vsel %vm3231_vm2, %v3233_v14, %v3229_v49  ;;  %v3260_v14 = vand.u32 2147483647, %v3220_v17  ;;  %vm3256_vm6 = vweird.f32 %v3220_v17 }
 0x708   :  { %v3239_v61 = vmul.f32 %v6478_v45, %v3238_v63  ;;  %v3299_v41 = vpop.f32.mrf.mxu0  ;;  %v6482_v47 = vpop.eup %6481 }
 0x709   :  { %v3342_v58 = vadd.f32 %v3299_v41, %v10798_v48  ;;  %v8637_v36 = vpop.eup %6483  ;;  %v3268_v33 = vmul.f32 %v6482_v47, %v3234_v0  ;;  %vm3261_vm8 = vcmp.eq.f32.partialorder %v3260_v14, 8.507059e+37 }
 0x70a   :  { %v3240_v39 = vadd.f32 %v6478_v45, %v3239_v61  ;;  %v3374_v40 = vmul.f32 %v8637_v36, %v8633_v60  ;;  %vm3379_vm9 = vweird.f32 %v8637_v36 }
 0x70b   :  { %v6067_v51 = vmul.f32 -1.442695, %v3342_v58  ;;  %v3262_v58 = vand.u32 2147483648, %v3220_v17  ;;  %vm8657_vm11 = vmor %vm3378_vm10, %vm3379_vm9 }
 0x70c   :  { %v3244_v15 = vsel %vm3243_vm3, %v6478_v45, %v3240_v39 }
 0x70d   :  { %v6486_v63 = vpop.eup %6485  ;;  %v3249_v21 = vsel %vm3246_vm4, %v3248_v38, %v3244_v15  ;;  %6487 = vpow2.f32 %v6067_v51  ;;  %v3263_v51 = vor.u32 1.1754944e-38, %v3262_v58  ;;  %v3384_v58 = vand.u32 2147483648, %v8633_v60 }
 0x70e   :  { %v3252_v56 = vmul.f32 %v6486_v63, %v3220_v17  ;;  %v3267_v1 = vmul.f32 %v3249_v21, %v8361_v11  ;;  %v3325_v48 = vpop.f32.mrf.mxu2  ;;  %vm3257_vm5 = vweird.f32 %v6486_v63  ;;  %v3375_v21 = vsub.f32 1.0, %v3374_v40 }
 0x70f   :  { %v3344_v61 = vadd.f32 %v3325_v48, %v10799_v12  ;;  %vm3258_vm7 = vmor %vm3256_vm6, %vm3257_vm5 }
 0x710   :  { %v3253_v28 = vsub.f32 1.0, %v3252_v56  ;;  %v3269_v49 = vadd.f32 %v3268_v33, %v3267_v1  ;;  %v3301_v41 = vpop.f32.mrf.mxu0 }
 0x711   :  { %v6069_v45 = vmul.f32 -1.442695, %v3344_v61  ;;  %v3376_v61 = vmul.f32 %v8637_v36, %v3375_v21 }
 0x712   :  { %v3254_v57 = vmul.f32 %v6486_v63, %v3253_v28  ;;  %6489 = vtanh.f32 %v3269_v49  ;;  %v3275_v15 = vsub.f32 %v3269_v49, %v8361_v11 }
 0x713   :  { %v6488_v39 = vpop.eup %6487  ;;  %6491 = vpow2.f32 %v6069_v45  ;;  %v3377_v45 = vadd.f32 %v8637_v36, %v3376_v61 }
 0x714   :  { %v3255_v0 = vadd.f32 %v6486_v63, %v3254_v57  ;;  %v3276_v47 = vmul.f32 %v3275_v15, %v8405_v8  ;;  %v3355_v38 = vadd.f32 1.0, %v6488_v39  ;;  %v3382_v15 = vand.u32 2147483647, %v8633_v60  ;;  %v10803_v57 = vld [vmem:[#allocation28_spill] sm:$0xff] }
 0x716   :  { %v3259_v56 = vsel %vm3258_vm7, %v6486_v63, %v3255_v0  ;;  %v8646_v1 = vadd.f32 %v3276_v47, %v8361_v11  ;;  %6493 = vrcp.f32 %v3355_v38  ;;  %v3327_v33 = vpop.f32.mrf.mxu2  ;;  %v2926_v11 = vsub.f32 %v8395_v34, %v8390_v55 }
 0x717   :  { %v3264_v48 = vsel %vm3261_vm8, %v3263_v51, %v3259_v56  ;;  %v3381_v34 = vsel %vm8657_vm11, %v8637_v36, %v3377_v45  ;;  %v3369_v0 = vand.u32 2147483648, %v3355_v38  ;;  %v3367_v56 = vand.u32 2147483647, %v3355_v38 }
 0x718   :  { %v6490_v12 = vpop.eup %6489  ;;  %v2927_v47 = vmul.f32 %v2926_v11, %v8405_v8  ;;  %vm3383_vm13 = vcmp.eq.f32.partialorder %v3382_v15, 8.507059e+37  ;;  %vm3363_vm14 = vweird.f32 %v3355_v38 }
 0x719   :  { %v6492_v40 = vpop.eup %6491  ;;  %v3271_v28 = vmul.f32 %v6490_v12, %v3264_v48  ;;  %v3385_v48 = vor.u32 1.1754944e-38, %v3384_v58  ;;  %vm3368_vm0 = vcmp.eq.f32.partialorder %v3367_v56, 8.507059e+37  ;;  %v10802_v58 = vld [vmem:[#allocation24_spill] sm:$0xff] }
 0x71a   :  { %v3357_v49 = vadd.f32 1.0, %v6492_v40  ;;  %v8675_v40 = vadd.f32 %v2927_v47, %v8390_v55 }
 0x71b   :  { %v3272_v17 = vsub.f32 %v3271_v28, %v8378_v4  ;;  %v3386_v36 = vsel %vm3383_vm13, %v3385_v48, %v3381_v34  ;;  %v10804_v34 = vld [vmem:[#allocation29_spill] sm:$0xff]  ;;  %v10806_v48 = vld [vmem:[#allocation82_spill] sm:$0xff] }
 0x71c   :  { %v6494_v41 = vpop.eup %6493  ;;  %6495 = vrcp.f32 %v3357_v49  ;;  %vm3393_vm2 = vweird.f32 %v3357_v49  ;;  %v3397_v55 = vand.u32 2147483647, %v3357_v49 }
 0x71d   :  { %v3359_v63 = vmul.f32 %v6494_v41, %v3355_v38  ;;  %v3273_v14 = vmul.f32 %v3272_v17, %v8405_v8  ;;  %6497 = vtanh.f32 %v8507_v2  ;;  %vm3364_vm12 = vweird.f32 %v6494_v41 }
 0x71e   :  { %vm3365_vm15 = vmor %vm3363_vm14, %vm3364_vm12  ;;  %v3370_v2 = vor.u32 1.1754944e-38, %v3369_v0  ;;  %v3404_v38 = vmul.f32 %v3386_v36, %v8675_v40  ;;  %vm3398_vm4 = vcmp.eq.f32.partialorder %v3397_v55, 8.507059e+37  ;;  %v10805_v0 = vld [vmem:[#allocation32_spill] sm:$0xff]  ;;  %v8690_v36 = vpop.permute.xlu2 %3283  ;;  %v10819_v55 = vld [vmem:[#allocation179_spill] sm:$0xff] }
 0x71f   :  { %v3360_v39 = vsub.f32 1.0, %v3359_v63  ;;  %v8663_v21 = vadd.f32 %v3273_v14, %v8378_v4 }
 0x721   :  { %v3361_v51 = vmul.f32 %v6494_v41, %v3360_v39  ;;  %v3590_v33 = vpack.c.bf16 %v8663_v21, %v8663_v21 }
 0x722   :  { %v6496_v60 = vpop.eup %6495 }
 0x723   :  { %v3362_v4 = vadd.f32 %v6494_v41, %v3361_v51  ;;  %v3389_v12 = vmul.f32 %v6496_v60, %v3357_v49  ;;  %3612 = vmatmul.bf16.vlgmr.msra.gmra.mxu1 %v3590_v33  ;;  %3638 = vmatmul.bf16.vlgmr.msra.gmra.mxu3 %v3590_v33  ;;  %v6498_v28 = vpop.eup %6497  ;;  %vm3394_vm1 = vweird.f32 %v6496_v60 }
 0x724   :  { %3789 = vmatpush.bf16.msra.mxu1 %v10348_v7  ;;  %3815 = vmatpush.bf16.msra.mxu3 %v10349_v54  ;;  %vm3395_vm3 = vmor %vm3393_vm2, %vm3394_vm1 }
 0x725   :  { %v3366_v8 = vsel %vm3365_vm15, %v6494_v41, %v3362_v4  ;;  %v3390_v61 = vsub.f32 1.0, %v3389_v12  ;;  %v3399_v41 = vand.u32 2147483648, %v3357_v49  ;;  %v10807_v49 = vld [vmem:[#allocation33_spill] sm:$0xff]  ;;  %v10808_v12 = vld [vmem:[#allocation36_spill] sm:$0xff] }
 0x726   :  { %v3371_v17 = vsel %vm3368_vm0, %v3370_v2, %v3366_v8  ;;  %v10810_v8 = vld [vmem:[#allocation37_spill] sm:$0xff] }
 0x727   :  { %v3391_v45 = vmul.f32 %v6496_v60, %v3390_v61  ;;  %v3405_v11 = vmul.f32 %v6498_v28, %v3371_v17  ;;  %v3400_v39 = vor.u32 1.1754944e-38, %v3399_v41  ;;  %v10811_v61 = vld [vmem:[#allocation41_spill] sm:$0xff]  ;;  %v10812_v28 = vld [vmem:[#allocation40_spill] sm:$0xff]  ;;  %v10818_v41 = vld [vmem:[#allocation178_spill] sm:$0xff] }
 0x728   :  { %3790 = vmatpush.bf16.msra.mxu1 %v10350_v10  ;;  %3816 = vmatpush.bf16.msra.mxu3 %v10351_v52  ;;  %v10813_v17 = vld [vmem:[#allocation44_spill] sm:$0xff] }
 0x729   :  { %v8680_v63 = vadd.f32 %v3405_v11, %v3404_v38  ;;  %v3392_v14 = vadd.f32 %v6496_v60, %v3391_v45  ;;  %v10814_v45 = vld [vmem:[#allocation176_spill] sm:$0xff]  ;;  %v10815_v38 = vld [vmem:[#allocation177_spill] sm:$0xff] }
 0x72a   :  { %v10816_v11 = vld [vmem:[#allocation45_spill] sm:$0xff] }
 0x72b   :  { %6499 = vtanh.f32 %v8680_v63  ;;  %v3396_v15 = vsel %vm3395_vm3, %v6496_v60, %v3392_v14  ;;  %v10817_v14 = vld [vmem:[#allocation47_spill] sm:$0xff] }
 0x72c   :  { %3791 = vmatpush.bf16.msra.mxu1 %v10802_v58  ;;  %3817 = vmatpush.bf16.msra.mxu3 %v10803_v57  ;;  %v3401_v51 = vsel %vm3398_vm4, %v3400_v39, %v3396_v15  ;;  %v10820_v15 = vld [vmem:[#allocation48_spill] sm:$0xff]  ;;  %v10821_v39 = vld [vmem:[#allocation49_spill] sm:$0xff] }
 0x730   :  { %3792 = vmatpush.bf16.msra.mxu1 %v10804_v34  ;;  %3818 = vmatpush.bf16.msra.mxu3 %v10805_v0 }
 0x731   :  { %v6500_v47 = vpop.eup %6499 }
 0x732   :  { %v3408_v56 = vmul.f32 %v6500_v47, %v3401_v51  ;;  %v10822_v47 = vld [vmem:[#allocation180_spill] sm:$0xff]  ;;  %v10823_v51 = vld [vmem:[#allocation181_spill] sm:$0xff] }
 0x733   :  { %3664 = vmatmul.bf16.vlgmr.msrb.gmra.mxu1 %v3590_v33  ;;  %3690 = vmatmul.bf16.vlgmr.msrb.gmra.mxu3 %v3590_v33 }
 0x734   :  { %v3409_v4 = vsub.f32 %v3408_v56, %v10806_v48  ;;  %3793 = vmatpush.bf16.msra.mxu1 %v10807_v49  ;;  %3819 = vmatpush.bf16.msra.mxu3 %v10808_v12  ;;  %v10824_v56 = vld [vmem:[#allocation50_spill] sm:$0xff] }
 0x736   :  { %v3410_v60 = vmul.f32 %v3409_v4, %v8690_v36  ;;  %v10826_v4 = vld [vmem:[#allocation182_spill] sm:$0xff] }
 0x738   :  { %v8694_v2 = vadd.f32 %v3410_v60, %v10806_v48  ;;  %3794 = vmatpush.bf16.msra.mxu1 %v10810_v8  ;;  %3820 = vmatpush.bf16.msra.mxu3 %v10811_v61  ;;  %v10825_v48 = vld [vmem:[#allocation51_spill] sm:$0xff]  ;;  %v10883_v8 = vld [vmem:[#allocation196_spill] sm:$0xff] }
 0x739   :  { %v10827_v60 = vld [vmem:[#allocation183_spill] sm:$0xff] }
 0x73a   :  { %10809 = vst [vmem:[#allocation83_spill] sm:$0xff] %v8694_v2  ;;  %v8700_v33 = vpack.c.bf16 %v8694_v2, %v8694_v2 }
 0x73c   :  { %3424 = vmatmul.bf16.vlgmr.msra.gmra.mxu0 %v8700_v33  ;;  %3450 = vmatmul.bf16.vlgmr.msra.gmra.mxu2 %v8700_v33 }
 0x73d   :  { %3795 = vmatpush.bf16.msra.mxu1 %v10812_v28  ;;  %3821 = vmatpush.bf16.msra.mxu3 %v10813_v17  ;;  %v10882_v28 = vld [vmem:[#allocation130_spill] sm:$0xff] }
 0x73e   :  { %3591 = vmatpush.bf16.msra.mxu0 %v10814_v45  ;;  %3617 = vmatpush.bf16.msra.mxu2 %v10815_v38  ;;  %v10880_v38 = vld [vmem:[#allocation193_spill] sm:$0xff] }
 0x741   :  { %3796 = vmatpush.bf16.msra.mxu1 %v10816_v11  ;;  %3822 = vmatpush.bf16.msra.mxu3 %v10817_v14  ;;  %v10840_v14 = vld [vmem:[#allocation58_spill] sm:$0xff] }
 0x742   :  { %3592 = vmatpush.bf16.msra.mxu0 %v10818_v41  ;;  %3618 = vmatpush.bf16.msra.mxu2 %v10819_v55  ;;  %v10828_v55 = vld [vmem:[#allocation52_spill] sm:$0xff]  ;;  %v10839_v41 = vld [vmem:[#allocation189_spill] sm:$0xff] }
 0x744   :  { %3797 = vmatmul.bf16.vlgmr.msra.gmra.mxu1 %v8700_v33  ;;  %3823 = vmatmul.bf16.vlgmr.msra.gmra.mxu3 %v8700_v33 }
 0x745   :  { %3915 = vmatpush.bf16.msrb.mxu1 %v10820_v15  ;;  %3941 = vmatpush.bf16.msrb.mxu3 %v10821_v39  ;;  %v10829_v15 = vld [vmem:[#allocation53_spill] sm:$0xff]  ;;  %v10830_v39 = vld [vmem:[#allocation184_spill] sm:$0xff] }
 0x746   :  { %3593 = vmatpush.bf16.msra.mxu0 %v10822_v47  ;;  %3619 = vmatpush.bf16.msra.mxu2 %v10823_v51  ;;  %v10831_v47 = vld [vmem:[#allocation185_spill] sm:$0xff]  ;;  %v10832_v51 = vld [vmem:[#allocation54_spill] sm:$0xff] }
 0x749   :  { %3916 = vmatpush.bf16.msrb.mxu1 %v10824_v56  ;;  %3942 = vmatpush.bf16.msrb.mxu3 %v10825_v48  ;;  %v10833_v56 = vld [vmem:[#allocation55_spill] sm:$0xff]  ;;  %v10834_v48 = vld [vmem:[#allocation186_spill] sm:$0xff] }
 0x74a   :  { %3594 = vmatpush.bf16.msra.mxu0 %v10826_v4  ;;  %3620 = vmatpush.bf16.msra.mxu2 %v10827_v60  ;;  %v10835_v4 = vld [vmem:[#allocation187_spill] sm:$0xff]  ;;  %v10836_v60 = vld [vmem:[#allocation56_spill] sm:$0xff] }
 0x74c   :  { %3476 = vmatmul.bf16.vlgmr.msrb.gmra.mxu0 %v8700_v33  ;;  %3502 = vmatmul.bf16.vlgmr.msrb.gmra.mxu2 %v8700_v33 }
 0x74d   :  { %3917 = vmatpush.bf16.msrb.mxu1 %v10828_v55  ;;  %3943 = vmatpush.bf16.msrb.mxu3 %v10829_v15  ;;  %v10837_v55 = vld [vmem:[#allocation57_spill] sm:$0xff]  ;;  %v10838_v15 = vld [vmem:[#allocation188_spill] sm:$0xff] }
 0x74e   :  { %3595 = vmatpush.bf16.msra.mxu0 %v10830_v39  ;;  %3621 = vmatpush.bf16.msra.mxu2 %v10831_v47  ;;  %v10841_v39 = vld [vmem:[#allocation59_spill] sm:$0xff]  ;;  %v10842_v47 = vld [vmem:[#allocation190_spill] sm:$0xff] }
 0x751   :  { %3918 = vmatpush.bf16.msrb.mxu1 %v10832_v51  ;;  %3944 = vmatpush.bf16.msrb.mxu3 %v10833_v56  ;;  %v10843_v51 = vld [vmem:[#allocation191_spill] sm:$0xff]  ;;  %v10844_v56 = vld [vmem:[#allocation192_spill] sm:$0xff] }
 0x752   :  { %3596 = vmatpush.bf16.msra.mxu0 %v10834_v48  ;;  %3622 = vmatpush.bf16.msra.mxu2 %v10835_v4  ;;  %v10845_v48 = vld [vmem:[#allocation194_spill] sm:$0xff]  ;;  %v10846_v4 = vld [vmem:[#allocation60_spill] sm:$0xff] }
 0x755   :  { %3919 = vmatpush.bf16.msrb.mxu1 %v10836_v60  ;;  %3945 = vmatpush.bf16.msrb.mxu3 %v10837_v55  ;;  %v10847_v60 = vld [vmem:[#allocation61_spill] sm:$0xff]  ;;  %v10848_v55 = vld [vmem:[#allocation91_spill] sm:$0xff] }
 0x756   :  { %3597 = vmatpush.bf16.msra.mxu0 %v10838_v15  ;;  %3623 = vmatpush.bf16.msra.mxu2 %v10839_v41  ;;  %v10849_v15 = vld [vmem:[#allocation195_spill] sm:$0xff]  ;;  %v10850_v41 = vld [vmem:[#allocation62_spill] sm:$0xff] }
 0x759   :  { %3920 = vmatpush.bf16.msrb.mxu1 %v10840_v14  ;;  %3946 = vmatpush.bf16.msrb.mxu3 %v10841_v39  ;;  %v10851_v14 = vld [vmem:[#allocation63_spill] sm:$0xff]  ;;  %v10852_v39 = vld [vmem:[#allocation64_spill] sm:$0xff] }
 0x75a   :  { %3598 = vmatpush.bf16.msra.mxu0 %v10842_v47  ;;  %3624 = vmatpush.bf16.msra.mxu2 %v10843_v51  ;;  %v10853_v47 = vld [vmem:[#allocation65_spill] sm:$0xff] }
 0x75b   :  { %v10854_v51 = vld [vmem:[#allocation197_spill] sm:$0xff] }
 0x75d   :  { %3921 = vmatpush.bf16.msrb.mxu1 %v10846_v4  ;;  %3947 = vmatpush.bf16.msrb.mxu3 %v10847_v60  ;;  %v10857_v4 = vld [vmem:[#allocation67_spill] sm:$0xff]  ;;  %v10858_v60 = vld [vmem:[#allocation98_spill] sm:$0xff] }
 0x75e   :  { %3643 = vmatpush.bf16.msrb.mxu0 %v10844_v56  ;;  %3669 = vmatpush.bf16.msrb.mxu2 %v10845_v48  ;;  %v10855_v56 = vld [vmem:[#allocation198_spill] sm:$0xff] }
 0x75f   :  { %v10856_v48 = vld [vmem:[#allocation66_spill] sm:$0xff] }
 0x761   :  { %3922 = vmatpush.bf16.msrb.mxu1 %v10850_v41  ;;  %3948 = vmatpush.bf16.msrb.mxu3 %v10851_v14  ;;  %v10861_v41 = vld [vmem:[#allocation69_spill] sm:$0xff]  ;;  %v10862_v14 = vld [vmem:[#allocation200_spill] sm:$0xff] }
 0x762   :  { %3644 = vmatpush.bf16.msrb.mxu0 %v10848_v55  ;;  %3670 = vmatpush.bf16.msrb.mxu2 %v10849_v15  ;;  %v10859_v55 = vld [vmem:[#allocation199_spill] sm:$0xff]  ;;  %v10860_v15 = vld [vmem:[#allocation68_spill] sm:$0xff] }
 0x765   :  { %3967 = vmatpush.bf16.msra.mxu1 %v10852_v39  ;;  %3993 = vmatpush.bf16.msra.mxu3 %v10853_v47  ;;  %v10863_v39 = vld [vmem:[#allocation202_spill] sm:$0xff] }
 0x766   :  { %3645 = vmatpush.bf16.msrb.mxu0 %v10854_v51  ;;  %3671 = vmatpush.bf16.msrb.mxu2 %v10855_v56  ;;  %v10864_v47 = vld [vmem:[#allocation70_spill] sm:$0xff]  ;;  %v10865_v51 = vld [vmem:[#allocation71_spill] sm:$0xff] }
 0x767   :  { %v10866_v56 = vld [vmem:[#allocation203_spill] sm:$0xff] }
 0x769   :  { %3968 = vmatpush.bf16.msra.mxu1 %v10856_v48  ;;  %3994 = vmatpush.bf16.msra.mxu3 %v10857_v4  ;;  %v10867_v48 = vld [vmem:[#allocation205_spill] sm:$0xff]  ;;  %v10868_v4 = vld [vmem:[#allocation72_spill] sm:$0xff] }
 0x76a   :  { %3646 = vmatpush.bf16.msrb.mxu0 %v10858_v60  ;;  %3672 = vmatpush.bf16.msrb.mxu2 %v10859_v55  ;;  %v10869_v60 = vld [vmem:[#allocation73_spill] sm:$0xff]  ;;  %v10870_v55 = vld [vmem:[#allocation206_spill] sm:$0xff] }
 0x76d   :  { %3969 = vmatpush.bf16.msra.mxu1 %v10860_v15  ;;  %3995 = vmatpush.bf16.msra.mxu3 %v10861_v41  ;;  %v10871_v15 = vld [vmem:[#allocation207_spill] sm:$0xff]  ;;  %v10872_v41 = vld [vmem:[#allocation74_spill] sm:$0xff] }
 0x76e   :  { %3647 = vmatpush.bf16.msrb.mxu0 %v10862_v14  ;;  %3673 = vmatpush.bf16.msrb.mxu2 %v10863_v39  ;;  %v10873_v14 = vld [vmem:[#allocation75_spill] sm:$0xff]  ;;  %v10874_v39 = vld [vmem:[#allocation208_spill] sm:$0xff] }
 0x771   :  { %3970 = vmatpush.bf16.msra.mxu1 %v10864_v47  ;;  %3996 = vmatpush.bf16.msra.mxu3 %v10865_v51  ;;  %v10875_v47 = vld [vmem:[#allocation209_spill] sm:$0xff]  ;;  %v10876_v51 = vld [vmem:[#allocation76_spill] sm:$0xff] }
 0x772   :  { %3648 = vmatpush.bf16.msrb.mxu0 %v10866_v56  ;;  %3674 = vmatpush.bf16.msrb.mxu2 %v10867_v48  ;;  %v10877_v56 = vld [vmem:[#allocation77_spill] sm:$0xff]  ;;  %v10878_v48 = vld [vmem:[#allocation78_spill] sm:$0xff] }
 0x775   :  { %3971 = vmatpush.bf16.msra.mxu1 %v10868_v4  ;;  %3997 = vmatpush.bf16.msra.mxu3 %v10869_v60  ;;  %v10879_v4 = vld [vmem:[#allocation79_spill] sm:$0xff] }
 0x776   :  { %3649 = vmatpush.bf16.msrb.mxu0 %v10870_v55  ;;  %3675 = vmatpush.bf16.msrb.mxu2 %v10871_v15 }
 0x779   :  { %3972 = vmatpush.bf16.msra.mxu1 %v10872_v41  ;;  %3998 = vmatpush.bf16.msra.mxu3 %v10873_v14 }
 0x77a   :  { %3650 = vmatpush.bf16.msrb.mxu0 %v10874_v39  ;;  %3676 = vmatpush.bf16.msrb.mxu2 %v10875_v47 }
 0x77d   :  { %3973 = vmatpush.bf16.msra.mxu1 %v10876_v51  ;;  %3999 = vmatpush.bf16.msra.mxu3 %v10877_v56 }
 0x781   :  { %3974 = vmatpush.bf16.msra.mxu1 %v10878_v48  ;;  %4000 = vmatpush.bf16.msra.mxu3 %v10879_v4  ;;  %v10881_v4 = vld [vmem:[#allocation97_spill] sm:$0xff] }
 0x782   :  { %v262_v61 = vadd.f32 %v10882_v28, %v10881_v4 }
 0x7a0   :  { %v8776_v60 = vpop.f32.mrf.mxu1 }
 0x7a6   :  { %v8778_v55 = vpop.f32.mrf.mxu3 }
 0x7a8   :  { %v3615_v15 = vpop.f32.mrf.mxu1 }
 0x7ae   :  { %v3641_v41 = vpop.f32.mrf.mxu3 }
 0x7b0   :  { %v8780_v11 = vpop.f32.mrf.mxu1 }
 0x7b6   :  { %v8782_v14 = vpop.f32.mrf.mxu3 }
 0x7b8   :  { %v3667_v39 = vpop.f32.mrf.mxu1 }
 0x7b9   :  { %v3425_v47 = vpop.f32.mrf.mxu0 }
 0x7ba   :  { %v3426_v51 = vadd.f32 %v3425_v47, %v10880_v38  ;;  %v10884_v47 = vld [vmem:[#allocation107_spill] sm:$0xff] }
 0x7bb   :  { %v10885_v38 = vld [vmem:[#allocation139_spill] sm:$0xff] }
 0x7bc   :  { %v3439_v56 = vadd.f32 %v8617_v19, %v3426_v51  ;;  %v320_v19 = vadd.f32 %v10885_v38, %v10884_v47 }
 0x7be   :  { %v6070_v45 = vmul.f32 -1.442695, %v3439_v56  ;;  %v3693_v48 = vpop.f32.mrf.mxu3 }
 0x7bf   :  { %v3451_v17 = vpop.f32.mrf.mxu2 }
 0x7c0   :  { %6501 = vpow2.f32 %v6070_v45  ;;  %v3452_v15 = vadd.f32 %v3451_v17, %v10883_v8  ;;  %v10886_v45 = vld [vmem:[#allocation201_spill] sm:$0xff] }
 0x7c1   :  { %v3427_v41 = vpop.f32.mrf.mxu0  ;;  %v3798_v12 = vpop.f32.mrf.mxu1 }
 0x7c2   :  { %v3465_v49 = vadd.f32 %v8621_v20, %v3452_v15  ;;  %v8790_v2 = vadd.f32 %v3798_v12, %v262_v61 }
 0x7c4   :  { %v6071_v39 = vmul.f32 -1.442695, %v3465_v49 }
 0x7c6   :  { %v6502_v0 = vpop.eup %6501  ;;  %6503 = vpow2.f32 %v6071_v39 }
 0x7c7   :  { %v3529_v51 = vadd.f32 1.0, %v6502_v0  ;;  %v3453_v56 = vpop.f32.mrf.mxu2  ;;  %v3824_v48 = vpop.f32.mrf.mxu3  ;;  %v10887_v0 = vld [vmem:[#allocation204_spill] sm:$0xff] }
 0x7c8   :  { %v8794_v34 = vadd.f32 %v3824_v48, %v320_v19 }
 0x7c9   :  { %6505 = vrcp.f32 %v3529_v51  ;;  %v3477_v28 = vpop.f32.mrf.mxu0  ;;  %v3800_v17 = vpop.f32.mrf.mxu1  ;;  %vm3537_vm6 = vweird.f32 %v3529_v51 }
 0x7ca   :  { %v3478_v41 = vadd.f32 %v3477_v28, %v10886_v45 }
 0x7cc   :  { %v6504_v4 = vpop.eup %6503  ;;  %v3491_v20 = vadd.f32 %v8626_v5, %v3478_v41 }
 0x7cd   :  { %v3530_v12 = vadd.f32 1.0, %v6504_v4  ;;  %v3543_v4 = vand.u32 2147483648, %v3529_v51 }
 0x7ce   :  { %v6072_v49 = vmul.f32 -1.442695, %v3491_v20 }
 0x7cf   :  { %v6506_v61 = vpop.eup %6505  ;;  %6507 = vrcp.f32 %v3530_v12  ;;  %v3503_v15 = vpop.f32.mrf.mxu2  ;;  %vm3552_vm9 = vweird.f32 %v3530_v12 }
 0x7d0   :  { %v3826_v38 = vpop.f32.mrf.mxu3  ;;  %v3533_v39 = vmul.f32 %v6506_v61, %v3529_v51  ;;  %6509 = vpow2.f32 %v6072_v49  ;;  %v3504_v56 = vadd.f32 %v3503_v15, %v10887_v0  ;;  %vm3538_vm5 = vweird.f32 %v6506_v61 }
 0x7d1   :  { %v3479_v19 = vpop.f32.mrf.mxu0  ;;  %v3541_v38 = vand.u32 2147483647, %v3529_v51  ;;  %v3558_v49 = vand.u32 2147483648, %v3530_v12  ;;  %vm3539_vm7 = vmor %vm3537_vm6, %vm3538_vm5  ;;  %v3556_v15 = vand.u32 2147483647, %v3530_v12 }
 0x7d2   :  { %v3534_v48 = vsub.f32 1.0, %v3533_v39  ;;  %v3517_v47 = vadd.f32 %v8630_v16, %v3504_v56  ;;  %v3544_v39 = vor.u32 1.1754944e-38, %v3543_v4 }
 0x7d3   :  { %vm3542_vm10 = vcmp.eq.f32.partialorder %v3541_v38, 8.507059e+37  ;;  %vm3557_vm12 = vcmp.eq.f32.partialorder %v3556_v15, 8.507059e+37 }
 0x7d4   :  { %v3535_v17 = vmul.f32 %v6506_v61, %v3534_v48  ;;  %6511 = vtanh.f32 %v3517_v47 }
 0x7d5   :  { %v6508_v8 = vpop.eup %6507 }
 0x7d6   :  { %v3548_v28 = vmul.f32 %v6508_v8, %v3530_v12  ;;  %v3536_v45 = vadd.f32 %v6506_v61, %v3535_v17  ;;  %v6510_v5 = vpop.eup %6509  ;;  %vm3553_vm8 = vweird.f32 %v6508_v8  ;;  %v3559_v17 = vor.u32 1.1754944e-38, %v3558_v49 }
 0x7d7   :  { %v3505_v41 = vpop.f32.mrf.mxu2  ;;  %v3531_v57 = vadd.f32 1.0, %v6510_v5  ;;  %vm3554_vm11 = vmor %vm3552_vm9, %vm3553_vm8 }
 0x7d8   :  { %v3549_v20 = vsub.f32 1.0, %v3548_v28  ;;  %v3540_v16 = vsel %vm3539_vm7, %v6506_v61, %v3536_v45 }
 0x7d9   :  { %6513 = vrcp.f32 %v3531_v57  ;;  %v3545_v47 = vsel %vm3542_vm10, %v3544_v39, %v3540_v16  ;;  %v3573_v10 = vand.u32 2147483648, %v3531_v57  ;;  %v3571_v61 = vand.u32 2147483647, %v3531_v57 }
 0x7da   :  { %v3550_v19 = vmul.f32 %v6508_v8, %v3549_v20  ;;  %v6512_v48 = vpop.eup %6511  ;;  %vm3567_vm14 = vweird.f32 %v3531_v57 }
 0x7db   :  { %v3579_v0 = vmul.f32 %v6512_v48, %v3545_v47  ;;  %vm3572_vm0 = vcmp.eq.f32.partialorder %v3571_v61, 8.507059e+37  ;;  %v10892_v48 = vld [vmem:[#allocation99_spill] sm:$0xff]  ;;  %v10894_v47 = vld [vmem:[#allocation46_spill] sm:$0xff]  ;;  %v10902_v61 = vld [vmem:[#allocation113_spill] sm:$0xff] }
 0x7dc   :  { %v3551_v56 = vadd.f32 %v6508_v8, %v3550_v19 }
 0x7de   :  { %v3555_v41 = vsel %vm3554_vm11, %v6508_v8, %v3551_v56  ;;  %v3574_v8 = vor.u32 1.1754944e-38, %v3573_v10  ;;  %v10888_v10 = vld [vmem:[#allocation93_spill] sm:$0xff]  ;;  %v10891_v56 = vld [vmem:[#allocation96_spill] sm:$0xff] }
 0x7df   :  { %v3560_v28 = vsel %vm3557_vm12, %v3559_v17, %v3555_v41  ;;  %v6514_v5 = vpop.eup %6513  ;;  %v10893_v17 = vld [vmem:[#allocation43_spill] sm:$0xff]  ;;  %v10895_v41 = vld [vmem:[#allocation102_spill] sm:$0xff] }
 0x7e0   :  { %v3578_v51 = vmul.f32 %v3560_v28, %v8517_v9  ;;  %v3563_v58 = vmul.f32 %v6514_v5, %v3531_v57  ;;  %vm3568_vm13 = vweird.f32 %v6514_v5  ;;  %v10896_v28 = vld [vmem:[#allocation103_spill] sm:$0xff] }
 0x7e1   :  { %vm3569_vm15 = vmor %vm3567_vm14, %vm3568_vm13 }
 0x7e2   :  { %v3580_v20 = vadd.f32 %v3579_v0, %v3578_v51  ;;  %v3564_v52 = vsub.f32 1.0, %v3563_v58  ;;  %v10898_v51 = vld [vmem:[#allocation105_spill] sm:$0xff] }
 0x7e4   :  { %6515 = vtanh.f32 %v3580_v20  ;;  %v3586_v45 = vsub.f32 %v3580_v20, %v8517_v9  ;;  %v3565_v12 = vmul.f32 %v6514_v5, %v3564_v52  ;;  %v10899_v20 = vld [vmem:[#allocation122_spill] sm:$0xff] }
 0x7e6   :  { %v3587_v4 = vmul.f32 %v3586_v45, %v8690_v36  ;;  %v3566_v38 = vadd.f32 %v6514_v5, %v3565_v12  ;;  %v10900_v45 = vld [vmem:[#allocation123_spill] sm:$0xff]  ;;  %v10901_v12 = vld [vmem:[#allocation110_spill] sm:$0xff] }
 0x7e8   :  { %v8804_v49 = vadd.f32 %v3587_v4, %v8517_v9  ;;  %v3570_v15 = vsel %vm3569_vm15, %v6514_v5, %v3566_v38  ;;  %v10889_v9 = vld [vmem:[#allocation39_spill] sm:$0xff]  ;;  %v10897_v5 = vld [vmem:[#allocation104_spill] sm:$0xff] }
 0x7e9   :  { %v3575_v58 = vsel %vm3572_vm0, %v3574_v8, %v3570_v15  ;;  %v10903_v4 = vld [vmem:[#allocation128_spill] sm:$0xff]  ;;  %v10904_v38 = vld [vmem:[#allocation131_spill] sm:$0xff]  ;;  %v10905_v8 = vld [vmem:[#allocation114_spill] sm:$0xff] }
 0x7ea   :  { %v6516_v0 = vpop.eup %6515  ;;  %v10906_v15 = vld [vmem:[#allocation115_spill] sm:$0xff] }
 0x7eb   :  { %v3582_v19 = vmul.f32 %v6516_v0, %v3575_v58  ;;  %v10907_v0 = vld [vmem:[#allocation134_spill] sm:$0xff]  ;;  %v10908_v58 = vld [vmem:[#allocation135_spill] sm:$0xff] }
 0x7ed   :  { %v3583_v16 = vsub.f32 %v3582_v19, %v8522_v44  ;;  %v10910_v19 = vld [vmem:[#allocation120_spill] sm:$0xff] }
 0x7ef   :  { %v3584_v52 = vmul.f32 %v3583_v16, %v8690_v36  ;;  %v10911_v16 = vld [vmem:[#allocation140_spill] sm:$0xff] }
 0x7f1   :  { %v8809_v39 = vadd.f32 %v3584_v52, %v8522_v44  ;;  %v10890_v44 = vld [vmem:[#allocation42_spill] sm:$0xff] }
 0x7f2   :  { %v10912_v52 = vld [vmem:[#allocation142_spill] sm:$0xff] }
 0x7f3   :  { %v3589_v57 = vpack.c.bf16 %v8809_v39, %v8809_v39 }
 0x7f5   :  { %3599 = vmatmul.bf16.vlgmr.msra.gmra.mxu0 %v3589_v57  ;;  %3625 = vmatmul.bf16.vlgmr.msra.gmra.mxu2 %v3589_v57 }
 0x7f6   :  { %3923 = vmatmul.bf16.vlgmr.msrb.gmra.mxu1 %v3589_v57  ;;  %3949 = vmatmul.bf16.vlgmr.msrb.gmra.mxu3 %v3589_v57 }
 0x7f7   :  { %3776 = vmatpush.bf16.msra.mxu0 %v10281_v23  ;;  %3802 = vmatpush.bf16.msra.mxu2 %v10282_v26 }
 0x7f8   :  { %4090 = vmatpush.bf16.msrb.mxu1 %v10283_v22  ;;  %4116 = vmatpush.bf16.msrb.mxu3 %v10284_v37 }
 0x7fb   :  { %3777 = vmatpush.bf16.msra.mxu0 %v10285_v62  ;;  %3803 = vmatpush.bf16.msra.mxu2 %v10286_v53 }
 0x7fc   :  { %4091 = vmatpush.bf16.msrb.mxu1 %v10287_v18  ;;  %4117 = vmatpush.bf16.msrb.mxu3 %v10288_v13 }
 0x7ff   :  { %3778 = vmatpush.bf16.msra.mxu0 %v10289_v35  ;;  %3804 = vmatpush.bf16.msra.mxu2 %v10290_v29 }
 0x800   :  { %4092 = vmatpush.bf16.msrb.mxu1 %v10291_v50  ;;  %4118 = vmatpush.bf16.msrb.mxu3 %v10429_v27 }
 0x803   :  { %3779 = vmatpush.bf16.msra.mxu0 %v10430_v6  ;;  %3805 = vmatpush.bf16.msra.mxu2 %v10431_v59 }
 0x804   :  { %4093 = vmatpush.bf16.msrb.mxu1 %v10432_v25  ;;  %4119 = vmatpush.bf16.msrb.mxu3 %v10435_v31 }
 0x805   :  { %3651 = vmatmul.bf16.vlgmr.msrb.gmra.mxu0 %v3589_v57  ;;  %3677 = vmatmul.bf16.vlgmr.msrb.gmra.mxu2 %v3589_v57 }
 0x806   :  { %3975 = vmatmul.bf16.vlgmr.msra.gmra.mxu1 %v3589_v57  ;;  %4001 = vmatmul.bf16.vlgmr.msra.gmra.mxu3 %v3589_v57  ;;  %v10913_v57 = vld [vmem:[#allocation124_spill] sm:$0xff] }
 0x807   :  { %3780 = vmatpush.bf16.msra.mxu0 %v10433_v24  ;;  %3806 = vmatpush.bf16.msra.mxu2 %v10434_v43 }
 0x808   :  { %4094 = vmatpush.bf16.msrb.mxu1 %v10436_v42  ;;  %4120 = vmatpush.bf16.msrb.mxu3 %v10735_v32 }
 0x80b   :  { %3781 = vmatpush.bf16.msra.mxu0 %v10581_v30  ;;  %3807 = vmatpush.bf16.msra.mxu2 %v10582_v3 }
 0x80c   :  { %4095 = vmatpush.bf16.msrb.mxu1 %v10736_v46  ;;  %4121 = vmatpush.bf16.msrb.mxu3 %v10888_v10 }
 0x80f   :  { %3782 = vmatpush.bf16.msra.mxu0 %v10889_v9  ;;  %3808 = vmatpush.bf16.msra.mxu2 %v10890_v44  ;;  %v10952_v9 = vld [vmem:[#allocation138_spill] sm:$0xff] }
 0x810   :  { %4096 = vmatpush.bf16.msrb.mxu1 %v10891_v56  ;;  %4122 = vmatpush.bf16.msrb.mxu3 %v10892_v48 }
 0x813   :  { %3783 = vmatpush.bf16.msra.mxu0 %v10893_v17  ;;  %3809 = vmatpush.bf16.msra.mxu2 %v10894_v47 }
 0x814   :  { %4097 = vmatpush.bf16.msrb.mxu1 %v10895_v41  ;;  %4123 = vmatpush.bf16.msrb.mxu3 %v10896_v28 }
 0x816   :  { %3784 = vmatmul.bf16.vlgmr.msra.gmra.mxu0 %v8700_v33  ;;  %3810 = vmatmul.bf16.vlgmr.msra.gmra.mxu2 %v8700_v33  ;;  %v10909_v33 = vld [vmem:[#allocation118_spill] sm:$0xff] }
 0x817   :  { %3902 = vmatpush.bf16.msrb.mxu0 %v10899_v20  ;;  %3928 = vmatpush.bf16.msrb.mxu2 %v10900_v45 }
 0x818   :  { %4142 = vmatpush.bf16.msra.mxu1 %v10897_v5  ;;  %4168 = vmatpush.bf16.msra.mxu3 %v10898_v51 }
 0x81b   :  { %3903 = vmatpush.bf16.msrb.mxu0 %v10903_v4  ;;  %3929 = vmatpush.bf16.msrb.mxu2 %v10904_v38  ;;  %v10914_v4 = vld [vmem:[#allocation125_spill] sm:$0xff]  ;;  %v10915_v38 = vld [vmem:[#allocation146_spill] sm:$0xff] }
 0x81c   :  { %4143 = vmatpush.bf16.msra.mxu1 %v10901_v12  ;;  %4169 = vmatpush.bf16.msra.mxu3 %v10902_v61 }
 0x81f   :  { %3904 = vmatpush.bf16.msrb.mxu0 %v10907_v0  ;;  %3930 = vmatpush.bf16.msrb.mxu2 %v10908_v58  ;;  %v10918_v0 = vld [vmem:[#allocation133_spill] sm:$0xff]  ;;  %v10919_v58 = vld [vmem:[#allocation150_spill] sm:$0xff] }
 0x820   :  { %4144 = vmatpush.bf16.msra.mxu1 %v10905_v8  ;;  %4170 = vmatpush.bf16.msra.mxu3 %v10906_v15  ;;  %v10916_v8 = vld [vmem:[#allocation147_spill] sm:$0xff]  ;;  %v10917_v15 = vld [vmem:[#allocation132_spill] sm:$0xff] }
 0x823   :  { %3905 = vmatpush.bf16.msrb.mxu0 %v10911_v16  ;;  %3931 = vmatpush.bf16.msrb.mxu2 %v10912_v52  ;;  %v10922_v16 = vld [vmem:[#allocation137_spill] sm:$0xff]  ;;  %v10923_v52 = vld [vmem:[#allocation154_spill] sm:$0xff] }
 0x824   :  { %4145 = vmatpush.bf16.msra.mxu1 %v10909_v33  ;;  %4171 = vmatpush.bf16.msra.mxu3 %v10910_v19  ;;  %v10920_v33 = vld [vmem:[#allocation153_spill] sm:$0xff]  ;;  %v10921_v19 = vld [vmem:[#allocation136_spill] sm:$0xff] }
 0x827   :  { %3906 = vmatpush.bf16.msrb.mxu0 %v10915_v38  ;;  %3932 = vmatpush.bf16.msrb.mxu2 %v10916_v8  ;;  %v10926_v38 = vld [vmem:[#allocation145_spill] sm:$0xff]  ;;  %v10927_v8 = vld [vmem:[#allocation158_spill] sm:$0xff] }
 0x828   :  { %4146 = vmatpush.bf16.msra.mxu1 %v10913_v57  ;;  %4172 = vmatpush.bf16.msra.mxu3 %v10914_v4  ;;  %v10924_v57 = vld [vmem:[#allocation155_spill] sm:$0xff] }
 0x829   :  { %v10925_v4 = vld [vmem:[#allocation143_spill] sm:$0xff] }
 0x82b   :  { %3907 = vmatpush.bf16.msrb.mxu0 %v10919_v58  ;;  %3933 = vmatpush.bf16.msrb.mxu2 %v10920_v33  ;;  %v10930_v58 = vld [vmem:[#allocation161_spill] sm:$0xff]  ;;  %v10931_v33 = vld [vmem:[#allocation162_spill] sm:$0xff] }
 0x82c   :  { %4147 = vmatpush.bf16.msra.mxu1 %v10917_v15  ;;  %4173 = vmatpush.bf16.msra.mxu3 %v10918_v0  ;;  %v10928_v15 = vld [vmem:[#allocation159_spill] sm:$0xff]  ;;  %v10929_v0 = vld [vmem:[#allocation160_spill] sm:$0xff] }
 0x82f   :  { %3908 = vmatpush.bf16.msrb.mxu0 %v10923_v52  ;;  %3934 = vmatpush.bf16.msrb.mxu2 %v10924_v57  ;;  %v10934_v52 = vld [vmem:[#allocation165_spill] sm:$0xff]  ;;  %v10935_v57 = vld [vmem:[#allocation166_spill] sm:$0xff] }
 0x830   :  { %4148 = vmatpush.bf16.msra.mxu1 %v10921_v19  ;;  %4174 = vmatpush.bf16.msra.mxu3 %v10922_v16  ;;  %v10932_v19 = vld [vmem:[#allocation163_spill] sm:$0xff]  ;;  %v10933_v16 = vld [vmem:[#allocation164_spill] sm:$0xff] }
 0x833   :  { %3909 = vmatpush.bf16.msrb.mxu0 %v10927_v8  ;;  %3935 = vmatpush.bf16.msrb.mxu2 %v10928_v15  ;;  %v10938_v8 = vld [vmem:[#allocation169_spill] sm:$0xff]  ;;  %v10939_v15 = vld [vmem:[#allocation170_spill] sm:$0xff] }
 0x834   :  { %4149 = vmatpush.bf16.msra.mxu1 %v10925_v4  ;;  %4175 = vmatpush.bf16.msra.mxu3 %v10926_v38  ;;  %v10936_v4 = vld [vmem:[#allocation167_spill] sm:$0xff]  ;;  %v10937_v38 = vld [vmem:[#allocation168_spill] sm:$0xff] }
 0x837   :  { %3954 = vmatpush.bf16.msra.mxu0 %v10929_v0  ;;  %3980 = vmatpush.bf16.msra.mxu2 %v10930_v58  ;;  %v10940_v0 = vld [vmem:[#allocation171_spill] sm:$0xff]  ;;  %v10941_v58 = vld [vmem:[#allocation172_spill] sm:$0xff] }
 0x83b   :  { %3955 = vmatpush.bf16.msra.mxu0 %v10931_v33  ;;  %3981 = vmatpush.bf16.msra.mxu2 %v10932_v19  ;;  %v10942_v33 = vld [vmem:[#allocation173_spill] sm:$0xff]  ;;  %v10943_v19 = vld [vmem:[#allocation174_spill] sm:$0xff] }
 0x83f   :  { %3956 = vmatpush.bf16.msra.mxu0 %v10933_v16  ;;  %3982 = vmatpush.bf16.msra.mxu2 %v10934_v52  ;;  %v10944_v16 = vld [vmem:[#allocation175_spill] sm:$0xff] }
 0x843   :  { %3957 = vmatpush.bf16.msra.mxu0 %v10935_v57  ;;  %3983 = vmatpush.bf16.msra.mxu2 %v10936_v4  ;;  %v10945_v57 = vld [vmem:[#allocation16_spill] sm:$0xff] }
 0x847   :  { %3958 = vmatpush.bf16.msra.mxu0 %v10937_v38  ;;  %3984 = vmatpush.bf16.msra.mxu2 %v10938_v8 }
 0x84b   :  { %3959 = vmatpush.bf16.msra.mxu0 %v10939_v15  ;;  %3985 = vmatpush.bf16.msra.mxu2 %v10940_v0  ;;  %v10946_v15 = vld [vmem:[#allocation18_spill] sm:$0xff] }
 0x84f   :  { %3960 = vmatpush.bf16.msra.mxu0 %v10941_v58  ;;  %3986 = vmatpush.bf16.msra.mxu2 %v10942_v33 }
 0x853   :  { %3961 = vmatpush.bf16.msra.mxu0 %v10943_v19  ;;  %3987 = vmatpush.bf16.msra.mxu2 %v10944_v16 }
 0x872   :  { %v3600_v52 = vpop.f32.mrf.mxu0 }
 0x873   :  { %v3601_v61 = vadd.f32 %v3600_v52, %v10945_v57  ;;  %v8896_v4 = vpop.f32.mrf.mxu1  ;;  %v6078_v52 = vmul.f32 -1.442695, %v8790_v2  ;;  %v10948_v2 = vld [vmem:[#allocation81_spill] sm:$0xff] }
 0x875   :  { %v3614_v38 = vadd.f32 %v8776_v60, %v3601_v61  ;;  %v10947_v61 = vld [vmem:[#allocation80_spill] sm:$0xff] }
 0x877   :  { %v6073_v8 = vmul.f32 -1.442695, %v3614_v38 }
 0x878   :  { %v3626_v12 = vpop.f32.mrf.mxu2 }
 0x879   :  { %6517 = vpow2.f32 %v6073_v8  ;;  %v3627_v0 = vadd.f32 %v3626_v12, %v10946_v15  ;;  %v8900_v45 = vpop.f32.mrf.mxu3 }
 0x87a   :  { %v3602_v58 = vpop.f32.mrf.mxu0 }
 0x87b   :  { %v3640_v33 = vadd.f32 %v8778_v55, %v3627_v0  ;;  %v3926_v19 = vpop.f32.mrf.mxu1 }
 0x87d   :  { %v6074_v20 = vmul.f32 -1.442695, %v3640_v33 }
 0x87f   :  { %v6518_v16 = vpop.eup %6517  ;;  %6519 = vpow2.f32 %v6074_v20 }
 0x880   :  { %v3704_v57 = vadd.f32 1.0, %v6518_v16  ;;  %v3628_v51 = vpop.f32.mrf.mxu2 }
 0x881   :  { %v3952_v5 = vpop.f32.mrf.mxu3 }
 0x882   :  { %6521 = vrcp.f32 %v3704_v57  ;;  %v3652_v60 = vpop.f32.mrf.mxu0  ;;  %vm3712_vm2 = vweird.f32 %v3704_v57 }
 0x883   :  { %v3653_v38 = vadd.f32 %v3652_v60, %v10947_v61  ;;  %v8905_v8 = vpop.f32.mrf.mxu1  ;;  %6523 = vpow2.f32 %v6078_v52 }
 0x885   :  { %v6520_v12 = vpop.eup %6519  ;;  %v3666_v58 = vadd.f32 %v8780_v11, %v3653_v38 }
 0x886   :  { %v3705_v55 = vadd.f32 1.0, %v6520_v12 }
 0x887   :  { %v6075_v0 = vmul.f32 -1.442695, %v3666_v58 }
 0x888   :  { %v6522_v33 = vpop.eup %6521  ;;  %6525 = vrcp.f32 %v3705_v55  ;;  %v3678_v20 = vpop.f32.mrf.mxu2  ;;  %v3731_v17 = vand.u32 2147483647, %v3705_v55  ;;  %vm3727_vm5 = vweird.f32 %v3705_v55 }
 0x889   :  { %v3708_v19 = vmul.f32 %v6522_v33, %v3704_v57  ;;  %6527 = vpow2.f32 %v6075_v0  ;;  %v3679_v51 = vadd.f32 %v3678_v20, %v10948_v2  ;;  %v8909_v5 = vpop.f32.mrf.mxu3  ;;  %v6524_v16 = vpop.eup %6523  ;;  %vm3713_vm1 = vweird.f32 %v6522_v33 }
 0x88a   :  { %v3654_v15 = vpop.f32.mrf.mxu0  ;;  %v8912_v28 = vadd.f32 1.0, %v6524_v16  ;;  %v3718_v0 = vand.u32 2147483648, %v3704_v57  ;;  %v3733_v16 = vand.u32 2147483648, %v3705_v55  ;;  %vm3714_vm3 = vmor %vm3712_vm2, %vm3713_vm1  ;;  %vm3732_vm8 = vcmp.eq.f32.partialorder %v3731_v17, 8.507059e+37 }
 0x88b   :  { %v3709_v60 = vsub.f32 1.0, %v3708_v19  ;;  %v3978_v61 = vpop.f32.mrf.mxu1  ;;  %v3692_v52 = vadd.f32 %v8782_v14, %v3679_v51  ;;  %v3716_v15 = vand.u32 2147483647, %v3704_v57  ;;  %v10949_v19 = vld [vmem:[#allocation94_spill] sm:$0xff]  ;;  %v10950_v14 = vld [vmem:[#allocation127_spill] sm:$0xff] }
 0x88c   :  { %v233_v51 = vadd.f32 %v10950_v14, %v10949_v19  ;;  %v3719_v48 = vor.u32 1.1754944e-38, %v3718_v0  ;;  %v3734_v57 = vor.u32 1.1754944e-38, %v3733_v16  ;;  %vm3864_vm14 = vweird.f32 %v8912_v28 }
 0x88d   :  { %v3710_v11 = vmul.f32 %v6522_v33, %v3709_v60  ;;  %6529 = vtanh.f32 %v3692_v52  ;;  %vm3717_vm6 = vcmp.eq.f32.partialorder %v3716_v15, 8.507059e+37 }
 0x88e   :  { %v6526_v38 = vpop.eup %6525  ;;  %6531 = vrcp.f32 %v8912_v28 }
 0x88f   :  { %v6528_v12 = vpop.eup %6527  ;;  %v3723_v58 = vmul.f32 %v6526_v38, %v3705_v55  ;;  %v3711_v41 = vadd.f32 %v6522_v33, %v3710_v11  ;;  %vm3728_vm4 = vweird.f32 %v6526_v38 }
 0x890   :  { %v3706_v47 = vadd.f32 1.0, %v6528_v12  ;;  %v3680_v20 = vpop.f32.mrf.mxu2  ;;  %vm3729_vm7 = vmor %vm3727_vm5, %vm3728_vm4 }
 0x891   :  { %v3724_v2 = vsub.f32 1.0, %v3723_v58  ;;  %v4004_v61 = vpop.f32.mrf.mxu3  ;;  %v3715_v11 = vsel %vm3714_vm3, %v6522_v33, %v3711_v41 }
 0x892   :  { %6533 = vrcp.f32 %v3706_v47  ;;  %v3720_v61 = vsel %vm3717_vm6, %v3719_v48, %v3715_v11  ;;  %v3748_v17 = vand.u32 2147483648, %v3706_v47  ;;  %vm3742_vm10 = vweird.f32 %v3706_v47 }
 0x893   :  { %v3725_v60 = vmul.f32 %v6526_v38, %v3724_v2  ;;  %v3785_v12 = vpop.f32.mrf.mxu0  ;;  %v6530_v58 = vpop.eup %6529  ;;  %v10951_v2 = vld [vmem:[#allocation106_spill] sm:$0xff] }
 0x894   :  { %v3828_v52 = vadd.f32 %v3785_v12, %v233_v51  ;;  %v8917_v44 = vpop.eup %6531  ;;  %v291_v41 = vadd.f32 %v10952_v9, %v10951_v2  ;;  %v3754_v15 = vmul.f32 %v6530_v58, %v3720_v61  ;;  %v10981_v2 = vld [vmem:[#allocation182_spill] sm:$0xff] }
 0x895   :  { %v3726_v20 = vadd.f32 %v6526_v38, %v3725_v60  ;;  %v3860_v16 = vmul.f32 %v8917_v44, %v8912_v28  ;;  %vm3865_vm13 = vweird.f32 %v8917_v44 }
 0x896   :  { %v6077_v56 = vmul.f32 -1.442695, %v3828_v52  ;;  %vm8938_vm15 = vmor %vm3864_vm14, %vm3865_vm13 }
 0x897   :  { %v3730_v14 = vsel %vm3729_vm7, %v6526_v38, %v3726_v20  ;;  %v3746_v38 = vand.u32 2147483647, %v3706_v47 }
 0x898   :  { %v6534_v19 = vpop.eup %6533  ;;  %v3735_v33 = vsel %vm3732_vm8, %v3734_v57, %v3730_v14  ;;  %6535 = vpow2.f32 %v6077_v56  ;;  %v3861_v57 = vsub.f32 1.0, %v3860_v16 }
 0x899   :  { %v3738_v0 = vmul.f32 %v6534_v19, %v3706_v47  ;;  %v3753_v55 = vmul.f32 %v3735_v33, %v8646_v1  ;;  %v3811_v51 = vpop.f32.mrf.mxu2  ;;  %vm3743_vm9 = vweird.f32 %v6534_v19  ;;  %vm3747_vm12 = vcmp.eq.f32.partialorder %v3746_v38, 8.507059e+37 }
 0x89a   :  { %v3830_v48 = vadd.f32 %v3811_v51, %v291_v41  ;;  %vm3744_vm11 = vmor %vm3742_vm10, %vm3743_vm9  ;;  %v3749_v41 = vor.u32 1.1754944e-38, %v3748_v17  ;;  %v3412_v17 = vsub.f32 %v8680_v63, %v8675_v40 }
 0x89b   :  { %v3739_v60 = vsub.f32 1.0, %v3738_v0  ;;  %v3755_v11 = vadd.f32 %v3754_v15, %v3753_v55  ;;  %v3787_v12 = vpop.f32.mrf.mxu0 }
 0x89c   :  { %v6079_v52 = vmul.f32 -1.442695, %v3830_v48  ;;  %v3862_v48 = vmul.f32 %v8917_v44, %v3861_v57  ;;  %v3413_v57 = vmul.f32 %v3412_v17, %v8690_v36 }
 0x89d   :  { %v3740_v20 = vmul.f32 %v6534_v19, %v3739_v60  ;;  %6537 = vtanh.f32 %v3755_v11  ;;  %v3761_v9 = vsub.f32 %v3755_v11, %v8646_v1 }
 0x89e   :  { %v6536_v56 = vpop.eup %6535  ;;  %6539 = vpow2.f32 %v6079_v52  ;;  %v3870_v52 = vand.u32 2147483648, %v8912_v28 }
 0x89f   :  { %v3741_v58 = vadd.f32 %v6534_v19, %v3740_v20  ;;  %v3762_v61 = vmul.f32 %v3761_v9, %v8690_v36  ;;  %v3841_v14 = vadd.f32 1.0, %v6536_v56  ;;  %v3868_v9 = vand.u32 2147483647, %v8912_v28 }
 0x8a1   :  { %v3745_v33 = vsel %vm3744_vm11, %v6534_v19, %v3741_v58  ;;  %v8927_v0 = vadd.f32 %v3762_v61, %v8646_v1  ;;  %6541 = vrcp.f32 %v3841_v14  ;;  %v3813_v55 = vpop.f32.mrf.mxu2  ;;  %v3863_v19 = vadd.f32 %v8917_v44, %v3862_v48 }
 0x8a2   :  { %v3750_v15 = vsel %vm3747_vm12, %v3749_v41, %v3745_v33  ;;  %v3855_v61 = vand.u32 2147483648, %v3841_v14  ;;  %v3853_v33 = vand.u32 2147483647, %v3841_v14  ;;  %vm3869_vm1 = vcmp.eq.f32.partialorder %v3868_v9, 8.507059e+37  ;;  %v10957_v9 = vld [vmem:[#allocation24_spill] sm:$0xff] }
 0x8a3   :  { %v6538_v51 = vpop.eup %6537  ;;  %v3867_v58 = vsel %vm8938_vm15, %v8917_v44, %v3863_v19  ;;  %vm3849_vm2 = vweird.f32 %v3841_v14 }
 0x8a4   :  { %v6540_v16 = vpop.eup %6539  ;;  %v3757_v60 = vmul.f32 %v6538_v51, %v3750_v15  ;;  %v3871_v15 = vor.u32 1.1754944e-38, %v3870_v52  ;;  %v3856_v44 = vor.u32 1.1754944e-38, %v3855_v61  ;;  %vm3854_vm4 = vcmp.eq.f32.partialorder %v3853_v33, 8.507059e+37  ;;  %v10959_v61 = vld [vmem:[#allocation29_spill] sm:$0xff] }
 0x8a5   :  { %v3843_v11 = vadd.f32 1.0, %v6540_v16 }
 0x8a6   :  { %v3758_v47 = vsub.f32 %v3757_v60, %v8663_v21 }
 0x8a7   :  { %v6542_v12 = vpop.eup %6541  ;;  %6543 = vrcp.f32 %v3843_v11  ;;  %vm3879_vm6 = vweird.f32 %v3843_v11 }
 0x8a8   :  { %v3845_v1 = vmul.f32 %v6542_v12, %v3841_v14  ;;  %v3759_v38 = vmul.f32 %v3758_v47, %v8690_v36  ;;  %6545 = vtanh.f32 %v8794_v34  ;;  %vm3850_vm0 = vweird.f32 %v6542_v12 }
 0x8a9   :  { %v3872_v36 = vsel %vm3869_vm1, %v3871_v15, %v3867_v58  ;;  %vm3851_vm3 = vmor %vm3849_vm2, %vm3850_vm0  ;;  %v8956_v34 = vadd.f32 %v3413_v57, %v8675_v40  ;;  %v3885_v40 = vand.u32 2147483648, %v3843_v11 }
 0x8aa   :  { %v3846_v56 = vsub.f32 1.0, %v3845_v1  ;;  %v8944_v63 = vadd.f32 %v3759_v38, %v8663_v21  ;;  %v10955_v1 = vld [vmem:[#allocation20_spill] sm:$0xff]  ;;  %v10956_v38 = vld [vmem:[#allocation25_spill] sm:$0xff] }
 0x8ab   :  { %v3890_v14 = vmul.f32 %v3872_v36, %v8956_v34  ;;  %v3886_v58 = vor.u32 1.1754944e-38, %v3885_v40  ;;  %v10971_v40 = vld [vmem:[#allocation45_spill] sm:$0xff] }
 0x8ac   :  { %v3847_v41 = vmul.f32 %v6542_v12, %v3846_v56  ;;  %v4076_v55 = vpack.c.bf16 %v8944_v63, %v8944_v63  ;;  %v10958_v56 = vld [vmem:[#allocation28_spill] sm:$0xff] }
 0x8ad   :  { %v6544_v28 = vpop.eup %6543 }
 0x8ae   :  { %v3848_v21 = vadd.f32 %v6542_v12, %v3847_v41  ;;  %v3875_v51 = vmul.f32 %v6544_v28, %v3843_v11  ;;  %4098 = vmatmul.bf16.vlgmr.msrb.gmra.mxu1 %v4076_v55  ;;  %4124 = vmatmul.bf16.vlgmr.msrb.gmra.mxu3 %v4076_v55  ;;  %v6546_v60 = vpop.eup %6545  ;;  %vm3880_vm5 = vweird.f32 %v6544_v28  ;;  %v10960_v41 = vld [vmem:[#allocation32_spill] sm:$0xff] }
 0x8af   :  { %4275 = vmatpush.bf16.msrb.mxu1 %v10348_v7  ;;  %4301 = vmatpush.bf16.msrb.mxu3 %v10349_v54  ;;  %vm3881_vm7 = vmor %vm3879_vm6, %vm3880_vm5 }
 0x8b0   :  { %v3852_v48 = vsel %vm3851_vm3, %v6542_v12, %v3848_v21  ;;  %v3876_v16 = vsub.f32 1.0, %v3875_v51  ;;  %v3883_v12 = vand.u32 2147483647, %v3843_v11  ;;  %v10961_v51 = vld [vmem:[#allocation83_spill] sm:$0xff]  ;;  %v10962_v11 = vld [vmem:[#allocation33_spill] sm:$0xff] }
 0x8b1   :  { %v3857_v47 = vsel %vm3854_vm4, %v3856_v44, %v3852_v48  ;;  %v10963_v44 = vld [vmem:[#allocation36_spill] sm:$0xff]  ;;  %v8971_v48 = vpop.permute.xlu2 %3769 }
 0x8b2   :  { %v3891_v17 = vmul.f32 %v6546_v60, %v3857_v47  ;;  %v3877_v19 = vmul.f32 %v6544_v28, %v3876_v16  ;;  %vm3884_vm8 = vcmp.eq.f32.partialorder %v3883_v12, 8.507059e+37  ;;  %v10965_v60 = vld [vmem:[#allocation37_spill] sm:$0xff]  ;;  %v10972_v12 = vld [vmem:[#allocation47_spill] sm:$0xff] }
 0x8b3   :  { %4276 = vmatpush.bf16.msrb.mxu1 %v10955_v1  ;;  %4302 = vmatpush.bf16.msrb.mxu3 %v10956_v38  ;;  %v10966_v47 = vld [vmem:[#allocation41_spill] sm:$0xff] }
 0x8b4   :  { %v8961_v52 = vadd.f32 %v3891_v17, %v3890_v14  ;;  %v3878_v20 = vadd.f32 %v6544_v28, %v3877_v19  ;;  %v10967_v14 = vld [vmem:[#allocation40_spill] sm:$0xff] }
 0x8b5   :  { %v10968_v17 = vld [vmem:[#allocation44_spill] sm:$0xff] }
 0x8b6   :  { %6547 = vtanh.f32 %v8961_v52  ;;  %v3882_v57 = vsel %vm3881_vm7, %v6544_v28, %v3878_v20  ;;  %v10969_v19 = vld [vmem:[#allocation176_spill] sm:$0xff]  ;;  %v10970_v20 = vld [vmem:[#allocation177_spill] sm:$0xff] }
 0x8b7   :  { %4277 = vmatpush.bf16.msrb.mxu1 %v10957_v9  ;;  %4303 = vmatpush.bf16.msrb.mxu3 %v10958_v56  ;;  %v3887_v15 = vsel %vm3884_vm8, %v3886_v58, %v3882_v57  ;;  %v10973_v57 = vld [vmem:[#allocation178_spill] sm:$0xff]  ;;  %v10974_v58 = vld [vmem:[#allocation179_spill] sm:$0xff] }
 0x8bb   :  { %4278 = vmatpush.bf16.msrb.mxu1 %v10959_v61  ;;  %4304 = vmatpush.bf16.msrb.mxu3 %v10960_v41 }
 0x8bc   :  { %v6548_v33 = vpop.eup %6547 }
 0x8bd   :  { %v3894_v21 = vmul.f32 %v6548_v33, %v3887_v15  ;;  %v10975_v33 = vld [vmem:[#allocation48_spill] sm:$0xff]  ;;  %v10976_v15 = vld [vmem:[#allocation49_spill] sm:$0xff] }
 0x8be   :  { %4150 = vmatmul.bf16.vlgmr.msra.gmra.mxu1 %v4076_v55  ;;  %4176 = vmatmul.bf16.vlgmr.msra.gmra.mxu3 %v4076_v55 }
 0x8bf   :  { %v3895_v36 = vsub.f32 %v3894_v21, %v10961_v51  ;;  %4279 = vmatpush.bf16.msrb.mxu1 %v10962_v11  ;;  %4305 = vmatpush.bf16.msrb.mxu3 %v10963_v44  ;;  %v10977_v21 = vld [vmem:[#allocation180_spill] sm:$0xff] }
 0x8c1   :  { %v3896_v28 = vmul.f32 %v3895_v36, %v8971_v48  ;;  %v10979_v36 = vld [vmem:[#allocation50_spill] sm:$0xff] }
 0x8c3   :  { %v8975_v16 = vadd.f32 %v3896_v28, %v10961_v51  ;;  %4280 = vmatpush.bf16.msrb.mxu1 %v10965_v60  ;;  %4306 = vmatpush.bf16.msrb.mxu3 %v10966_v47  ;;  %v10978_v51 = vld [vmem:[#allocation181_spill] sm:$0xff]  ;;  %v10980_v28 = vld [vmem:[#allocation51_spill] sm:$0xff] }
 0x8c5   :  { %10964 = vst [vmem:[#allocation23_spill] sm:$0xff] %v8975_v16  ;;  %v8981_v55 = vpack.c.bf16 %v8975_v16, %v8975_v16 }
 0x8c7   :  { %3910 = vmatmul.bf16.vlgmr.msrb.gmra.mxu0 %v8981_v55  ;;  %3936 = vmatmul.bf16.vlgmr.msrb.gmra.mxu2 %v8981_v55 }
 0x8c8   :  { %4281 = vmatpush.bf16.msrb.mxu1 %v10967_v14  ;;  %4307 = vmatpush.bf16.msrb.mxu3 %v10968_v17 }
 0x8c9   :  { %4077 = vmatpush.bf16.msrb.mxu0 %v10969_v19  ;;  %4103 = vmatpush.bf16.msrb.mxu2 %v10970_v20  ;;  %v11035_v19 = vld [vmem:[#allocation193_spill] sm:$0xff] }
 0x8cc   :  { %4282 = vmatpush.bf16.msrb.mxu1 %v10971_v40  ;;  %4308 = vmatpush.bf16.msrb.mxu3 %v10972_v12  ;;  %v10994_v12 = vld [vmem:[#allocation189_spill] sm:$0xff]  ;;  %v10995_v40 = vld [vmem:[#allocation58_spill] sm:$0xff] }
 0x8cd   :  { %4078 = vmatpush.bf16.msrb.mxu0 %v10973_v57  ;;  %4104 = vmatpush.bf16.msrb.mxu2 %v10974_v58  ;;  %v10982_v57 = vld [vmem:[#allocation183_spill] sm:$0xff]  ;;  %v10983_v58 = vld [vmem:[#allocation52_spill] sm:$0xff] }
 0x8cf   :  { %4283 = vmatmul.bf16.vlgmr.msrb.gmra.mxu1 %v8981_v55  ;;  %4309 = vmatmul.bf16.vlgmr.msrb.gmra.mxu3 %v8981_v55 }
 0x8d0   :  { %4401 = vmatpush.bf16.msra.mxu1 %v10975_v33  ;;  %4427 = vmatpush.bf16.msra.mxu3 %v10976_v15  ;;  %v10984_v33 = vld [vmem:[#allocation53_spill] sm:$0xff]  ;;  %v10985_v15 = vld [vmem:[#allocation184_spill] sm:$0xff] }
 0x8d1   :  { %4079 = vmatpush.bf16.msrb.mxu0 %v10977_v21  ;;  %4105 = vmatpush.bf16.msrb.mxu2 %v10978_v51  ;;  %v10986_v21 = vld [vmem:[#allocation185_spill] sm:$0xff]  ;;  %v10987_v51 = vld [vmem:[#allocation54_spill] sm:$0xff] }
 0x8d4   :  { %4402 = vmatpush.bf16.msra.mxu1 %v10979_v36  ;;  %4428 = vmatpush.bf16.msra.mxu3 %v10980_v28  ;;  %v10988_v36 = vld [vmem:[#allocation55_spill] sm:$0xff]  ;;  %v10989_v28 = vld [vmem:[#allocation186_spill] sm:$0xff] }
 0x8d5   :  { %4080 = vmatpush.bf16.msrb.mxu0 %v10981_v2  ;;  %4106 = vmatpush.bf16.msrb.mxu2 %v10982_v57  ;;  %v10990_v2 = vld [vmem:[#allocation187_spill] sm:$0xff]  ;;  %v10991_v57 = vld [vmem:[#allocation56_spill] sm:$0xff] }
 0x8d7   :  { %3962 = vmatmul.bf16.vlgmr.msra.gmra.mxu0 %v8981_v55  ;;  %3988 = vmatmul.bf16.vlgmr.msra.gmra.mxu2 %v8981_v55 }
 0x8d8   :  { %4403 = vmatpush.bf16.msra.mxu1 %v10983_v58  ;;  %4429 = vmatpush.bf16.msra.mxu3 %v10984_v33  ;;  %v10992_v58 = vld [vmem:[#allocation57_spill] sm:$0xff]  ;;  %v10993_v33 = vld [vmem:[#allocation188_spill] sm:$0xff] }
 0x8d9   :  { %4081 = vmatpush.bf16.msrb.mxu0 %v10985_v15  ;;  %4107 = vmatpush.bf16.msrb.mxu2 %v10986_v21  ;;  %v10996_v15 = vld [vmem:[#allocation59_spill] sm:$0xff]  ;;  %v10997_v21 = vld [vmem:[#allocation190_spill] sm:$0xff] }
 0x8dc   :  { %4404 = vmatpush.bf16.msra.mxu1 %v10987_v51  ;;  %4430 = vmatpush.bf16.msra.mxu3 %v10988_v36  ;;  %v10998_v51 = vld [vmem:[#allocation191_spill] sm:$0xff]  ;;  %v10999_v36 = vld [vmem:[#allocation192_spill] sm:$0xff] }
 0x8dd   :  { %4082 = vmatpush.bf16.msrb.mxu0 %v10989_v28  ;;  %4108 = vmatpush.bf16.msrb.mxu2 %v10990_v2  ;;  %v11000_v28 = vld [vmem:[#allocation194_spill] sm:$0xff]  ;;  %v11001_v2 = vld [vmem:[#allocation60_spill] sm:$0xff] }
 0x8e0   :  { %4405 = vmatpush.bf16.msra.mxu1 %v10991_v57  ;;  %4431 = vmatpush.bf16.msra.mxu3 %v10992_v58  ;;  %v11002_v57 = vld [vmem:[#allocation61_spill] sm:$0xff]  ;;  %v11003_v58 = vld [vmem:[#allocation91_spill] sm:$0xff] }
 0x8e1   :  { %4083 = vmatpush.bf16.msrb.mxu0 %v10993_v33  ;;  %4109 = vmatpush.bf16.msrb.mxu2 %v10994_v12  ;;  %v11004_v33 = vld [vmem:[#allocation195_spill] sm:$0xff]  ;;  %v11005_v12 = vld [vmem:[#allocation62_spill] sm:$0xff] }
 0x8e4   :  { %4406 = vmatpush.bf16.msra.mxu1 %v10995_v40  ;;  %4432 = vmatpush.bf16.msra.mxu3 %v10996_v15  ;;  %v11006_v40 = vld [vmem:[#allocation63_spill] sm:$0xff]  ;;  %v11007_v15 = vld [vmem:[#allocation64_spill] sm:$0xff] }
 0x8e5   :  { %4084 = vmatpush.bf16.msrb.mxu0 %v10997_v21  ;;  %4110 = vmatpush.bf16.msrb.mxu2 %v10998_v51  ;;  %v11008_v21 = vld [vmem:[#allocation65_spill] sm:$0xff] }
 0x8e6   :  { %v11009_v51 = vld [vmem:[#allocation197_spill] sm:$0xff] }
 0x8e8   :  { %4407 = vmatpush.bf16.msra.mxu1 %v11001_v2  ;;  %4433 = vmatpush.bf16.msra.mxu3 %v11002_v57  ;;  %v11012_v2 = vld [vmem:[#allocation67_spill] sm:$0xff]  ;;  %v11013_v57 = vld [vmem:[#allocation98_spill] sm:$0xff] }
 0x8e9   :  { %4129 = vmatpush.bf16.msra.mxu0 %v10999_v36  ;;  %4155 = vmatpush.bf16.msra.mxu2 %v11000_v28  ;;  %v11010_v36 = vld [vmem:[#allocation198_spill] sm:$0xff] }
 0x8ea   :  { %v11011_v28 = vld [vmem:[#allocation66_spill] sm:$0xff] }
 0x8ec   :  { %4408 = vmatpush.bf16.msra.mxu1 %v11005_v12  ;;  %4434 = vmatpush.bf16.msra.mxu3 %v11006_v40  ;;  %v11016_v12 = vld [vmem:[#allocation69_spill] sm:$0xff]  ;;  %v11017_v40 = vld [vmem:[#allocation200_spill] sm:$0xff] }
 0x8ed   :  { %4130 = vmatpush.bf16.msra.mxu0 %v11003_v58  ;;  %4156 = vmatpush.bf16.msra.mxu2 %v11004_v33  ;;  %v11014_v58 = vld [vmem:[#allocation199_spill] sm:$0xff]  ;;  %v11015_v33 = vld [vmem:[#allocation68_spill] sm:$0xff] }
 0x8f0   :  { %4453 = vmatpush.bf16.msrb.mxu1 %v11007_v15  ;;  %4479 = vmatpush.bf16.msrb.mxu3 %v11008_v21  ;;  %v11018_v15 = vld [vmem:[#allocation202_spill] sm:$0xff] }
 0x8f1   :  { %4131 = vmatpush.bf16.msra.mxu0 %v11009_v51  ;;  %4157 = vmatpush.bf16.msra.mxu2 %v11010_v36  ;;  %v11019_v21 = vld [vmem:[#allocation70_spill] sm:$0xff]  ;;  %v11020_v51 = vld [vmem:[#allocation71_spill] sm:$0xff] }
 0x8f2   :  { %v11021_v36 = vld [vmem:[#allocation203_spill] sm:$0xff] }
 0x8f4   :  { %4454 = vmatpush.bf16.msrb.mxu1 %v11011_v28  ;;  %4480 = vmatpush.bf16.msrb.mxu3 %v11012_v2  ;;  %v11022_v28 = vld [vmem:[#allocation205_spill] sm:$0xff]  ;;  %v11023_v2 = vld [vmem:[#allocation72_spill] sm:$0xff] }
 0x8f5   :  { %4132 = vmatpush.bf16.msra.mxu0 %v11013_v57  ;;  %4158 = vmatpush.bf16.msra.mxu2 %v11014_v58  ;;  %v11024_v57 = vld [vmem:[#allocation73_spill] sm:$0xff]  ;;  %v11025_v58 = vld [vmem:[#allocation206_spill] sm:$0xff] }
 0x8f8   :  { %4455 = vmatpush.bf16.msrb.mxu1 %v11015_v33  ;;  %4481 = vmatpush.bf16.msrb.mxu3 %v11016_v12  ;;  %v11026_v33 = vld [vmem:[#allocation207_spill] sm:$0xff]  ;;  %v11027_v12 = vld [vmem:[#allocation74_spill] sm:$0xff] }
 0x8f9   :  { %4133 = vmatpush.bf16.msra.mxu0 %v11017_v40  ;;  %4159 = vmatpush.bf16.msra.mxu2 %v11018_v15  ;;  %v11028_v40 = vld [vmem:[#allocation75_spill] sm:$0xff]  ;;  %v11029_v15 = vld [vmem:[#allocation208_spill] sm:$0xff] }
 0x8fc   :  { %4456 = vmatpush.bf16.msrb.mxu1 %v11019_v21  ;;  %4482 = vmatpush.bf16.msrb.mxu3 %v11020_v51  ;;  %v11030_v21 = vld [vmem:[#allocation209_spill] sm:$0xff]  ;;  %v11031_v51 = vld [vmem:[#allocation76_spill] sm:$0xff] }
 0x8fd   :  { %4134 = vmatpush.bf16.msra.mxu0 %v11021_v36  ;;  %4160 = vmatpush.bf16.msra.mxu2 %v11022_v28  ;;  %v11032_v36 = vld [vmem:[#allocation77_spill] sm:$0xff]  ;;  %v11033_v28 = vld [vmem:[#allocation78_spill] sm:$0xff] }
 0x900   :  { %4457 = vmatpush.bf16.msrb.mxu1 %v11023_v2  ;;  %4483 = vmatpush.bf16.msrb.mxu3 %v11024_v57  ;;  %v11034_v2 = vld [vmem:[#allocation79_spill] sm:$0xff] }
 0x901   :  { %4135 = vmatpush.bf16.msra.mxu0 %v11025_v58  ;;  %4161 = vmatpush.bf16.msra.mxu2 %v11026_v33 }
 0x904   :  { %4458 = vmatpush.bf16.msrb.mxu1 %v11027_v12  ;;  %4484 = vmatpush.bf16.msrb.mxu3 %v11028_v40 }
 0x905   :  { %4136 = vmatpush.bf16.msra.mxu0 %v11029_v15  ;;  %4162 = vmatpush.bf16.msra.mxu2 %v11030_v21 }
 0x908   :  { %4459 = vmatpush.bf16.msrb.mxu1 %v11031_v51  ;;  %4485 = vmatpush.bf16.msrb.mxu3 %v11032_v36 }
 0x90c   :  { %4460 = vmatpush.bf16.msrb.mxu1 %v11033_v28  ;;  %4486 = vmatpush.bf16.msrb.mxu3 %v11034_v2  ;;  %v11036_v2 = vld [vmem:[#allocation196_spill] sm:$0xff] }
 0x92b   :  { %v9057_v57 = vpop.f32.mrf.mxu1 }
 0x931   :  { %v9059_v58 = vpop.f32.mrf.mxu3 }
 0x933   :  { %v4101_v33 = vpop.f32.mrf.mxu1 }
 0x934   :  { %v11037_v33 = vld [vmem:[#allocation144_spill] sm:$0xff] }
 0x939   :  { %v4127_v12 = vpop.f32.mrf.mxu3 }
 0x93b   :  { %v9061_v20 = vpop.f32.mrf.mxu1 }
 0x941   :  { %v9063_v40 = vpop.f32.mrf.mxu3 }
 0x943   :  { %v4153_v15 = vpop.f32.mrf.mxu1 }
 0x944   :  { %v3911_v21 = vpop.f32.mrf.mxu0 }
 0x945   :  { %v3912_v51 = vadd.f32 %v3911_v21, %v11035_v19 }
 0x947   :  { %v3925_v36 = vadd.f32 %v8896_v4, %v3912_v51  ;;  %v11038_v4 = vld [vmem:[#allocation151_spill] sm:$0xff] }
 0x949   :  { %v6080_v17 = vmul.f32 -1.442695, %v3925_v36  ;;  %v4179_v28 = vpop.f32.mrf.mxu3 }
 0x94a   :  { %v3937_v14 = vpop.f32.mrf.mxu2 }
 0x94b   :  { %6549 = vpow2.f32 %v6080_v17  ;;  %v3938_v47 = vadd.f32 %v3937_v14, %v11036_v2  ;;  %v11039_v14 = vld [vmem:[#allocation201_spill] sm:$0xff] }
 0x94c   :  { %v3913_v60 = vpop.f32.mrf.mxu0  ;;  %v4284_v44 = vpop.f32.mrf.mxu1 }
 0x94d   :  { %v3951_v12 = vadd.f32 %v8900_v45, %v3938_v47  ;;  %v9070_v11 = vadd.f32 %v4284_v44, %v11037_v33 }
 0x94f   :  { %v6081_v16 = vmul.f32 -1.442695, %v3951_v12 }
 0x951   :  { %v6550_v15 = vpop.eup %6549  ;;  %6551 = vpow2.f32 %v6081_v16 }
 0x952   :  { %v4015_v41 = vadd.f32 1.0, %v6550_v15  ;;  %v3939_v21 = vpop.f32.mrf.mxu2  ;;  %v4310_v19 = vpop.f32.mrf.mxu3 }
 0x953   :  { %v9073_v51 = vadd.f32 %v4310_v19, %v11038_v4  ;;  %v11040_v21 = vld [vmem:[#allocation204_spill] sm:$0xff] }
 0x954   :  { %6553 = vrcp.f32 %v4015_v41  ;;  %v3963_v17 = vpop.f32.mrf.mxu0  ;;  %v4286_v36 = vpop.f32.mrf.mxu1  ;;  %vm4023_vm10 = vweird.f32 %v4015_v41 }
 0x955   :  { %v3964_v60 = vadd.f32 %v3963_v17, %v11039_v14 }
 0x957   :  { %v6552_v28 = vpop.eup %6551  ;;  %v3977_v45 = vadd.f32 %v8905_v8, %v3964_v60  ;;  %v4029_v60 = vand.u32 2147483648, %v4015_v41 }
 0x958   :  { %v4016_v47 = vadd.f32 1.0, %v6552_v28 }
 0x959   :  { %v6082_v44 = vmul.f32 -1.442695, %v3977_v45 }
 0x95a   :  { %v6554_v33 = vpop.eup %6553  ;;  %6555 = vrcp.f32 %v4016_v47  ;;  %v3989_v12 = vpop.f32.mrf.mxu2  ;;  %vm4038_vm13 = vweird.f32 %v4016_v47 }
 0x95b   :  { %v4312_v16 = vpop.f32.mrf.mxu3  ;;  %v4019_v15 = vmul.f32 %v6554_v33, %v4015_v41  ;;  %6557 = vpow2.f32 %v6082_v44  ;;  %v3990_v2 = vadd.f32 %v3989_v12, %v11040_v21  ;;  %vm4024_vm9 = vweird.f32 %v6554_v33 }
 0x95c   :  { %v3965_v19 = vpop.f32.mrf.mxu0  ;;  %v4027_v16 = vand.u32 2147483647, %v4015_v41  ;;  %v4044_v44 = vand.u32 2147483648, %v4016_v47  ;;  %vm4025_vm11 = vmor %vm4023_vm10, %vm4024_vm9  ;;  %v4042_v12 = vand.u32 2147483647, %v4016_v47 }
 0x95d   :  { %v4020_v4 = vsub.f32 1.0, %v4019_v15  ;;  %v4003_v61 = vadd.f32 %v8909_v5, %v3990_v2  ;;  %v4030_v2 = vor.u32 1.1754944e-38, %v4029_v60 }
 0x95e   :  { %vm4028_vm14 = vcmp.eq.f32.partialorder %v4027_v16, 8.507059e+37  ;;  %vm4043_vm0 = vcmp.eq.f32.partialorder %v4042_v12, 8.507059e+37 }
 0x95f   :  { %v4021_v36 = vmul.f32 %v6554_v33, %v4020_v4  ;;  %6559 = vtanh.f32 %v4003_v61 }
 0x960   :  { %v6556_v56 = vpop.eup %6555 }
 0x961   :  { %v4034_v17 = vmul.f32 %v6556_v56, %v4016_v47  ;;  %v4022_v14 = vadd.f32 %v6554_v33, %v4021_v36  ;;  %v6558_v8 = vpop.eup %6557  ;;  %vm4039_vm12 = vweird.f32 %v6556_v56  ;;  %v4045_v36 = vor.u32 1.1754944e-38, %v4044_v44 }
 0x962   :  { %v3991_v28 = vpop.f32.mrf.mxu2  ;;  %v4017_v9 = vadd.f32 1.0, %v6558_v8  ;;  %vm4040_vm15 = vmor %vm4038_vm13, %vm4039_vm12 }
 0x963   :  { %v4035_v45 = vsub.f32 1.0, %v4034_v17  ;;  %v4026_v5 = vsel %vm4025_vm11, %v6554_v33, %v4022_v14 }
 0x964   :  { %6561 = vrcp.f32 %v4017_v9  ;;  %v4031_v61 = vsel %vm4028_vm14, %v4030_v2, %v4026_v5  ;;  %v4059_v54 = vand.u32 2147483648, %v4017_v9  ;;  %v4057_v33 = vand.u32 2147483647, %v4017_v9 }
 0x965   :  { %v4036_v19 = vmul.f32 %v6556_v56, %v4035_v45  ;;  %v6560_v4 = vpop.eup %6559  ;;  %vm4053_vm2 = vweird.f32 %v4017_v9 }
 0x966   :  { %v4065_v21 = vmul.f32 %v6560_v4, %v4031_v61  ;;  %vm4058_vm4 = vcmp.eq.f32.partialorder %v4057_v33, 8.507059e+37  ;;  %v11045_v4 = vld [vmem:[#allocation43_spill] sm:$0xff]  ;;  %v11047_v61 = vld [vmem:[#allocation102_spill] sm:$0xff]  ;;  %v11055_v33 = vld [vmem:[#allocation128_spill] sm:$0xff] }
 0x967   :  { %v4037_v15 = vadd.f32 %v6556_v56, %v4036_v19 }
 0x969   :  { %v4041_v28 = vsel %vm4040_vm15, %v6556_v56, %v4037_v15  ;;  %v4060_v56 = vor.u32 1.1754944e-38, %v4059_v54  ;;  %v11041_v54 = vld [vmem:[#allocation39_spill] sm:$0xff] }
 0x96a   :  { %v4046_v17 = vsel %vm4043_vm0, %v4045_v36, %v4041_v28  ;;  %v6562_v8 = vpop.eup %6561  ;;  %v11044_v15 = vld [vmem:[#allocation99_spill] sm:$0xff]  ;;  %v11046_v36 = vld [vmem:[#allocation46_spill] sm:$0xff] }
 0x96b   :  { %v4064_v41 = vmul.f32 %v4046_v17, %v8804_v49  ;;  %v4049_v38 = vmul.f32 %v6562_v8, %v4017_v9  ;;  %vm4054_vm1 = vweird.f32 %v6562_v8  ;;  %v11048_v28 = vld [vmem:[#allocation103_spill] sm:$0xff]  ;;  %v11049_v17 = vld [vmem:[#allocation104_spill] sm:$0xff] }
 0x96c   :  { %vm4055_vm3 = vmor %vm4053_vm2, %vm4054_vm1 }
 0x96d   :  { %v4066_v45 = vadd.f32 %v4065_v21, %v4064_v41  ;;  %v4050_v1 = vsub.f32 1.0, %v4049_v38  ;;  %v11051_v41 = vld [vmem:[#allocation122_spill] sm:$0xff] }
 0x96f   :  { %6563 = vtanh.f32 %v4066_v45  ;;  %v4072_v14 = vsub.f32 %v4066_v45, %v8804_v49  ;;  %v4051_v47 = vmul.f32 %v6562_v8, %v4050_v1  ;;  %v11052_v45 = vld [vmem:[#allocation123_spill] sm:$0xff] }
 0x971   :  { %v4073_v60 = vmul.f32 %v4072_v14, %v8971_v48  ;;  %v4052_v16 = vadd.f32 %v6562_v8, %v4051_v47  ;;  %v11053_v14 = vld [vmem:[#allocation110_spill] sm:$0xff]  ;;  %v11054_v47 = vld [vmem:[#allocation113_spill] sm:$0xff] }
 0x973   :  { %v9083_v44 = vadd.f32 %v4073_v60, %v8804_v49  ;;  %v4056_v12 = vsel %vm4055_vm3, %v6562_v8, %v4052_v16  ;;  %v11042_v49 = vld [vmem:[#allocation42_spill] sm:$0xff]  ;;  %v11050_v8 = vld [vmem:[#allocation105_spill] sm:$0xff]  ;;  %v11056_v60 = vld [vmem:[#allocation131_spill] sm:$0xff] }
 0x974   :  { %v4061_v38 = vsel %vm4058_vm4, %v4060_v56, %v4056_v12  ;;  %v11057_v16 = vld [vmem:[#allocation114_spill] sm:$0xff]  ;;  %v11058_v56 = vld [vmem:[#allocation115_spill] sm:$0xff] }
 0x975   :  { %v6564_v21 = vpop.eup %6563  ;;  %v11059_v12 = vld [vmem:[#allocation134_spill] sm:$0xff] }
 0x976   :  { %v4068_v19 = vmul.f32 %v6564_v21, %v4061_v38  ;;  %v11060_v21 = vld [vmem:[#allocation135_spill] sm:$0xff]  ;;  %v11062_v38 = vld [vmem:[#allocation120_spill] sm:$0xff] }
 0x978   :  { %v4069_v5 = vsub.f32 %v4068_v19, %v8809_v39  ;;  %v11063_v19 = vld [vmem:[#allocation140_spill] sm:$0xff] }
 0x97a   :  { %v4070_v1 = vmul.f32 %v4069_v5, %v8971_v48  ;;  %v11064_v5 = vld [vmem:[#allocation142_spill] sm:$0xff] }
 0x97c   :  { %v9088_v2 = vadd.f32 %v4070_v1, %v8809_v39  ;;  %v11043_v39 = vld [vmem:[#allocation96_spill] sm:$0xff] }
 0x97d   :  { %v11065_v1 = vld [vmem:[#allocation124_spill] sm:$0xff] }
 0x97e   :  { %v4075_v9 = vpack.c.bf16 %v9088_v2, %v9088_v2 }
 0x980   :  { %4085 = vmatmul.bf16.vlgmr.msrb.gmra.mxu0 %v4075_v9  ;;  %4111 = vmatmul.bf16.vlgmr.msrb.gmra.mxu2 %v4075_v9 }
 0x981   :  { %4409 = vmatmul.bf16.vlgmr.msra.gmra.mxu1 %v4075_v9  ;;  %4435 = vmatmul.bf16.vlgmr.msra.gmra.mxu3 %v4075_v9 }
 0x982   :  { %4262 = vmatpush.bf16.msrb.mxu0 %v10281_v23  ;;  %4288 = vmatpush.bf16.msrb.mxu2 %v10282_v26 }
 0x983   :  { %4576 = vmatpush.bf16.msra.mxu1 %v10283_v22  ;;  %4602 = vmatpush.bf16.msra.mxu3 %v10284_v37 }
 0x986   :  { %4263 = vmatpush.bf16.msrb.mxu0 %v10285_v62  ;;  %4289 = vmatpush.bf16.msrb.mxu2 %v10286_v53 }
 0x987   :  { %4577 = vmatpush.bf16.msra.mxu1 %v10287_v18  ;;  %4603 = vmatpush.bf16.msra.mxu3 %v10288_v13 }
 0x98a   :  { %4264 = vmatpush.bf16.msrb.mxu0 %v10289_v35  ;;  %4290 = vmatpush.bf16.msrb.mxu2 %v10290_v29 }
 0x98b   :  { %4578 = vmatpush.bf16.msra.mxu1 %v10291_v50  ;;  %4604 = vmatpush.bf16.msra.mxu3 %v10429_v27 }
 0x98e   :  { %4265 = vmatpush.bf16.msrb.mxu0 %v10430_v6  ;;  %4291 = vmatpush.bf16.msrb.mxu2 %v10431_v59 }
 0x98f   :  { %4579 = vmatpush.bf16.msra.mxu1 %v10432_v25  ;;  %4605 = vmatpush.bf16.msra.mxu3 %v10435_v31 }
 0x990   :  { %4137 = vmatmul.bf16.vlgmr.msra.gmra.mxu0 %v4075_v9  ;;  %4163 = vmatmul.bf16.vlgmr.msra.gmra.mxu2 %v4075_v9 }
 0x991   :  { %4461 = vmatmul.bf16.vlgmr.msrb.gmra.mxu1 %v4075_v9  ;;  %4487 = vmatmul.bf16.vlgmr.msrb.gmra.mxu3 %v4075_v9  ;;  %v11066_v9 = vld [vmem:[#allocation125_spill] sm:$0xff] }
 0x992   :  { %4266 = vmatpush.bf16.msrb.mxu0 %v10433_v24  ;;  %4292 = vmatpush.bf16.msrb.mxu2 %v10434_v43 }
 0x993   :  { %4580 = vmatpush.bf16.msra.mxu1 %v10436_v42  ;;  %4606 = vmatpush.bf16.msra.mxu3 %v10735_v32 }
 0x996   :  { %4267 = vmatpush.bf16.msrb.mxu0 %v10581_v30  ;;  %4293 = vmatpush.bf16.msrb.mxu2 %v10582_v3 }
 0x997   :  { %4581 = vmatpush.bf16.msra.mxu1 %v10736_v46  ;;  %4607 = vmatpush.bf16.msra.mxu3 %v10888_v10 }
 0x99a   :  { %4268 = vmatpush.bf16.msrb.mxu0 %v11041_v54  ;;  %4294 = vmatpush.bf16.msrb.mxu2 %v11042_v49 }
 0x99b   :  { %4582 = vmatpush.bf16.msra.mxu1 %v11043_v39  ;;  %4608 = vmatpush.bf16.msra.mxu3 %v11044_v15 }
 0x99e   :  { %4269 = vmatpush.bf16.msrb.mxu0 %v11045_v4  ;;  %4295 = vmatpush.bf16.msrb.mxu2 %v11046_v36  ;;  %v11101_v36 = vld [vmem:[#allocation141_spill] sm:$0xff] }
 0x99f   :  { %4583 = vmatpush.bf16.msra.mxu1 %v11047_v61  ;;  %4609 = vmatpush.bf16.msra.mxu3 %v11048_v28 }
 0x9a1   :  { %4270 = vmatmul.bf16.vlgmr.msrb.gmra.mxu0 %v8981_v55  ;;  %4296 = vmatmul.bf16.vlgmr.msrb.gmra.mxu2 %v8981_v55  ;;  %v11061_v55 = vld [vmem:[#allocation118_spill] sm:$0xff] }
 0x9a2   :  { %4388 = vmatpush.bf16.msra.mxu0 %v11051_v41  ;;  %4414 = vmatpush.bf16.msra.mxu2 %v11052_v45 }
 0x9a3   :  { %4628 = vmatpush.bf16.msrb.mxu1 %v11049_v17  ;;  %4654 = vmatpush.bf16.msrb.mxu3 %v11050_v8 }
 0x9a6   :  { %4389 = vmatpush.bf16.msra.mxu0 %v11055_v33  ;;  %4415 = vmatpush.bf16.msra.mxu2 %v11056_v60 }
 0x9a7   :  { %4629 = vmatpush.bf16.msrb.mxu1 %v11053_v14  ;;  %4655 = vmatpush.bf16.msrb.mxu3 %v11054_v47  ;;  %v11067_v47 = vld [vmem:[#allocation146_spill] sm:$0xff] }
 0x9aa   :  { %4390 = vmatpush.bf16.msra.mxu0 %v11059_v12  ;;  %4416 = vmatpush.bf16.msra.mxu2 %v11060_v21  ;;  %v11070_v12 = vld [vmem:[#allocation133_spill] sm:$0xff]  ;;  %v11071_v21 = vld [vmem:[#allocation150_spill] sm:$0xff] }
 0x9ab   :  { %4630 = vmatpush.bf16.msrb.mxu1 %v11057_v16  ;;  %4656 = vmatpush.bf16.msrb.mxu3 %v11058_v56  ;;  %v11068_v16 = vld [vmem:[#allocation147_spill] sm:$0xff]  ;;  %v11069_v56 = vld [vmem:[#allocation132_spill] sm:$0xff] }
 0x9ae   :  { %4391 = vmatpush.bf16.msra.mxu0 %v11063_v19  ;;  %4417 = vmatpush.bf16.msra.mxu2 %v11064_v5  ;;  %v11074_v19 = vld [vmem:[#allocation137_spill] sm:$0xff]  ;;  %v11075_v5 = vld [vmem:[#allocation154_spill] sm:$0xff] }
 0x9af   :  { %4631 = vmatpush.bf16.msrb.mxu1 %v11061_v55  ;;  %4657 = vmatpush.bf16.msrb.mxu3 %v11062_v38  ;;  %v11072_v55 = vld [vmem:[#allocation153_spill] sm:$0xff]  ;;  %v11073_v38 = vld [vmem:[#allocation136_spill] sm:$0xff] }
 0x9b2   :  { %4392 = vmatpush.bf16.msra.mxu0 %v11067_v47  ;;  %4418 = vmatpush.bf16.msra.mxu2 %v11068_v16  ;;  %v11078_v47 = vld [vmem:[#allocation145_spill] sm:$0xff]  ;;  %v11079_v16 = vld [vmem:[#allocation158_spill] sm:$0xff] }
 0x9b3   :  { %4632 = vmatpush.bf16.msrb.mxu1 %v11065_v1  ;;  %4658 = vmatpush.bf16.msrb.mxu3 %v11066_v9  ;;  %v11076_v1 = vld [vmem:[#allocation155_spill] sm:$0xff] }
 0x9b4   :  { %v11077_v9 = vld [vmem:[#allocation143_spill] sm:$0xff] }
 0x9b6   :  { %4393 = vmatpush.bf16.msra.mxu0 %v11071_v21  ;;  %4419 = vmatpush.bf16.msra.mxu2 %v11072_v55  ;;  %v11082_v21 = vld [vmem:[#allocation161_spill] sm:$0xff]  ;;  %v11083_v55 = vld [vmem:[#allocation162_spill] sm:$0xff] }
 0x9b7   :  { %4633 = vmatpush.bf16.msrb.mxu1 %v11069_v56  ;;  %4659 = vmatpush.bf16.msrb.mxu3 %v11070_v12  ;;  %v11080_v56 = vld [vmem:[#allocation159_spill] sm:$0xff]  ;;  %v11081_v12 = vld [vmem:[#allocation160_spill] sm:$0xff] }
 0x9ba   :  { %4394 = vmatpush.bf16.msra.mxu0 %v11075_v5  ;;  %4420 = vmatpush.bf16.msra.mxu2 %v11076_v1  ;;  %v11086_v5 = vld [vmem:[#allocation165_spill] sm:$0xff]  ;;  %v11087_v1 = vld [vmem:[#allocation166_spill] sm:$0xff] }
 0x9bb   :  { %4634 = vmatpush.bf16.msrb.mxu1 %v11073_v38  ;;  %4660 = vmatpush.bf16.msrb.mxu3 %v11074_v19  ;;  %v11084_v38 = vld [vmem:[#allocation163_spill] sm:$0xff]  ;;  %v11085_v19 = vld [vmem:[#allocation164_spill] sm:$0xff] }
 0x9be   :  { %4395 = vmatpush.bf16.msra.mxu0 %v11079_v16  ;;  %4421 = vmatpush.bf16.msra.mxu2 %v11080_v56  ;;  %v11090_v16 = vld [vmem:[#allocation169_spill] sm:$0xff]  ;;  %v11091_v56 = vld [vmem:[#allocation170_spill] sm:$0xff] }
 0x9bf   :  { %4635 = vmatpush.bf16.msrb.mxu1 %v11077_v9  ;;  %4661 = vmatpush.bf16.msrb.mxu3 %v11078_v47  ;;  %v11088_v9 = vld [vmem:[#allocation167_spill] sm:$0xff]  ;;  %v11089_v47 = vld [vmem:[#allocation168_spill] sm:$0xff] }
 0x9c2   :  { %4440 = vmatpush.bf16.msrb.mxu0 %v11081_v12  ;;  %4466 = vmatpush.bf16.msrb.mxu2 %v11082_v21  ;;  %v11092_v12 = vld [vmem:[#allocation171_spill] sm:$0xff]  ;;  %v11093_v21 = vld [vmem:[#allocation172_spill] sm:$0xff] }
 0x9c6   :  { %4441 = vmatpush.bf16.msrb.mxu0 %v11083_v55  ;;  %4467 = vmatpush.bf16.msrb.mxu2 %v11084_v38  ;;  %v11094_v55 = vld [vmem:[#allocation173_spill] sm:$0xff]  ;;  %v11095_v38 = vld [vmem:[#allocation174_spill] sm:$0xff] }
 0x9ca   :  { %4442 = vmatpush.bf16.msrb.mxu0 %v11085_v19  ;;  %4468 = vmatpush.bf16.msrb.mxu2 %v11086_v5  ;;  %v11096_v19 = vld [vmem:[#allocation175_spill] sm:$0xff] }
 0x9ce   :  { %4443 = vmatpush.bf16.msrb.mxu0 %v11087_v1  ;;  %4469 = vmatpush.bf16.msrb.mxu2 %v11088_v9  ;;  %v11097_v1 = vld [vmem:[#allocation16_spill] sm:$0xff] }
 0x9d2   :  { %4444 = vmatpush.bf16.msrb.mxu0 %v11089_v47  ;;  %4470 = vmatpush.bf16.msrb.mxu2 %v11090_v16 }
 0x9d6   :  { %4445 = vmatpush.bf16.msrb.mxu0 %v11091_v56  ;;  %4471 = vmatpush.bf16.msrb.mxu2 %v11092_v12  ;;  %v11098_v56 = vld [vmem:[#allocation18_spill] sm:$0xff] }
 0x9da   :  { %4446 = vmatpush.bf16.msrb.mxu0 %v11093_v21  ;;  %4472 = vmatpush.bf16.msrb.mxu2 %v11094_v55 }
 0x9de   :  { %4447 = vmatpush.bf16.msrb.mxu0 %v11095_v38  ;;  %4473 = vmatpush.bf16.msrb.mxu2 %v11096_v19 }
 0x9fd   :  { %v4086_v5 = vpop.f32.mrf.mxu0 }
 0x9fe   :  { %v4087_v14 = vadd.f32 %v4086_v5, %v11097_v1  ;;  %v9175_v9 = vpop.f32.mrf.mxu1  ;;  %v6088_v5 = vmul.f32 -1.442695, %v9070_v11  ;;  %v11100_v11 = vld [vmem:[#allocation81_spill] sm:$0xff] }
 0xa00   :  { %v4100_v47 = vadd.f32 %v9057_v57, %v4087_v14  ;;  %v11099_v14 = vld [vmem:[#allocation80_spill] sm:$0xff] }
 0xa02   :  { %v6083_v16 = vmul.f32 -1.442695, %v4100_v47 }
 0xa03   :  { %v4112_v60 = vpop.f32.mrf.mxu2 }
 0xa04   :  { %6565 = vpow2.f32 %v6083_v16  ;;  %v4113_v12 = vadd.f32 %v4112_v60, %v11098_v56  ;;  %v9179_v33 = vpop.f32.mrf.mxu3 }
 0xa05   :  { %v4088_v21 = vpop.f32.mrf.mxu0 }
 0xa06   :  { %v4126_v55 = vadd.f32 %v9059_v58, %v4113_v12  ;;  %v4412_v38 = vpop.f32.mrf.mxu1 }
 0xa08   :  { %v6084_v8 = vmul.f32 -1.442695, %v4126_v55 }
 0xa0a   :  { %v6566_v19 = vpop.eup %6565  ;;  %6567 = vpow2.f32 %v6084_v8 }
 0xa0b   :  { %v4190_v1 = vadd.f32 1.0, %v6566_v19  ;;  %v4114_v17 = vpop.f32.mrf.mxu2 }
 0xa0c   :  { %v4438_v28 = vpop.f32.mrf.mxu3 }
 0xa0d   :  { %6569 = vrcp.f32 %v4190_v1  ;;  %v4138_v57 = vpop.f32.mrf.mxu0  ;;  %vm4198_vm6 = vweird.f32 %v4190_v1 }
 0xa0e   :  { %v4139_v47 = vadd.f32 %v4138_v57, %v11099_v14  ;;  %v9184_v16 = vpop.f32.mrf.mxu1  ;;  %6571 = vpow2.f32 %v6088_v5 }
 0xa10   :  { %v6568_v60 = vpop.eup %6567  ;;  %v4152_v21 = vadd.f32 %v9061_v20, %v4139_v47 }
 0xa11   :  { %v4191_v58 = vadd.f32 1.0, %v6568_v60 }
 0xa12   :  { %v6085_v12 = vmul.f32 -1.442695, %v4152_v21 }
 0xa13   :  { %v6570_v55 = vpop.eup %6569  ;;  %6573 = vrcp.f32 %v4191_v58  ;;  %v4164_v8 = vpop.f32.mrf.mxu2  ;;  %vm4213_vm9 = vweird.f32 %v4191_v58 }
 0xa14   :  { %v4194_v38 = vmul.f32 %v6570_v55, %v4190_v1  ;;  %6575 = vpow2.f32 %v6085_v12  ;;  %v4165_v17 = vadd.f32 %v4164_v8, %v11100_v11  ;;  %v9188_v28 = vpop.f32.mrf.mxu3  ;;  %v6572_v19 = vpop.eup %6571  ;;  %vm4199_vm5 = vweird.f32 %v6570_v55 }
 0xa15   :  { %v4140_v56 = vpop.f32.mrf.mxu0  ;;  %v9191_v61 = vadd.f32 1.0, %v6572_v19  ;;  %v4204_v12 = vand.u32 2147483648, %v4190_v1  ;;  %vm4200_vm7 = vmor %vm4198_vm6, %vm4199_vm5  ;;  %v4217_v19 = vand.u32 2147483647, %v4191_v58 }
 0xa16   :  { %v4195_v57 = vsub.f32 1.0, %v4194_v38  ;;  %v4464_v14 = vpop.f32.mrf.mxu1  ;;  %v4178_v5 = vadd.f32 %v9063_v40, %v4165_v17  ;;  %v4202_v56 = vand.u32 2147483647, %v4190_v1  ;;  %v4219_v38 = vand.u32 2147483648, %v4191_v58 }
 0xa17   :  { %vm4218_vm12 = vcmp.eq.f32.partialorder %v4217_v19, 8.507059e+37  ;;  %vm4350_vm2 = vweird.f32 %v9191_v61 }
 0xa18   :  { %v4196_v20 = vmul.f32 %v6570_v55, %v4195_v57  ;;  %6577 = vtanh.f32 %v4178_v5  ;;  %vm4203_vm10 = vcmp.eq.f32.partialorder %v4202_v56, 8.507059e+37  ;;  %v11102_v56 = vld [vmem:[#allocation148_spill] sm:$0xff] }
 0xa19   :  { %v6574_v47 = vpop.eup %6573  ;;  %6579 = vrcp.f32 %v9191_v61 }
 0xa1a   :  { %v6576_v60 = vpop.eup %6575  ;;  %v4209_v21 = vmul.f32 %v6574_v47, %v4191_v58  ;;  %v4197_v45 = vadd.f32 %v6570_v55, %v4196_v20  ;;  %vm4214_vm8 = vweird.f32 %v6574_v47  ;;  %v4205_v20 = vor.u32 1.1754944e-38, %v4204_v12 }
 0xa1b   :  { %v4192_v41 = vadd.f32 1.0, %v6576_v60  ;;  %v4166_v8 = vpop.f32.mrf.mxu2  ;;  %vm4215_vm11 = vmor %vm4213_vm9, %vm4214_vm8 }
 0xa1c   :  { %v4210_v11 = vsub.f32 1.0, %v4209_v21  ;;  %v4490_v14 = vpop.f32.mrf.mxu3  ;;  %v4201_v17 = vsel %vm4200_vm7, %v6570_v55, %v4197_v45  ;;  %v4220_v21 = vor.u32 1.1754944e-38, %v4219_v38 }
 0xa1d   :  { %6581 = vrcp.f32 %v4192_v41  ;;  %v4206_v4 = vsel %vm4203_vm10, %v4205_v20, %v4201_v17  ;;  %v4232_v20 = vand.u32 2147483647, %v4192_v41  ;;  %vm4228_vm14 = vweird.f32 %v4192_v41 }
 0xa1e   :  { %v4211_v40 = vmul.f32 %v6574_v47, %v4210_v11  ;;  %v4271_v57 = vpop.f32.mrf.mxu0  ;;  %v6578_v8 = vpop.eup %6577 }
 0xa1f   :  { %v4314_v60 = vadd.f32 %v4271_v57, %v11101_v36  ;;  %v9195_v14 = vpop.eup %6579  ;;  %v4240_v12 = vmul.f32 %v6578_v8, %v4206_v4  ;;  %vm4233_vm0 = vcmp.eq.f32.partialorder %v4232_v20, 8.507059e+37 }
 0xa20   :  { %v4212_v5 = vadd.f32 %v6574_v47, %v4211_v40  ;;  %v4346_v58 = vmul.f32 %v9195_v14, %v9191_v61  ;;  %vm4351_vm1 = vweird.f32 %v9195_v14 }
 0xa21   :  { %v6087_v1 = vmul.f32 -1.442695, %v4314_v60  ;;  %v4234_v60 = vand.u32 2147483648, %v4192_v41  ;;  %vm9215_vm3 = vmor %vm4350_vm2, %vm4351_vm1 }
 0xa22   :  { %v4216_v15 = vsel %vm4215_vm11, %v6574_v47, %v4212_v5 }
 0xa23   :  { %v6582_v11 = vpop.eup %6581  ;;  %v4221_v39 = vsel %vm4218_vm12, %v4220_v21, %v4216_v15  ;;  %6583 = vpow2.f32 %v6087_v1  ;;  %v4235_v1 = vor.u32 1.1754944e-38, %v4234_v60  ;;  %v3898_v60 = vsub.f32 %v8961_v52, %v8956_v34 }
 0xa24   :  { %v4224_v45 = vmul.f32 %v6582_v11, %v4192_v41  ;;  %v4239_v55 = vmul.f32 %v4221_v39, %v8927_v0  ;;  %v4297_v36 = vpop.f32.mrf.mxu2  ;;  %vm4229_vm13 = vweird.f32 %v6582_v11  ;;  %v4347_v39 = vsub.f32 1.0, %v4346_v58 }
 0xa25   :  { %v4316_v40 = vadd.f32 %v4297_v36, %v11102_v56  ;;  %vm4230_vm15 = vmor %vm4228_vm14, %vm4229_vm13 }
 0xa26   :  { %v4225_v38 = vsub.f32 1.0, %v4224_v45  ;;  %v4241_v17 = vadd.f32 %v4240_v12, %v4239_v55  ;;  %v4273_v57 = vpop.f32.mrf.mxu0 }
 0xa27   :  { %v6089_v47 = vmul.f32 -1.442695, %v4316_v40  ;;  %v4348_v40 = vmul.f32 %v9195_v14, %v4347_v39  ;;  %v3899_v39 = vmul.f32 %v3898_v60, %v8971_v48 }
 0xa28   :  { %v4226_v19 = vmul.f32 %v6582_v11, %v4225_v38  ;;  %6585 = vtanh.f32 %v4241_v17  ;;  %v4247_v15 = vsub.f32 %v4241_v17, %v8927_v0 }
 0xa29   :  { %v6584_v5 = vpop.eup %6583  ;;  %6587 = vpow2.f32 %v6089_v47  ;;  %v4356_v47 = vand.u32 2147483648, %v9191_v61 }
 0xa2a   :  { %v4227_v4 = vadd.f32 %v6582_v11, %v4226_v19  ;;  %v4248_v8 = vmul.f32 %v4247_v15, %v8971_v48  ;;  %v4327_v21 = vadd.f32 1.0, %v6584_v5  ;;  %v4354_v15 = vand.u32 2147483647, %v9191_v61 }
 0xa2c   :  { %v4231_v45 = vsel %vm4230_vm15, %v6582_v11, %v4227_v4  ;;  %v9204_v55 = vadd.f32 %v4248_v8, %v8927_v0  ;;  %6589 = vrcp.f32 %v4327_v21  ;;  %v4299_v12 = vpop.f32.mrf.mxu2  ;;  %v4349_v11 = vadd.f32 %v9195_v14, %v4348_v40 }
 0xa2d   :  { %v4236_v36 = vsel %vm4233_vm0, %v4235_v1, %v4231_v45  ;;  %v4341_v8 = vand.u32 2147483648, %v4327_v21  ;;  %v4339_v45 = vand.u32 2147483647, %v4327_v21  ;;  %vm4355_vm5 = vcmp.eq.f32.partialorder %v4354_v15, 8.507059e+37  ;;  %v11108_v15 = vld [vmem:[#allocation24_spill] sm:$0xff] }
 0xa2e   :  { %v6586_v56 = vpop.eup %6585  ;;  %v4353_v4 = vsel %vm9215_vm3, %v9195_v14, %v4349_v11  ;;  %vm4335_vm6 = vweird.f32 %v4327_v21  ;;  %v9233_v40 = vadd.f32 %v3899_v39, %v8956_v34 }
 0xa2f   :  { %v6588_v58 = vpop.eup %6587  ;;  %v4243_v38 = vmul.f32 %v6586_v56, %v4236_v36  ;;  %v4357_v36 = vor.u32 1.1754944e-38, %v4356_v47  ;;  %v4342_v14 = vor.u32 1.1754944e-38, %v4341_v8  ;;  %vm4340_vm8 = vcmp.eq.f32.partialorder %v4339_v45, 8.507059e+37  ;;  %v11107_v47 = vld [vmem:[#allocation25_spill] sm:$0xff] }
 0xa30   :  { %v4329_v17 = vadd.f32 1.0, %v6588_v58  ;;  %v11110_v8 = vld [vmem:[#allocation29_spill] sm:$0xff] }
 0xa31   :  { %v4244_v41 = vsub.f32 %v4243_v38, %v8944_v63 }
 0xa32   :  { %v6590_v57 = vpop.eup %6589  ;;  %6591 = vrcp.f32 %v4329_v17  ;;  %v4371_v34 = vand.u32 2147483648, %v4329_v17  ;;  %vm4365_vm10 = vweird.f32 %v4329_v17 }
 0xa33   :  { %v4331_v0 = vmul.f32 %v6590_v57, %v4327_v21  ;;  %v4245_v20 = vmul.f32 %v4244_v41, %v8971_v48  ;;  %6593 = vtanh.f32 %v9073_v51  ;;  %vm4336_vm4 = vweird.f32 %v6590_v57  ;;  %v11105_v51 = vld [vmem:[#allocation21_spill] sm:$0xff] }
 0xa34   :  { %v4358_v48 = vsel %vm4355_vm5, %v4357_v36, %v4353_v4  ;;  %vm4337_vm7 = vmor %vm4335_vm6, %vm4336_vm4  ;;  %v4372_v4 = vor.u32 1.1754944e-38, %v4371_v34  ;;  %v11125_v34 = vld [vmem:[#allocation179_spill] sm:$0xff] }
 0xa35   :  { %v4332_v5 = vsub.f32 1.0, %v4331_v0  ;;  %v9221_v52 = vadd.f32 %v4245_v20, %v8944_v63  ;;  %v4376_v21 = vmul.f32 %v4358_v48, %v9233_v40  ;;  %v11106_v20 = vld [vmem:[#allocation20_spill] sm:$0xff] }
 0xa37   :  { %v4333_v1 = vmul.f32 %v6590_v57, %v4332_v5  ;;  %v4562_v12 = vpack.c.bf16 %v9221_v52, %v9221_v52  ;;  %v11109_v5 = vld [vmem:[#allocation28_spill] sm:$0xff] }
 0xa38   :  { %v6592_v61 = vpop.eup %6591 }
 0xa39   :  { %v4334_v63 = vadd.f32 %v6590_v57, %v4333_v1  ;;  %v4361_v56 = vmul.f32 %v6592_v61, %v4329_v17  ;;  %4584 = vmatmul.bf16.vlgmr.msra.gmra.mxu1 %v4562_v12  ;;  %4610 = vmatmul.bf16.vlgmr.msra.gmra.mxu3 %v4562_v12  ;;  %v6594_v41 = vpop.eup %6593  ;;  %vm4366_vm9 = vweird.f32 %v6592_v61  ;;  %v11111_v1 = vld [vmem:[#allocation32_spill] sm:$0xff] }
 0xa3a   :  { %4761 = vmatpush.bf16.msra.mxu1 %v10348_v7  ;;  %4787 = vmatpush.bf16.msra.mxu3 %v11105_v51  ;;  %vm4367_vm11 = vmor %vm4365_vm10, %vm4366_vm9  ;;  %v9248_v51 = vpop.permute.xlu0 %4255 }
 0xa3b   :  { %v4338_v58 = vsel %vm4337_vm7, %v6590_v57, %v4334_v63  ;;  %v4362_v38 = vsub.f32 1.0, %v4361_v56  ;;  %v4369_v57 = vand.u32 2147483647, %v4329_v17  ;;  %v11112_v56 = vld [vmem:[#allocation23_spill] sm:$0xff]  ;;  %v11113_v17 = vld [vmem:[#allocation33_spill] sm:$0xff] }
 0xa3c   :  { %v4343_v60 = vsel %vm4340_vm8, %v4342_v14, %v4338_v58  ;;  %v11114_v14 = vld [vmem:[#allocation36_spill] sm:$0xff] }
 0xa3d   :  { %v4377_v11 = vmul.f32 %v6594_v41, %v4343_v60  ;;  %v4363_v0 = vmul.f32 %v6592_v61, %v4362_v38  ;;  %vm4370_vm12 = vcmp.eq.f32.partialorder %v4369_v57, 8.507059e+37  ;;  %v11116_v38 = vld [vmem:[#allocation37_spill] sm:$0xff]  ;;  %v11118_v60 = vld [vmem:[#allocation40_spill] sm:$0xff] }
 0xa3e   :  { %4762 = vmatpush.bf16.msra.mxu1 %v11106_v20  ;;  %4788 = vmatpush.bf16.msra.mxu3 %v11107_v47  ;;  %v11117_v41 = vld [vmem:[#allocation41_spill] sm:$0xff]  ;;  %v11123_v47 = vld [vmem:[#allocation47_spill] sm:$0xff]  ;;  %v11126_v57 = vld [vmem:[#allocation48_spill] sm:$0xff] }
 0xa3f   :  { %v9238_v19 = vadd.f32 %v4377_v11, %v4376_v21  ;;  %v4364_v7 = vadd.f32 %v6592_v61, %v4363_v0  ;;  %v11119_v21 = vld [vmem:[#allocation44_spill] sm:$0xff]  ;;  %v11121_v0 = vld [vmem:[#allocation177_spill] sm:$0xff] }
 0xa40   :  { %v11120_v11 = vld [vmem:[#allocation176_spill] sm:$0xff]  ;;  %v11122_v20 = vld [vmem:[#allocation45_spill] sm:$0xff] }
 0xa41   :  { %6595 = vtanh.f32 %v9238_v19  ;;  %v4368_v39 = vsel %vm4367_vm11, %v6592_v61, %v4364_v7  ;;  %v11124_v7 = vld [vmem:[#allocation178_spill] sm:$0xff] }
 0xa42   :  { %4763 = vmatpush.bf16.msra.mxu1 %v11108_v15  ;;  %4789 = vmatpush.bf16.msra.mxu3 %v11109_v5  ;;  %v4373_v36 = vsel %vm4370_vm12, %v4372_v4, %v4368_v39  ;;  %v11127_v15 = vld [vmem:[#allocation49_spill] sm:$0xff]  ;;  %v11128_v5 = vld [vmem:[#allocation180_spill] sm:$0xff]  ;;  %v11130_v4 = vld [vmem:[#allocation50_spill] sm:$0xff] }
 0xa43   :  { %v11129_v39 = vld [vmem:[#allocation181_spill] sm:$0xff] }
 0xa46   :  { %4764 = vmatpush.bf16.msra.mxu1 %v11110_v8  ;;  %4790 = vmatpush.bf16.msra.mxu3 %v11111_v1  ;;  %v11131_v8 = vld [vmem:[#allocation51_spill] sm:$0xff]  ;;  %v11132_v1 = vld [vmem:[#allocation182_spill] sm:$0xff] }
 0xa47   :  { %v6596_v45 = vpop.eup %6595 }
 0xa48   :  { %v4380_v63 = vmul.f32 %v6596_v45, %v4373_v36  ;;  %v11133_v45 = vld [vmem:[#allocation183_spill] sm:$0xff]  ;;  %v11134_v36 = vld [vmem:[#allocation52_spill] sm:$0xff] }
 0xa49   :  { %4636 = vmatmul.bf16.vlgmr.msrb.gmra.mxu1 %v4562_v12  ;;  %4662 = vmatmul.bf16.vlgmr.msrb.gmra.mxu3 %v4562_v12 }
 0xa4a   :  { %v4381_v48 = vsub.f32 %v4380_v63, %v11112_v56  ;;  %4765 = vmatpush.bf16.msra.mxu1 %v11113_v17  ;;  %4791 = vmatpush.bf16.msra.mxu3 %v11114_v14  ;;  %v11135_v63 = vld [vmem:[#allocation53_spill] sm:$0xff]  ;;  %v11138_v17 = vld [vmem:[#allocation54_spill] sm:$0xff]  ;;  %v11139_v14 = vld [vmem:[#allocation55_spill] sm:$0xff] }
 0xa4c   :  { %v4382_v61 = vmul.f32 %v4381_v48, %v9248_v51  ;;  %v11137_v48 = vld [vmem:[#allocation185_spill] sm:$0xff] }
 0xa4e   :  { %v9252_v58 = vadd.f32 %v4382_v61, %v11112_v56  ;;  %4766 = vmatpush.bf16.msra.mxu1 %v11116_v38  ;;  %4792 = vmatpush.bf16.msra.mxu3 %v11117_v41  ;;  %v11136_v56 = vld [vmem:[#allocation184_spill] sm:$0xff]  ;;  %v11140_v61 = vld [vmem:[#allocation186_spill] sm:$0xff]  ;;  %v11141_v38 = vld [vmem:[#allocation187_spill] sm:$0xff] }
 0xa4f   :  { %v11142_v41 = vld [vmem:[#allocation56_spill] sm:$0xff] }
 0xa50   :  { %11115 = vst [vmem:[#allocation26_spill] sm:$0xff] %v9252_v58  ;;  %v9258_v12 = vpack.c.bf16 %v9252_v58, %v9252_v58 }
 0xa52   :  { %4396 = vmatmul.bf16.vlgmr.msra.gmra.mxu0 %v9258_v12  ;;  %4422 = vmatmul.bf16.vlgmr.msra.gmra.mxu2 %v9258_v12 }
 0xa53   :  { %4767 = vmatpush.bf16.msra.mxu1 %v11118_v60  ;;  %4793 = vmatpush.bf16.msra.mxu3 %v11119_v21  ;;  %v11143_v60 = vld [vmem:[#allocation57_spill] sm:$0xff]  ;;  %v11144_v21 = vld [vmem:[#allocation188_spill] sm:$0xff] }
 0xa54   :  { %4563 = vmatpush.bf16.msra.mxu0 %v11120_v11  ;;  %4589 = vmatpush.bf16.msra.mxu2 %v11121_v0 }
 0xa57   :  { %4768 = vmatpush.bf16.msra.mxu1 %v11122_v20  ;;  %4794 = vmatpush.bf16.msra.mxu3 %v11123_v47  ;;  %v11145_v20 = vld [vmem:[#allocation189_spill] sm:$0xff]  ;;  %v11146_v47 = vld [vmem:[#allocation58_spill] sm:$0xff] }
 0xa58   :  { %4564 = vmatpush.bf16.msra.mxu0 %v11124_v7  ;;  %4590 = vmatpush.bf16.msra.mxu2 %v11125_v34 }
 0xa5a   :  { %4769 = vmatmul.bf16.vlgmr.msra.gmra.mxu1 %v9258_v12  ;;  %4795 = vmatmul.bf16.vlgmr.msra.gmra.mxu3 %v9258_v12 }
 0xa5b   :  { %4884 = vmatpush.bf16.msrb.mxu1 %v11126_v57  ;;  %4910 = vmatpush.bf16.msrb.mxu3 %v11127_v15  ;;  %v11147_v57 = vld [vmem:[#allocation59_spill] sm:$0xff]  ;;  %v11148_v15 = vld [vmem:[#allocation190_spill] sm:$0xff] }
 0xa5c   :  { %4565 = vmatpush.bf16.msra.mxu0 %v11128_v5  ;;  %4591 = vmatpush.bf16.msra.mxu2 %v11129_v39 }
 0xa5f   :  { %4885 = vmatpush.bf16.msrb.mxu1 %v11130_v4  ;;  %4911 = vmatpush.bf16.msrb.mxu3 %v11131_v8  ;;  %v11149_v4 = vld [vmem:[#allocation191_spill] sm:$0xff]  ;;  %v11150_v8 = vld [vmem:[#allocation192_spill] sm:$0xff] }
 0xa60   :  { %4566 = vmatpush.bf16.msra.mxu0 %v11132_v1  ;;  %4592 = vmatpush.bf16.msra.mxu2 %v11133_v45  ;;  %v11189_v45 = vld [vmem:[#allocation196_spill] sm:$0xff] }
 0xa62   :  { %4448 = vmatmul.bf16.vlgmr.msrb.gmra.mxu0 %v9258_v12  ;;  %4474 = vmatmul.bf16.vlgmr.msrb.gmra.mxu2 %v9258_v12 }
 0xa63   :  { %4886 = vmatpush.bf16.msrb.mxu1 %v11134_v36  ;;  %4912 = vmatpush.bf16.msrb.mxu3 %v11135_v63  ;;  %v11151_v36 = vld [vmem:[#allocation194_spill] sm:$0xff]  ;;  %v11152_v63 = vld [vmem:[#allocation60_spill] sm:$0xff] }
 0xa64   :  { %4567 = vmatpush.bf16.msra.mxu0 %v11136_v56  ;;  %4593 = vmatpush.bf16.msra.mxu2 %v11137_v48  ;;  %v11188_v48 = vld [vmem:[#allocation152_spill] sm:$0xff] }
 0xa67   :  { %4887 = vmatpush.bf16.msrb.mxu1 %v11138_v17  ;;  %4913 = vmatpush.bf16.msrb.mxu3 %v11139_v14  ;;  %v11153_v17 = vld [vmem:[#allocation61_spill] sm:$0xff]  ;;  %v11154_v14 = vld [vmem:[#allocation91_spill] sm:$0xff] }
 0xa68   :  { %4568 = vmatpush.bf16.msra.mxu0 %v11140_v61  ;;  %4594 = vmatpush.bf16.msra.mxu2 %v11141_v38 }
 0xa6b   :  { %4888 = vmatpush.bf16.msrb.mxu1 %v11142_v41  ;;  %4914 = vmatpush.bf16.msrb.mxu3 %v11143_v60  ;;  %v11155_v41 = vld [vmem:[#allocation195_spill] sm:$0xff]  ;;  %v11156_v60 = vld [vmem:[#allocation62_spill] sm:$0xff] }
 0xa6c   :  { %4569 = vmatpush.bf16.msra.mxu0 %v11144_v21  ;;  %4595 = vmatpush.bf16.msra.mxu2 %v11145_v20  ;;  %v11186_v21 = vld [vmem:[#allocation193_spill] sm:$0xff] }
 0xa6f   :  { %4889 = vmatpush.bf16.msrb.mxu1 %v11146_v47  ;;  %4915 = vmatpush.bf16.msrb.mxu3 %v11147_v57  ;;  %v11157_v47 = vld [vmem:[#allocation63_spill] sm:$0xff]  ;;  %v11158_v57 = vld [vmem:[#allocation64_spill] sm:$0xff] }
 0xa70   :  { %4570 = vmatpush.bf16.msra.mxu0 %v11148_v15  ;;  %4596 = vmatpush.bf16.msra.mxu2 %v11149_v4  ;;  %v11159_v15 = vld [vmem:[#allocation65_spill] sm:$0xff] }
 0xa71   :  { %v11160_v4 = vld [vmem:[#allocation197_spill] sm:$0xff] }
 0xa73   :  { %4890 = vmatpush.bf16.msrb.mxu1 %v11152_v63  ;;  %4916 = vmatpush.bf16.msrb.mxu3 %v11153_v17  ;;  %v11163_v63 = vld [vmem:[#allocation67_spill] sm:$0xff]  ;;  %v11164_v17 = vld [vmem:[#allocation98_spill] sm:$0xff] }
 0xa74   :  { %4615 = vmatpush.bf16.msrb.mxu0 %v11150_v8  ;;  %4641 = vmatpush.bf16.msrb.mxu2 %v11151_v36  ;;  %v11161_v8 = vld [vmem:[#allocation198_spill] sm:$0xff] }
 0xa75   :  { %v11162_v36 = vld [vmem:[#allocation66_spill] sm:$0xff] }
 0xa77   :  { %4891 = vmatpush.bf16.msrb.mxu1 %v11156_v60  ;;  %4917 = vmatpush.bf16.msrb.mxu3 %v11157_v47  ;;  %v11167_v60 = vld [vmem:[#allocation69_spill] sm:$0xff]  ;;  %v11168_v47 = vld [vmem:[#allocation200_spill] sm:$0xff] }
 0xa78   :  { %4616 = vmatpush.bf16.msrb.mxu0 %v11154_v14  ;;  %4642 = vmatpush.bf16.msrb.mxu2 %v11155_v41  ;;  %v11165_v14 = vld [vmem:[#allocation199_spill] sm:$0xff]  ;;  %v11166_v41 = vld [vmem:[#allocation68_spill] sm:$0xff] }
 0xa7b   :  { %4936 = vmatpush.bf16.msra.mxu1 %v11158_v57  ;;  %4962 = vmatpush.bf16.msra.mxu3 %v11159_v15  ;;  %v11169_v57 = vld [vmem:[#allocation202_spill] sm:$0xff] }
 0xa7c   :  { %4617 = vmatpush.bf16.msrb.mxu0 %v11160_v4  ;;  %4643 = vmatpush.bf16.msrb.mxu2 %v11161_v8  ;;  %v11170_v15 = vld [vmem:[#allocation70_spill] sm:$0xff]  ;;  %v11171_v4 = vld [vmem:[#allocation71_spill] sm:$0xff] }
 0xa7d   :  { %v11172_v8 = vld [vmem:[#allocation203_spill] sm:$0xff] }
 0xa7f   :  { %4937 = vmatpush.bf16.msra.mxu1 %v11162_v36  ;;  %4963 = vmatpush.bf16.msra.mxu3 %v11163_v63  ;;  %v11173_v36 = vld [vmem:[#allocation205_spill] sm:$0xff]  ;;  %v11174_v63 = vld [vmem:[#allocation72_spill] sm:$0xff] }
 0xa80   :  { %4618 = vmatpush.bf16.msrb.mxu0 %v11164_v17  ;;  %4644 = vmatpush.bf16.msrb.mxu2 %v11165_v14  ;;  %v11175_v17 = vld [vmem:[#allocation73_spill] sm:$0xff]  ;;  %v11176_v14 = vld [vmem:[#allocation206_spill] sm:$0xff] }
 0xa83   :  { %4938 = vmatpush.bf16.msra.mxu1 %v11166_v41  ;;  %4964 = vmatpush.bf16.msra.mxu3 %v11167_v60  ;;  %v11177_v41 = vld [vmem:[#allocation207_spill] sm:$0xff]  ;;  %v11178_v60 = vld [vmem:[#allocation74_spill] sm:$0xff] }
 0xa84   :  { %4619 = vmatpush.bf16.msrb.mxu0 %v11168_v47  ;;  %4645 = vmatpush.bf16.msrb.mxu2 %v11169_v57  ;;  %v11179_v47 = vld [vmem:[#allocation75_spill] sm:$0xff]  ;;  %v11180_v57 = vld [vmem:[#allocation208_spill] sm:$0xff] }
 0xa87   :  { %4939 = vmatpush.bf16.msra.mxu1 %v11170_v15  ;;  %4965 = vmatpush.bf16.msra.mxu3 %v11171_v4  ;;  %v11181_v15 = vld [vmem:[#allocation209_spill] sm:$0xff]  ;;  %v11182_v4 = vld [vmem:[#allocation76_spill] sm:$0xff] }
 0xa88   :  { %4620 = vmatpush.bf16.msrb.mxu0 %v11172_v8  ;;  %4646 = vmatpush.bf16.msrb.mxu2 %v11173_v36  ;;  %v11183_v8 = vld [vmem:[#allocation77_spill] sm:$0xff]  ;;  %v11184_v36 = vld [vmem:[#allocation78_spill] sm:$0xff] }
 0xa8b   :  { %4940 = vmatpush.bf16.msra.mxu1 %v11174_v63  ;;  %4966 = vmatpush.bf16.msra.mxu3 %v11175_v17  ;;  %v11185_v63 = vld [vmem:[#allocation79_spill] sm:$0xff] }
 0xa8c   :  { %4621 = vmatpush.bf16.msrb.mxu0 %v11176_v14  ;;  %4647 = vmatpush.bf16.msrb.mxu2 %v11177_v41 }
 0xa8f   :  { %4941 = vmatpush.bf16.msra.mxu1 %v11178_v60  ;;  %4967 = vmatpush.bf16.msra.mxu3 %v11179_v47 }
 0xa90   :  { %4622 = vmatpush.bf16.msrb.mxu0 %v11180_v57  ;;  %4648 = vmatpush.bf16.msrb.mxu2 %v11181_v15 }
 0xa93   :  { %4942 = vmatpush.bf16.msra.mxu1 %v11182_v4  ;;  %4968 = vmatpush.bf16.msra.mxu3 %v11183_v8 }
 0xa97   :  { %4943 = vmatpush.bf16.msra.mxu1 %v11184_v36  ;;  %4969 = vmatpush.bf16.msra.mxu3 %v11185_v63  ;;  %v11187_v63 = vld [vmem:[#allocation97_spill] sm:$0xff] }
 0xa98   :  { %v267_v56 = vadd.f32 %v11188_v48, %v11187_v63  ;;  %v11193_v63 = vld [vmem:[#allocation201_spill] sm:$0xff] }
 0xab6   :  { %v9334_v17 = vpop.f32.mrf.mxu1 }
 0xabc   :  { %v9336_v14 = vpop.f32.mrf.mxu3 }
 0xabe   :  { %v4587_v41 = vpop.f32.mrf.mxu1 }
 0xac4   :  { %v4613_v60 = vpop.f32.mrf.mxu3 }
 0xac6   :  { %v9338_v20 = vpop.f32.mrf.mxu1 }
 0xacc   :  { %v9340_v47 = vpop.f32.mrf.mxu3 }
 0xace   :  { %v4639_v57 = vpop.f32.mrf.mxu1 }
 0xacf   :  { %v4397_v15 = vpop.f32.mrf.mxu0 }
 0xad0   :  { %v4398_v4 = vadd.f32 %v4397_v15, %v11186_v21  ;;  %v11190_v15 = vld [vmem:[#allocation107_spill] sm:$0xff]  ;;  %v11191_v21 = vld [vmem:[#allocation157_spill] sm:$0xff] }
 0xad2   :  { %v4411_v8 = vadd.f32 %v9175_v9, %v4398_v4  ;;  %v325_v9 = vadd.f32 %v11191_v21, %v11190_v15  ;;  %v11194_v15 = vld [vmem:[#allocation204_spill] sm:$0xff] }
 0xad4   :  { %v6090_v38 = vmul.f32 -1.442695, %v4411_v8  ;;  %v4665_v36 = vpop.f32.mrf.mxu3 }
 0xad5   :  { %v4423_v61 = vpop.f32.mrf.mxu2 }
 0xad6   :  { %6597 = vpow2.f32 %v6090_v38  ;;  %v4424_v41 = vadd.f32 %v4423_v61, %v11189_v45 }
 0xad7   :  { %v4399_v60 = vpop.f32.mrf.mxu0  ;;  %v4770_v1 = vpop.f32.mrf.mxu1 }
 0xad8   :  { %v4437_v39 = vadd.f32 %v9179_v33, %v4424_v41  ;;  %v4801_v5 = vadd.f32 %v4770_v1, %v267_v56 }
 0xada   :  { %v6091_v57 = vmul.f32 -1.442695, %v4437_v39  ;;  %v6098_v34 = vmul.f32 -1.442695, %v4801_v5 }
 0xadc   :  { %v6598_v7 = vpop.eup %6597  ;;  %6599 = vpow2.f32 %v6091_v57 }
 0xadd   :  { %v4501_v4 = vadd.f32 1.0, %v6598_v7  ;;  %6601 = vpow2.f32 %v6098_v34  ;;  %v4425_v8 = vpop.f32.mrf.mxu2  ;;  %v4796_v36 = vpop.f32.mrf.mxu3 }
 0xade   :  { %v9350_v48 = vadd.f32 %v4796_v36, %v325_v9 }
 0xadf   :  { %6603 = vrcp.f32 %v4501_v4  ;;  %v4449_v61 = vpop.f32.mrf.mxu0  ;;  %v4772_v38 = vpop.f32.mrf.mxu1  ;;  %vm4509_vm14 = vweird.f32 %v4501_v4 }
 0xae0   :  { %11192 = vst [vmem:[#allocation84_spill] sm:$0xff] %v9350_v48  ;;  %v4450_v60 = vadd.f32 %v4449_v61, %v11193_v63  ;;  %v4384_v61 = vsub.f32 %v9238_v19, %v9233_v40 }
 0xae2   :  { %v6600_v33 = vpop.eup %6599  ;;  %v4463_v39 = vadd.f32 %v9184_v16, %v4450_v60 }
 0xae3   :  { %v6602_v5 = vpop.eup %6601  ;;  %v4502_v1 = vadd.f32 1.0, %v6600_v33 }
 0xae4   :  { %v4814_v56 = vadd.f32 1.0, %v6602_v5  ;;  %v6092_v41 = vmul.f32 -1.442695, %v4463_v39 }
 0xae5   :  { %v6604_v21 = vpop.eup %6603  ;;  %6605 = vrcp.f32 %v4502_v1  ;;  %v4475_v7 = vpop.f32.mrf.mxu2  ;;  %v4530_v19 = vand.u32 2147483648, %v4502_v1  ;;  %vm4524_vm2 = vweird.f32 %v4502_v1 }
 0xae6   :  { %v4798_v34 = vpop.f32.mrf.mxu3  ;;  %v4505_v57 = vmul.f32 %v6604_v21, %v4501_v4  ;;  %6607 = vrcp.f32 %v4814_v56  ;;  %v4476_v9 = vadd.f32 %v4475_v7, %v11194_v15  ;;  %vm4510_vm13 = vweird.f32 %v6604_v21 }
 0xae7   :  { %6609 = vpow2.f32 %v6092_v41  ;;  %v4451_v8 = vpop.f32.mrf.mxu0  ;;  %v4385_v34 = vmul.f32 %v4384_v61, %v9248_v51  ;;  %v4515_v41 = vand.u32 2147483648, %v4501_v4  ;;  %v4513_v15 = vand.u32 2147483647, %v4501_v4  ;;  %vm9359_vm15 = vmor %vm4509_vm14, %vm4510_vm13 }
 0xae8   :  { %v4506_v36 = vsub.f32 1.0, %v4505_v57  ;;  %v4489_v16 = vadd.f32 %v9188_v28, %v4476_v9  ;;  %v4842_v28 = vand.u32 2147483648, %v4814_v56  ;;  %vm4836_vm5 = vweird.f32 %v4814_v56 }
 0xae9   :  { %vm4514_vm3 = vcmp.eq.f32.partialorder %v4513_v15, 8.507059e+37  ;;  %v4386_v9 = vadd.f32 %v4385_v34, %v9233_v40 }
 0xaea   :  { %v4507_v38 = vmul.f32 %v6604_v21, %v4506_v36  ;;  %6611 = vtanh.f32 %v4489_v16  ;;  %v4528_v36 = vand.u32 2147483647, %v4502_v1 }
 0xaeb   :  { %v6606_v60 = vpop.eup %6605 }
 0xaec   :  { %v6608_v33 = vpop.eup %6607  ;;  %v4520_v39 = vmul.f32 %v6606_v60, %v4502_v1  ;;  %v4508_v5 = vadd.f32 %v6604_v21, %v4507_v38  ;;  %vm4525_vm0 = vweird.f32 %v6606_v60  ;;  %vm4529_vm7 = vcmp.eq.f32.partialorder %v4528_v36, 8.507059e+37 }
 0xaed   :  { %v6610_v63 = vpop.eup %6609  ;;  %v4832_v45 = vmul.f32 %v6608_v33, %v4814_v56  ;;  %v4477_v7 = vpop.f32.mrf.mxu2  ;;  %vm4837_vm1 = vweird.f32 %v6608_v33  ;;  %vm4526_vm4 = vmor %vm4524_vm2, %vm4525_vm0 }
 0xaee   :  { %v4521_v8 = vsub.f32 1.0, %v4520_v39  ;;  %v4503_v57 = vadd.f32 1.0, %v6610_v63  ;;  %v4512_v61 = vsel %vm9359_vm15, %v6604_v21, %v4508_v5  ;;  %v4840_v39 = vand.u32 2147483647, %v4814_v56  ;;  %vm4838_vm6 = vmor %vm4836_vm5, %vm4837_vm1 }
 0xaef   :  { %v4833_v0 = vsub.f32 1.0, %v4832_v45  ;;  %v4516_v63 = vor.u32 1.1754944e-38, %v4515_v41  ;;  %v4531_v7 = vor.u32 1.1754944e-38, %v4530_v19 }
 0xaf0   :  { %v4522_v38 = vmul.f32 %v6606_v60, %v4521_v8  ;;  %6613 = vrcp.f32 %v4503_v57  ;;  %v6612_v45 = vpop.eup %6611  ;;  %v4843_v8 = vor.u32 1.1754944e-38, %v4842_v28  ;;  %vm4841_vm8 = vcmp.eq.f32.partialorder %v4840_v39, 8.507059e+37 }
 0xaf1   :  { %v4834_v16 = vmul.f32 %v6608_v33, %v4833_v0  ;;  %v4517_v58 = vsel %vm4514_vm3, %v4516_v63, %v4512_v61  ;;  %v4545_v61 = vand.u32 2147483648, %v4503_v57  ;;  %v4543_v40 = vand.u32 2147483647, %v4503_v57 }
 0xaf2   :  { %v4523_v4 = vadd.f32 %v6606_v60, %v4522_v38  ;;  %v4551_v15 = vmul.f32 %v6612_v45, %v4517_v58  ;;  %vm4539_vm10 = vweird.f32 %v4503_v57 }
 0xaf3   :  { %v4835_v11 = vadd.f32 %v6608_v33, %v4834_v16  ;;  %vm4544_vm12 = vcmp.eq.f32.partialorder %v4543_v40, 8.507059e+37  ;;  %v11240_v40 = vld [vmem:[#allocation165_spill] sm:$0xff] }
 0xaf4   :  { %v4527_v48 = vsel %vm4526_vm4, %v6606_v60, %v4523_v4 }
 0xaf5   :  { %v4839_v21 = vsel %vm4838_vm6, %v6608_v33, %v4835_v11  ;;  %v4532_v0 = vsel %vm4529_vm7, %v4531_v7, %v4527_v48  ;;  %v4546_v33 = vor.u32 1.1754944e-38, %v4545_v61  ;;  %v11237_v61 = vld [vmem:[#allocation162_spill] sm:$0xff] }
 0xaf6   :  { %v6614_v5 = vpop.eup %6613  ;;  %v4844_v41 = vsel %vm4841_vm8, %v4843_v8, %v4839_v21  ;;  %v4550_v1 = vmul.f32 %v4532_v0, %v9083_v44  ;;  %v11226_v8 = vld [vmem:[#allocation133_spill] sm:$0xff]  ;;  %v11228_v21 = vld [vmem:[#allocation155_spill] sm:$0xff]  ;;  %v11229_v0 = vld [vmem:[#allocation136_spill] sm:$0xff] }
 0xaf7   :  { %v9367_v38 = vmul.f32 %v4844_v41, %v4386_v9  ;;  %v4535_v19 = vmul.f32 %v6614_v5, %v4503_v57  ;;  %vm4540_vm9 = vweird.f32 %v6614_v5  ;;  %v11227_v9 = vld [vmem:[#allocation154_spill] sm:$0xff] }
 0xaf8   :  { %v4552_v16 = vadd.f32 %v4551_v15, %v4550_v1  ;;  %vm4541_vm11 = vmor %vm4539_vm10, %vm4540_vm9  ;;  %v11231_v41 = vld [vmem:[#allocation158_spill] sm:$0xff]  ;;  %v11232_v1 = vld [vmem:[#allocation159_spill] sm:$0xff] }
 0xaf9   :  { %v4536_v56 = vsub.f32 1.0, %v4535_v19  ;;  %v11233_v15 = vld [vmem:[#allocation160_spill] sm:$0xff]  ;;  %v11234_v19 = vld [vmem:[#allocation161_spill] sm:$0xff] }
 0xafa   :  { %6615 = vtanh.f32 %v4552_v16  ;;  %v4558_v60 = vsub.f32 %v4552_v16, %v9083_v44  ;;  %v11235_v16 = vld [vmem:[#allocation143_spill] sm:$0xff] }
 0xafb   :  { %v4537_v28 = vmul.f32 %v6614_v5, %v4536_v56  ;;  %v11236_v56 = vld [vmem:[#allocation145_spill] sm:$0xff] }
 0xafc   :  { %v4559_v11 = vmul.f32 %v4558_v60, %v9248_v51  ;;  %v11238_v60 = vld [vmem:[#allocation163_spill] sm:$0xff] }
 0xafd   :  { %v4538_v48 = vadd.f32 %v6614_v5, %v4537_v28  ;;  %v11239_v28 = vld [vmem:[#allocation164_spill] sm:$0xff] }
 0xafe   :  { %v9372_v58 = vadd.f32 %v4559_v11, %v9083_v44  ;;  %v11221_v44 = vld [vmem:[#allocation124_spill] sm:$0xff]  ;;  %v11241_v11 = vld [vmem:[#allocation166_spill] sm:$0xff] }
 0xaff   :  { %v4542_v34 = vsel %vm4541_vm11, %v6614_v5, %v4538_v48  ;;  %v11230_v5 = vld [vmem:[#allocation137_spill] sm:$0xff]  ;;  %v11242_v48 = vld [vmem:[#allocation167_spill] sm:$0xff] }
 0xb00   :  { %v6616_v36 = vpop.eup %6615  ;;  %v4547_v39 = vsel %vm4544_vm12, %v4546_v33, %v4542_v34  ;;  %v11243_v33 = vld [vmem:[#allocation168_spill] sm:$0xff]  ;;  %v11244_v34 = vld [vmem:[#allocation169_spill] sm:$0xff] }
 0xb01   :  { %v4554_v63 = vmul.f32 %v6616_v36, %v4547_v39  ;;  %v11245_v36 = vld [vmem:[#allocation170_spill] sm:$0xff]  ;;  %v11246_v39 = vld [vmem:[#allocation171_spill] sm:$0xff] }
 0xb03   :  { %v4555_v4 = vsub.f32 %v4554_v63, %v9088_v2  ;;  %v11247_v63 = vld [vmem:[#allocation172_spill] sm:$0xff] }
 0xb05   :  { %v4556_v45 = vmul.f32 %v4555_v4, %v9248_v51  ;;  %v11248_v4 = vld [vmem:[#allocation173_spill] sm:$0xff] }
 0xb07   :  { %v9377_v7 = vadd.f32 %v4556_v45, %v9088_v2  ;;  %v11222_v2 = vld [vmem:[#allocation125_spill] sm:$0xff]  ;;  %v11249_v45 = vld [vmem:[#allocation174_spill] sm:$0xff] }
 0xb09   :  { %v4561_v57 = vpack.c.bf16 %v9377_v7, %v9377_v7 }
 0xb0b   :  { %4571 = vmatmul.bf16.vlgmr.msra.gmra.mxu0 %v4561_v57  ;;  %4597 = vmatmul.bf16.vlgmr.msra.gmra.mxu2 %v4561_v57 }
 0xb0c   :  { %4892 = vmatmul.bf16.vlgmr.msrb.gmra.mxu1 %v4561_v57  ;;  %4918 = vmatmul.bf16.vlgmr.msrb.gmra.mxu3 %v4561_v57 }
 0xb0d   :  { %4748 = vmatpush.bf16.msra.mxu0 %v10281_v23  ;;  %4774 = vmatpush.bf16.msra.mxu2 %v10282_v26  ;;  %v11197_v23 = vld [vmem:[#allocation96_spill] sm:$0xff]  ;;  %v11198_v26 = vld [vmem:[#allocation99_spill] sm:$0xff] }
 0xb0e   :  { %5056 = vmatpush.bf16.msrb.mxu1 %v10283_v22  ;;  %5082 = vmatpush.bf16.msrb.mxu3 %v10284_v37  ;;  %v11199_v22 = vld [vmem:[#allocation43_spill] sm:$0xff]  ;;  %v11200_v37 = vld [vmem:[#allocation46_spill] sm:$0xff] }
 0xb11   :  { %4749 = vmatpush.bf16.msra.mxu0 %v10285_v62  ;;  %4775 = vmatpush.bf16.msra.mxu2 %v10286_v53  ;;  %v11201_v62 = vld [vmem:[#allocation122_spill] sm:$0xff]  ;;  %v11202_v53 = vld [vmem:[#allocation123_spill] sm:$0xff] }
 0xb12   :  { %5057 = vmatpush.bf16.msrb.mxu1 %v10287_v18  ;;  %5083 = vmatpush.bf16.msrb.mxu3 %v10288_v13  ;;  %v11203_v18 = vld [vmem:[#allocation102_spill] sm:$0xff]  ;;  %v11204_v13 = vld [vmem:[#allocation103_spill] sm:$0xff] }
 0xb15   :  { %4750 = vmatpush.bf16.msra.mxu0 %v10289_v35  ;;  %4776 = vmatpush.bf16.msra.mxu2 %v10290_v29  ;;  %v11205_v35 = vld [vmem:[#allocation104_spill] sm:$0xff]  ;;  %v11206_v29 = vld [vmem:[#allocation105_spill] sm:$0xff] }
 0xb16   :  { %5058 = vmatpush.bf16.msrb.mxu1 %v10291_v50  ;;  %5084 = vmatpush.bf16.msrb.mxu3 %v10429_v27  ;;  %v11207_v50 = vld [vmem:[#allocation128_spill] sm:$0xff]  ;;  %v11208_v27 = vld [vmem:[#allocation131_spill] sm:$0xff] }
 0xb19   :  { %4751 = vmatpush.bf16.msra.mxu0 %v10430_v6  ;;  %4777 = vmatpush.bf16.msra.mxu2 %v10431_v59  ;;  %v11209_v6 = vld [vmem:[#allocation110_spill] sm:$0xff]  ;;  %v11210_v59 = vld [vmem:[#allocation113_spill] sm:$0xff] }
 0xb1a   :  { %5059 = vmatpush.bf16.msrb.mxu1 %v10432_v25  ;;  %5085 = vmatpush.bf16.msrb.mxu3 %v10435_v31  ;;  %v11211_v25 = vld [vmem:[#allocation134_spill] sm:$0xff]  ;;  %v11214_v31 = vld [vmem:[#allocation115_spill] sm:$0xff] }
 0xb1b   :  { %4623 = vmatmul.bf16.vlgmr.msrb.gmra.mxu0 %v4561_v57  ;;  %4649 = vmatmul.bf16.vlgmr.msrb.gmra.mxu2 %v4561_v57 }
 0xb1c   :  { %4944 = vmatmul.bf16.vlgmr.msra.gmra.mxu1 %v4561_v57  ;;  %4970 = vmatmul.bf16.vlgmr.msra.gmra.mxu3 %v4561_v57  ;;  %v11250_v57 = vld [vmem:[#allocation175_spill] sm:$0xff] }
 0xb1d   :  { %4752 = vmatpush.bf16.msra.mxu0 %v10433_v24  ;;  %4778 = vmatpush.bf16.msra.mxu2 %v10434_v43  ;;  %v11212_v24 = vld [vmem:[#allocation135_spill] sm:$0xff]  ;;  %v11213_v43 = vld [vmem:[#allocation114_spill] sm:$0xff] }
 0xb1e   :  { %5060 = vmatpush.bf16.msrb.mxu1 %v10436_v42  ;;  %5086 = vmatpush.bf16.msrb.mxu3 %v10735_v32  ;;  %v11215_v42 = vld [vmem:[#allocation140_spill] sm:$0xff] }
 0xb1f   :  { %v11218_v32 = vld [vmem:[#allocation120_spill] sm:$0xff] }
 0xb21   :  { %4753 = vmatpush.bf16.msra.mxu0 %v10581_v30  ;;  %4779 = vmatpush.bf16.msra.mxu2 %v10582_v3  ;;  %v11216_v30 = vld [vmem:[#allocation142_spill] sm:$0xff] }
 0xb22   :  { %5061 = vmatpush.bf16.msrb.mxu1 %v10736_v46  ;;  %5087 = vmatpush.bf16.msrb.mxu3 %v10888_v10  ;;  %v11217_v3 = vld [vmem:[#allocation118_spill] sm:$0xff]  ;;  %v11220_v10 = vld [vmem:[#allocation147_spill] sm:$0xff] }
 0xb23   :  { %v11219_v46 = vld [vmem:[#allocation146_spill] sm:$0xff] }
 0xb25   :  { %4754 = vmatpush.bf16.msra.mxu0 %v11041_v54  ;;  %4780 = vmatpush.bf16.msra.mxu2 %v11042_v49  ;;  %v11223_v54 = vld [vmem:[#allocation150_spill] sm:$0xff]  ;;  %v11224_v49 = vld [vmem:[#allocation153_spill] sm:$0xff] }
 0xb26   :  { %5062 = vmatpush.bf16.msrb.mxu1 %v11197_v23  ;;  %5088 = vmatpush.bf16.msrb.mxu3 %v11198_v26  ;;  %v11251_v26 = vld [vmem:[#allocation16_spill] sm:$0xff] }
 0xb29   :  { %4755 = vmatpush.bf16.msra.mxu0 %v11199_v22  ;;  %4781 = vmatpush.bf16.msra.mxu2 %v11200_v37 }
 0xb2a   :  { %5063 = vmatpush.bf16.msrb.mxu1 %v11203_v18  ;;  %5089 = vmatpush.bf16.msrb.mxu3 %v11204_v13  ;;  %v11252_v13 = vld [vmem:[#allocation18_spill] sm:$0xff] }
 0xb2c   :  { %4756 = vmatmul.bf16.vlgmr.msra.gmra.mxu0 %v9258_v12  ;;  %4782 = vmatmul.bf16.vlgmr.msra.gmra.mxu2 %v9258_v12  ;;  %v11225_v12 = vld [vmem:[#allocation132_spill] sm:$0xff] }
 0xb2d   :  { %4871 = vmatpush.bf16.msrb.mxu0 %v11201_v62  ;;  %4897 = vmatpush.bf16.msrb.mxu2 %v11202_v53 }
 0xb2e   :  { %5108 = vmatpush.bf16.msra.mxu1 %v11205_v35  ;;  %5134 = vmatpush.bf16.msra.mxu3 %v11206_v29 }
 0xb31   :  { %4872 = vmatpush.bf16.msrb.mxu0 %v11207_v50  ;;  %4898 = vmatpush.bf16.msrb.mxu2 %v11208_v27 }
 0xb32   :  { %5109 = vmatpush.bf16.msra.mxu1 %v11209_v6  ;;  %5135 = vmatpush.bf16.msra.mxu3 %v11210_v59 }
 0xb35   :  { %4873 = vmatpush.bf16.msrb.mxu0 %v11211_v25  ;;  %4899 = vmatpush.bf16.msrb.mxu2 %v11212_v24 }
 0xb36   :  { %5110 = vmatpush.bf16.msra.mxu1 %v11213_v43  ;;  %5136 = vmatpush.bf16.msra.mxu3 %v11214_v31 }
 0xb39   :  { %4874 = vmatpush.bf16.msrb.mxu0 %v11215_v42  ;;  %4900 = vmatpush.bf16.msrb.mxu2 %v11216_v30 }
 0xb3a   :  { %5111 = vmatpush.bf16.msra.mxu1 %v11217_v3  ;;  %5137 = vmatpush.bf16.msra.mxu3 %v11218_v32 }
 0xb3d   :  { %4875 = vmatpush.bf16.msrb.mxu0 %v11219_v46  ;;  %4901 = vmatpush.bf16.msrb.mxu2 %v11220_v10 }
 0xb3e   :  { %5112 = vmatpush.bf16.msra.mxu1 %v11221_v44  ;;  %5138 = vmatpush.bf16.msra.mxu3 %v11222_v2 }
 0xb41   :  { %4876 = vmatpush.bf16.msrb.mxu0 %v11223_v54  ;;  %4902 = vmatpush.bf16.msrb.mxu2 %v11224_v49  ;;  %v11254_v49 = vld [vmem:[#allocation81_spill] sm:$0xff] }
 0xb42   :  { %5113 = vmatpush.bf16.msra.mxu1 %v11225_v12  ;;  %5139 = vmatpush.bf16.msra.mxu3 %v11226_v8 }
 0xb45   :  { %4877 = vmatpush.bf16.msrb.mxu0 %v11227_v9  ;;  %4903 = vmatpush.bf16.msrb.mxu2 %v11228_v21 }
 0xb46   :  { %5114 = vmatpush.bf16.msra.mxu1 %v11229_v0  ;;  %5140 = vmatpush.bf16.msra.mxu3 %v11230_v5 }
 0xb49   :  { %4878 = vmatpush.bf16.msrb.mxu0 %v11231_v41  ;;  %4904 = vmatpush.bf16.msrb.mxu2 %v11232_v1 }
 0xb4a   :  { %5115 = vmatpush.bf16.msra.mxu1 %v11235_v16  ;;  %5141 = vmatpush.bf16.msra.mxu3 %v11236_v56 }
 0xb4d   :  { %4923 = vmatpush.bf16.msra.mxu0 %v11233_v15  ;;  %4949 = vmatpush.bf16.msra.mxu2 %v11234_v19 }
 0xb51   :  { %4924 = vmatpush.bf16.msra.mxu0 %v11237_v61  ;;  %4950 = vmatpush.bf16.msra.mxu2 %v11238_v60 }
 0xb55   :  { %4925 = vmatpush.bf16.msra.mxu0 %v11239_v28  ;;  %4951 = vmatpush.bf16.msra.mxu2 %v11240_v40 }
 0xb59   :  { %4926 = vmatpush.bf16.msra.mxu0 %v11241_v11  ;;  %4952 = vmatpush.bf16.msra.mxu2 %v11242_v48  ;;  %v11255_v11 = vld [vmem:[#allocation94_spill] sm:$0xff]  ;;  %v11256_v48 = vld [vmem:[#allocation149_spill] sm:$0xff] }
 0xb5d   :  { %4927 = vmatpush.bf16.msra.mxu0 %v11243_v33  ;;  %4953 = vmatpush.bf16.msra.mxu2 %v11244_v34  ;;  %v238_v33 = vadd.f32 %v11256_v48, %v11255_v11 }
 0xb61   :  { %4928 = vmatpush.bf16.msra.mxu0 %v11245_v36  ;;  %4954 = vmatpush.bf16.msra.mxu2 %v11246_v39 }
 0xb65   :  { %4929 = vmatpush.bf16.msra.mxu0 %v11247_v63  ;;  %4955 = vmatpush.bf16.msra.mxu2 %v11248_v4 }
 0xb69   :  { %4930 = vmatpush.bf16.msra.mxu0 %v11249_v45  ;;  %4956 = vmatpush.bf16.msra.mxu2 %v11250_v57 }
 0xb88   :  { %v4572_v23 = vpop.f32.mrf.mxu0 }
 0xb89   :  { %v4573_v22 = vadd.f32 %v4572_v23, %v11251_v26  ;;  %v9464_v37 = vpop.f32.mrf.mxu1 }
 0xb8b   :  { %v4586_v62 = vadd.f32 %v9334_v17, %v4573_v22  ;;  %v11253_v17 = vld [vmem:[#allocation80_spill] sm:$0xff] }
 0xb8d   :  { %v6093_v53 = vmul.f32 -1.442695, %v4586_v62 }
 0xb8e   :  { %v4598_v18 = vpop.f32.mrf.mxu2 }
 0xb8f   :  { %6617 = vpow2.f32 %v6093_v53  ;;  %v4599_v35 = vadd.f32 %v4598_v18, %v11252_v13  ;;  %v9468_v29 = vpop.f32.mrf.mxu3 }
 0xb90   :  { %v4574_v50 = vpop.f32.mrf.mxu0 }
 0xb91   :  { %v4612_v27 = vadd.f32 %v9336_v14, %v4599_v35  ;;  %v4895_v6 = vpop.f32.mrf.mxu1  ;;  %v11257_v50 = vld [vmem:[#allocation106_spill] sm:$0xff] }
 0xb93   :  { %v6094_v59 = vmul.f32 -1.442695, %v4612_v27  ;;  %v11258_v27 = vld [vmem:[#allocation156_spill] sm:$0xff] }
 0xb94   :  { %v296_v6 = vadd.f32 %v11258_v27, %v11257_v50 }
 0xb95   :  { %v6618_v25 = vpop.eup %6617  ;;  %6619 = vpow2.f32 %v6094_v59 }
 0xb96   :  { %v4676_v24 = vadd.f32 1.0, %v6618_v25  ;;  %v4600_v43 = vpop.f32.mrf.mxu2 }
 0xb97   :  { %v4921_v31 = vpop.f32.mrf.mxu3 }
 0xb98   :  { %6621 = vrcp.f32 %v4676_v24  ;;  %v4624_v42 = vpop.f32.mrf.mxu0  ;;  %v4690_v56 = vand.u32 2147483648, %v4676_v24  ;;  %vm4684_vm14 = vweird.f32 %v4676_v24  ;;  %v4688_v28 = vand.u32 2147483647, %v4676_v24 }
 0xb99   :  { %v4625_v30 = vadd.f32 %v4624_v42, %v11253_v17  ;;  %v9472_v3 = vpop.f32.mrf.mxu1 }
 0xb9a   :  { %v4691_v4 = vor.u32 1.1754944e-38, %v4690_v56  ;;  %vm4689_vm2 = vcmp.eq.f32.partialorder %v4688_v28, 8.507059e+37 }
 0xb9b   :  { %v6620_v32 = vpop.eup %6619  ;;  %v4638_v46 = vadd.f32 %v9338_v20, %v4625_v30 }
 0xb9c   :  { %v4677_v10 = vadd.f32 1.0, %v6620_v32 }
 0xb9d   :  { %v6095_v44 = vmul.f32 -1.442695, %v4638_v46 }
 0xb9e   :  { %v6622_v2 = vpop.eup %6621  ;;  %6623 = vrcp.f32 %v4677_v10  ;;  %v4650_v14 = vpop.f32.mrf.mxu2  ;;  %v4705_v34 = vand.u32 2147483648, %v4677_v10  ;;  %v4703_v39 = vand.u32 2147483647, %v4677_v10  ;;  %vm4699_vm1 = vweird.f32 %v4677_v10 }
 0xb9f   :  { %v4680_v54 = vmul.f32 %v6622_v2, %v4676_v24  ;;  %6625 = vpow2.f32 %v6095_v44  ;;  %v4651_v12 = vadd.f32 %v4650_v14, %v11254_v49  ;;  %v9476_v8 = vpop.f32.mrf.mxu3  ;;  %vm4685_vm13 = vweird.f32 %v6622_v2 }
 0xba0   :  { %v4626_v9 = vpop.f32.mrf.mxu0  ;;  %vm4686_vm15 = vmor %vm4684_vm14, %vm4685_vm13  ;;  %v4706_v22 = vor.u32 1.1754944e-38, %v4705_v34  ;;  %vm4704_vm4 = vcmp.eq.f32.partialorder %v4703_v39, 8.507059e+37  ;;  %v11259_v34 = vld [vmem:[#allocation84_spill] sm:$0xff] }
 0xba1   :  { %v4681_v21 = vsub.f32 1.0, %v4680_v54  ;;  %v4947_v0 = vpop.f32.mrf.mxu1  ;;  %v4664_v5 = vadd.f32 %v9340_v47, %v4651_v12 }
 0xba3   :  { %v4682_v41 = vmul.f32 %v6622_v2, %v4681_v21  ;;  %6627 = vtanh.f32 %v4664_v5 }
 0xba4   :  { %v6624_v1 = vpop.eup %6623 }
 0xba5   :  { %v6626_v15 = vpop.eup %6625  ;;  %v4695_v20 = vmul.f32 %v6624_v1, %v4677_v10  ;;  %v4683_v19 = vadd.f32 %v6622_v2, %v4682_v41  ;;  %vm4700_vm0 = vweird.f32 %v6624_v1 }
 0xba6   :  { %v4678_v16 = vadd.f32 1.0, %v6626_v15  ;;  %v4652_v61 = vpop.f32.mrf.mxu2  ;;  %vm4701_vm3 = vmor %vm4699_vm1, %vm4700_vm0 }
 0xba7   :  { %v4696_v60 = vsub.f32 1.0, %v4695_v20  ;;  %v4973_v40 = vpop.f32.mrf.mxu3  ;;  %v4687_v36 = vsel %vm4686_vm15, %v6622_v2, %v4683_v19 }
 0xba8   :  { %6629 = vrcp.f32 %v4678_v16  ;;  %v4692_v62 = vsel %vm4689_vm2, %v4691_v4, %v4687_v36  ;;  %v4718_v10 = vand.u32 2147483647, %v4678_v16  ;;  %v4720_v44 = vand.u32 2147483648, %v4678_v16 }
 0xba9   :  { %v4697_v47 = vmul.f32 %v6624_v1, %v4696_v60  ;;  %v4757_v63 = vpop.f32.mrf.mxu0  ;;  %v6628_v23 = vpop.eup %6627  ;;  %vm4714_vm6 = vweird.f32 %v4678_v16 }
 0xbaa   :  { %v4800_v45 = vadd.f32 %v4757_v63, %v238_v33  ;;  %v4726_v43 = vmul.f32 %v6628_v23, %v4692_v62  ;;  %v4721_v5 = vor.u32 1.1754944e-38, %v4720_v44  ;;  %vm4719_vm8 = vcmp.eq.f32.partialorder %v4718_v10, 8.507059e+37  ;;  %v11261_v10 = vld [vmem:[#allocation176_spill] sm:$0xff]  ;;  %v11262_v44 = vld [vmem:[#allocation177_spill] sm:$0xff] }
 0xbab   :  { %v4698_v57 = vadd.f32 %v6624_v1, %v4697_v47 }
 0xbac   :  { %v6097_v53 = vmul.f32 -1.442695, %v4800_v45 }
 0xbad   :  { %v4702_v18 = vsel %vm4701_vm3, %v6624_v1, %v4698_v57 }
 0xbae   :  { %v6630_v35 = vpop.eup %6629  ;;  %v4707_v59 = vsel %vm4704_vm4, %v4706_v22, %v4702_v18  ;;  %6631 = vpow2.f32 %v6097_v53 }
 0xbaf   :  { %v4710_v25 = vmul.f32 %v6630_v35, %v4678_v16  ;;  %v4725_v24 = vmul.f32 %v4707_v59, %v9204_v55  ;;  %v4783_v31 = vpop.f32.mrf.mxu2  ;;  %vm4715_vm5 = vweird.f32 %v6630_v35 }
 0xbb0   :  { %v4802_v42 = vadd.f32 %v4783_v31, %v296_v6  ;;  %vm4716_vm7 = vmor %vm4714_vm6, %vm4715_vm5  ;;  %v11260_v31 = vld [vmem:[#allocation26_spill] sm:$0xff] }
 0xbb1   :  { %v4711_v30 = vsub.f32 1.0, %v4710_v25  ;;  %v4727_v32 = vadd.f32 %v4726_v43, %v4725_v24  ;;  %v4759_v46 = vpop.f32.mrf.mxu0 }
 0xbb2   :  { %v6099_v2 = vmul.f32 -1.442695, %v4802_v42 }
 0xbb3   :  { %v4712_v14 = vmul.f32 %v6630_v35, %v4711_v30  ;;  %6633 = vtanh.f32 %v4727_v32  ;;  %v4733_v54 = vsub.f32 %v4727_v32, %v9204_v55  ;;  %v9499_v30 = vpop.permute.xlu1 %4741 }
 0xbb4   :  { %v6632_v12 = vpop.eup %6631  ;;  %6635 = vpow2.f32 %v6099_v2  ;;  %v11263_v2 = vld [vmem:[#allocation178_spill] sm:$0xff] }
 0xbb5   :  { %v4713_v9 = vadd.f32 %v6630_v35, %v4712_v14  ;;  %v4734_v21 = vmul.f32 %v4733_v54, %v9248_v51  ;;  %v4813_v0 = vadd.f32 1.0, %v6632_v12  ;;  %v11264_v14 = vld [vmem:[#allocation179_spill] sm:$0xff]  ;;  %v11265_v54 = vld [vmem:[#allocation180_spill] sm:$0xff]  ;;  %v11266_v12 = vld [vmem:[#allocation181_spill] sm:$0xff] }
 0xbb7   :  { %v4717_v41 = vsel %vm4716_vm7, %v6630_v35, %v4713_v9  ;;  %6637 = vrcp.f32 %v4813_v0  ;;  %v4785_v1 = vpop.f32.mrf.mxu2  ;;  %v9487_v20 = vadd.f32 %v4734_v21, %v9204_v55  ;;  %v4827_v47 = vand.u32 2147483648, %v4813_v0  ;;  %v11267_v9 = vld [vmem:[#allocation182_spill] sm:$0xff]  ;;  %v11268_v21 = vld [vmem:[#allocation183_spill] sm:$0xff] }
 0xbb8   :  { %v4722_v15 = vsel %vm4719_vm8, %v4721_v5, %v4717_v41  ;;  %v4825_v36 = vand.u32 2147483647, %v4813_v0  ;;  %vm4821_vm10 = vweird.f32 %v4813_v0  ;;  %v11270_v5 = vld [vmem:[#allocation185_spill] sm:$0xff]  ;;  %v11271_v41 = vld [vmem:[#allocation186_spill] sm:$0xff]  ;;  %v11272_v1 = vld [vmem:[#allocation187_spill] sm:$0xff] }
 0xbb9   :  { %v6634_v19 = vpop.eup %6633 }
 0xbba   :  { %v6636_v56 = vpop.eup %6635  ;;  %v4729_v61 = vmul.f32 %v6634_v19, %v4722_v15  ;;  %vm4826_vm12 = vcmp.eq.f32.partialorder %v4825_v36, 8.507059e+37  ;;  %v11273_v15 = vld [vmem:[#allocation188_spill] sm:$0xff]  ;;  %v11274_v19 = vld [vmem:[#allocation189_spill] sm:$0xff]  ;;  %v11286_v36 = vld [vmem:[#allocation202_spill] sm:$0xff] }
 0xbbb   :  { %v4815_v60 = vadd.f32 1.0, %v6636_v56  ;;  %v11275_v56 = vld [vmem:[#allocation190_spill] sm:$0xff] }
 0xbbc   :  { %v4730_v28 = vsub.f32 %v4729_v61, %v9221_v52  ;;  %v11276_v61 = vld [vmem:[#allocation191_spill] sm:$0xff] }
 0xbbd   :  { %v6638_v16 = vpop.eup %6637  ;;  %6639 = vrcp.f32 %v4815_v60  ;;  %v4857_v50 = vand.u32 2147483648, %v4815_v60  ;;  %vm4851_vm14 = vweird.f32 %v4815_v60  ;;  %v4855_v27 = vand.u32 2147483647, %v4815_v60 }
 0xbbe   :  { %v4817_v40 = vmul.f32 %v6638_v16, %v4813_v0  ;;  %v4731_v11 = vmul.f32 %v4730_v28, %v9248_v51  ;;  %6641 = vtanh.f32 %v11259_v34  ;;  %vm4822_vm9 = vweird.f32 %v6638_v16  ;;  %v11269_v0 = vld [vmem:[#allocation184_spill] sm:$0xff]  ;;  %v11278_v28 = vld [vmem:[#allocation194_spill] sm:$0xff] }
 0xbbf   :  { %vm4823_vm11 = vmor %vm4821_vm10, %vm4822_vm9  ;;  %v4828_v51 = vor.u32 1.1754944e-38, %v4827_v47  ;;  %v4858_v59 = vor.u32 1.1754944e-38, %v4857_v50  ;;  %vm4856_vm0 = vcmp.eq.f32.partialorder %v4855_v27, 8.507059e+37  ;;  %v11283_v34 = vld [vmem:[#allocation98_spill] sm:$0xff]  ;;  %v11284_v47 = vld [vmem:[#allocation199_spill] sm:$0xff] }
 0xbc0   :  { %v4818_v48 = vsub.f32 1.0, %v4817_v40  ;;  %v9492_v33 = vadd.f32 %v4731_v11, %v9221_v52  ;;  %v11280_v40 = vld [vmem:[#allocation195_spill] sm:$0xff]  ;;  %v11281_v11 = vld [vmem:[#allocation197_spill] sm:$0xff] }
 0xbc1   :  { %v11293_v27 = vld [vmem:[#allocation193_spill] sm:$0xff] }
 0xbc2   :  { %v4819_v55 = vmul.f32 %v6638_v16, %v4818_v48  ;;  %v5042_v39 = vpack.c.bf16 %v9492_v33, %v9492_v33  ;;  %v11282_v48 = vld [vmem:[#allocation198_spill] sm:$0xff] }
 0xbc3   :  { %v6640_v63 = vpop.eup %6639 }
 0xbc4   :  { %v4820_v4 = vadd.f32 %v6638_v16, %v4819_v55  ;;  %v4847_v45 = vmul.f32 %v6640_v63, %v4815_v60  ;;  %5064 = vmatmul.bf16.vlgmr.msrb.gmra.mxu1 %v5042_v39  ;;  %5090 = vmatmul.bf16.vlgmr.msrb.gmra.mxu3 %v5042_v39  ;;  %v6642_v23 = vpop.eup %6641  ;;  %vm4852_vm13 = vweird.f32 %v6640_v63  ;;  %v11277_v60 = vld [vmem:[#allocation192_spill] sm:$0xff] }
 0xbc5   :  { %vm4853_vm15 = vmor %vm4851_vm14, %vm4852_vm13  ;;  %v11285_v55 = vld [vmem:[#allocation200_spill] sm:$0xff] }
 0xbc6   :  { %v4824_v57 = vsel %vm4823_vm11, %v6638_v16, %v4820_v4  ;;  %v4848_v52 = vsub.f32 1.0, %v4847_v45  ;;  %v11279_v16 = vld [vmem:[#allocation91_spill] sm:$0xff]  ;;  %v11289_v4 = vld [vmem:[#allocation206_spill] sm:$0xff] }
 0xbc7   :  { %v4829_v22 = vsel %vm4826_vm12, %v4828_v51, %v4824_v57  ;;  %v11290_v45 = vld [vmem:[#allocation207_spill] sm:$0xff]  ;;  %v11291_v51 = vld [vmem:[#allocation208_spill] sm:$0xff]  ;;  %v11292_v57 = vld [vmem:[#allocation209_spill] sm:$0xff] }
 0xbc8   :  { %v4863_v62 = vmul.f32 %v6642_v23, %v4829_v22  ;;  %v4849_v53 = vmul.f32 %v6640_v63, %v4848_v52 }
 0xbca   :  { %v4864_v18 = vadd.f32 %v4863_v62, %v9367_v38  ;;  %v4850_v35 = vadd.f32 %v6640_v63, %v4849_v53 }
 0xbcc   :  { %6643 = vtanh.f32 %v4864_v18  ;;  %v4854_v6 = vsel %vm4853_vm15, %v6640_v63, %v4850_v35  ;;  %v11288_v63 = vld [vmem:[#allocation205_spill] sm:$0xff] }
 0xbcd   :  { %v4859_v24 = vsel %vm4856_vm0, %v4858_v59, %v4854_v6 }
 0xbd2   :  { %v6644_v25 = vpop.eup %6643 }
 0xbd3   :  { %v4866_v43 = vmul.f32 %v6644_v25, %v4859_v24 }
 0xbd4   :  { %5116 = vmatmul.bf16.vlgmr.msra.gmra.mxu1 %v5042_v39  ;;  %5142 = vmatmul.bf16.vlgmr.msra.gmra.mxu3 %v5042_v39  ;;  %v11287_v39 = vld [vmem:[#allocation203_spill] sm:$0xff] }
 0xbd5   :  { %v4867_v42 = vsub.f32 %v4866_v43, %v11260_v31 }
 0xbd7   :  { %v4868_v38 = vmul.f32 %v4867_v42, %v9499_v30 }
 0xbd9   :  { %v4869_v32 = vadd.f32 %v4868_v38, %v11260_v31  ;;  %v11294_v31 = vld [vmem:[#allocation196_spill] sm:$0xff] }
 0xbdb   :  { %v4870_v46 = vpack.c.bf16 %v4869_v32, %v4869_v32 }
 0xbdd   :  { %4879 = vmatmul.bf16.vlgmr.msrb.gmra.mxu0 %v4870_v46  ;;  %4905 = vmatmul.bf16.vlgmr.msrb.gmra.mxu2 %v4870_v46 }
 0xbde   :  { %5043 = vmatpush.bf16.msrb.mxu0 %v11261_v10  ;;  %5069 = vmatpush.bf16.msrb.mxu2 %v11262_v44 }
 0xbe2   :  { %5044 = vmatpush.bf16.msrb.mxu0 %v11263_v2  ;;  %5070 = vmatpush.bf16.msrb.mxu2 %v11264_v14 }
 0xbe6   :  { %5045 = vmatpush.bf16.msrb.mxu0 %v11265_v54  ;;  %5071 = vmatpush.bf16.msrb.mxu2 %v11266_v12  ;;  %v11295_v54 = vld [vmem:[#allocation201_spill] sm:$0xff] }
 0xbea   :  { %5046 = vmatpush.bf16.msrb.mxu0 %v11267_v9  ;;  %5072 = vmatpush.bf16.msrb.mxu2 %v11268_v21 }
 0xbed   :  { %4931 = vmatmul.bf16.vlgmr.msra.gmra.mxu0 %v4870_v46  ;;  %4957 = vmatmul.bf16.vlgmr.msra.gmra.mxu2 %v4870_v46 }
 0xbee   :  { %5047 = vmatpush.bf16.msrb.mxu0 %v11269_v0  ;;  %5073 = vmatpush.bf16.msrb.mxu2 %v11270_v5 }
 0xbf2   :  { %5048 = vmatpush.bf16.msrb.mxu0 %v11271_v41  ;;  %5074 = vmatpush.bf16.msrb.mxu2 %v11272_v1 }
 0xbf6   :  { %5049 = vmatpush.bf16.msrb.mxu0 %v11273_v15  ;;  %5075 = vmatpush.bf16.msrb.mxu2 %v11274_v19 }
 0xbfa   :  { %5050 = vmatpush.bf16.msrb.mxu0 %v11275_v56  ;;  %5076 = vmatpush.bf16.msrb.mxu2 %v11276_v61 }
 0xbfe   :  { %5095 = vmatpush.bf16.msra.mxu0 %v11277_v60  ;;  %5121 = vmatpush.bf16.msra.mxu2 %v11278_v28 }
 0xc02   :  { %5096 = vmatpush.bf16.msra.mxu0 %v11279_v16  ;;  %5122 = vmatpush.bf16.msra.mxu2 %v11280_v40 }
 0xc06   :  { %5097 = vmatpush.bf16.msra.mxu0 %v11281_v11  ;;  %5123 = vmatpush.bf16.msra.mxu2 %v11282_v48 }
 0xc0a   :  { %5098 = vmatpush.bf16.msra.mxu0 %v11283_v34  ;;  %5124 = vmatpush.bf16.msra.mxu2 %v11284_v47 }
 0xc0e   :  { %5099 = vmatpush.bf16.msra.mxu0 %v11285_v55  ;;  %5125 = vmatpush.bf16.msra.mxu2 %v11286_v36 }
 0xc12   :  { %5100 = vmatpush.bf16.msra.mxu0 %v11287_v39  ;;  %5126 = vmatpush.bf16.msra.mxu2 %v11288_v63 }
 0xc16   :  { %5101 = vmatpush.bf16.msra.mxu0 %v11289_v4  ;;  %5127 = vmatpush.bf16.msra.mxu2 %v11290_v45 }
 0xc1a   :  { %5102 = vmatpush.bf16.msra.mxu0 %v11291_v51  ;;  %5128 = vmatpush.bf16.msra.mxu2 %v11292_v57 }
 0xc41   :  { %v9535_v52 = vpop.f32.mrf.mxu1 }
 0xc47   :  { %v9537_v23 = vpop.f32.mrf.mxu3 }
 0xc49   :  { %v5067_v22 = vpop.f32.mrf.mxu1 }
 0xc4f   :  { %v5093_v62 = vpop.f32.mrf.mxu3 }
 0xc51   :  { %v9539_v53 = vpop.f32.mrf.mxu1 }
 0xc57   :  { %v9541_v18 = vpop.f32.mrf.mxu3 }
 0xc59   :  { %v5119_v35 = vpop.f32.mrf.mxu1 }
 0xc5a   :  { %v4880_v50 = vpop.f32.mrf.mxu0 }
 0xc5b   :  { %v4881_v6 = vadd.f32 %v4880_v50, %v11293_v27 }
 0xc5d   :  { %v4894_v59 = vadd.f32 %v9464_v37, %v4881_v6 }
 0xc5f   :  { %v6100_v25 = vmul.f32 -1.442695, %v4894_v59  ;;  %v5145_v24 = vpop.f32.mrf.mxu3 }
 0xc60   :  { %v4906_v43 = vpop.f32.mrf.mxu2 }
 0xc61   :  { %6645 = vpow2.f32 %v6100_v25  ;;  %v4907_v42 = vadd.f32 %v4906_v43, %v11294_v31 }
 0xc62   :  { %v4882_v38 = vpop.f32.mrf.mxu0 }
 0xc63   :  { %v4920_v32 = vadd.f32 %v9468_v29, %v4907_v42  ;;  %v11296_v29 = vld [vmem:[#allocation204_spill] sm:$0xff] }
 0xc65   :  { %v6101_v46 = vmul.f32 -1.442695, %v4920_v32 }
 0xc67   :  { %v6646_v10 = vpop.eup %6645  ;;  %6647 = vpow2.f32 %v6101_v46 }
 0xc68   :  { %v4984_v44 = vadd.f32 1.0, %v6646_v10  ;;  %v4908_v2 = vpop.f32.mrf.mxu2 }
 0xc6a   :  { %6649 = vrcp.f32 %v4984_v44  ;;  %v4932_v14 = vpop.f32.mrf.mxu0  ;;  %v4998_v48 = vand.u32 2147483648, %v4984_v44  ;;  %vm4992_vm2 = vweird.f32 %v4984_v44  ;;  %v4996_v55 = vand.u32 2147483647, %v4984_v44 }
 0xc6b   :  { %v4933_v12 = vadd.f32 %v4932_v14, %v11295_v54 }
 0xc6c   :  { %v4999_v4 = vor.u32 1.1754944e-38, %v4998_v48  ;;  %vm4997_vm6 = vcmp.eq.f32.partialorder %v4996_v55, 8.507059e+37 }
 0xc6d   :  { %v6648_v9 = vpop.eup %6647  ;;  %v4946_v37 = vadd.f32 %v9472_v3, %v4933_v12 }
 0xc6e   :  { %v4985_v21 = vadd.f32 1.0, %v6648_v9  ;;  %v5235_v9 = vld [vmem:[%s9695_s10 + $0x78] sm:$0xff] }
 0xc6f   :  { %v6102_v0 = vmul.f32 -1.442695, %v4946_v37  ;;  %v5234_v37 = vld [vmem:[%s9695_s10 + $0x70] sm:$0xff] }
 0xc70   :  { %v6650_v5 = vpop.eup %6649  ;;  %6651 = vrcp.f32 %v4985_v21  ;;  %v4958_v41 = vpop.f32.mrf.mxu2  ;;  %v5013_v36 = vand.u32 2147483648, %v4985_v21  ;;  %vm5007_vm5 = vweird.f32 %v4985_v21 }
 0xc71   :  { %v4988_v1 = vmul.f32 %v6650_v5, %v4984_v44  ;;  %6653 = vpow2.f32 %v6102_v0  ;;  %v4959_v15 = vadd.f32 %v4958_v41, %v11296_v29  ;;  %vm4993_vm1 = vweird.f32 %v6650_v5  ;;  %v5232_v41 = vld [vmem:[%s9695_s10 + $0x60] sm:$0xff]  ;;  %v5231_v29 = vld [vmem:[%s9695_s10 + $0x58] sm:$0xff] }
 0xc72   :  { %v4934_v19 = vpop.f32.mrf.mxu0  ;;  %vm4994_vm3 = vmor %vm4992_vm2, %vm4993_vm1  ;;  %v5014_v57 = vor.u32 1.1754944e-38, %v5013_v36 }
 0xc73   :  { %v4989_v56 = vsub.f32 1.0, %v4988_v1  ;;  %v4972_v61 = vadd.f32 %v9476_v8, %v4959_v15  ;;  %v5011_v8 = vand.u32 2147483647, %v4985_v21  ;;  %v5230_v19 = vld [vmem:[%s9695_s10 + $0x50] sm:$0xff] }
 0xc75   :  { %v4990_v60 = vmul.f32 %v6650_v5, %v4989_v56  ;;  %6655 = vtanh.f32 %v4972_v61  ;;  %vm5012_vm8 = vcmp.eq.f32.partialorder %v5011_v8, 8.507059e+37  ;;  %v5229_v61 = vld [vmem:[%s9695_s10 + $0x48] sm:$0xff] }
 0xc76   :  { %v6652_v28 = vpop.eup %6651 }
 0xc77   :  { %v6654_v16 = vpop.eup %6653  ;;  %v5003_v40 = vmul.f32 %v6652_v28, %v4985_v21  ;;  %v4991_v11 = vadd.f32 %v6650_v5, %v4990_v60  ;;  %vm5008_vm4 = vweird.f32 %v6652_v28 }
 0xc78   :  { %v4986_v3 = vadd.f32 1.0, %v6654_v16  ;;  %v4960_v34 = vpop.f32.mrf.mxu2  ;;  %vm5009_vm7 = vmor %vm5007_vm5, %vm5008_vm4  ;;  %v5227_v16 = vld [vmem:[%s9695_s10 + $0x38] sm:$0xff] }
 0xc79   :  { %v5004_v47 = vsub.f32 1.0, %v5003_v40  ;;  %v4995_v63 = vsel %vm4994_vm3, %v6650_v5, %v4991_v11  ;;  %v5226_v11 = vld [vmem:[%s9695_s10 + $0x30] sm:$0xff]  ;;  %v5225_v34 = vld [vmem:[%s9695_s10 + $0x28] sm:$0xff] }
 0xc7a   :  { %6657 = vrcp.f32 %v4986_v3  ;;  %v5000_v22 = vsel %vm4997_vm6, %v4999_v4, %v4995_v63  ;;  %v5028_v43 = vand.u32 2147483648, %v4986_v3  ;;  %v5026_v42 = vand.u32 2147483647, %v4986_v3 }
 0xc7b   :  { %v5005_v39 = vmul.f32 %v6652_v28, %v5004_v47  ;;  %v6656_v51 = vpop.eup %6655  ;;  %vm5022_vm10 = vweird.f32 %v4986_v3  ;;  %v5224_v47 = vld [vmem:[%s9695_s10 + $0x20] sm:$0xff] }
 0xc7c   :  { %v5034_v59 = vmul.f32 %v6656_v51, %v5000_v22  ;;  %v5029_v32 = vor.u32 1.1754944e-38, %v5028_v43  ;;  %vm5027_vm12 = vcmp.eq.f32.partialorder %v5026_v42, 8.507059e+37 }
 0xc7d   :  { %v5006_v45 = vadd.f32 %v6652_v28, %v5005_v39  ;;  %v5223_v39 = vld [vmem:[%s9695_s10 + $0x18] sm:$0xff] }
 0xc7f   :  { %v5010_v62 = vsel %vm5009_vm7, %v6652_v28, %v5006_v45  ;;  %v5228_v28 = vld [vmem:[%s9695_s10 + $0x40] sm:$0xff] }
 0xc80   :  { %v6658_v35 = vpop.eup %6657  ;;  %v5015_v50 = vsel %vm5012_vm8, %v5014_v57, %v5010_v62  ;;  %v5221_v57 = vld [vmem:[%s9695_s10 + $0x8] sm:$0xff] }
 0xc81   :  { %v5018_v27 = vmul.f32 %v6658_v35, %v4986_v3  ;;  %v5033_v6 = vmul.f32 %v5015_v50, %v9372_v58  ;;  %vm5023_vm9 = vweird.f32 %v6658_v35 }
 0xc82   :  { %vm5024_vm11 = vmor %vm5022_vm10, %vm5023_vm9  ;;  %vm5301_vm9 = vcmask 130048  }
 0xc83   :  { %v5019_v25 = vsub.f32 1.0, %v5018_v27  ;;  %v5035_v24 = vadd.f32 %v5034_v59, %v5033_v6  ;;  %v5275_v59 = vld [vmem:[%s9697_s12 + $0x70] sm:$0xff] }
 0xc85   :  { %v5020_v31 = vmul.f32 %v6658_v35, %v5019_v25  ;;  %6659 = vtanh.f32 %v5035_v24 }
 0xc87   :  { %v5021_v38 = vadd.f32 %v6658_v35, %v5020_v31 }
 0xc89   :  { %v5025_v46 = vsel %vm5024_vm11, %v6658_v35, %v5021_v38  ;;  %v5220_v35 = vld [vmem:[%s9695_s10] sm:$0xff]  ;;  %v5274_v38 = vld [vmem:[%s9697_s12 + $0x68] sm:$0xff] }
 0xc8a   :  { %v5030_v10 = vsel %vm5027_vm12, %v5029_v32, %v5025_v46 }
 0xc8b   :  { %v6660_v44 = vpop.eup %6659 }
 0xc8c   :  { %v5037_v2 = vmul.f32 %v6660_v44, %v5030_v10 }
 0xc8e   :  { %v5038_v14 = vsub.f32 %v5037_v2, %v9377_v7  ;;  %v5273_v2 = vld [vmem:[%s9697_s12 + $0x60] sm:$0xff] }
 0xc90   :  { %v5039_v58 = vmul.f32 %v5038_v14, %v9499_v30 }
 0xc92   :  { %v5040_v54 = vadd.f32 %v5039_v58, %v9377_v7  ;;  %v5233_v7 = vld [vmem:[%s9695_s10 + $0x68] sm:$0xff] }
 0xc94   :  { %v5041_v12 = vpack.c.bf16 %v5040_v54, %v5040_v54 }
 0xc96   :  { %5051 = vmatmul.bf16.vlgmr.msrb.gmra.mxu0 %v5041_v12  ;;  %5077 = vmatmul.bf16.vlgmr.msrb.gmra.mxu2 %v5041_v12 }
 0xc97   :  { %5240 = vmatpush.msrb.mxu0 %v5235_v9  ;;  %v5272_v9 = vld [vmem:[%s9697_s12 + $0x58] sm:$0xff] }
 0xc99   :  { %5241 = vmatpush.msrb.mxu0 %v5234_v37 }
 0xc9b   :  { %5242 = vmatpush.msrb.mxu0 %v5233_v7 }
 0xc9d   :  { %5243 = vmatpush.msrb.mxu0 %v5232_v41 }
 0xc9f   :  { %5244 = vmatpush.msrb.mxu0 %v5231_v29 }
 0xca1   :  { %5245 = vmatpush.msrb.mxu0 %v5230_v19 }
 0xca3   :  { %5246 = vmatpush.msrb.mxu0 %v5229_v61 }
 0xca5   :  { %5247 = vmatpush.msrb.mxu0 %v5228_v28 }
 0xca6   :  { %5103 = vmatmul.bf16.vlgmr.msra.gmra.mxu0 %v5041_v12  ;;  %5129 = vmatmul.bf16.vlgmr.msra.gmra.mxu2 %v5041_v12 }
 0xca7   :  { %5248 = vmatpush.msrb.mxu0 %v5227_v16 }
 0xca9   :  { %5249 = vmatpush.msrb.mxu0 %v5226_v11 }
 0xcab   :  { %5250 = vmatpush.msrb.mxu0 %v5225_v34 }
 0xcad   :  { %5251 = vmatpush.msrb.mxu0 %v5224_v47  ;;  %v5265_v47 = vld [vmem:[%s9697_s12 + $0x20] sm:$0xff] }
 0xcaf   :  { %5252 = vmatpush.msrb.mxu0 %v5223_v39  ;;  %v5264_v39 = vld [vmem:[%s9697_s12 + $0x18] sm:$0xff] }
 0xd13   :  { %v5052_v21 = vpop.f32.mrf.mxu0 }
 0xd14   :  { %v5053_v0 = vadd.f32 %v5052_v21, %v11251_v26 }
 0xd16   :  { %v5066_v5 = vadd.f32 %v9535_v52, %v5053_v0 }
 0xd18   :  { %v6103_v1 = vmul.f32 -1.442695, %v5066_v5  ;;  %v5271_v5 = vld [vmem:[%s9697_s12 + $0x50] sm:$0xff] }
 0xd19   :  { %v5078_v15 = vpop.f32.mrf.mxu2 }
 0xd1a   :  { %6661 = vpow2.f32 %v6103_v1  ;;  %v5079_v26 = vadd.f32 %v5078_v15, %v11252_v13  ;;  %v5270_v15 = vld [vmem:[%s9697_s12 + $0x48] sm:$0xff] }
 0xd1b   :  { %v5054_v52 = vpop.f32.mrf.mxu0 }
 0xd1c   :  { %v5092_v56 = vadd.f32 %v9537_v23, %v5079_v26 }
 0xd1e   :  { %v6104_v60 = vmul.f32 -1.442695, %v5092_v56  ;;  %v5269_v56 = vld [vmem:[%s9697_s12 + $0x40] sm:$0xff] }
 0xd20   :  { %v6662_v13 = vpop.eup %6661  ;;  %6663 = vpow2.f32 %v6104_v60 }
 0xd21   :  { %v9586_v40 = vadd.f32 1.0, %v6662_v13  ;;  %v5080_v23 = vpop.f32.mrf.mxu2  ;;  %v5268_v13 = vld [vmem:[%s9697_s12 + $0x38] sm:$0xff] }
 0xd23   :  { %6665 = vrcp.f32 %v9586_v40  ;;  %v5104_v3 = vpop.f32.mrf.mxu0  ;;  %vm5164_vm14 = vweird.f32 %v9586_v40  ;;  %v5168_v46 = vand.u32 2147483647, %v9586_v40 }
 0xd24   :  { %v5105_v48 = vadd.f32 %v5104_v3, %v11253_v17  ;;  %v5222_v17 = vld [vmem:[%s9695_s10 + $0x10] sm:$0xff]  ;;  %v5266_v3 = vld [vmem:[%s9697_s12 + $0x28] sm:$0xff] }
 0xd25   :  { %5253 = vmatpush.msrb.mxu0 %v5222_v17  ;;  %vm5169_vm2 = vcmp.eq.f32.partialorder %v5168_v46, 8.507059e+37 }
 0xd26   :  { %v6664_v55 = vpop.eup %6663  ;;  %v5118_v36 = vadd.f32 %v9539_v53, %v5105_v48 }
 0xd27   :  { %v5157_v63 = vadd.f32 1.0, %v6664_v55  ;;  %5254 = vmatpush.msrb.mxu0 %v5221_v57  ;;  %v5261_v57 = vld [vmem:[%s9697_s12] sm:$0xff] }
 0xd28   :  { %v6105_v8 = vmul.f32 -1.442695, %v5118_v36 }
 0xd29   :  { %v6666_v4 = vpop.eup %6665  ;;  %6667 = vrcp.f32 %v5157_v63  ;;  %v5130_v45 = vpop.f32.mrf.mxu2  ;;  %5255 = vmatpush.msrb.mxu0 %v5220_v35  ;;  %v5185_v10 = vand.u32 2147483648, %v5157_v63  ;;  %v5183_v54 = vand.u32 2147483647, %v5157_v63  ;;  %vm5179_vm1 = vweird.f32 %v5157_v63  ;;  %v6292_v35 = vld [vmem:[%s9698_s13] ss:$0 sm:$0xff] }
 0xd2a   :  { %v5160_v51 = vmul.f32 %v6666_v4, %v9586_v40  ;;  %6669 = vpow2.f32 %v6105_v8  ;;  %v5131_v53 = vadd.f32 %v5130_v45, %v11254_v49  ;;  %v5276_v49 = vld [vmem:[%s9697_s12 + $0x78] sm:$0xff]  ;;  %vm5165_vm13 = vweird.f32 %v6666_v4 }
 0xd2b   :  { %v5106_v22 = vpop.f32.mrf.mxu0  ;;  %5281 = vmatpush.msrb.mxu1 %v5276_v49  ;;  %vm9627_vm15 = vmor %vm5164_vm14, %vm5165_vm13  ;;  %v5186_v0 = vor.u32 1.1754944e-38, %v5185_v10  ;;  %vm5184_vm4 = vcmp.eq.f32.partialorder %v5183_v54, 8.507059e+37 }
 0xd2c   :  { %v5161_v62 = vsub.f32 1.0, %v5160_v51  ;;  %v5144_v50 = vadd.f32 %v9541_v18, %v5131_v53  ;;  %v5170_v18 = vand.u32 2147483648, %v9586_v40  ;;  %v5263_v51 = vld [vmem:[%s9697_s12 + $0x10] sm:$0xff]  ;;  %v5262_v53 = vld [vmem:[%s9697_s12 + $0x8] sm:$0xff] }
 0xd2d   :  { %5282 = vmatpush.msrb.mxu1 %v5275_v59 }
 0xd2e   :  { %v5162_v27 = vmul.f32 %v6666_v4, %v5161_v62  ;;  %6671 = vtanh.f32 %v5144_v50  ;;  %v5171_v12 = vor.u32 1.1754944e-38, %v5170_v18 }
 0xd2f   :  { %v6668_v6 = vpop.eup %6667  ;;  %5283 = vmatpush.msrb.mxu1 %v5274_v38 }
 0xd30   :  { %v6670_v25 = vpop.eup %6669  ;;  %v5175_v24 = vmul.f32 %v6668_v6, %v5157_v63  ;;  %v5163_v43 = vadd.f32 %v6666_v4, %v5162_v27  ;;  %vm5180_vm0 = vweird.f32 %v6668_v6 }
 0xd31   :  { %v5158_v31 = vadd.f32 1.0, %v6670_v25  ;;  %v5132_v42 = vpop.f32.mrf.mxu2  ;;  %5284 = vmatpush.msrb.mxu1 %v5273_v2  ;;  %vm5181_vm3 = vmor %vm5179_vm1, %vm5180_vm0 }
 0xd32   :  { %v5176_v32 = vsub.f32 1.0, %v5175_v24  ;;  %v5167_v58 = vsel %vm9627_vm15, %v6666_v4, %v5163_v43  ;;  %v5217_v4 = vpop.permute.xlu2 %5216 }
 0xd33   :  { %6673 = vrcp.f32 %v5158_v31  ;;  %v5172_v7 = vsel %vm5169_vm2, %v5171_v12, %v5167_v58  ;;  %5285 = vmatpush.msrb.mxu1 %v5272_v9  ;;  %v5200_v28 = vand.u32 2147483648, %v5158_v31  ;;  %v5198_v40 = vand.u32 2147483647, %v5158_v31 }
 0xd34   :  { %v5177_v14 = vmul.f32 %v6668_v6, %v5176_v32  ;;  %v6672_v21 = vpop.eup %6671  ;;  %vm5194_vm6 = vweird.f32 %v5158_v31 }
 0xd35   :  { %v5206_v52 = vmul.f32 %v6672_v21, %v5172_v7  ;;  %5286 = vmatpush.msrb.mxu1 %v5271_v5  ;;  %v5201_v11 = vor.u32 1.1754944e-38, %v5200_v28  ;;  %vm5199_vm8 = vcmp.eq.f32.partialorder %v5198_v40, 8.507059e+37 }
 0xd36   :  { %v5178_v37 = vadd.f32 %v6668_v6, %v5177_v14 }
 0xd37   :  { %5287 = vmatpush.msrb.mxu1 %v5270_v15 }
 0xd38   :  { %v5182_v41 = vsel %vm5181_vm3, %v6668_v6, %v5178_v37 }
 0xd39   :  { %v6674_v1 = vpop.eup %6673  ;;  %v5187_v29 = vsel %vm5184_vm4, %v5186_v0, %v5182_v41  ;;  %5288 = vmatpush.msrb.mxu1 %v5269_v56 }
 0xd3a   :  { %v5190_v26 = vmul.f32 %v6674_v1, %v5158_v31  ;;  %v5205_v19 = vmul.f32 %v5187_v29, %v9487_v20  ;;  %vm5195_vm5 = vweird.f32 %v6674_v1  ;;  %v5267_v20 = vld [vmem:[%s9697_s12 + $0x30] sm:$0xff] }
 0xd3b   :  { %5289 = vmatpush.msrb.mxu1 %v5268_v13  ;;  %vm5196_vm7 = vmor %vm5194_vm6, %vm5195_vm5 }
 0xd3c   :  { %v5191_v61 = vsub.f32 1.0, %v5190_v26  ;;  %v5207_v60 = vadd.f32 %v5206_v52, %v5205_v19 }
 0xd3d   :  { %5290 = vmatpush.msrb.mxu1 %v5267_v20 }
 0xd3e   :  { %v5192_v16 = vmul.f32 %v6674_v1, %v5191_v61  ;;  %6675 = vtanh.f32 %v5207_v60 }
 0xd3f   :  { %5291 = vmatpush.msrb.mxu1 %v5266_v3 }
 0xd40   :  { %v5193_v23 = vadd.f32 %v6674_v1, %v5192_v16 }
 0xd41   :  { %5292 = vmatpush.msrb.mxu1 %v5265_v47 }
 0xd42   :  { %v5197_v48 = vsel %vm5196_vm7, %v6674_v1, %v5193_v23 }
 0xd43   :  { %v5202_v34 = vsel %vm5199_vm8, %v5201_v11, %v5197_v48  ;;  %5293 = vmatpush.msrb.mxu1 %v5264_v39 }
 0xd44   :  { %v6676_v55 = vpop.eup %6675 }
 0xd45   :  { %v5209_v36 = vmul.f32 %v6676_v55, %v5202_v34  ;;  %5294 = vmatpush.msrb.mxu1 %v5263_v51 }
 0xd47   :  { %v5210_v63 = vsub.f32 %v5209_v36, %v9492_v33  ;;  %5295 = vmatpush.msrb.mxu1 %v5262_v53 }
 0xd49   :  { %v5211_v8 = vmul.f32 %v5210_v63, %v9499_v30  ;;  %5296 = vmatpush.msrb.mxu1 %v5261_v57 }
 0xd4b   :  { %v5212_v17 = vadd.f32 %v5211_v8, %v9492_v33  ;;  %v6291_v33 = vld [vmem:[%s9696_s11] ss:$0 sm:$0xff] }
 0xd4d   :  { %v5219_v45 = vmul.f32 %v5217_v4, %v5212_v17 }
 0xd4f   :  { %5256 = vmatmul.f32.vlgmr.msrb.gmra.mxu0 %v5219_v45 }
 0xdcc   :  { %v5257_v30 = vpop.f32.mrf.mxu0 }
 0xdcd   :  { %v5258_v22 = vadd.f32 %v6291_v33, %v5257_v30 }
 0xdcf   :  { %v5260_v62 = vmax.f32 %v5258_v22, 0.0 }
 0xdd1   :  { %5297 = vmatmul.f32.vlgmr.msrb.gmra.mxu1 %v5260_v62 }
 0xe4e   :  { %v5298_v50 = vpop.f32.mrf.mxu1 }
 0xe4f   :  { %v5299_v27 = vadd.f32 %v6292_v35, %v5298_v50 }
 0xe51   :  { %5302 = vst.msk [vmem:[#allocation11] sm:$0xff] %vm5301_vm9, %v5299_v27 }
 0xe52   :  { %5313 = dma.vmem_to_hbm [thread:$0]  %s5309_s25, 128, %s5311_s7, [#allocation5]  }
 0xe53   :  { %6805 = dma.done.wait [#allocation5], 128  }
 0xe54   :  { %6806 = vsyncadd [#allocation5], 4294967168 }
 0xe55   :  { %5318 = vsyncpa [#allocation4], 1 }
 0xe56   :  { %5319 = vsyncpa [#allocation7], 1 }
 0xe57   :  { %5320 = vsyncpa [#allocation10], 1 }
 0xe58   :  { %5321 = vsyncpa [#allocation5], 1 }

</bundles_post_ra>
